<compile_context>
chip_gen: v7x
topology: tpu7x:2x2x1
jax: 0.10.0
libtpu: 0.0.40
codegen_flags: <defaults>
</compile_context>

<pallas_src>
import functools
import math

import jax
import jax.numpy as jnp
from jax.experimental import pallas as pl
from jax.experimental.pallas import tpu as pltpu

NEG_INF = -1e9


# ----------------------------- in-kernel math helpers -----------------------------

def _ln(x, g, b, eps):
    mean = jnp.mean(x, axis=-1, keepdims=True)
    var = jnp.mean(jnp.square(x - mean), axis=-1, keepdims=True)
    return (x - mean) * jax.lax.rsqrt(var + eps) * g + b


def _gelu_tanh(x):
    # TODO(synk): HF ViT/BLIP use exact erf-GELU; tanh approximation kept (it IS exact
    # for GPT2's gelu_new).
    c = math.sqrt(2.0 / math.pi)
    return 0.5 * x * (1.0 + jnp.tanh(c * (x + 0.044715 * x * x * x)))


def _mha(q, k, v, wo, bo, *, heads, scale, causal, key_bias):
    """Multi-head attention core on lane-dense [S, D] slabs.

    Scores for all heads are stacked along the sublane axis ([H*Sq, Sk]) so the masked
    softmax is issued once; per-head context is accumulated directly into the output
    projection (no lane concatenate of 32-lane pieces)."""
    sq, D = q.shape
    sk = k.shape[0]
    dh = D // heads

    qb = (q * scale).astype(jnp.bfloat16)
    kb = k.astype(jnp.bfloat16)
    s_parts = [
        jax.lax.dot_general(qb[:, h * dh:(h + 1) * dh], kb[:, h * dh:(h + 1) * dh],
                            (((1,), (1,)), ((), ())),
                            preferred_element_type=jnp.float32)
        for h in range(heads)
    ]
    s = jnp.concatenate(s_parts, axis=0)                       # [H*Sq, Sk]
    if key_bias is not None:
        s = s + key_bias                                       # [1, Sk] broadcast
    if causal:
        row = jax.lax.broadcasted_iota(jnp.int32, (heads * sq, sk), 0)
        col = jax.lax.broadcasted_iota(jnp.int32, (heads * sq, sk), 1)
        qrow = (row & (sq - 1)) if (sq & (sq - 1)) == 0 else (row % sq)
        s = jnp.where(col <= qrow, s, NEG_INF)
    s = s - jnp.max(s, axis=-1, keepdims=True)
    p = jnp.exp(s)
    p = p * pl.reciprocal(jnp.sum(p, axis=-1, keepdims=True), approx=True)
    p = p.astype(jnp.bfloat16)

    vb = v.astype(jnp.bfloat16)
    out = bo                                                   # [1, D], broadcasts
    for h in range(heads):
        ctx = jnp.dot(p[h * sq:(h + 1) * sq], vb[:, h * dh:(h + 1) * dh],
                      preferred_element_type=jnp.float32)      # [Sq, dh]
        out = out + jnp.dot(ctx.astype(jnp.bfloat16), wo[h * dh:(h + 1) * dh, :],
                            preferred_element_type=jnp.float32)
    return out                                                 # [Sq, D] f32


def _self_attn(h, wqkv, bqkv, wo, bo, *, heads, scale, causal, key_bias):
    D = h.shape[-1]
    qkv = jnp.dot(h.astype(jnp.bfloat16), wqkv,
                  preferred_element_type=jnp.float32) + bqkv   # fused QKV: [S, 3D]
    return _mha(qkv[:, :D], qkv[:, D:2 * D], qkv[:, 2 * D:], wo, bo,
                heads=heads, scale=scale, causal=causal, key_bias=key_bias)


def _cross_attn(h, hkv, wq, bq, wkv, bkv, wo, bo, *, heads, scale, key_bias):
    D = h.shape[-1]
    q = jnp.dot(h.astype(jnp.bfloat16), wq, preferred_element_type=jnp.float32) + bq
    kv = jnp.dot(hkv.astype(jnp.bfloat16), wkv,
                 preferred_element_type=jnp.float32) + bkv      # fused KV: [Sk, 2D]
    return _mha(q, kv[:, :D], kv[:, D:], wo, bo,
                heads=heads, scale=scale, causal=False, key_bias=key_bias)


def _ffn(h, w1, b1, w2, b2):
    f = jnp.dot(h.astype(jnp.bfloat16), w1, preferred_element_type=jnp.float32) + b1
    f = _gelu_tanh(f)
    return jnp.dot(f.astype(jnp.bfloat16), w2, preferred_element_type=jnp.float32) + b2


# ----------------------------- BlockSpec helpers -----------------------------

def _batch_spec(t):
    """[B, ...] activation: one batch element per grid step, constant over layers."""
    zeros = (0,) * (t.ndim - 1)
    return pl.BlockSpec((1,) + t.shape[1:], lambda b, l, _z=zeros: (b,) + _z)


def _layer_spec(t):
    """[L, ...] stacked per-layer weight: slab l per grid step."""
    zeros = (0,) * (t.ndim - 1)
    return pl.BlockSpec((1,) + t.shape[1:], lambda b, l, _z=zeros: (l,) + _z)


def _const_spec(t):
    """Weight shared by all grid steps (fetched once)."""
    idx = (0,) * t.ndim
    return pl.BlockSpec(t.shape, lambda b, l, _i=idx: _i)


# ----------------------------- ViT stack (pre-LN encoder) -----------------------------

def _vit_stack_kernel(patches_ref, pw_ref, prefix_ref,
                      a_g, a_b, wqkv, bqkv, wo, bo,
                      f_g, f_b, w1, b1, w2, b2,
                      lnf_g, lnf_b,
                      out_ref, x_sc,
                      *, heads, scale, n_real, n_layers, eps):
    l = pl.program_id(1)
    T, _ = x_sc.shape

    # static key-padding bias for the 8-aligned pad tokens (keys >= n_real)
    col = jax.lax.broadcasted_iota(jnp.int32, (1, T), 1)
    key_bias = jnp.where(col < n_real, 0.0, NEG_INF)

    @pl.when(l == 0)
    def _():
        # patch projection fused with the cls / position / conv-bias prefix
        x_sc[...] = jnp.dot(patches_ref[0].astype(jnp.bfloat16), pw_ref[...],
                            preferred_element_type=jnp.float32) + prefix_ref[0]

    x = x_sc[...]
    h = _ln(x, a_g[0], a_b[0], eps)                                        # pre-LN
    x = x + _self_attn(h, wqkv[0], bqkv[0], wo[0], bo[0],
                       heads=heads, scale=scale, causal=False, key_bias=key_bias)
    h = _ln(x, f_g[0], f_b[0], eps)
    x = x + _ffn(h, w1[0], b1[0], w2[0], b2[0])
    x_sc[...] = x

    @pl.when(l == n_layers - 1)
    def _():
        out_ref[0] = _ln(x, lnf_g[...], lnf_b[...], eps).astype(out_ref.dtype)


def vit_encoder(image, p, cfg):
    """self.visual_encoder(image).last_hidden_state  (pre-LN ViT), one fused kernel."""
    B = image.shape[0]
    C, HW, P, D = cfg["img_channels"], cfg["img_size"], cfg["patch"], cfg["dim"]
    gh = HW // P
    n_patch = gh * gh
    n_real = n_patch + 1
    T = cfg["vit_tokens"]                 # 8-aligned padded token count
    L = cfg["vit_layers"]
    heads = cfg["heads"]
    scale = 1.0 / math.sqrt(D // heads)

    # patch extraction NCHW -> [B, n_patch, C*P*P] (matches Conv2d(stride=P) flatten),
    # with a zero row for the CLS slot and zero rows up to T.
    patches = image.reshape(B, C, gh, P, gh, P).transpose(0, 2, 4, 1, 3, 5)
    patches = patches.reshape(B, n_patch, C * P * P)
    patches = jnp.pad(patches, ((0, 0), (1, T - 1 - n_patch), (0, 0)))

    # cls token + position embeddings + conv bias folded into a single [1, T, D] prefix
    prefix = jnp.zeros((1, T, D), jnp.float32)
    prefix = prefix.at[:, 0].set(p["cls"] + p["pos"][:, 0])
    prefix = prefix.at[:, 1:n_real].set(p["pos"][:, 1:] + p["patch_b"])

    lw = p["layers"]
    keys = ("a_g", "a_b", "wqkv", "bqkv", "wo", "bo",
            "f_g", "f_b", "w1", "b1", "w2", "b2")
    w_layer = [lw[k] for k in keys]

    inputs = [patches, p["patch_w"], prefix] + w_layer + [p["ln_g"], p["ln_b"]]
    in_specs = ([_batch_spec(patches), _const_spec(p["patch_w"]), _const_spec(prefix)]
                + [_layer_spec(t) for t in w_layer]
                + [_const_spec(p["ln_g"]), _const_spec(p["ln_b"])])

    kernel = functools.partial(_vit_stack_kernel, heads=heads, scale=scale,
                               n_real=n_real, n_layers=L, eps=1e-12)
    return pl.pallas_call(
        kernel,
        out_shape=jax.ShapeDtypeStruct((B, T, D), jnp.bfloat16),
        grid=(B, L),
        in_specs=in_specs,
        out_specs=pl.BlockSpec((1, T, D), lambda b, l: (b, 0, 0)),
        scratch_shapes=[pltpu.VMEM((T, D), jnp.float32)],
        compiler_params=pltpu.CompilerParams(
            dimension_semantics=("parallel", "arbitrary")),
    )(*inputs)


# ----------------------------- BLIP text stack (post-LN, cross-attn) -----------------------------

def _blip_stack_kernel(x_ref, mask_ref, img_ref, eg_ref, eb_ref,
                       sa_g, sa_b, sa_wqkv, sa_bqkv, sa_wo, sa_bo,
                       ca_g, ca_b, ca_wq, ca_bq, ca_wkv, ca_bkv, ca_wo, ca_bo,
                       f_g, f_b, w1, b1, w2, b2,
                       out_ref, x_sc,
                       *, heads, scale, n_img_real, n_layers, eps):
    l = pl.program_id(1)
    T = img_ref.shape[1]

    # text key-padding bias from the attention mask (0/1 -> -1e9/0)
    txt_bias = (mask_ref[0] - 1.0) * 1e9                       # [1, S]
    # image_atts == ones over the real tokens; only the ViT pad rows are masked
    col = jax.lax.broadcasted_iota(jnp.int32, (1, T), 1)
    img_bias = jnp.where(col < n_img_real, 0.0, NEG_INF)

    @pl.when(l == 0)
    def _():  # embedding LayerNorm fused into the first layer step
        x_sc[...] = _ln(x_ref[0].astype(jnp.float32), eg_ref[...], eb_ref[...], eps)

    x = x_sc[...]
    img = img_ref[0].astype(jnp.float32)

    # post-LN self-attention
    x = _ln(x + _self_attn(x, sa_wqkv[0], sa_bqkv[0], sa_wo[0], sa_bo[0],
                           heads=heads, scale=scale, causal=False, key_bias=txt_bias),
            sa_g[0], sa_b[0], eps)
    # post-LN cross-attention over image tokens
    x = _ln(x + _cross_attn(x, img, ca_wq[0], ca_bq[0], ca_wkv[0], ca_bkv[0],
                            ca_wo[0], ca_bo[0], heads=heads, scale=scale,
                            key_bias=img_bias),
            ca_g[0], ca_b[0], eps)
    # post-LN FFN
    x = _ln(x + _ffn(x, w1[0], b1[0], w2[0], b2[0]), f_g[0], f_b[0], eps)
    x_sc[...] = x

    @pl.when(l == n_layers - 1)
    def _():
        out_ref[0] = x.astype(out_ref.dtype)


def blip_text_encoder(input_ids, att_mask, image_embeds, p, cfg):
    """self.text_encoder(..., encoder_hidden_states=image_embeds).last_hidden_state."""
    B, S = input_ids.shape
    D = cfg["dim"]
    L = cfg["text_layers"]
    heads = cfg["heads"]
    scale = 1.0 / math.sqrt(D // heads)
    n_img_real = (cfg["img_size"] // cfg["patch"]) ** 2 + 1

    # embedding gather kept as JAX glue (data-dependent gather)
    x = jnp.take(p["word_emb"], input_ids, axis=0) + p["pos_emb"][:S][None]
    mask = att_mask.astype(jnp.float32).reshape(B, 1, S)

    lw = p["layers"]
    keys = ("sa_g", "sa_b", "sa_wqkv", "sa_bqkv", "sa_wo", "sa_bo",
            "ca_g", "ca_b", "ca_wq", "ca_bq", "ca_wkv", "ca_bkv", "ca_wo", "ca_bo",
            "f_g", "f_b", "w1", "b1", "w2", "b2")
    w_layer = [lw[k] for k in keys]

    inputs = [x, mask, image_embeds, p["emb_ln_g"], p["emb_ln_b"]] + w_layer
    in_specs = ([_batch_spec(x), _batch_spec(mask), _batch_spec(image_embeds),
                 _const_spec(p["emb_ln_g"]), _const_spec(p["emb_ln_b"])]
                + [_layer_spec(t) for t in w_layer])

    kernel = functools.partial(_blip_stack_kernel, heads=heads, scale=scale,
                               n_img_real=n_img_real, n_layers=L, eps=1e-12)
    return pl.pallas_call(
        kernel,
        out_shape=jax.ShapeDtypeStruct((B, S, D), jnp.bfloat16),
        grid=(B, L),
        in_specs=in_specs,
        out_specs=pl.BlockSpec((1, S, D), lambda b, l: (b, 0, 0)),
        scratch_shapes=[pltpu.VMEM((S, D), jnp.float32)],
        compiler_params=pltpu.CompilerParams(
            dimension_semantics=("parallel", "arbitrary")),
    )(*inputs)


# ----------------------------- GPT2 stack (pre-LN causal LM) -----------------------------

def _gpt_stack_kernel(x_ref, wpe_ref,
                      g1, b1, wqkv, bqkv, wo, bo,
                      g2, b2, w1, fb1, w2, fb2,
                      lnf_g, lnf_b, wte_t,
                      out_ref, x_sc,
                      *, heads, scale, n_layers, eps):
    l = pl.program_id(1)

    @pl.when(l == 0)
    def _():  # position-embedding add fused into the first layer step
        x_sc[...] = x_ref[0].astype(jnp.float32) + wpe_ref[0]

    x = x_sc[...]
    h = _ln(x, g1[0], b1[0], eps)                                          # pre-LN
    x = x + _self_attn(h, wqkv[0], bqkv[0], wo[0], bo[0],
                       heads=heads, scale=scale, causal=True, key_bias=None)
    h = _ln(x, g2[0], b2[0], eps)
    x = x + _ffn(h, w1[0], fb1[0], w2[0], fb2[0])
    x_sc[...] = x

    @pl.when(l == n_layers - 1)
    def _():
        # final LN fused with the tied (bias-free) LM head
        hf = _ln(x, lnf_g[...], lnf_b[...], eps)
        out_ref[0] = jnp.dot(hf.astype(jnp.bfloat16), wte_t[...],
                             preferred_element_type=jnp.float32).astype(out_ref.dtype)


def gpt2_lm(inputs_embeds, p, cfg):
    """self.gpt(inputs_embeds=text_embeds, encoder_attention_mask=qa_att_mask).logits
       Base GPT2 has no cross-attention, so encoder_attention_mask is unused -> pure causal LM."""
    B, S, D = inputs_embeds.shape
    V = cfg["vocab"]
    L = cfg["gpt_layers"]
    heads = cfg["heads"]
    scale = 1.0 / math.sqrt(D // heads)

    wpe = p["wpe"][:S][None]                                   # [1, S, D]

    lw = p["layers"]
    keys = ("g1", "b1", "wqkv", "bqkv", "wo", "bo",
            "g2", "b2", "w1", "fb1", "w2", "fb2")
    w_layer = [lw[k] for k in keys]

    inputs = [inputs_embeds, wpe] + w_layer + [p["lnf_g"], p["lnf_b"], p["wte_t"]]
    in_specs = ([_batch_spec(inputs_embeds), _const_spec(wpe)]
                + [_layer_spec(t) for t in w_layer]
                + [_const_spec(p["lnf_g"]), _const_spec(p["lnf_b"]),
                   _const_spec(p["wte_t"])])

    # TODO(synk): at real GPT2 vocab sizes (50257) the fused LM head should be tiled over
    # the vocab axis (tile_n >= 512); at V=128 one [S, V] block is already lane-dense.
    kernel = functools.partial(_gpt_stack_kernel, heads=heads, scale=scale,
                               n_layers=L, eps=1e-5)
    return pl.pallas_call(
        kernel,
        out_shape=jax.ShapeDtypeStruct((B, S, V), jnp.float32),
        grid=(B, L),
        in_specs=in_specs,
        out_specs=pl.BlockSpec((1, S, V), lambda b, l: (b, 0, 0)),
        scratch_shapes=[pltpu.VMEM((S, D), jnp.float32)],
        compiler_params=pltpu.CompilerParams(
            dimension_semantics=("parallel", "arbitrary")),
    )(*inputs)


# ----------------------------- full forward -----------------------------

def pitvqa_gen_forward(params, cfg, image, qa_inputs_ids, qa_att_mask):
    image_embeds = vit_encoder(image, params["vit"], cfg)                 # last_hidden_state
    text_embeds = blip_text_encoder(qa_inputs_ids, qa_att_mask, image_embeds,
                                    params["text"], cfg)
    return gpt2_lm(text_embeds, params["gpt"], cfg)


# ----------------------------- deterministic parameter init -----------------------------
# TODO(synk): pretrained HF checkpoints (ViT / BLIP / GPT2), tokenizer resize and PEFT/LoRA
# wrapping have no Pallas equivalent; weights are deterministic synthetic tensors instead.

def init_params(key, cfg):
    D, F = cfg["dim"], cfg["ffn"]
    bf16 = jnp.bfloat16
    counter = [0]

    def nxt(shape, dtype=jnp.float32, scale=0.02):
        counter[0] += 1
        w = scale * jax.random.normal(jax.random.fold_in(key, counter[0]), shape, jnp.float32)
        return w.astype(dtype)

    ones = lambda *s: jnp.ones(s, jnp.float32)
    zeros = lambda *s: jnp.zeros(s, jnp.float32)

    patch_dim = cfg["img_channels"] * cfg["patch"] ** 2
    n_real = (cfg["img_size"] // cfg["patch"]) ** 2 + 1
    Lv, Lt, Lg = cfg["vit_layers"], cfg["text_layers"], cfg["gpt_layers"]

    vit = dict(
        patch_w=nxt((patch_dim, D), bf16), patch_b=zeros(1, D),
        cls=nxt((1, D)), pos=nxt((1, n_real, D)),
        ln_g=ones(1, D), ln_b=zeros(1, D),
        layers=dict(
            a_g=ones(Lv, 1, D), a_b=zeros(Lv, 1, D),
            wqkv=nxt((Lv, D, 3 * D), bf16), bqkv=zeros(Lv, 1, 3 * D),
            wo=nxt((Lv, D, D), bf16), bo=zeros(Lv, 1, D),
            f_g=ones(Lv, 1, D), f_b=zeros(Lv, 1, D),
            w1=nxt((Lv, D, F), bf16), b1=zeros(Lv, 1, F),
            w2=nxt((Lv, F, D), bf16), b2=zeros(Lv, 1, D)))

    txt = dict(
        word_emb=nxt((cfg["text_vocab"], D)), pos_emb=nxt((cfg["max_pos"], D)),
        emb_ln_g=ones(1, D), emb_ln_b=zeros(1, D),
        layers=dict(
            sa_g=ones(Lt, 1, D), sa_b=zeros(Lt, 1, D),
            sa_wqkv=nxt((Lt, D, 3 * D), bf16), sa_bqkv=zeros(Lt, 1, 3 * D),
            sa_wo=nxt((Lt, D, D), bf16), sa_bo=zeros(Lt, 1, D),
            ca_g=ones(Lt, 1, D), ca_b=zeros(Lt, 1, D),
            ca_wq=nxt((Lt, D, D), bf16), ca_bq=zeros(Lt, 1, D),
            ca_wkv=nxt((Lt, D, 2 * D), bf16), ca_bkv=zeros(Lt, 1, 2 * D),
            ca_wo=nxt((Lt, D, D), bf16), ca_bo=zeros(Lt, 1, D),
            f_g=ones(Lt, 1, D), f_b=zeros(Lt, 1, D),
            w1=nxt((Lt, D, F), bf16), b1=zeros(Lt, 1, F),
            w2=nxt((Lt, F, D), bf16), b2=zeros(Lt, 1, D)))

    gpt = dict(
        wte_t=nxt((D, cfg["vocab"]), bf16),     # tied LM head, pre-transposed, no bias
        wpe=nxt((cfg["max_pos"], D)),
        lnf_g=ones(1, D), lnf_b=zeros(1, D),
        layers=dict(
            g1=ones(Lg, 1, D), b1=zeros(Lg, 1, D),
            wqkv=nxt((Lg, D, 3 * D), bf16), bqkv=zeros(Lg, 1, 3 * D),
            wo=nxt((Lg, D, D), bf16), bo=zeros(Lg, 1, D),
            g2=ones(Lg, 1, D), b2=zeros(Lg, 1, D),
            w1=nxt((Lg, D, F), bf16), fb1=zeros(Lg, 1, F),
            w2=nxt((Lg, F, D), bf16), fb2=zeros(Lg, 1, D)))
    return dict(vit=vit, text=txt, gpt=gpt)


# ----------------------------- main -----------------------------

if __name__ == "__main__":
    # D padded to 128 (lane-dense); ViT token count padded 17 -> 24 (sublane 8-aligned).
    cfg = dict(img_size=32, img_channels=3, patch=8, dim=128, heads=4, ffn=256,
               vit_layers=2, text_layers=2, gpt_layers=2,
               text_vocab=128, vocab=128, max_pos=64, vit_tokens=24)

    key = jax.random.PRNGKey(0)
    params = init_params(jax.random.fold_in(key, 1), cfg)

    B, S = 2, 8
    image = jax.random.normal(jax.random.fold_in(key, 2),
                              (B, cfg["img_channels"], cfg["img_size"], cfg["img_size"]),
                              jnp.float32)
    qa_inputs_ids = jax.random.randint(jax.random.fold_in(key, 3), (B, S), 0, cfg["text_vocab"])
    qa_att_mask = jnp.concatenate(
        [jnp.ones((B, S - 2), jnp.int32), jnp.zeros((B, 2), jnp.int32)], axis=1)

    fwd = jax.jit(lambda img, ids, m: pitvqa_gen_forward(params, cfg, img, ids, m))
    logits = fwd(image, qa_inputs_ids, qa_att_mask)
    jax.block_until_ready(logits)

    assert logits.shape == (B, S, cfg["vocab"]), logits.shape
    assert bool(jnp.all(jnp.isfinite(logits)))
    print("KERNEL_OK")
</pallas_src>

<mosaic_0001>
module attributes {stable_mosaic.version = 11 : i64} {
  func.func @_vit_stack_kernel(%arg0: i32, %arg1: i32, %arg2: memref<1x24x192xf32, #tpu.memory_space<vmem>>, %arg3: memref<192x128xbf16, #tpu.memory_space<vmem>>, %arg4: memref<1x24x128xf32, #tpu.memory_space<vmem>>, %arg5: memref<1x1x128xf32, #tpu.memory_space<vmem>>, %arg6: memref<1x1x128xf32, #tpu.memory_space<vmem>>, %arg7: memref<1x128x384xbf16, #tpu.memory_space<vmem>>, %arg8: memref<1x1x384xf32, #tpu.memory_space<vmem>>, %arg9: memref<1x128x128xbf16, #tpu.memory_space<vmem>>, %arg10: memref<1x1x128xf32, #tpu.memory_space<vmem>>, %arg11: memref<1x1x128xf32, #tpu.memory_space<vmem>>, %arg12: memref<1x1x128xf32, #tpu.memory_space<vmem>>, %arg13: memref<1x128x256xbf16, #tpu.memory_space<vmem>>, %arg14: memref<1x1x256xf32, #tpu.memory_space<vmem>>, %arg15: memref<1x256x128xbf16, #tpu.memory_space<vmem>>, %arg16: memref<1x1x128xf32, #tpu.memory_space<vmem>>, %arg17: memref<1x128xf32, #tpu.memory_space<vmem>>, %arg18: memref<1x128xf32, #tpu.memory_space<vmem>>, %arg19: memref<1x24x128xbf16, #tpu.memory_space<vmem>>, %arg20: memref<24x128xf32, #tpu.memory_space<vmem>>) attributes {dimension_semantics = [#tpu.dimension_semantics<parallel>, #tpu.dimension_semantics<arbitrary>], iteration_bounds = array<i64: 2, 2>, scalar_prefetch = 0 : i64, scratch_operands = 1 : i64, tpu.core_type = #tpu.core_type<tc>, window_params = [{transform_indices = @transform_0, window_bounds = array<i64: 1, 24, 192>}, {pipeline_mode = #tpu.pipeline_mode<synchronous>, transform_indices = @transform_1, window_bounds = array<i64: 192, 128>}, {pipeline_mode = #tpu.pipeline_mode<synchronous>, transform_indices = @transform_2, window_bounds = array<i64: 1, 24, 128>}, {transform_indices = @transform_3, window_bounds = array<i64: 1, 1, 128>}, {transform_indices = @transform_4, window_bounds = array<i64: 1, 1, 128>}, {transform_indices = @transform_5, window_bounds = array<i64: 1, 128, 384>}, {transform_indices = @transform_6, window_bounds = array<i64: 1, 1, 384>}, {transform_indices = @transform_7, window_bounds = array<i64: 1, 128, 128>}, {transform_indices = @transform_8, window_bounds = array<i64: 1, 1, 128>}, {transform_indices = @transform_9, window_bounds = array<i64: 1, 1, 128>}, {transform_indices = @transform_10, window_bounds = array<i64: 1, 1, 128>}, {transform_indices = @transform_11, window_bounds = array<i64: 1, 128, 256>}, {transform_indices = @transform_12, window_bounds = array<i64: 1, 1, 256>}, {transform_indices = @transform_13, window_bounds = array<i64: 1, 256, 128>}, {transform_indices = @transform_14, window_bounds = array<i64: 1, 1, 128>}, {pipeline_mode = #tpu.pipeline_mode<synchronous>, transform_indices = @transform_15, window_bounds = array<i64: 1, 128>}, {pipeline_mode = #tpu.pipeline_mode<synchronous>, transform_indices = @transform_16, window_bounds = array<i64: 1, 128>}, {transform_indices = @transform_17, window_bounds = array<i64: 1, 24, 128>}]} {
    %0 = tpu.iota {dimensions = array<i32: 1>} : vector<1x24xi32>
    %c17_i32 = arith.constant 17 : i32
    %1 = vector.broadcast %c17_i32 : i32 to vector<1x24xi32>
    %2 = arith.cmpi slt, %0, %1 : vector<1x24xi32>
    %cst = arith.constant 0.000000e+00 : f32
    %cst_0 = arith.constant -1.000000e+09 : f32
    %3 = vector.broadcast %cst : f32 to vector<1x24xf32>
    %4 = vector.broadcast %cst_0 : f32 to vector<1x24xf32>
    %5 = arith.select %2, %3, %4 : vector<1x24xi1>, vector<1x24xf32>
    %c0_i32 = arith.constant 0 : i32
    %6 = arith.cmpi eq, %arg1, %c0_i32 : i32
    %7 = arith.extui %6 : i1 to i32
    %c0_i32_1 = arith.constant 0 : i32
    %8 = arith.cmpi ne, %7, %c0_i32_1 : i32
    scf.if %8 {
      %c0_74 = arith.constant 0 : index
      %c0_75 = arith.constant 0 : index
      %c0_76 = arith.constant 0 : index
      %172 = vector.load %arg2[%c0_74, %c0_75, %c0_76] : memref<1x24x192xf32, #tpu.memory_space<vmem>>, vector<1x24x192xf32>
      %173 = vector.shape_cast %172 : vector<1x24x192xf32> to vector<24x192xf32>
      %174 = arith.truncf %173 : vector<24x192xf32> to vector<24x192xbf16>
      %c0_77 = arith.constant 0 : index
      %c0_78 = arith.constant 0 : index
      %175 = vector.load %arg3[%c0_77, %c0_78] : memref<192x128xbf16, #tpu.memory_space<vmem>>, vector<192x128xbf16>
      %cst_79 = arith.constant dense<0.000000e+00> : vector<24x128xf32>
      %176 = tpu.matmul %174, %175, %cst_79 {dimension_numbers = #tpu.dot_dimension_numbers<[1], [0], [0], [1], [0, 0, 1, 1], [], []>} : vector<24x192xbf16>, vector<192x128xbf16>, vector<24x128xf32> -> vector<24x128xf32>
      %c0_80 = arith.constant 0 : index
      %c0_81 = arith.constant 0 : index
      %c0_82 = arith.constant 0 : index
      %177 = vector.load %arg4[%c0_80, %c0_81, %c0_82] : memref<1x24x128xf32, #tpu.memory_space<vmem>>, vector<1x24x128xf32>
      %178 = vector.shape_cast %177 : vector<1x24x128xf32> to vector<24x128xf32>
      %179 = arith.addf %176, %178 : vector<24x128xf32>
      %c0_83 = arith.constant 0 : index
      %c0_84 = arith.constant 0 : index
      %180 = vector.load %arg20[%c0_83, %c0_84] : memref<24x128xf32, #tpu.memory_space<vmem>>, vector<24x128xf32>
      tpu.vector_store %arg20[%c0_83, %c0_84], %179 {strides = array<i32>} : memref<24x128xf32, #tpu.memory_space<vmem>>, vector<24x128xf32>,
    } else {
    }
    %c0 = arith.constant 0 : index
    %c0_2 = arith.constant 0 : index
    %9 = vector.load %arg20[%c0, %c0_2] : memref<24x128xf32, #tpu.memory_space<vmem>>, vector<24x128xf32>
    %c0_3 = arith.constant 0 : index
    %c0_4 = arith.constant 0 : index
    %c0_5 = arith.constant 0 : index
    %10 = vector.load %arg5[%c0_3, %c0_4, %c0_5] : memref<1x1x128xf32, #tpu.memory_space<vmem>>, vector<1x1x128xf32>
    %11 = vector.shape_cast %10 : vector<1x1x128xf32> to vector<1x128xf32>
    %c0_6 = arith.constant 0 : index
    %c0_7 = arith.constant 0 : index
    %c0_8 = arith.constant 0 : index
    %12 = vector.load %arg6[%c0_6, %c0_7, %c0_8] : memref<1x1x128xf32, #tpu.memory_space<vmem>>, vector<1x1x128xf32>
    %13 = vector.shape_cast %12 : vector<1x1x128xf32> to vector<1x128xf32>
    %cst_9 = arith.constant dense<0.000000e+00> : vector<24xf32>
    %14 = vector.multi_reduction <add>, %9, %cst_9 [1] : vector<24x128xf32> to vector<24xf32>
    %15 = vector.shape_cast %14 : vector<24xf32> to vector<24x1xf32>
    %cst_10 = arith.constant 1.280000e+02 : f32
    %16 = vector.broadcast %cst_10 : f32 to vector<24x1xf32>
    %17 = arith.divf %15, %16 : vector<24x1xf32>
    %18 = vector.broadcast %17 : vector<24x1xf32> to vector<24x128xf32>
    %19 = arith.subf %9, %18 : vector<24x128xf32>
    %20 = arith.mulf %19, %19 : vector<24x128xf32>
    %cst_11 = arith.constant dense<0.000000e+00> : vector<24xf32>
    %21 = vector.multi_reduction <add>, %20, %cst_11 [1] : vector<24x128xf32> to vector<24xf32>
    %22 = vector.shape_cast %21 : vector<24xf32> to vector<24x1xf32>
    %cst_12 = arith.constant 1.280000e+02 : f32
    %23 = vector.broadcast %cst_12 : f32 to vector<24x1xf32>
    %24 = arith.divf %22, %23 : vector<24x1xf32>
    %25 = vector.broadcast %17 : vector<24x1xf32> to vector<24x128xf32>
    %26 = arith.subf %9, %25 : vector<24x128xf32>
    %cst_13 = arith.constant 9.99999996E-13 : f32
    %27 = vector.broadcast %cst_13 : f32 to vector<24x1xf32>
    %28 = arith.addf %24, %27 : vector<24x1xf32>
    %29 = math.rsqrt %28 : vector<24x1xf32>
    %30 = vector.broadcast %29 : vector<24x1xf32> to vector<24x128xf32>
    %31 = arith.mulf %26, %30 : vector<24x128xf32>
    %32 = vector.broadcast %11 : vector<1x128xf32> to vector<24x128xf32>
    %33 = arith.mulf %31, %32 : vector<24x128xf32>
    %34 = vector.broadcast %13 : vector<1x128xf32> to vector<24x128xf32>
    %35 = arith.addf %33, %34 : vector<24x128xf32>
    %c0_14 = arith.constant 0 : index
    %c0_15 = arith.constant 0 : index
    %c0_16 = arith.constant 0 : index
    %36 = vector.load %arg7[%c0_14, %c0_15, %c0_16] : memref<1x128x384xbf16, #tpu.memory_space<vmem>>, vector<1x128x384xbf16>
    %37 = vector.shape_cast %36 : vector<1x128x384xbf16> to vector<128x384xbf16>
    %c0_17 = arith.constant 0 : index
    %c0_18 = arith.constant 0 : index
    %c0_19 = arith.constant 0 : index
    %38 = vector.load %arg8[%c0_17, %c0_18, %c0_19] : memref<1x1x384xf32, #tpu.memory_space<vmem>>, vector<1x1x384xf32>
    %39 = vector.shape_cast %38 : vector<1x1x384xf32> to vector<1x384xf32>
    %c0_20 = arith.constant 0 : index
    %c0_21 = arith.constant 0 : index
    %c0_22 = arith.constant 0 : index
    %40 = vector.load %arg9[%c0_20, %c0_21, %c0_22] : memref<1x128x128xbf16, #tpu.memory_space<vmem>>, vector<1x128x128xbf16>
    %41 = vector.shape_cast %40 : vector<1x128x128xbf16> to vector<128x128xbf16>
    %c0_23 = arith.constant 0 : index
    %c0_24 = arith.constant 0 : index
    %c0_25 = arith.constant 0 : index
    %42 = vector.load %arg10[%c0_23, %c0_24, %c0_25] : memref<1x1x128xf32, #tpu.memory_space<vmem>>, vector<1x1x128xf32>
    %43 = vector.shape_cast %42 : vector<1x1x128xf32> to vector<1x128xf32>
    %44 = arith.truncf %35 : vector<24x128xf32> to vector<24x128xbf16>
    %cst_26 = arith.constant dense<0.000000e+00> : vector<24x384xf32>
    %45 = tpu.matmul %44, %37, %cst_26 {dimension_numbers = #tpu.dot_dimension_numbers<[1], [0], [0], [1], [0, 0, 1, 1], [], []>} : vector<24x128xbf16>, vector<128x384xbf16>, vector<24x384xf32> -> vector<24x384xf32>
    %46 = vector.broadcast %39 : vector<1x384xf32> to vector<24x384xf32>
    %47 = arith.addf %45, %46 : vector<24x384xf32>
    %48 = vector.extract_strided_slice %47 {offsets = [0, 0], sizes = [24, 128], strides = [1, 1]} : vector<24x384xf32> to vector<24x128xf32>
    %49 = vector.extract_strided_slice %47 {offsets = [0, 128], sizes = [24, 128], strides = [1, 1]} : vector<24x384xf32> to vector<24x128xf32>
    %50 = vector.extract_strided_slice %47 {offsets = [0, 256], sizes = [24, 128], strides = [1, 1]} : vector<24x384xf32> to vector<24x128xf32>
    %cst_27 = arith.constant 0.176776692 : f32
    %51 = vector.broadcast %cst_27 : f32 to vector<24x128xf32>
    %52 = arith.mulf %48, %51 : vector<24x128xf32>
    %53 = arith.truncf %52 : vector<24x128xf32> to vector<24x128xbf16>
    %54 = arith.truncf %49 : vector<24x128xf32> to vector<24x128xbf16>
    %55 = vector.extract_strided_slice %53 {offsets = [0, 0], sizes = [24, 32], strides = [1, 1]} : vector<24x128xbf16> to vector<24x32xbf16>
    %56 = vector.extract_strided_slice %54 {offsets = [0, 0], sizes = [24, 32], strides = [1, 1]} : vector<24x128xbf16> to vector<24x32xbf16>
    %cst_28 = arith.constant dense<0.000000e+00> : vector<24x24xf32>
    %57 = tpu.matmul %55, %56, %cst_28 {dimension_numbers = #tpu.dot_dimension_numbers<[1], [1], [0], [0], [0, 0, 1, 0], [], []>} : vector<24x32xbf16>, vector<24x32xbf16>, vector<24x24xf32> -> vector<24x24xf32>
    %58 = vector.extract_strided_slice %53 {offsets = [0, 32], sizes = [24, 32], strides = [1, 1]} : vector<24x128xbf16> to vector<24x32xbf16>
    %59 = vector.extract_strided_slice %54 {offsets = [0, 32], sizes = [24, 32], strides = [1, 1]} : vector<24x128xbf16> to vector<24x32xbf16>
    %cst_29 = arith.constant dense<0.000000e+00> : vector<24x24xf32>
    %60 = tpu.matmul %58, %59, %cst_29 {dimension_numbers = #tpu.dot_dimension_numbers<[1], [1], [0], [0], [0, 0, 1, 0], [], []>} : vector<24x32xbf16>, vector<24x32xbf16>, vector<24x24xf32> -> vector<24x24xf32>
    %61 = vector.extract_strided_slice %53 {offsets = [0, 64], sizes = [24, 32], strides = [1, 1]} : vector<24x128xbf16> to vector<24x32xbf16>
    %62 = vector.extract_strided_slice %54 {offsets = [0, 64], sizes = [24, 32], strides = [1, 1]} : vector<24x128xbf16> to vector<24x32xbf16>
    %cst_30 = arith.constant dense<0.000000e+00> : vector<24x24xf32>
    %63 = tpu.matmul %61, %62, %cst_30 {dimension_numbers = #tpu.dot_dimension_numbers<[1], [1], [0], [0], [0, 0, 1, 0], [], []>} : vector<24x32xbf16>, vector<24x32xbf16>, vector<24x24xf32> -> vector<24x24xf32>
    %64 = vector.extract_strided_slice %53 {offsets = [0, 96], sizes = [24, 32], strides = [1, 1]} : vector<24x128xbf16> to vector<24x32xbf16>
    %65 = vector.extract_strided_slice %54 {offsets = [0, 96], sizes = [24, 32], strides = [1, 1]} : vector<24x128xbf16> to vector<24x32xbf16>
    %cst_31 = arith.constant dense<0.000000e+00> : vector<24x24xf32>
    %66 = tpu.matmul %64, %65, %cst_31 {dimension_numbers = #tpu.dot_dimension_numbers<[1], [1], [0], [0], [0, 0, 1, 0], [], []>} : vector<24x32xbf16>, vector<24x32xbf16>, vector<24x24xf32> -> vector<24x24xf32>
    %67 = tpu.concatenate %57, %60, %63, %66 in 0 : vector<24x24xf32>, vector<24x24xf32>, vector<24x24xf32>, vector<24x24xf32> -> vector<96x24xf32>
    %68 = vector.broadcast %5 : vector<1x24xf32> to vector<96x24xf32>
    %69 = arith.addf %67, %68 : vector<96x24xf32>
    %cst_32 = arith.constant dense<0xFF800000> : vector<96xf32>
    %70 = vector.multi_reduction <maximumf>, %69, %cst_32 [1] : vector<96x24xf32> to vector<96xf32>
    %71 = vector.shape_cast %70 : vector<96xf32> to vector<96x1xf32>
    %72 = vector.broadcast %71 : vector<96x1xf32> to vector<96x24xf32>
    %73 = arith.subf %69, %72 : vector<96x24xf32>
    %74 = math.exp %73 : vector<96x24xf32>
    %cst_33 = arith.constant dense<0.000000e+00> : vector<96xf32>
    %75 = vector.multi_reduction <add>, %74, %cst_33 [1] : vector<96x24xf32> to vector<96xf32>
    %76 = vector.shape_cast %75 : vector<96xf32> to vector<96x1xf32>
    %77 = tpu.reciprocal %76 {approx = true} : vector<96x1xf32> -> vector<96x1xf32>
    %78 = vector.broadcast %77 : vector<96x1xf32> to vector<96x24xf32>
    %79 = arith.mulf %74, %78 : vector<96x24xf32>
    %80 = arith.truncf %79 : vector<96x24xf32> to vector<96x24xbf16>
    %81 = arith.truncf %50 : vector<24x128xf32> to vector<24x128xbf16>
    %82 = vector.extract_strided_slice %80 {offsets = [0, 0], sizes = [24, 24], strides = [1, 1]} : vector<96x24xbf16> to vector<24x24xbf16>
    %83 = vector.extract_strided_slice %81 {offsets = [0, 0], sizes = [24, 32], strides = [1, 1]} : vector<24x128xbf16> to vector<24x32xbf16>
    %cst_34 = arith.constant dense<0.000000e+00> : vector<24x32xf32>
    %84 = tpu.matmul %82, %83, %cst_34 {dimension_numbers = #tpu.dot_dimension_numbers<[1], [0], [0], [1], [0, 0, 1, 1], [], []>} : vector<24x24xbf16>, vector<24x32xbf16>, vector<24x32xf32> -> vector<24x32xf32>
    %85 = arith.truncf %84 : vector<24x32xf32> to vector<24x32xbf16>
    %86 = vector.extract_strided_slice %41 {offsets = [0, 0], sizes = [32, 128], strides = [1, 1]} : vector<128x128xbf16> to vector<32x128xbf16>
    %cst_35 = arith.constant dense<0.000000e+00> : vector<24x128xf32>
    %87 = tpu.matmul %85, %86, %cst_35 {dimension_numbers = #tpu.dot_dimension_numbers<[1], [0], [0], [1], [0, 0, 1, 1], [], []>} : vector<24x32xbf16>, vector<32x128xbf16>, vector<24x128xf32> -> vector<24x128xf32>
    %88 = vector.broadcast %43 : vector<1x128xf32> to vector<24x128xf32>
    %89 = arith.addf %88, %87 : vector<24x128xf32>
    %90 = vector.extract_strided_slice %80 {offsets = [24, 0], sizes = [24, 24], strides = [1, 1]} : vector<96x24xbf16> to vector<24x24xbf16>
    %91 = vector.extract_strided_slice %81 {offsets = [0, 32], sizes = [24, 32], strides = [1, 1]} : vector<24x128xbf16> to vector<24x32xbf16>
    %cst_36 = arith.constant dense<0.000000e+00> : vector<24x32xf32>
    %92 = tpu.matmul %90, %91, %cst_36 {dimension_numbers = #tpu.dot_dimension_numbers<[1], [0], [0], [1], [0, 0, 1, 1], [], []>} : vector<24x24xbf16>, vector<24x32xbf16>, vector<24x32xf32> -> vector<24x32xf32>
    %93 = arith.truncf %92 : vector<24x32xf32> to vector<24x32xbf16>
    %94 = vector.extract_strided_slice %41 {offsets = [32, 0], sizes = [32, 128], strides = [1, 1]} : vector<128x128xbf16> to vector<32x128xbf16>
    %cst_37 = arith.constant dense<0.000000e+00> : vector<24x128xf32>
    %95 = tpu.matmul %93, %94, %cst_37 {dimension_numbers = #tpu.dot_dimension_numbers<[1], [0], [0], [1], [0, 0, 1, 1], [], []>} : vector<24x32xbf16>, vector<32x128xbf16>, vector<24x128xf32> -> vector<24x128xf32>
    %96 = arith.addf %89, %95 : vector<24x128xf32>
    %97 = vector.extract_strided_slice %80 {offsets = [48, 0], sizes = [24, 24], strides = [1, 1]} : vector<96x24xbf16> to vector<24x24xbf16>
    %98 = vector.extract_strided_slice %81 {offsets = [0, 64], sizes = [24, 32], strides = [1, 1]} : vector<24x128xbf16> to vector<24x32xbf16>
    %cst_38 = arith.constant dense<0.000000e+00> : vector<24x32xf32>
    %99 = tpu.matmul %97, %98, %cst_38 {dimension_numbers = #tpu.dot_dimension_numbers<[1], [0], [0], [1], [0, 0, 1, 1], [], []>} : vector<24x24xbf16>, vector<24x32xbf16>, vector<24x32xf32> -> vector<24x32xf32>
    %100 = arith.truncf %99 : vector<24x32xf32> to vector<24x32xbf16>
    %101 = vector.extract_strided_slice %41 {offsets = [64, 0], sizes = [32, 128], strides = [1, 1]} : vector<128x128xbf16> to vector<32x128xbf16>
    %cst_39 = arith.constant dense<0.000000e+00> : vector<24x128xf32>
    %102 = tpu.matmul %100, %101, %cst_39 {dimension_numbers = #tpu.dot_dimension_numbers<[1], [0], [0], [1], [0, 0, 1, 1], [], []>} : vector<24x32xbf16>, vector<32x128xbf16>, vector<24x128xf32> -> vector<24x128xf32>
    %103 = arith.addf %96, %102 : vector<24x128xf32>
    %104 = vector.extract_strided_slice %80 {offsets = [72, 0], sizes = [24, 24], strides = [1, 1]} : vector<96x24xbf16> to vector<24x24xbf16>
    %105 = vector.extract_strided_slice %81 {offsets = [0, 96], sizes = [24, 32], strides = [1, 1]} : vector<24x128xbf16> to vector<24x32xbf16>
    %cst_40 = arith.constant dense<0.000000e+00> : vector<24x32xf32>
    %106 = tpu.matmul %104, %105, %cst_40 {dimension_numbers = #tpu.dot_dimension_numbers<[1], [0], [0], [1], [0, 0, 1, 1], [], []>} : vector<24x24xbf16>, vector<24x32xbf16>, vector<24x32xf32> -> vector<24x32xf32>
    %107 = arith.truncf %106 : vector<24x32xf32> to vector<24x32xbf16>
    %108 = vector.extract_strided_slice %41 {offsets = [96, 0], sizes = [32, 128], strides = [1, 1]} : vector<128x128xbf16> to vector<32x128xbf16>
    %cst_41 = arith.constant dense<0.000000e+00> : vector<24x128xf32>
    %109 = tpu.matmul %107, %108, %cst_41 {dimension_numbers = #tpu.dot_dimension_numbers<[1], [0], [0], [1], [0, 0, 1, 1], [], []>} : vector<24x32xbf16>, vector<32x128xbf16>, vector<24x128xf32> -> vector<24x128xf32>
    %110 = arith.addf %103, %109 : vector<24x128xf32>
    %111 = arith.addf %9, %110 : vector<24x128xf32>
    %c0_42 = arith.constant 0 : index
    %c0_43 = arith.constant 0 : index
    %c0_44 = arith.constant 0 : index
    %112 = vector.load %arg11[%c0_42, %c0_43, %c0_44] : memref<1x1x128xf32, #tpu.memory_space<vmem>>, vector<1x1x128xf32>
    %113 = vector.shape_cast %112 : vector<1x1x128xf32> to vector<1x128xf32>
    %c0_45 = arith.constant 0 : index
    %c0_46 = arith.constant 0 : index
    %c0_47 = arith.constant 0 : index
    %114 = vector.load %arg12[%c0_45, %c0_46, %c0_47] : memref<1x1x128xf32, #tpu.memory_space<vmem>>, vector<1x1x128xf32>
    %115 = vector.shape_cast %114 : vector<1x1x128xf32> to vector<1x128xf32>
    %cst_48 = arith.constant dense<0.000000e+00> : vector<24xf32>
    %116 = vector.multi_reduction <add>, %111, %cst_48 [1] : vector<24x128xf32> to vector<24xf32>
    %117 = vector.shape_cast %116 : vector<24xf32> to vector<24x1xf32>
    %cst_49 = arith.constant 1.280000e+02 : f32
    %118 = vector.broadcast %cst_49 : f32 to vector<24x1xf32>
    %119 = arith.divf %117, %118 : vector<24x1xf32>
    %120 = vector.broadcast %119 : vector<24x1xf32> to vector<24x128xf32>
    %121 = arith.subf %111, %120 : vector<24x128xf32>
    %122 = arith.mulf %121, %121 : vector<24x128xf32>
    %cst_50 = arith.constant dense<0.000000e+00> : vector<24xf32>
    %123 = vector.multi_reduction <add>, %122, %cst_50 [1] : vector<24x128xf32> to vector<24xf32>
    %124 = vector.shape_cast %123 : vector<24xf32> to vector<24x1xf32>
    %cst_51 = arith.constant 1.280000e+02 : f32
    %125 = vector.broadcast %cst_51 : f32 to vector<24x1xf32>
    %126 = arith.divf %124, %125 : vector<24x1xf32>
    %127 = vector.broadcast %119 : vector<24x1xf32> to vector<24x128xf32>
    %128 = arith.subf %111, %127 : vector<24x128xf32>
    %cst_52 = arith.constant 9.99999996E-13 : f32
    %129 = vector.broadcast %cst_52 : f32 to vector<24x1xf32>
    %130 = arith.addf %126, %129 : vector<24x1xf32>
    %131 = math.rsqrt %130 : vector<24x1xf32>
    %132 = vector.broadcast %131 : vector<24x1xf32> to vector<24x128xf32>
    %133 = arith.mulf %128, %132 : vector<24x128xf32>
    %134 = vector.broadcast %113 : vector<1x128xf32> to vector<24x128xf32>
    %135 = arith.mulf %133, %134 : vector<24x128xf32>
    %136 = vector.broadcast %115 : vector<1x128xf32> to vector<24x128xf32>
    %137 = arith.addf %135, %136 : vector<24x128xf32>
    %c0_53 = arith.constant 0 : index
    %c0_54 = arith.constant 0 : index
    %c0_55 = arith.constant 0 : index
    %138 = vector.load %arg13[%c0_53, %c0_54, %c0_55] : memref<1x128x256xbf16, #tpu.memory_space<vmem>>, vector<1x128x256xbf16>
    %139 = vector.shape_cast %138 : vector<1x128x256xbf16> to vector<128x256xbf16>
    %c0_56 = arith.constant 0 : index
    %c0_57 = arith.constant 0 : index
    %c0_58 = arith.constant 0 : index
    %140 = vector.load %arg14[%c0_56, %c0_57, %c0_58] : memref<1x1x256xf32, #tpu.memory_space<vmem>>, vector<1x1x256xf32>
    %141 = vector.shape_cast %140 : vector<1x1x256xf32> to vector<1x256xf32>
    %c0_59 = arith.constant 0 : index
    %c0_60 = arith.constant 0 : index
    %c0_61 = arith.constant 0 : index
    %142 = vector.load %arg15[%c0_59, %c0_60, %c0_61] : memref<1x256x128xbf16, #tpu.memory_space<vmem>>, vector<1x256x128xbf16>
    %143 = vector.shape_cast %142 : vector<1x256x128xbf16> to vector<256x128xbf16>
    %c0_62 = arith.constant 0 : index
    %c0_63 = arith.constant 0 : index
    %c0_64 = arith.constant 0 : index
    %144 = vector.load %arg16[%c0_62, %c0_63, %c0_64] : memref<1x1x128xf32, #tpu.memory_space<vmem>>, vector<1x1x128xf32>
    %145 = vector.shape_cast %144 : vector<1x1x128xf32> to vector<1x128xf32>
    %146 = arith.truncf %137 : vector<24x128xf32> to vector<24x128xbf16>
    %cst_65 = arith.constant dense<0.000000e+00> : vector<24x256xf32>
    %147 = tpu.matmul %146, %139, %cst_65 {dimension_numbers = #tpu.dot_dimension_numbers<[1], [0], [0], [1], [0, 0, 1, 1], [], []>} : vector<24x128xbf16>, vector<128x256xbf16>, vector<24x256xf32> -> vector<24x256xf32>
    %148 = vector.broadcast %141 : vector<1x256xf32> to vector<24x256xf32>
    %149 = arith.addf %147, %148 : vector<24x256xf32>
    %cst_66 = arith.constant 5.000000e-01 : f32
    %150 = vector.broadcast %cst_66 : f32 to vector<24x256xf32>
    %151 = arith.mulf %150, %149 : vector<24x256xf32>
    %cst_67 = arith.constant 4.471500e-02 : f32
    %152 = vector.broadcast %cst_67 : f32 to vector<24x256xf32>
    %153 = arith.mulf %152, %149 : vector<24x256xf32>
    %154 = arith.mulf %153, %149 : vector<24x256xf32>
    %155 = arith.mulf %154, %149 : vector<24x256xf32>
    %156 = arith.addf %149, %155 : vector<24x256xf32>
    %cst_68 = arith.constant 0.797884583 : f32
    %157 = vector.broadcast %cst_68 : f32 to vector<24x256xf32>
    %158 = arith.mulf %157, %156 : vector<24x256xf32>
    %159 = math.tanh %158 : vector<24x256xf32>
    %cst_69 = arith.constant 1.000000e+00 : f32
    %160 = vector.broadcast %cst_69 : f32 to vector<24x256xf32>
    %161 = arith.addf %160, %159 : vector<24x256xf32>
    %162 = arith.mulf %151, %161 : vector<24x256xf32>
    %163 = arith.truncf %162 : vector<24x256xf32> to vector<24x256xbf16>
    %cst_70 = arith.constant dense<0.000000e+00> : vector<24x128xf32>
    %164 = tpu.matmul %163, %143, %cst_70 {dimension_numbers = #tpu.dot_dimension_numbers<[1], [0], [0], [1], [0, 0, 1, 1], [], []>} : vector<24x256xbf16>, vector<256x128xbf16>, vector<24x128xf32> -> vector<24x128xf32>
    %165 = vector.broadcast %145 : vector<1x128xf32> to vector<24x128xf32>
    %166 = arith.addf %164, %165 : vector<24x128xf32>
    %167 = arith.addf %111, %166 : vector<24x128xf32>
    %c0_71 = arith.constant 0 : index
    %c0_72 = arith.constant 0 : index
    %168 = vector.load %arg20[%c0_71, %c0_72] : memref<24x128xf32, #tpu.memory_space<vmem>>, vector<24x128xf32>
    tpu.vector_store %arg20[%c0_71, %c0_72], %167 {strides = array<i32>} : memref<24x128xf32, #tpu.memory_space<vmem>>, vector<24x128xf32>,
    %c1_i32 = arith.constant 1 : i32
    %169 = arith.cmpi eq, %arg1, %c1_i32 : i32
    %170 = arith.extui %169 : i1 to i32
    %c0_i32_73 = arith.constant 0 : i32
    %171 = arith.cmpi ne, %170, %c0_i32_73 : i32
    scf.if %171 {
      %c0_74 = arith.constant 0 : index
      %c0_75 = arith.constant 0 : index
      %172 = vector.load %arg17[%c0_74, %c0_75] : memref<1x128xf32, #tpu.memory_space<vmem>>, vector<1x128xf32>
      %c0_76 = arith.constant 0 : index
      %c0_77 = arith.constant 0 : index
      %173 = vector.load %arg18[%c0_76, %c0_77] : memref<1x128xf32, #tpu.memory_space<vmem>>, vector<1x128xf32>
      %cst_78 = arith.constant dense<0.000000e+00> : vector<24xf32>
      %174 = vector.multi_reduction <add>, %167, %cst_78 [1] : vector<24x128xf32> to vector<24xf32>
      %175 = vector.shape_cast %174 : vector<24xf32> to vector<24x1xf32>
      %cst_79 = arith.constant 1.280000e+02 : f32
      %176 = vector.broadcast %cst_79 : f32 to vector<24x1xf32>
      %177 = arith.divf %175, %176 : vector<24x1xf32>
      %178 = vector.broadcast %177 : vector<24x1xf32> to vector<24x128xf32>
      %179 = arith.subf %167, %178 : vector<24x128xf32>
      %180 = arith.mulf %179, %179 : vector<24x128xf32>
      %cst_80 = arith.constant dense<0.000000e+00> : vector<24xf32>
      %181 = vector.multi_reduction <add>, %180, %cst_80 [1] : vector<24x128xf32> to vector<24xf32>
      %182 = vector.shape_cast %181 : vector<24xf32> to vector<24x1xf32>
      %cst_81 = arith.constant 1.280000e+02 : f32
      %183 = vector.broadcast %cst_81 : f32 to vector<24x1xf32>
      %184 = arith.divf %182, %183 : vector<24x1xf32>
      %185 = vector.broadcast %177 : vector<24x1xf32> to vector<24x128xf32>
      %186 = arith.subf %167, %185 : vector<24x128xf32>
      %cst_82 = arith.constant 9.99999996E-13 : f32
      %187 = vector.broadcast %cst_82 : f32 to vector<24x1xf32>
      %188 = arith.addf %184, %187 : vector<24x1xf32>
      %189 = math.rsqrt %188 : vector<24x1xf32>
      %190 = vector.broadcast %189 : vector<24x1xf32> to vector<24x128xf32>
      %191 = arith.mulf %186, %190 : vector<24x128xf32>
      %192 = vector.broadcast %172 : vector<1x128xf32> to vector<24x128xf32>
      %193 = arith.mulf %191, %192 : vector<24x128xf32>
      %194 = vector.broadcast %173 : vector<1x128xf32> to vector<24x128xf32>
      %195 = arith.addf %193, %194 : vector<24x128xf32>
      %196 = arith.truncf %195 : vector<24x128xf32> to vector<24x128xbf16>
      %c0_83 = arith.constant 0 : index
      %c0_84 = arith.constant 0 : index
      %c0_85 = arith.constant 0 : index
      %197 = vector.load %arg19[%c0_83, %c0_84, %c0_85] : memref<1x24x128xbf16, #tpu.memory_space<vmem>>, vector<1x24x128xbf16>
      %198 = vector.shape_cast %197 : vector<1x24x128xbf16> to vector<24x128xbf16>
      %199 = vector.shape_cast %196 : vector<24x128xbf16> to vector<1x24x128xbf16>
      tpu.vector_store %arg19[%c0_83, %c0_84, %c0_85], %199 {strides = array<i32>} : memref<1x24x128xbf16, #tpu.memory_space<vmem>>, vector<1x24x128xbf16>,
    } else {
    }
    return
  }
  func.func @transform_0(%arg0: i32, %arg1: i32) -> (i32, i32, i32) {
    %c0_i32 = arith.constant 0 : i32
    %c0_i32_0 = arith.constant 0 : i32
    %c0_i32_1 = arith.constant 0 : i32
    return %arg0, %c0_i32, %c0_i32_0 : i32, i32, i32
  }
  func.func @transform_1(%arg0: i32, %arg1: i32) -> (i32, i32) {
    %c0_i32 = arith.constant 0 : i32
    %c0_i32_0 = arith.constant 0 : i32
    %c0_i32_1 = arith.constant 0 : i32
    return %c0_i32, %c0_i32_0 : i32, i32
  }
  func.func @transform_2(%arg0: i32, %arg1: i32) -> (i32, i32, i32) {
    %c0_i32 = arith.constant 0 : i32
    %c0_i32_0 = arith.constant 0 : i32
    %c0_i32_1 = arith.constant 0 : i32
    %c0_i32_2 = arith.constant 0 : i32
    return %c0_i32, %c0_i32_0, %c0_i32_1 : i32, i32, i32
  }
  func.func @transform_3(%arg0: i32, %arg1: i32) -> (i32, i32, i32) {
    %c0_i32 = arith.constant 0 : i32
    %c0_i32_0 = arith.constant 0 : i32
    %c0_i32_1 = arith.constant 0 : i32
    return %arg1, %c0_i32, %c0_i32_0 : i32, i32, i32
  }
  func.func @transform_4(%arg0: i32, %arg1: i32) -> (i32, i32, i32) {
    %c0_i32 = arith.constant 0 : i32
    %c0_i32_0 = arith.constant 0 : i32
    %c0_i32_1 = arith.constant 0 : i32
    return %arg1, %c0_i32, %c0_i32_0 : i32, i32, i32
  }
  func.func @transform_5(%arg0: i32, %arg1: i32) -> (i32, i32, i32) {
    %c0_i32 = arith.constant 0 : i32
    %c0_i32_0 = arith.constant 0 : i32
    %c0_i32_1 = arith.constant 0 : i32
    return %arg1, %c0_i32, %c0_i32_0 : i32, i32, i32
  }
  func.func @transform_6(%arg0: i32, %arg1: i32) -> (i32, i32, i32) {
    %c0_i32 = arith.constant 0 : i32
    %c0_i32_0 = arith.constant 0 : i32
    %c0_i32_1 = arith.constant 0 : i32
    return %arg1, %c0_i32, %c0_i32_0 : i32, i32, i32
  }
  func.func @transform_7(%arg0: i32, %arg1: i32) -> (i32, i32, i32) {
    %c0_i32 = arith.constant 0 : i32
    %c0_i32_0 = arith.constant 0 : i32
    %c0_i32_1 = arith.constant 0 : i32
    return %arg1, %c0_i32, %c0_i32_0 : i32, i32, i32
  }
  func.func @transform_8(%arg0: i32, %arg1: i32) -> (i32, i32, i32) {
    %c0_i32 = arith.constant 0 : i32
    %c0_i32_0 = arith.constant 0 : i32
    %c0_i32_1 = arith.constant 0 : i32
    return %arg1, %c0_i32, %c0_i32_0 : i32, i32, i32
  }
  func.func @transform_9(%arg0: i32, %arg1: i32) -> (i32, i32, i32) {
    %c0_i32 = arith.constant 0 : i32
    %c0_i32_0 = arith.constant 0 : i32
    %c0_i32_1 = arith.constant 0 : i32
    return %arg1, %c0_i32, %c0_i32_0 : i32, i32, i32
  }
  func.func @transform_10(%arg0: i32, %arg1: i32) -> (i32, i32, i32) {
    %c0_i32 = arith.constant 0 : i32
    %c0_i32_0 = arith.constant 0 : i32
    %c0_i32_1 = arith.constant 0 : i32
    return %arg1, %c0_i32, %c0_i32_0 : i32, i32, i32
  }
  func.func @transform_11(%arg0: i32, %arg1: i32) -> (i32, i32, i32) {
    %c0_i32 = arith.constant 0 : i32
    %c0_i32_0 = arith.constant 0 : i32
    %c0_i32_1 = arith.constant 0 : i32
    return %arg1, %c0_i32, %c0_i32_0 : i32, i32, i32
  }
  func.func @transform_12(%arg0: i32, %arg1: i32) -> (i32, i32, i32) {
    %c0_i32 = arith.constant 0 : i32
    %c0_i32_0 = arith.constant 0 : i32
    %c0_i32_1 = arith.constant 0 : i32
    return %arg1, %c0_i32, %c0_i32_0 : i32, i32, i32
  }
  func.func @transform_13(%arg0: i32, %arg1: i32) -> (i32, i32, i32) {
    %c0_i32 = arith.constant 0 : i32
    %c0_i32_0 = arith.constant 0 : i32
    %c0_i32_1 = arith.constant 0 : i32
    return %arg1, %c0_i32, %c0_i32_0 : i32, i32, i32
  }
  func.func @transform_14(%arg0: i32, %arg1: i32) -> (i32, i32, i32) {
    %c0_i32 = arith.constant 0 : i32
    %c0_i32_0 = arith.constant 0 : i32
    %c0_i32_1 = arith.constant 0 : i32
    return %arg1, %c0_i32, %c0_i32_0 : i32, i32, i32
  }
  func.func @transform_15(%arg0: i32, %arg1: i32) -> (i32, i32) {
    %c0_i32 = arith.constant 0 : i32
    %c0_i32_0 = arith.constant 0 : i32
    %c0_i32_1 = arith.constant 0 : i32
    return %c0_i32, %c0_i32_0 : i32, i32
  }
  func.func @transform_16(%arg0: i32, %arg1: i32) -> (i32, i32) {
    %c0_i32 = arith.constant 0 : i32
    %c0_i32_0 = arith.constant 0 : i32
    %c0_i32_1 = arith.constant 0 : i32
    return %c0_i32, %c0_i32_0 : i32, i32
  }
  func.func @transform_17(%arg0: i32, %arg1: i32) -> (i32, i32, i32) {
    %c0_i32 = arith.constant 0 : i32
    %c0_i32_0 = arith.constant 0 : i32
    %c0_i32_1 = arith.constant 0 : i32
    return %arg0, %c0_i32, %c0_i32_0 : i32, i32, i32
  }
}

module attributes {stable_mosaic.version = 11 : i64} {
  func.func @_gpt_stack_kernel(%arg0: i32, %arg1: i32, %arg2: memref<1x8x128xbf16, #tpu.memory_space<vmem>>, %arg3: memref<1x8x128xf32, #tpu.memory_space<vmem>>, %arg4: memref<1x1x128xf32, #tpu.memory_space<vmem>>, %arg5: memref<1x1x128xf32, #tpu.memory_space<vmem>>, %arg6: memref<1x128x384xbf16, #tpu.memory_space<vmem>>, %arg7: memref<1x1x384xf32, #tpu.memory_space<vmem>>, %arg8: memref<1x128x128xbf16, #tpu.memory_space<vmem>>, %arg9: memref<1x1x128xf32, #tpu.memory_space<vmem>>, %arg10: memref<1x1x128xf32, #tpu.memory_space<vmem>>, %arg11: memref<1x1x128xf32, #tpu.memory_space<vmem>>, %arg12: memref<1x128x256xbf16, #tpu.memory_space<vmem>>, %arg13: memref<1x1x256xf32, #tpu.memory_space<vmem>>, %arg14: memref<1x256x128xbf16, #tpu.memory_space<vmem>>, %arg15: memref<1x1x128xf32, #tpu.memory_space<vmem>>, %arg16: memref<1x128xf32, #tpu.memory_space<vmem>>, %arg17: memref<1x128xf32, #tpu.memory_space<vmem>>, %arg18: memref<128x128xbf16, #tpu.memory_space<vmem>>, %arg19: memref<1x8x128xf32, #tpu.memory_space<vmem>>, %arg20: memref<8x128xf32, #tpu.memory_space<vmem>>) attributes {dimension_semantics = [#tpu.dimension_semantics<parallel>, #tpu.dimension_semantics<arbitrary>], iteration_bounds = array<i64: 2, 2>, scalar_prefetch = 0 : i64, scratch_operands = 1 : i64, tpu.core_type = #tpu.core_type<tc>, window_params = [{transform_indices = @transform_0, window_bounds = array<i64: 1, 8, 128>}, {pipeline_mode = #tpu.pipeline_mode<synchronous>, transform_indices = @transform_1, window_bounds = array<i64: 1, 8, 128>}, {transform_indices = @transform_2, window_bounds = array<i64: 1, 1, 128>}, {transform_indices = @transform_3, window_bounds = array<i64: 1, 1, 128>}, {transform_indices = @transform_4, window_bounds = array<i64: 1, 128, 384>}, {transform_indices = @transform_5, window_bounds = array<i64: 1, 1, 384>}, {transform_indices = @transform_6, window_bounds = array<i64: 1, 128, 128>}, {transform_indices = @transform_7, window_bounds = array<i64: 1, 1, 128>}, {transform_indices = @transform_8, window_bounds = array<i64: 1, 1, 128>}, {transform_indices = @transform_9, window_bounds = array<i64: 1, 1, 128>}, {transform_indices = @transform_10, window_bounds = array<i64: 1, 128, 256>}, {transform_indices = @transform_11, window_bounds = array<i64: 1, 1, 256>}, {transform_indices = @transform_12, window_bounds = array<i64: 1, 256, 128>}, {transform_indices = @transform_13, window_bounds = array<i64: 1, 1, 128>}, {pipeline_mode = #tpu.pipeline_mode<synchronous>, transform_indices = @transform_14, window_bounds = array<i64: 1, 128>}, {pipeline_mode = #tpu.pipeline_mode<synchronous>, transform_indices = @transform_15, window_bounds = array<i64: 1, 128>}, {pipeline_mode = #tpu.pipeline_mode<synchronous>, transform_indices = @transform_16, window_bounds = array<i64: 128, 128>}, {transform_indices = @transform_17, window_bounds = array<i64: 1, 8, 128>}]} {
    %c0_i32 = arith.constant 0 : i32
    %0 = arith.cmpi eq, %arg1, %c0_i32 : i32
    %1 = arith.extui %0 : i1 to i32
    %c0_i32_0 = arith.constant 0 : i32
    %2 = arith.cmpi ne, %1, %c0_i32_0 : i32
    scf.if %2 {
      %c0_73 = arith.constant 0 : index
      %c0_74 = arith.constant 0 : index
      %c0_75 = arith.constant 0 : index
      %171 = vector.load %arg2[%c0_73, %c0_74, %c0_75] : memref<1x8x128xbf16, #tpu.memory_space<vmem>>, vector<1x8x128xbf16>
      %172 = vector.shape_cast %171 : vector<1x8x128xbf16> to vector<8x128xbf16>
      %173 = arith.extf %172 : vector<8x128xbf16> to vector<8x128xf32>
      %c0_76 = arith.constant 0 : index
      %c0_77 = arith.constant 0 : index
      %c0_78 = arith.constant 0 : index
      %174 = vector.load %arg3[%c0_76, %c0_77, %c0_78] : memref<1x8x128xf32, #tpu.memory_space<vmem>>, vector<1x8x128xf32>
      %175 = vector.shape_cast %174 : vector<1x8x128xf32> to vector<8x128xf32>
      %176 = arith.addf %173, %175 : vector<8x128xf32>
      %c0_79 = arith.constant 0 : index
      %c0_80 = arith.constant 0 : index
      %177 = vector.load %arg20[%c0_79, %c0_80] : memref<8x128xf32, #tpu.memory_space<vmem>>, vector<8x128xf32>
      tpu.vector_store %arg20[%c0_79, %c0_80], %176 {strides = array<i32>} : memref<8x128xf32, #tpu.memory_space<vmem>>, vector<8x128xf32>,
    } else {
    }
    %c0 = arith.constant 0 : index
    %c0_1 = arith.constant 0 : index
    %3 = vector.load %arg20[%c0, %c0_1] : memref<8x128xf32, #tpu.memory_space<vmem>>, vector<8x128xf32>
    %c0_2 = arith.constant 0 : index
    %c0_3 = arith.constant 0 : index
    %c0_4 = arith.constant 0 : index
    %4 = vector.load %arg4[%c0_2, %c0_3, %c0_4] : memref<1x1x128xf32, #tpu.memory_space<vmem>>, vector<1x1x128xf32>
    %5 = vector.shape_cast %4 : vector<1x1x128xf32> to vector<1x128xf32>
    %c0_5 = arith.constant 0 : index
    %c0_6 = arith.constant 0 : index
    %c0_7 = arith.constant 0 : index
    %6 = vector.load %arg5[%c0_5, %c0_6, %c0_7] : memref<1x1x128xf32, #tpu.memory_space<vmem>>, vector<1x1x128xf32>
    %7 = vector.shape_cast %6 : vector<1x1x128xf32> to vector<1x128xf32>
    %cst = arith.constant dense<0.000000e+00> : vector<8xf32>
    %8 = vector.multi_reduction <add>, %3, %cst [1] : vector<8x128xf32> to vector<8xf32>
    %9 = vector.shape_cast %8 : vector<8xf32> to vector<8x1xf32>
    %cst_8 = arith.constant 1.280000e+02 : f32
    %10 = vector.broadcast %cst_8 : f32 to vector<8x1xf32>
    %11 = arith.divf %9, %10 : vector<8x1xf32>
    %12 = vector.broadcast %11 : vector<8x1xf32> to vector<8x128xf32>
    %13 = arith.subf %3, %12 : vector<8x128xf32>
    %14 = arith.mulf %13, %13 : vector<8x128xf32>
    %cst_9 = arith.constant dense<0.000000e+00> : vector<8xf32>
    %15 = vector.multi_reduction <add>, %14, %cst_9 [1] : vector<8x128xf32> to vector<8xf32>
    %16 = vector.shape_cast %15 : vector<8xf32> to vector<8x1xf32>
    %cst_10 = arith.constant 1.280000e+02 : f32
    %17 = vector.broadcast %cst_10 : f32 to vector<8x1xf32>
    %18 = arith.divf %16, %17 : vector<8x1xf32>
    %19 = vector.broadcast %11 : vector<8x1xf32> to vector<8x128xf32>
    %20 = arith.subf %3, %19 : vector<8x128xf32>
    %cst_11 = arith.constant 9.99999974E-6 : f32
    %21 = vector.broadcast %cst_11 : f32 to vector<8x1xf32>
    %22 = arith.addf %18, %21 : vector<8x1xf32>
    %23 = math.rsqrt %22 : vector<8x1xf32>
    %24 = vector.broadcast %23 : vector<8x1xf32> to vector<8x128xf32>
    %25 = arith.mulf %20, %24 : vector<8x128xf32>
    %26 = vector.broadcast %5 : vector<1x128xf32> to vector<8x128xf32>
    %27 = arith.mulf %25, %26 : vector<8x128xf32>
    %28 = vector.broadcast %7 : vector<1x128xf32> to vector<8x128xf32>
    %29 = arith.addf %27, %28 : vector<8x128xf32>
    %c0_12 = arith.constant 0 : index
    %c0_13 = arith.constant 0 : index
    %c0_14 = arith.constant 0 : index
    %30 = vector.load %arg6[%c0_12, %c0_13, %c0_14] : memref<1x128x384xbf16, #tpu.memory_space<vmem>>, vector<1x128x384xbf16>
    %31 = vector.shape_cast %30 : vector<1x128x384xbf16> to vector<128x384xbf16>
    %c0_15 = arith.constant 0 : index
    %c0_16 = arith.constant 0 : index
    %c0_17 = arith.constant 0 : index
    %32 = vector.load %arg7[%c0_15, %c0_16, %c0_17] : memref<1x1x384xf32, #tpu.memory_space<vmem>>, vector<1x1x384xf32>
    %33 = vector.shape_cast %32 : vector<1x1x384xf32> to vector<1x384xf32>
    %c0_18 = arith.constant 0 : index
    %c0_19 = arith.constant 0 : index
    %c0_20 = arith.constant 0 : index
    %34 = vector.load %arg8[%c0_18, %c0_19, %c0_20] : memref<1x128x128xbf16, #tpu.memory_space<vmem>>, vector<1x128x128xbf16>
    %35 = vector.shape_cast %34 : vector<1x128x128xbf16> to vector<128x128xbf16>
    %c0_21 = arith.constant 0 : index
    %c0_22 = arith.constant 0 : index
    %c0_23 = arith.constant 0 : index
    %36 = vector.load %arg9[%c0_21, %c0_22, %c0_23] : memref<1x1x128xf32, #tpu.memory_space<vmem>>, vector<1x1x128xf32>
    %37 = vector.shape_cast %36 : vector<1x1x128xf32> to vector<1x128xf32>
    %38 = arith.truncf %29 : vector<8x128xf32> to vector<8x128xbf16>
    %cst_24 = arith.constant dense<0.000000e+00> : vector<8x384xf32>
    %39 = tpu.matmul %38, %31, %cst_24 {dimension_numbers = #tpu.dot_dimension_numbers<[1], [0], [0], [1], [0, 0, 1, 1], [], []>} : vector<8x128xbf16>, vector<128x384xbf16>, vector<8x384xf32> -> vector<8x384xf32>
    %40 = vector.broadcast %33 : vector<1x384xf32> to vector<8x384xf32>
    %41 = arith.addf %39, %40 : vector<8x384xf32>
    %42 = vector.extract_strided_slice %41 {offsets = [0, 0], sizes = [8, 128], strides = [1, 1]} : vector<8x384xf32> to vector<8x128xf32>
    %43 = vector.extract_strided_slice %41 {offsets = [0, 128], sizes = [8, 128], strides = [1, 1]} : vector<8x384xf32> to vector<8x128xf32>
    %44 = vector.extract_strided_slice %41 {offsets = [0, 256], sizes = [8, 128], strides = [1, 1]} : vector<8x384xf32> to vector<8x128xf32>
    %cst_25 = arith.constant 0.176776692 : f32
    %45 = vector.broadcast %cst_25 : f32 to vector<8x128xf32>
    %46 = arith.mulf %42, %45 : vector<8x128xf32>
    %47 = arith.truncf %46 : vector<8x128xf32> to vector<8x128xbf16>
    %48 = arith.truncf %43 : vector<8x128xf32> to vector<8x128xbf16>
    %49 = vector.extract_strided_slice %47 {offsets = [0, 0], sizes = [8, 32], strides = [1, 1]} : vector<8x128xbf16> to vector<8x32xbf16>
    %50 = vector.extract_strided_slice %48 {offsets = [0, 0], sizes = [8, 32], strides = [1, 1]} : vector<8x128xbf16> to vector<8x32xbf16>
    %cst_26 = arith.constant dense<0.000000e+00> : vector<8x8xf32>
    %51 = tpu.matmul %49, %50, %cst_26 {dimension_numbers = #tpu.dot_dimension_numbers<[1], [1], [0], [0], [0, 0, 1, 0], [], []>} : vector<8x32xbf16>, vector<8x32xbf16>, vector<8x8xf32> -> vector<8x8xf32>
    %52 = vector.extract_strided_slice %47 {offsets = [0, 32], sizes = [8, 32], strides = [1, 1]} : vector<8x128xbf16> to vector<8x32xbf16>
    %53 = vector.extract_strided_slice %48 {offsets = [0, 32], sizes = [8, 32], strides = [1, 1]} : vector<8x128xbf16> to vector<8x32xbf16>
    %cst_27 = arith.constant dense<0.000000e+00> : vector<8x8xf32>
    %54 = tpu.matmul %52, %53, %cst_27 {dimension_numbers = #tpu.dot_dimension_numbers<[1], [1], [0], [0], [0, 0, 1, 0], [], []>} : vector<8x32xbf16>, vector<8x32xbf16>, vector<8x8xf32> -> vector<8x8xf32>
    %55 = vector.extract_strided_slice %47 {offsets = [0, 64], sizes = [8, 32], strides = [1, 1]} : vector<8x128xbf16> to vector<8x32xbf16>
    %56 = vector.extract_strided_slice %48 {offsets = [0, 64], sizes = [8, 32], strides = [1, 1]} : vector<8x128xbf16> to vector<8x32xbf16>
    %cst_28 = arith.constant dense<0.000000e+00> : vector<8x8xf32>
    %57 = tpu.matmul %55, %56, %cst_28 {dimension_numbers = #tpu.dot_dimension_numbers<[1], [1], [0], [0], [0, 0, 1, 0], [], []>} : vector<8x32xbf16>, vector<8x32xbf16>, vector<8x8xf32> -> vector<8x8xf32>
    %58 = vector.extract_strided_slice %47 {offsets = [0, 96], sizes = [8, 32], strides = [1, 1]} : vector<8x128xbf16> to vector<8x32xbf16>
    %59 = vector.extract_strided_slice %48 {offsets = [0, 96], sizes = [8, 32], strides = [1, 1]} : vector<8x128xbf16> to vector<8x32xbf16>
    %cst_29 = arith.constant dense<0.000000e+00> : vector<8x8xf32>
    %60 = tpu.matmul %58, %59, %cst_29 {dimension_numbers = #tpu.dot_dimension_numbers<[1], [1], [0], [0], [0, 0, 1, 0], [], []>} : vector<8x32xbf16>, vector<8x32xbf16>, vector<8x8xf32> -> vector<8x8xf32>
    %61 = tpu.concatenate %51, %54, %57, %60 in 0 : vector<8x8xf32>, vector<8x8xf32>, vector<8x8xf32>, vector<8x8xf32> -> vector<32x8xf32>
    %62 = tpu.iota {dimensions = array<i32: 0>} : vector<32x8xi32>
    %63 = tpu.iota {dimensions = array<i32: 1>} : vector<32x8xi32>
    %c7_i32 = arith.constant 7 : i32
    %64 = vector.broadcast %c7_i32 : i32 to vector<32x8xi32>
    %65 = arith.andi %62, %64 : vector<32x8xi32>
    %66 = arith.cmpi sle, %63, %65 : vector<32x8xi32>
    %cst_30 = arith.constant -1.000000e+09 : f32
    %67 = vector.broadcast %cst_30 : f32 to vector<32x8xf32>
    %68 = arith.select %66, %61, %67 : vector<32x8xi1>, vector<32x8xf32>
    %cst_31 = arith.constant dense<0xFF800000> : vector<32xf32>
    %69 = vector.multi_reduction <maximumf>, %68, %cst_31 [1] : vector<32x8xf32> to vector<32xf32>
    %70 = vector.shape_cast %69 : vector<32xf32> to vector<32x1xf32>
    %71 = vector.broadcast %70 : vector<32x1xf32> to vector<32x8xf32>
    %72 = arith.subf %68, %71 : vector<32x8xf32>
    %73 = math.exp %72 : vector<32x8xf32>
    %cst_32 = arith.constant dense<0.000000e+00> : vector<32xf32>
    %74 = vector.multi_reduction <add>, %73, %cst_32 [1] : vector<32x8xf32> to vector<32xf32>
    %75 = vector.shape_cast %74 : vector<32xf32> to vector<32x1xf32>
    %76 = tpu.reciprocal %75 {approx = true} : vector<32x1xf32> -> vector<32x1xf32>
    %77 = vector.broadcast %76 : vector<32x1xf32> to vector<32x8xf32>
    %78 = arith.mulf %73, %77 : vector<32x8xf32>
    %79 = arith.truncf %78 : vector<32x8xf32> to vector<32x8xbf16>
    %80 = arith.truncf %44 : vector<8x128xf32> to vector<8x128xbf16>
    %81 = vector.extract_strided_slice %79 {offsets = [0, 0], sizes = [8, 8], strides = [1, 1]} : vector<32x8xbf16> to vector<8x8xbf16>
    %82 = vector.extract_strided_slice %80 {offsets = [0, 0], sizes = [8, 32], strides = [1, 1]} : vector<8x128xbf16> to vector<8x32xbf16>
    %cst_33 = arith.constant dense<0.000000e+00> : vector<8x32xf32>
    %83 = tpu.matmul %81, %82, %cst_33 {dimension_numbers = #tpu.dot_dimension_numbers<[1], [0], [0], [1], [0, 0, 1, 1], [], []>} : vector<8x8xbf16>, vector<8x32xbf16>, vector<8x32xf32> -> vector<8x32xf32>
    %84 = arith.truncf %83 : vector<8x32xf32> to vector<8x32xbf16>
    %85 = vector.extract_strided_slice %35 {offsets = [0, 0], sizes = [32, 128], strides = [1, 1]} : vector<128x128xbf16> to vector<32x128xbf16>
    %cst_34 = arith.constant dense<0.000000e+00> : vector<8x128xf32>
    %86 = tpu.matmul %84, %85, %cst_34 {dimension_numbers = #tpu.dot_dimension_numbers<[1], [0], [0], [1], [0, 0, 1, 1], [], []>} : vector<8x32xbf16>, vector<32x128xbf16>, vector<8x128xf32> -> vector<8x128xf32>
    %87 = vector.broadcast %37 : vector<1x128xf32> to vector<8x128xf32>
    %88 = arith.addf %87, %86 : vector<8x128xf32>
    %89 = vector.extract_strided_slice %79 {offsets = [8, 0], sizes = [8, 8], strides = [1, 1]} : vector<32x8xbf16> to vector<8x8xbf16>
    %90 = vector.extract_strided_slice %80 {offsets = [0, 32], sizes = [8, 32], strides = [1, 1]} : vector<8x128xbf16> to vector<8x32xbf16>
    %cst_35 = arith.constant dense<0.000000e+00> : vector<8x32xf32>
    %91 = tpu.matmul %89, %90, %cst_35 {dimension_numbers = #tpu.dot_dimension_numbers<[1], [0], [0], [1], [0, 0, 1, 1], [], []>} : vector<8x8xbf16>, vector<8x32xbf16>, vector<8x32xf32> -> vector<8x32xf32>
    %92 = arith.truncf %91 : vector<8x32xf32> to vector<8x32xbf16>
    %93 = vector.extract_strided_slice %35 {offsets = [32, 0], sizes = [32, 128], strides = [1, 1]} : vector<128x128xbf16> to vector<32x128xbf16>
    %cst_36 = arith.constant dense<0.000000e+00> : vector<8x128xf32>
    %94 = tpu.matmul %92, %93, %cst_36 {dimension_numbers = #tpu.dot_dimension_numbers<[1], [0], [0], [1], [0, 0, 1, 1], [], []>} : vector<8x32xbf16>, vector<32x128xbf16>, vector<8x128xf32> -> vector<8x128xf32>
    %95 = arith.addf %88, %94 : vector<8x128xf32>
    %96 = vector.extract_strided_slice %79 {offsets = [16, 0], sizes = [8, 8], strides = [1, 1]} : vector<32x8xbf16> to vector<8x8xbf16>
    %97 = vector.extract_strided_slice %80 {offsets = [0, 64], sizes = [8, 32], strides = [1, 1]} : vector<8x128xbf16> to vector<8x32xbf16>
    %cst_37 = arith.constant dense<0.000000e+00> : vector<8x32xf32>
    %98 = tpu.matmul %96, %97, %cst_37 {dimension_numbers = #tpu.dot_dimension_numbers<[1], [0], [0], [1], [0, 0, 1, 1], [], []>} : vector<8x8xbf16>, vector<8x32xbf16>, vector<8x32xf32> -> vector<8x32xf32>
    %99 = arith.truncf %98 : vector<8x32xf32> to vector<8x32xbf16>
    %100 = vector.extract_strided_slice %35 {offsets = [64, 0], sizes = [32, 128], strides = [1, 1]} : vector<128x128xbf16> to vector<32x128xbf16>
    %cst_38 = arith.constant dense<0.000000e+00> : vector<8x128xf32>
    %101 = tpu.matmul %99, %100, %cst_38 {dimension_numbers = #tpu.dot_dimension_numbers<[1], [0], [0], [1], [0, 0, 1, 1], [], []>} : vector<8x32xbf16>, vector<32x128xbf16>, vector<8x128xf32> -> vector<8x128xf32>
    %102 = arith.addf %95, %101 : vector<8x128xf32>
    %103 = vector.extract_strided_slice %79 {offsets = [24, 0], sizes = [8, 8], strides = [1, 1]} : vector<32x8xbf16> to vector<8x8xbf16>
    %104 = vector.extract_strided_slice %80 {offsets = [0, 96], sizes = [8, 32], strides = [1, 1]} : vector<8x128xbf16> to vector<8x32xbf16>
    %cst_39 = arith.constant dense<0.000000e+00> : vector<8x32xf32>
    %105 = tpu.matmul %103, %104, %cst_39 {dimension_numbers = #tpu.dot_dimension_numbers<[1], [0], [0], [1], [0, 0, 1, 1], [], []>} : vector<8x8xbf16>, vector<8x32xbf16>, vector<8x32xf32> -> vector<8x32xf32>
    %106 = arith.truncf %105 : vector<8x32xf32> to vector<8x32xbf16>
    %107 = vector.extract_strided_slice %35 {offsets = [96, 0], sizes = [32, 128], strides = [1, 1]} : vector<128x128xbf16> to vector<32x128xbf16>
    %cst_40 = arith.constant dense<0.000000e+00> : vector<8x128xf32>
    %108 = tpu.matmul %106, %107, %cst_40 {dimension_numbers = #tpu.dot_dimension_numbers<[1], [0], [0], [1], [0, 0, 1, 1], [], []>} : vector<8x32xbf16>, vector<32x128xbf16>, vector<8x128xf32> -> vector<8x128xf32>
    %109 = arith.addf %102, %108 : vector<8x128xf32>
    %110 = arith.addf %3, %109 : vector<8x128xf32>
    %c0_41 = arith.constant 0 : index
    %c0_42 = arith.constant 0 : index
    %c0_43 = arith.constant 0 : index
    %111 = vector.load %arg10[%c0_41, %c0_42, %c0_43] : memref<1x1x128xf32, #tpu.memory_space<vmem>>, vector<1x1x128xf32>
    %112 = vector.shape_cast %111 : vector<1x1x128xf32> to vector<1x128xf32>
    %c0_44 = arith.constant 0 : index
    %c0_45 = arith.constant 0 : index
    %c0_46 = arith.constant 0 : index
    %113 = vector.load %arg11[%c0_44, %c0_45, %c0_46] : memref<1x1x128xf32, #tpu.memory_space<vmem>>, vector<1x1x128xf32>
    %114 = vector.shape_cast %113 : vector<1x1x128xf32> to vector<1x128xf32>
    %cst_47 = arith.constant dense<0.000000e+00> : vector<8xf32>
    %115 = vector.multi_reduction <add>, %110, %cst_47 [1] : vector<8x128xf32> to vector<8xf32>
    %116 = vector.shape_cast %115 : vector<8xf32> to vector<8x1xf32>
    %cst_48 = arith.constant 1.280000e+02 : f32
    %117 = vector.broadcast %cst_48 : f32 to vector<8x1xf32>
    %118 = arith.divf %116, %117 : vector<8x1xf32>
    %119 = vector.broadcast %118 : vector<8x1xf32> to vector<8x128xf32>
    %120 = arith.subf %110, %119 : vector<8x128xf32>
    %121 = arith.mulf %120, %120 : vector<8x128xf32>
    %cst_49 = arith.constant dense<0.000000e+00> : vector<8xf32>
    %122 = vector.multi_reduction <add>, %121, %cst_49 [1] : vector<8x128xf32> to vector<8xf32>
    %123 = vector.shape_cast %122 : vector<8xf32> to vector<8x1xf32>
    %cst_50 = arith.constant 1.280000e+02 : f32
    %124 = vector.broadcast %cst_50 : f32 to vector<8x1xf32>
    %125 = arith.divf %123, %124 : vector<8x1xf32>
    %126 = vector.broadcast %118 : vector<8x1xf32> to vector<8x128xf32>
    %127 = arith.subf %110, %126 : vector<8x128xf32>
    %cst_51 = arith.constant 9.99999974E-6 : f32
    %128 = vector.broadcast %cst_51 : f32 to vector<8x1xf32>
    %129 = arith.addf %125, %128 : vector<8x1xf32>
    %130 = math.rsqrt %129 : vector<8x1xf32>
    %131 = vector.broadcast %130 : vector<8x1xf32> to vector<8x128xf32>
    %132 = arith.mulf %127, %131 : vector<8x128xf32>
    %133 = vector.broadcast %112 : vector<1x128xf32> to vector<8x128xf32>
    %134 = arith.mulf %132, %133 : vector<8x128xf32>
    %135 = vector.broadcast %114 : vector<1x128xf32> to vector<8x128xf32>
    %136 = arith.addf %134, %135 : vector<8x128xf32>
    %c0_52 = arith.constant 0 : index
    %c0_53 = arith.constant 0 : index
    %c0_54 = arith.constant 0 : index
    %137 = vector.load %arg12[%c0_52, %c0_53, %c0_54] : memref<1x128x256xbf16, #tpu.memory_space<vmem>>, vector<1x128x256xbf16>
    %138 = vector.shape_cast %137 : vector<1x128x256xbf16> to vector<128x256xbf16>
    %c0_55 = arith.constant 0 : index
    %c0_56 = arith.constant 0 : index
    %c0_57 = arith.constant 0 : index
    %139 = vector.load %arg13[%c0_55, %c0_56, %c0_57] : memref<1x1x256xf32, #tpu.memory_space<vmem>>, vector<1x1x256xf32>
    %140 = vector.shape_cast %139 : vector<1x1x256xf32> to vector<1x256xf32>
    %c0_58 = arith.constant 0 : index
    %c0_59 = arith.constant 0 : index
    %c0_60 = arith.constant 0 : index
    %141 = vector.load %arg14[%c0_58, %c0_59, %c0_60] : memref<1x256x128xbf16, #tpu.memory_space<vmem>>, vector<1x256x128xbf16>
    %142 = vector.shape_cast %141 : vector<1x256x128xbf16> to vector<256x128xbf16>
    %c0_61 = arith.constant 0 : index
    %c0_62 = arith.constant 0 : index
    %c0_63 = arith.constant 0 : index
    %143 = vector.load %arg15[%c0_61, %c0_62, %c0_63] : memref<1x1x128xf32, #tpu.memory_space<vmem>>, vector<1x1x128xf32>
    %144 = vector.shape_cast %143 : vector<1x1x128xf32> to vector<1x128xf32>
    %145 = arith.truncf %136 : vector<8x128xf32> to vector<8x128xbf16>
    %cst_64 = arith.constant dense<0.000000e+00> : vector<8x256xf32>
    %146 = tpu.matmul %145, %138, %cst_64 {dimension_numbers = #tpu.dot_dimension_numbers<[1], [0], [0], [1], [0, 0, 1, 1], [], []>} : vector<8x128xbf16>, vector<128x256xbf16>, vector<8x256xf32> -> vector<8x256xf32>
    %147 = vector.broadcast %140 : vector<1x256xf32> to vector<8x256xf32>
    %148 = arith.addf %146, %147 : vector<8x256xf32>
    %cst_65 = arith.constant 5.000000e-01 : f32
    %149 = vector.broadcast %cst_65 : f32 to vector<8x256xf32>
    %150 = arith.mulf %149, %148 : vector<8x256xf32>
    %cst_66 = arith.constant 4.471500e-02 : f32
    %151 = vector.broadcast %cst_66 : f32 to vector<8x256xf32>
    %152 = arith.mulf %151, %148 : vector<8x256xf32>
    %153 = arith.mulf %152, %148 : vector<8x256xf32>
    %154 = arith.mulf %153, %148 : vector<8x256xf32>
    %155 = arith.addf %148, %154 : vector<8x256xf32>
    %cst_67 = arith.constant 0.797884583 : f32
    %156 = vector.broadcast %cst_67 : f32 to vector<8x256xf32>
    %157 = arith.mulf %156, %155 : vector<8x256xf32>
    %158 = math.tanh %157 : vector<8x256xf32>
    %cst_68 = arith.constant 1.000000e+00 : f32
    %159 = vector.broadcast %cst_68 : f32 to vector<8x256xf32>
    %160 = arith.addf %159, %158 : vector<8x256xf32>
    %161 = arith.mulf %150, %160 : vector<8x256xf32>
    %162 = arith.truncf %161 : vector<8x256xf32> to vector<8x256xbf16>
    %cst_69 = arith.constant dense<0.000000e+00> : vector<8x128xf32>
    %163 = tpu.matmul %162, %142, %cst_69 {dimension_numbers = #tpu.dot_dimension_numbers<[1], [0], [0], [1], [0, 0, 1, 1], [], []>} : vector<8x256xbf16>, vector<256x128xbf16>, vector<8x128xf32> -> vector<8x128xf32>
    %164 = vector.broadcast %144 : vector<1x128xf32> to vector<8x128xf32>
    %165 = arith.addf %163, %164 : vector<8x128xf32>
    %166 = arith.addf %110, %165 : vector<8x128xf32>
    %c0_70 = arith.constant 0 : index
    %c0_71 = arith.constant 0 : index
    %167 = vector.load %arg20[%c0_70, %c0_71] : memref<8x128xf32, #tpu.memory_space<vmem>>, vector<8x128xf32>
    tpu.vector_store %arg20[%c0_70, %c0_71], %166 {strides = array<i32>} : memref<8x128xf32, #tpu.memory_space<vmem>>, vector<8x128xf32>,
    %c1_i32 = arith.constant 1 : i32
    %168 = arith.cmpi eq, %arg1, %c1_i32 : i32
    %169 = arith.extui %168 : i1 to i32
    %c0_i32_72 = arith.constant 0 : i32
    %170 = arith.cmpi ne, %169, %c0_i32_72 : i32
    scf.if %170 {
      %c0_73 = arith.constant 0 : index
      %c0_74 = arith.constant 0 : index
      %171 = vector.load %arg16[%c0_73, %c0_74] : memref<1x128xf32, #tpu.memory_space<vmem>>, vector<1x128xf32>
      %c0_75 = arith.constant 0 : index
      %c0_76 = arith.constant 0 : index
      %172 = vector.load %arg17[%c0_75, %c0_76] : memref<1x128xf32, #tpu.memory_space<vmem>>, vector<1x128xf32>
      %cst_77 = arith.constant dense<0.000000e+00> : vector<8xf32>
      %173 = vector.multi_reduction <add>, %166, %cst_77 [1] : vector<8x128xf32> to vector<8xf32>
      %174 = vector.shape_cast %173 : vector<8xf32> to vector<8x1xf32>
      %cst_78 = arith.constant 1.280000e+02 : f32
      %175 = vector.broadcast %cst_78 : f32 to vector<8x1xf32>
      %176 = arith.divf %174, %175 : vector<8x1xf32>
      %177 = vector.broadcast %176 : vector<8x1xf32> to vector<8x128xf32>
      %178 = arith.subf %166, %177 : vector<8x128xf32>
      %179 = arith.mulf %178, %178 : vector<8x128xf32>
      %cst_79 = arith.constant dense<0.000000e+00> : vector<8xf32>
      %180 = vector.multi_reduction <add>, %179, %cst_79 [1] : vector<8x128xf32> to vector<8xf32>
      %181 = vector.shape_cast %180 : vector<8xf32> to vector<8x1xf32>
      %cst_80 = arith.constant 1.280000e+02 : f32
      %182 = vector.broadcast %cst_80 : f32 to vector<8x1xf32>
      %183 = arith.divf %181, %182 : vector<8x1xf32>
      %184 = vector.broadcast %176 : vector<8x1xf32> to vector<8x128xf32>
      %185 = arith.subf %166, %184 : vector<8x128xf32>
      %cst_81 = arith.constant 9.99999974E-6 : f32
      %186 = vector.broadcast %cst_81 : f32 to vector<8x1xf32>
      %187 = arith.addf %183, %186 : vector<8x1xf32>
      %188 = math.rsqrt %187 : vector<8x1xf32>
      %189 = vector.broadcast %188 : vector<8x1xf32> to vector<8x128xf32>
      %190 = arith.mulf %185, %189 : vector<8x128xf32>
      %191 = vector.broadcast %171 : vector<1x128xf32> to vector<8x128xf32>
      %192 = arith.mulf %190, %191 : vector<8x128xf32>
      %193 = vector.broadcast %172 : vector<1x128xf32> to vector<8x128xf32>
      %194 = arith.addf %192, %193 : vector<8x128xf32>
      %195 = arith.truncf %194 : vector<8x128xf32> to vector<8x128xbf16>
      %c0_82 = arith.constant 0 : index
      %c0_83 = arith.constant 0 : index
      %196 = vector.load %arg18[%c0_82, %c0_83] : memref<128x128xbf16, #tpu.memory_space<vmem>>, vector<128x128xbf16>
      %cst_84 = arith.constant dense<0.000000e+00> : vector<8x128xf32>
      %197 = tpu.matmul %195, %196, %cst_84 {dimension_numbers = #tpu.dot_dimension_numbers<[1], [0], [0], [1], [0, 0, 1, 1], [], []>} : vector<8x128xbf16>, vector<128x128xbf16>, vector<8x128xf32> -> vector<8x128xf32>
      %c0_85 = arith.constant 0 : index
      %c0_86 = arith.constant 0 : index
      %c0_87 = arith.constant 0 : index
      %198 = vector.load %arg19[%c0_85, %c0_86, %c0_87] : memref<1x8x128xf32, #tpu.memory_space<vmem>>, vector<1x8x128xf32>
      %199 = vector.shape_cast %198 : vector<1x8x128xf32> to vector<8x128xf32>
      %200 = vector.shape_cast %197 : vector<8x128xf32> to vector<1x8x128xf32>
      tpu.vector_store %arg19[%c0_85, %c0_86, %c0_87], %200 {strides = array<i32>} : memref<1x8x128xf32, #tpu.memory_space<vmem>>, vector<1x8x128xf32>,
    } else {
    }
    return
  }
  func.func @transform_0(%arg0: i32, %arg1: i32) -> (i32, i32, i32) {
    %c0_i32 = arith.constant 0 : i32
    %c0_i32_0 = arith.constant 0 : i32
    %c0_i32_1 = arith.constant 0 : i32
    return %arg0, %c0_i32, %c0_i32_0 : i32, i32, i32
  }
  func.func @transform_1(%arg0: i32, %arg1: i32) -> (i32, i32, i32) {
    %c0_i32 = arith.constant 0 : i32
    %c0_i32_0 = arith.constant 0 : i32
    %c0_i32_1 = arith.constant 0 : i32
    %c0_i32_2 = arith.constant 0 : i32
    return %c0_i32, %c0_i32_0, %c0_i32_1 : i32, i32, i32
  }
  func.func @transform_2(%arg0: i32, %arg1: i32) -> (i32, i32, i32) {
    %c0_i32 = arith.constant 0 : i32
    %c0_i32_0 = arith.constant 0 : i32
    %c0_i32_1 = arith.constant 0 : i32
    return %arg1, %c0_i32, %c0_i32_0 : i32, i32, i32
  }
  func.func @transform_3(%arg0: i32, %arg1: i32) -> (i32, i32, i32) {
    %c0_i32 = arith.constant 0 : i32
    %c0_i32_0 = arith.constant 0 : i32
    %c0_i32_1 = arith.constant 0 : i32
    return %arg1, %c0_i32, %c0_i32_0 : i32, i32, i32
  }
  func.func @transform_4(%arg0: i32, %arg1: i32) -> (i32, i32, i32) {
    %c0_i32 = arith.constant 0 : i32
    %c0_i32_0 = arith.constant 0 : i32
    %c0_i32_1 = arith.constant 0 : i32
    return %arg1, %c0_i32, %c0_i32_0 : i32, i32, i32
  }
  func.func @transform_5(%arg0: i32, %arg1: i32) -> (i32, i32, i32) {
    %c0_i32 = arith.constant 0 : i32
    %c0_i32_0 = arith.constant 0 : i32
    %c0_i32_1 = arith.constant 0 : i32
    return %arg1, %c0_i32, %c0_i32_0 : i32, i32, i32
  }
  func.func @transform_6(%arg0: i32, %arg1: i32) -> (i32, i32, i32) {
    %c0_i32 = arith.constant 0 : i32
    %c0_i32_0 = arith.constant 0 : i32
    %c0_i32_1 = arith.constant 0 : i32
    return %arg1, %c0_i32, %c0_i32_0 : i32, i32, i32
  }
  func.func @transform_7(%arg0: i32, %arg1: i32) -> (i32, i32, i32) {
    %c0_i32 = arith.constant 0 : i32
    %c0_i32_0 = arith.constant 0 : i32
    %c0_i32_1 = arith.constant 0 : i32
    return %arg1, %c0_i32, %c0_i32_0 : i32, i32, i32
  }
  func.func @transform_8(%arg0: i32, %arg1: i32) -> (i32, i32, i32) {
    %c0_i32 = arith.constant 0 : i32
    %c0_i32_0 = arith.constant 0 : i32
    %c0_i32_1 = arith.constant 0 : i32
    return %arg1, %c0_i32, %c0_i32_0 : i32, i32, i32
  }
  func.func @transform_9(%arg0: i32, %arg1: i32) -> (i32, i32, i32) {
    %c0_i32 = arith.constant 0 : i32
    %c0_i32_0 = arith.constant 0 : i32
    %c0_i32_1 = arith.constant 0 : i32
    return %arg1, %c0_i32, %c0_i32_0 : i32, i32, i32
  }
  func.func @transform_10(%arg0: i32, %arg1: i32) -> (i32, i32, i32) {
    %c0_i32 = arith.constant 0 : i32
    %c0_i32_0 = arith.constant 0 : i32
    %c0_i32_1 = arith.constant 0 : i32
    return %arg1, %c0_i32, %c0_i32_0 : i32, i32, i32
  }
  func.func @transform_11(%arg0: i32, %arg1: i32) -> (i32, i32, i32) {
    %c0_i32 = arith.constant 0 : i32
    %c0_i32_0 = arith.constant 0 : i32
    %c0_i32_1 = arith.constant 0 : i32
    return %arg1, %c0_i32, %c0_i32_0 : i32, i32, i32
  }
  func.func @transform_12(%arg0: i32, %arg1: i32) -> (i32, i32, i32) {
    %c0_i32 = arith.constant 0 : i32
    %c0_i32_0 = arith.constant 0 : i32
    %c0_i32_1 = arith.constant 0 : i32
    return %arg1, %c0_i32, %c0_i32_0 : i32, i32, i32
  }
  func.func @transform_13(%arg0: i32, %arg1: i32) -> (i32, i32, i32) {
    %c0_i32 = arith.constant 0 : i32
    %c0_i32_0 = arith.constant 0 : i32
    %c0_i32_1 = arith.constant 0 : i32
    return %arg1, %c0_i32, %c0_i32_0 : i32, i32, i32
  }
  func.func @transform_14(%arg0: i32, %arg1: i32) -> (i32, i32) {
    %c0_i32 = arith.constant 0 : i32
    %c0_i32_0 = arith.constant 0 : i32
    %c0_i32_1 = arith.constant 0 : i32
    return %c0_i32, %c0_i32_0 : i32, i32
  }
  func.func @transform_15(%arg0: i32, %arg1: i32) -> (i32, i32) {
    %c0_i32 = arith.constant 0 : i32
    %c0_i32_0 = arith.constant 0 : i32
    %c0_i32_1 = arith.constant 0 : i32
    return %c0_i32, %c0_i32_0 : i32, i32
  }
  func.func @transform_16(%arg0: i32, %arg1: i32) -> (i32, i32) {
    %c0_i32 = arith.constant 0 : i32
    %c0_i32_0 = arith.constant 0 : i32
    %c0_i32_1 = arith.constant 0 : i32
    return %c0_i32, %c0_i32_0 : i32, i32
  }
  func.func @transform_17(%arg0: i32, %arg1: i32) -> (i32, i32, i32) {
    %c0_i32 = arith.constant 0 : i32
    %c0_i32_0 = arith.constant 0 : i32
    %c0_i32_1 = arith.constant 0 : i32
    return %arg0, %c0_i32, %c0_i32_0 : i32, i32, i32
  }
}

module attributes {stable_mosaic.version = 11 : i64} {
  func.func @_blip_stack_kernel(%arg0: i32, %arg1: i32, %arg2: memref<1x8x128xf32, #tpu.memory_space<vmem>>, %arg3: memref<1x1x8xf32, #tpu.memory_space<vmem>>, %arg4: memref<1x24x128xbf16, #tpu.memory_space<vmem>>, %arg5: memref<1x128xf32, #tpu.memory_space<vmem>>, %arg6: memref<1x128xf32, #tpu.memory_space<vmem>>, %arg7: memref<1x1x128xf32, #tpu.memory_space<vmem>>, %arg8: memref<1x1x128xf32, #tpu.memory_space<vmem>>, %arg9: memref<1x128x384xbf16, #tpu.memory_space<vmem>>, %arg10: memref<1x1x384xf32, #tpu.memory_space<vmem>>, %arg11: memref<1x128x128xbf16, #tpu.memory_space<vmem>>, %arg12: memref<1x1x128xf32, #tpu.memory_space<vmem>>, %arg13: memref<1x1x128xf32, #tpu.memory_space<vmem>>, %arg14: memref<1x1x128xf32, #tpu.memory_space<vmem>>, %arg15: memref<1x128x128xbf16, #tpu.memory_space<vmem>>, %arg16: memref<1x1x128xf32, #tpu.memory_space<vmem>>, %arg17: memref<1x128x256xbf16, #tpu.memory_space<vmem>>, %arg18: memref<1x1x256xf32, #tpu.memory_space<vmem>>, %arg19: memref<1x128x128xbf16, #tpu.memory_space<vmem>>, %arg20: memref<1x1x128xf32, #tpu.memory_space<vmem>>, %arg21: memref<1x1x128xf32, #tpu.memory_space<vmem>>, %arg22: memref<1x1x128xf32, #tpu.memory_space<vmem>>, %arg23: memref<1x128x256xbf16, #tpu.memory_space<vmem>>, %arg24: memref<1x1x256xf32, #tpu.memory_space<vmem>>, %arg25: memref<1x256x128xbf16, #tpu.memory_space<vmem>>, %arg26: memref<1x1x128xf32, #tpu.memory_space<vmem>>, %arg27: memref<1x8x128xbf16, #tpu.memory_space<vmem>>, %arg28: memref<8x128xf32, #tpu.memory_space<vmem>>) attributes {dimension_semantics = [#tpu.dimension_semantics<parallel>, #tpu.dimension_semantics<arbitrary>], iteration_bounds = array<i64: 2, 2>, scalar_prefetch = 0 : i64, scratch_operands = 1 : i64, tpu.core_type = #tpu.core_type<tc>, window_params = [{transform_indices = @transform_0, window_bounds = array<i64: 1, 8, 128>}, {transform_indices = @transform_1, window_bounds = array<i64: 1, 1, 8>}, {transform_indices = @transform_2, window_bounds = array<i64: 1, 24, 128>}, {pipeline_mode = #tpu.pipeline_mode<synchronous>, transform_indices = @transform_3, window_bounds = array<i64: 1, 128>}, {pipeline_mode = #tpu.pipeline_mode<synchronous>, transform_indices = @transform_4, window_bounds = array<i64: 1, 128>}, {transform_indices = @transform_5, window_bounds = array<i64: 1, 1, 128>}, {transform_indices = @transform_6, window_bounds = array<i64: 1, 1, 128>}, {transform_indices = @transform_7, window_bounds = array<i64: 1, 128, 384>}, {transform_indices = @transform_8, window_bounds = array<i64: 1, 1, 384>}, {transform_indices = @transform_9, window_bounds = array<i64: 1, 128, 128>}, {transform_indices = @transform_10, window_bounds = array<i64: 1, 1, 128>}, {transform_indices = @transform_11, window_bounds = array<i64: 1, 1, 128>}, {transform_indices = @transform_12, window_bounds = array<i64: 1, 1, 128>}, {transform_indices = @transform_13, window_bounds = array<i64: 1, 128, 128>}, {transform_indices = @transform_14, window_bounds = array<i64: 1, 1, 128>}, {transform_indices = @transform_15, window_bounds = array<i64: 1, 128, 256>}, {transform_indices = @transform_16, window_bounds = array<i64: 1, 1, 256>}, {transform_indices = @transform_17, window_bounds = array<i64: 1, 128, 128>}, {transform_indices = @transform_18, window_bounds = array<i64: 1, 1, 128>}, {transform_indices = @transform_19, window_bounds = array<i64: 1, 1, 128>}, {transform_indices = @transform_20, window_bounds = array<i64: 1, 1, 128>}, {transform_indices = @transform_21, window_bounds = array<i64: 1, 128, 256>}, {transform_indices = @transform_22, window_bounds = array<i64: 1, 1, 256>}, {transform_indices = @transform_23, window_bounds = array<i64: 1, 256, 128>}, {transform_indices = @transform_24, window_bounds = array<i64: 1, 1, 128>}, {transform_indices = @transform_25, window_bounds = array<i64: 1, 8, 128>}]} {
    %c0 = arith.constant 0 : index
    %c0_0 = arith.constant 0 : index
    %c0_1 = arith.constant 0 : index
    %0 = vector.load %arg3[%c0, %c0_0, %c0_1] : memref<1x1x8xf32, #tpu.memory_space<vmem>>, vector<1x1x8xf32>
    %1 = vector.shape_cast %0 : vector<1x1x8xf32> to vector<1x8xf32>
    %cst = arith.constant 1.000000e+00 : f32
    %2 = vector.broadcast %cst : f32 to vector<1x8xf32>
    %3 = arith.subf %1, %2 : vector<1x8xf32>
    %cst_2 = arith.constant 1.000000e+09 : f32
    %4 = vector.broadcast %cst_2 : f32 to vector<1x8xf32>
    %5 = arith.mulf %3, %4 : vector<1x8xf32>
    %6 = tpu.iota {dimensions = array<i32: 1>} : vector<1x24xi32>
    %c17_i32 = arith.constant 17 : i32
    %7 = vector.broadcast %c17_i32 : i32 to vector<1x24xi32>
    %8 = arith.cmpi slt, %6, %7 : vector<1x24xi32>
    %cst_3 = arith.constant 0.000000e+00 : f32
    %cst_4 = arith.constant -1.000000e+09 : f32
    %9 = vector.broadcast %cst_3 : f32 to vector<1x24xf32>
    %10 = vector.broadcast %cst_4 : f32 to vector<1x24xf32>
    %11 = arith.select %8, %9, %10 : vector<1x24xi1>, vector<1x24xf32>
    %c0_i32 = arith.constant 0 : i32
    %12 = arith.cmpi eq, %arg1, %c0_i32 : i32
    %13 = arith.extui %12 : i1 to i32
    %c0_i32_5 = arith.constant 0 : i32
    %14 = arith.cmpi ne, %13, %c0_i32_5 : i32
    scf.if %14 {
      %c0_128 = arith.constant 0 : index
      %c0_129 = arith.constant 0 : index
      %c0_130 = arith.constant 0 : index
      %290 = vector.load %arg2[%c0_128, %c0_129, %c0_130] : memref<1x8x128xf32, #tpu.memory_space<vmem>>, vector<1x8x128xf32>
      %291 = vector.shape_cast %290 : vector<1x8x128xf32> to vector<8x128xf32>
      %c0_131 = arith.constant 0 : index
      %c0_132 = arith.constant 0 : index
      %292 = vector.load %arg5[%c0_131, %c0_132] : memref<1x128xf32, #tpu.memory_space<vmem>>, vector<1x128xf32>
      %c0_133 = arith.constant 0 : index
      %c0_134 = arith.constant 0 : index
      %293 = vector.load %arg6[%c0_133, %c0_134] : memref<1x128xf32, #tpu.memory_space<vmem>>, vector<1x128xf32>
      %cst_135 = arith.constant dense<0.000000e+00> : vector<8xf32>
      %294 = vector.multi_reduction <add>, %291, %cst_135 [1] : vector<8x128xf32> to vector<8xf32>
      %295 = vector.shape_cast %294 : vector<8xf32> to vector<8x1xf32>
      %cst_136 = arith.constant 1.280000e+02 : f32
      %296 = vector.broadcast %cst_136 : f32 to vector<8x1xf32>
      %297 = arith.divf %295, %296 : vector<8x1xf32>
      %298 = vector.broadcast %297 : vector<8x1xf32> to vector<8x128xf32>
      %299 = arith.subf %291, %298 : vector<8x128xf32>
      %300 = arith.mulf %299, %299 : vector<8x128xf32>
      %cst_137 = arith.constant dense<0.000000e+00> : vector<8xf32>
      %301 = vector.multi_reduction <add>, %300, %cst_137 [1] : vector<8x128xf32> to vector<8xf32>
      %302 = vector.shape_cast %301 : vector<8xf32> to vector<8x1xf32>
      %cst_138 = arith.constant 1.280000e+02 : f32
      %303 = vector.broadcast %cst_138 : f32 to vector<8x1xf32>
      %304 = arith.divf %302, %303 : vector<8x1xf32>
      %305 = vector.broadcast %297 : vector<8x1xf32> to vector<8x128xf32>
      %306 = arith.subf %291, %305 : vector<8x128xf32>
      %cst_139 = arith.constant 9.99999996E-13 : f32
      %307 = vector.broadcast %cst_139 : f32 to vector<8x1xf32>
      %308 = arith.addf %304, %307 : vector<8x1xf32>
      %309 = math.rsqrt %308 : vector<8x1xf32>
      %310 = vector.broadcast %309 : vector<8x1xf32> to vector<8x128xf32>
      %311 = arith.mulf %306, %310 : vector<8x128xf32>
      %312 = vector.broadcast %292 : vector<1x128xf32> to vector<8x128xf32>
      %313 = arith.mulf %311, %312 : vector<8x128xf32>
      %314 = vector.broadcast %293 : vector<1x128xf32> to vector<8x128xf32>
      %315 = arith.addf %313, %314 : vector<8x128xf32>
      %c0_140 = arith.constant 0 : index
      %c0_141 = arith.constant 0 : index
      %316 = vector.load %arg28[%c0_140, %c0_141] : memref<8x128xf32, #tpu.memory_space<vmem>>, vector<8x128xf32>
      tpu.vector_store %arg28[%c0_140, %c0_141], %315 {strides = array<i32>} : memref<8x128xf32, #tpu.memory_space<vmem>>, vector<8x128xf32>,
    } else {
    }
    %c0_6 = arith.constant 0 : index
    %c0_7 = arith.constant 0 : index
    %15 = vector.load %arg28[%c0_6, %c0_7] : memref<8x128xf32, #tpu.memory_space<vmem>>, vector<8x128xf32>
    %c0_8 = arith.constant 0 : index
    %c0_9 = arith.constant 0 : index
    %c0_10 = arith.constant 0 : index
    %16 = vector.load %arg4[%c0_8, %c0_9, %c0_10] : memref<1x24x128xbf16, #tpu.memory_space<vmem>>, vector<1x24x128xbf16>
    %17 = vector.shape_cast %16 : vector<1x24x128xbf16> to vector<24x128xbf16>
    %18 = arith.extf %17 : vector<24x128xbf16> to vector<24x128xf32>
    %c0_11 = arith.constant 0 : index
    %c0_12 = arith.constant 0 : index
    %c0_13 = arith.constant 0 : index
    %19 = vector.load %arg9[%c0_11, %c0_12, %c0_13] : memref<1x128x384xbf16, #tpu.memory_space<vmem>>, vector<1x128x384xbf16>
    %20 = vector.shape_cast %19 : vector<1x128x384xbf16> to vector<128x384xbf16>
    %c0_14 = arith.constant 0 : index
    %c0_15 = arith.constant 0 : index
    %c0_16 = arith.constant 0 : index
    %21 = vector.load %arg10[%c0_14, %c0_15, %c0_16] : memref<1x1x384xf32, #tpu.memory_space<vmem>>, vector<1x1x384xf32>
    %22 = vector.shape_cast %21 : vector<1x1x384xf32> to vector<1x384xf32>
    %c0_17 = arith.constant 0 : index
    %c0_18 = arith.constant 0 : index
    %c0_19 = arith.constant 0 : index
    %23 = vector.load %arg11[%c0_17, %c0_18, %c0_19] : memref<1x128x128xbf16, #tpu.memory_space<vmem>>, vector<1x128x128xbf16>
    %24 = vector.shape_cast %23 : vector<1x128x128xbf16> to vector<128x128xbf16>
    %c0_20 = arith.constant 0 : index
    %c0_21 = arith.constant 0 : index
    %c0_22 = arith.constant 0 : index
    %25 = vector.load %arg12[%c0_20, %c0_21, %c0_22] : memref<1x1x128xf32, #tpu.memory_space<vmem>>, vector<1x1x128xf32>
    %26 = vector.shape_cast %25 : vector<1x1x128xf32> to vector<1x128xf32>
    %27 = arith.truncf %15 : vector<8x128xf32> to vector<8x128xbf16>
    %cst_23 = arith.constant dense<0.000000e+00> : vector<8x384xf32>
    %28 = tpu.matmul %27, %20, %cst_23 {dimension_numbers = #tpu.dot_dimension_numbers<[1], [0], [0], [1], [0, 0, 1, 1], [], []>} : vector<8x128xbf16>, vector<128x384xbf16>, vector<8x384xf32> -> vector<8x384xf32>
    %29 = vector.broadcast %22 : vector<1x384xf32> to vector<8x384xf32>
    %30 = arith.addf %28, %29 : vector<8x384xf32>
    %31 = vector.extract_strided_slice %30 {offsets = [0, 0], sizes = [8, 128], strides = [1, 1]} : vector<8x384xf32> to vector<8x128xf32>
    %32 = vector.extract_strided_slice %30 {offsets = [0, 128], sizes = [8, 128], strides = [1, 1]} : vector<8x384xf32> to vector<8x128xf32>
    %33 = vector.extract_strided_slice %30 {offsets = [0, 256], sizes = [8, 128], strides = [1, 1]} : vector<8x384xf32> to vector<8x128xf32>
    %cst_24 = arith.constant 0.176776692 : f32
    %34 = vector.broadcast %cst_24 : f32 to vector<8x128xf32>
    %35 = arith.mulf %31, %34 : vector<8x128xf32>
    %36 = arith.truncf %35 : vector<8x128xf32> to vector<8x128xbf16>
    %37 = arith.truncf %32 : vector<8x128xf32> to vector<8x128xbf16>
    %38 = vector.extract_strided_slice %36 {offsets = [0, 0], sizes = [8, 32], strides = [1, 1]} : vector<8x128xbf16> to vector<8x32xbf16>
    %39 = vector.extract_strided_slice %37 {offsets = [0, 0], sizes = [8, 32], strides = [1, 1]} : vector<8x128xbf16> to vector<8x32xbf16>
    %cst_25 = arith.constant dense<0.000000e+00> : vector<8x8xf32>
    %40 = tpu.matmul %38, %39, %cst_25 {dimension_numbers = #tpu.dot_dimension_numbers<[1], [1], [0], [0], [0, 0, 1, 0], [], []>} : vector<8x32xbf16>, vector<8x32xbf16>, vector<8x8xf32> -> vector<8x8xf32>
    %41 = vector.extract_strided_slice %36 {offsets = [0, 32], sizes = [8, 32], strides = [1, 1]} : vector<8x128xbf16> to vector<8x32xbf16>
    %42 = vector.extract_strided_slice %37 {offsets = [0, 32], sizes = [8, 32], strides = [1, 1]} : vector<8x128xbf16> to vector<8x32xbf16>
    %cst_26 = arith.constant dense<0.000000e+00> : vector<8x8xf32>
    %43 = tpu.matmul %41, %42, %cst_26 {dimension_numbers = #tpu.dot_dimension_numbers<[1], [1], [0], [0], [0, 0, 1, 0], [], []>} : vector<8x32xbf16>, vector<8x32xbf16>, vector<8x8xf32> -> vector<8x8xf32>
    %44 = vector.extract_strided_slice %36 {offsets = [0, 64], sizes = [8, 32], strides = [1, 1]} : vector<8x128xbf16> to vector<8x32xbf16>
    %45 = vector.extract_strided_slice %37 {offsets = [0, 64], sizes = [8, 32], strides = [1, 1]} : vector<8x128xbf16> to vector<8x32xbf16>
    %cst_27 = arith.constant dense<0.000000e+00> : vector<8x8xf32>
    %46 = tpu.matmul %44, %45, %cst_27 {dimension_numbers = #tpu.dot_dimension_numbers<[1], [1], [0], [0], [0, 0, 1, 0], [], []>} : vector<8x32xbf16>, vector<8x32xbf16>, vector<8x8xf32> -> vector<8x8xf32>
    %47 = vector.extract_strided_slice %36 {offsets = [0, 96], sizes = [8, 32], strides = [1, 1]} : vector<8x128xbf16> to vector<8x32xbf16>
    %48 = vector.extract_strided_slice %37 {offsets = [0, 96], sizes = [8, 32], strides = [1, 1]} : vector<8x128xbf16> to vector<8x32xbf16>
    %cst_28 = arith.constant dense<0.000000e+00> : vector<8x8xf32>
    %49 = tpu.matmul %47, %48, %cst_28 {dimension_numbers = #tpu.dot_dimension_numbers<[1], [1], [0], [0], [0, 0, 1, 0], [], []>} : vector<8x32xbf16>, vector<8x32xbf16>, vector<8x8xf32> -> vector<8x8xf32>
    %50 = tpu.concatenate %40, %43, %46, %49 in 0 : vector<8x8xf32>, vector<8x8xf32>, vector<8x8xf32>, vector<8x8xf32> -> vector<32x8xf32>
    %51 = vector.broadcast %5 : vector<1x8xf32> to vector<32x8xf32>
    %52 = arith.addf %50, %51 : vector<32x8xf32>
    %cst_29 = arith.constant dense<0xFF800000> : vector<32xf32>
    %53 = vector.multi_reduction <maximumf>, %52, %cst_29 [1] : vector<32x8xf32> to vector<32xf32>
    %54 = vector.shape_cast %53 : vector<32xf32> to vector<32x1xf32>
    %55 = vector.broadcast %54 : vector<32x1xf32> to vector<32x8xf32>
    %56 = arith.subf %52, %55 : vector<32x8xf32>
    %57 = math.exp %56 : vector<32x8xf32>
    %cst_30 = arith.constant dense<0.000000e+00> : vector<32xf32>
    %58 = vector.multi_reduction <add>, %57, %cst_30 [1] : vector<32x8xf32> to vector<32xf32>
    %59 = vector.shape_cast %58 : vector<32xf32> to vector<32x1xf32>
    %60 = tpu.reciprocal %59 {approx = true} : vector<32x1xf32> -> vector<32x1xf32>
    %61 = vector.broadcast %60 : vector<32x1xf32> to vector<32x8xf32>
    %62 = arith.mulf %57, %61 : vector<32x8xf32>
    %63 = arith.truncf %62 : vector<32x8xf32> to vector<32x8xbf16>
    %64 = arith.truncf %33 : vector<8x128xf32> to vector<8x128xbf16>
    %65 = vector.extract_strided_slice %63 {offsets = [0, 0], sizes = [8, 8], strides = [1, 1]} : vector<32x8xbf16> to vector<8x8xbf16>
    %66 = vector.extract_strided_slice %64 {offsets = [0, 0], sizes = [8, 32], strides = [1, 1]} : vector<8x128xbf16> to vector<8x32xbf16>
    %cst_31 = arith.constant dense<0.000000e+00> : vector<8x32xf32>
    %67 = tpu.matmul %65, %66, %cst_31 {dimension_numbers = #tpu.dot_dimension_numbers<[1], [0], [0], [1], [0, 0, 1, 1], [], []>} : vector<8x8xbf16>, vector<8x32xbf16>, vector<8x32xf32> -> vector<8x32xf32>
    %68 = arith.truncf %67 : vector<8x32xf32> to vector<8x32xbf16>
    %69 = vector.extract_strided_slice %24 {offsets = [0, 0], sizes = [32, 128], strides = [1, 1]} : vector<128x128xbf16> to vector<32x128xbf16>
    %cst_32 = arith.constant dense<0.000000e+00> : vector<8x128xf32>
    %70 = tpu.matmul %68, %69, %cst_32 {dimension_numbers = #tpu.dot_dimension_numbers<[1], [0], [0], [1], [0, 0, 1, 1], [], []>} : vector<8x32xbf16>, vector<32x128xbf16>, vector<8x128xf32> -> vector<8x128xf32>
    %71 = vector.broadcast %26 : vector<1x128xf32> to vector<8x128xf32>
    %72 = arith.addf %71, %70 : vector<8x128xf32>
    %73 = vector.extract_strided_slice %63 {offsets = [8, 0], sizes = [8, 8], strides = [1, 1]} : vector<32x8xbf16> to vector<8x8xbf16>
    %74 = vector.extract_strided_slice %64 {offsets = [0, 32], sizes = [8, 32], strides = [1, 1]} : vector<8x128xbf16> to vector<8x32xbf16>
    %cst_33 = arith.constant dense<0.000000e+00> : vector<8x32xf32>
    %75 = tpu.matmul %73, %74, %cst_33 {dimension_numbers = #tpu.dot_dimension_numbers<[1], [0], [0], [1], [0, 0, 1, 1], [], []>} : vector<8x8xbf16>, vector<8x32xbf16>, vector<8x32xf32> -> vector<8x32xf32>
    %76 = arith.truncf %75 : vector<8x32xf32> to vector<8x32xbf16>
    %77 = vector.extract_strided_slice %24 {offsets = [32, 0], sizes = [32, 128], strides = [1, 1]} : vector<128x128xbf16> to vector<32x128xbf16>
    %cst_34 = arith.constant dense<0.000000e+00> : vector<8x128xf32>
    %78 = tpu.matmul %76, %77, %cst_34 {dimension_numbers = #tpu.dot_dimension_numbers<[1], [0], [0], [1], [0, 0, 1, 1], [], []>} : vector<8x32xbf16>, vector<32x128xbf16>, vector<8x128xf32> -> vector<8x128xf32>
    %79 = arith.addf %72, %78 : vector<8x128xf32>
    %80 = vector.extract_strided_slice %63 {offsets = [16, 0], sizes = [8, 8], strides = [1, 1]} : vector<32x8xbf16> to vector<8x8xbf16>
    %81 = vector.extract_strided_slice %64 {offsets = [0, 64], sizes = [8, 32], strides = [1, 1]} : vector<8x128xbf16> to vector<8x32xbf16>
    %cst_35 = arith.constant dense<0.000000e+00> : vector<8x32xf32>
    %82 = tpu.matmul %80, %81, %cst_35 {dimension_numbers = #tpu.dot_dimension_numbers<[1], [0], [0], [1], [0, 0, 1, 1], [], []>} : vector<8x8xbf16>, vector<8x32xbf16>, vector<8x32xf32> -> vector<8x32xf32>
    %83 = arith.truncf %82 : vector<8x32xf32> to vector<8x32xbf16>
    %84 = vector.extract_strided_slice %24 {offsets = [64, 0], sizes = [32, 128], strides = [1, 1]} : vector<128x128xbf16> to vector<32x128xbf16>
    %cst_36 = arith.constant dense<0.000000e+00> : vector<8x128xf32>
    %85 = tpu.matmul %83, %84, %cst_36 {dimension_numbers = #tpu.dot_dimension_numbers<[1], [0], [0], [1], [0, 0, 1, 1], [], []>} : vector<8x32xbf16>, vector<32x128xbf16>, vector<8x128xf32> -> vector<8x128xf32>
    %86 = arith.addf %79, %85 : vector<8x128xf32>
    %87 = vector.extract_strided_slice %63 {offsets = [24, 0], sizes = [8, 8], strides = [1, 1]} : vector<32x8xbf16> to vector<8x8xbf16>
    %88 = vector.extract_strided_slice %64 {offsets = [0, 96], sizes = [8, 32], strides = [1, 1]} : vector<8x128xbf16> to vector<8x32xbf16>
    %cst_37 = arith.constant dense<0.000000e+00> : vector<8x32xf32>
    %89 = tpu.matmul %87, %88, %cst_37 {dimension_numbers = #tpu.dot_dimension_numbers<[1], [0], [0], [1], [0, 0, 1, 1], [], []>} : vector<8x8xbf16>, vector<8x32xbf16>, vector<8x32xf32> -> vector<8x32xf32>
    %90 = arith.truncf %89 : vector<8x32xf32> to vector<8x32xbf16>
    %91 = vector.extract_strided_slice %24 {offsets = [96, 0], sizes = [32, 128], strides = [1, 1]} : vector<128x128xbf16> to vector<32x128xbf16>
    %cst_38 = arith.constant dense<0.000000e+00> : vector<8x128xf32>
    %92 = tpu.matmul %90, %91, %cst_38 {dimension_numbers = #tpu.dot_dimension_numbers<[1], [0], [0], [1], [0, 0, 1, 1], [], []>} : vector<8x32xbf16>, vector<32x128xbf16>, vector<8x128xf32> -> vector<8x128xf32>
    %93 = arith.addf %86, %92 : vector<8x128xf32>
    %94 = arith.addf %15, %93 : vector<8x128xf32>
    %c0_39 = arith.constant 0 : index
    %c0_40 = arith.constant 0 : index
    %c0_41 = arith.constant 0 : index
    %95 = vector.load %arg7[%c0_39, %c0_40, %c0_41] : memref<1x1x128xf32, #tpu.memory_space<vmem>>, vector<1x1x128xf32>
    %96 = vector.shape_cast %95 : vector<1x1x128xf32> to vector<1x128xf32>
    %c0_42 = arith.constant 0 : index
    %c0_43 = arith.constant 0 : index
    %c0_44 = arith.constant 0 : index
    %97 = vector.load %arg8[%c0_42, %c0_43, %c0_44] : memref<1x1x128xf32, #tpu.memory_space<vmem>>, vector<1x1x128xf32>
    %98 = vector.shape_cast %97 : vector<1x1x128xf32> to vector<1x128xf32>
    %cst_45 = arith.constant dense<0.000000e+00> : vector<8xf32>
    %99 = vector.multi_reduction <add>, %94, %cst_45 [1] : vector<8x128xf32> to vector<8xf32>
    %100 = vector.shape_cast %99 : vector<8xf32> to vector<8x1xf32>
    %cst_46 = arith.constant 1.280000e+02 : f32
    %101 = vector.broadcast %cst_46 : f32 to vector<8x1xf32>
    %102 = arith.divf %100, %101 : vector<8x1xf32>
    %103 = vector.broadcast %102 : vector<8x1xf32> to vector<8x128xf32>
    %104 = arith.subf %94, %103 : vector<8x128xf32>
    %105 = arith.mulf %104, %104 : vector<8x128xf32>
    %cst_47 = arith.constant dense<0.000000e+00> : vector<8xf32>
    %106 = vector.multi_reduction <add>, %105, %cst_47 [1] : vector<8x128xf32> to vector<8xf32>
    %107 = vector.shape_cast %106 : vector<8xf32> to vector<8x1xf32>
    %cst_48 = arith.constant 1.280000e+02 : f32
    %108 = vector.broadcast %cst_48 : f32 to vector<8x1xf32>
    %109 = arith.divf %107, %108 : vector<8x1xf32>
    %110 = vector.broadcast %102 : vector<8x1xf32> to vector<8x128xf32>
    %111 = arith.subf %94, %110 : vector<8x128xf32>
    %cst_49 = arith.constant 9.99999996E-13 : f32
    %112 = vector.broadcast %cst_49 : f32 to vector<8x1xf32>
    %113 = arith.addf %109, %112 : vector<8x1xf32>
    %114 = math.rsqrt %113 : vector<8x1xf32>
    %115 = vector.broadcast %114 : vector<8x1xf32> to vector<8x128xf32>
    %116 = arith.mulf %111, %115 : vector<8x128xf32>
    %117 = vector.broadcast %96 : vector<1x128xf32> to vector<8x128xf32>
    %118 = arith.mulf %116, %117 : vector<8x128xf32>
    %119 = vector.broadcast %98 : vector<1x128xf32> to vector<8x128xf32>
    %120 = arith.addf %118, %119 : vector<8x128xf32>
    %c0_50 = arith.constant 0 : index
    %c0_51 = arith.constant 0 : index
    %c0_52 = arith.constant 0 : index
    %121 = vector.load %arg15[%c0_50, %c0_51, %c0_52] : memref<1x128x128xbf16, #tpu.memory_space<vmem>>, vector<1x128x128xbf16>
    %122 = vector.shape_cast %121 : vector<1x128x128xbf16> to vector<128x128xbf16>
    %c0_53 = arith.constant 0 : index
    %c0_54 = arith.constant 0 : index
    %c0_55 = arith.constant 0 : index
    %123 = vector.load %arg16[%c0_53, %c0_54, %c0_55] : memref<1x1x128xf32, #tpu.memory_space<vmem>>, vector<1x1x128xf32>
    %124 = vector.shape_cast %123 : vector<1x1x128xf32> to vector<1x128xf32>
    %c0_56 = arith.constant 0 : index
    %c0_57 = arith.constant 0 : index
    %c0_58 = arith.constant 0 : index
    %125 = vector.load %arg17[%c0_56, %c0_57, %c0_58] : memref<1x128x256xbf16, #tpu.memory_space<vmem>>, vector<1x128x256xbf16>
    %126 = vector.shape_cast %125 : vector<1x128x256xbf16> to vector<128x256xbf16>
    %c0_59 = arith.constant 0 : index
    %c0_60 = arith.constant 0 : index
    %c0_61 = arith.constant 0 : index
    %127 = vector.load %arg18[%c0_59, %c0_60, %c0_61] : memref<1x1x256xf32, #tpu.memory_space<vmem>>, vector<1x1x256xf32>
    %128 = vector.shape_cast %127 : vector<1x1x256xf32> to vector<1x256xf32>
    %c0_62 = arith.constant 0 : index
    %c0_63 = arith.constant 0 : index
    %c0_64 = arith.constant 0 : index
    %129 = vector.load %arg19[%c0_62, %c0_63, %c0_64] : memref<1x128x128xbf16, #tpu.memory_space<vmem>>, vector<1x128x128xbf16>
    %130 = vector.shape_cast %129 : vector<1x128x128xbf16> to vector<128x128xbf16>
    %c0_65 = arith.constant 0 : index
    %c0_66 = arith.constant 0 : index
    %c0_67 = arith.constant 0 : index
    %131 = vector.load %arg20[%c0_65, %c0_66, %c0_67] : memref<1x1x128xf32, #tpu.memory_space<vmem>>, vector<1x1x128xf32>
    %132 = vector.shape_cast %131 : vector<1x1x128xf32> to vector<1x128xf32>
    %133 = arith.truncf %120 : vector<8x128xf32> to vector<8x128xbf16>
    %cst_68 = arith.constant dense<0.000000e+00> : vector<8x128xf32>
    %134 = tpu.matmul %133, %122, %cst_68 {dimension_numbers = #tpu.dot_dimension_numbers<[1], [0], [0], [1], [0, 0, 1, 1], [], []>} : vector<8x128xbf16>, vector<128x128xbf16>, vector<8x128xf32> -> vector<8x128xf32>
    %135 = vector.broadcast %124 : vector<1x128xf32> to vector<8x128xf32>
    %136 = arith.addf %134, %135 : vector<8x128xf32>
    %137 = arith.truncf %18 : vector<24x128xf32> to vector<24x128xbf16>
    %cst_69 = arith.constant dense<0.000000e+00> : vector<24x256xf32>
    %138 = tpu.matmul %137, %126, %cst_69 {dimension_numbers = #tpu.dot_dimension_numbers<[1], [0], [0], [1], [0, 0, 1, 1], [], []>} : vector<24x128xbf16>, vector<128x256xbf16>, vector<24x256xf32> -> vector<24x256xf32>
    %139 = vector.broadcast %128 : vector<1x256xf32> to vector<24x256xf32>
    %140 = arith.addf %138, %139 : vector<24x256xf32>
    %141 = vector.extract_strided_slice %140 {offsets = [0, 0], sizes = [24, 128], strides = [1, 1]} : vector<24x256xf32> to vector<24x128xf32>
    %142 = vector.extract_strided_slice %140 {offsets = [0, 128], sizes = [24, 128], strides = [1, 1]} : vector<24x256xf32> to vector<24x128xf32>
    %cst_70 = arith.constant 0.176776692 : f32
    %143 = vector.broadcast %cst_70 : f32 to vector<8x128xf32>
    %144 = arith.mulf %136, %143 : vector<8x128xf32>
    %145 = arith.truncf %144 : vector<8x128xf32> to vector<8x128xbf16>
    %146 = arith.truncf %141 : vector<24x128xf32> to vector<24x128xbf16>
    %147 = vector.extract_strided_slice %145 {offsets = [0, 0], sizes = [8, 32], strides = [1, 1]} : vector<8x128xbf16> to vector<8x32xbf16>
    %148 = vector.extract_strided_slice %146 {offsets = [0, 0], sizes = [24, 32], strides = [1, 1]} : vector<24x128xbf16> to vector<24x32xbf16>
    %cst_71 = arith.constant dense<0.000000e+00> : vector<8x24xf32>
    %149 = tpu.matmul %147, %148, %cst_71 {dimension_numbers = #tpu.dot_dimension_numbers<[1], [1], [0], [0], [0, 0, 1, 0], [], []>} : vector<8x32xbf16>, vector<24x32xbf16>, vector<8x24xf32> -> vector<8x24xf32>
    %150 = vector.extract_strided_slice %145 {offsets = [0, 32], sizes = [8, 32], strides = [1, 1]} : vector<8x128xbf16> to vector<8x32xbf16>
    %151 = vector.extract_strided_slice %146 {offsets = [0, 32], sizes = [24, 32], strides = [1, 1]} : vector<24x128xbf16> to vector<24x32xbf16>
    %cst_72 = arith.constant dense<0.000000e+00> : vector<8x24xf32>
    %152 = tpu.matmul %150, %151, %cst_72 {dimension_numbers = #tpu.dot_dimension_numbers<[1], [1], [0], [0], [0, 0, 1, 0], [], []>} : vector<8x32xbf16>, vector<24x32xbf16>, vector<8x24xf32> -> vector<8x24xf32>
    %153 = vector.extract_strided_slice %145 {offsets = [0, 64], sizes = [8, 32], strides = [1, 1]} : vector<8x128xbf16> to vector<8x32xbf16>
    %154 = vector.extract_strided_slice %146 {offsets = [0, 64], sizes = [24, 32], strides = [1, 1]} : vector<24x128xbf16> to vector<24x32xbf16>
    %cst_73 = arith.constant dense<0.000000e+00> : vector<8x24xf32>
    %155 = tpu.matmul %153, %154, %cst_73 {dimension_numbers = #tpu.dot_dimension_numbers<[1], [1], [0], [0], [0, 0, 1, 0], [], []>} : vector<8x32xbf16>, vector<24x32xbf16>, vector<8x24xf32> -> vector<8x24xf32>
    %156 = vector.extract_strided_slice %145 {offsets = [0, 96], sizes = [8, 32], strides = [1, 1]} : vector<8x128xbf16> to vector<8x32xbf16>
    %157 = vector.extract_strided_slice %146 {offsets = [0, 96], sizes = [24, 32], strides = [1, 1]} : vector<24x128xbf16> to vector<24x32xbf16>
    %cst_74 = arith.constant dense<0.000000e+00> : vector<8x24xf32>
    %158 = tpu.matmul %156, %157, %cst_74 {dimension_numbers = #tpu.dot_dimension_numbers<[1], [1], [0], [0], [0, 0, 1, 0], [], []>} : vector<8x32xbf16>, vector<24x32xbf16>, vector<8x24xf32> -> vector<8x24xf32>
    %159 = tpu.concatenate %149, %152, %155, %158 in 0 : vector<8x24xf32>, vector<8x24xf32>, vector<8x24xf32>, vector<8x24xf32> -> vector<32x24xf32>
    %160 = vector.broadcast %11 : vector<1x24xf32> to vector<32x24xf32>
    %161 = arith.addf %159, %160 : vector<32x24xf32>
    %cst_75 = arith.constant dense<0xFF800000> : vector<32xf32>
    %162 = vector.multi_reduction <maximumf>, %161, %cst_75 [1] : vector<32x24xf32> to vector<32xf32>
    %163 = vector.shape_cast %162 : vector<32xf32> to vector<32x1xf32>
    %164 = vector.broadcast %163 : vector<32x1xf32> to vector<32x24xf32>
    %165 = arith.subf %161, %164 : vector<32x24xf32>
    %166 = math.exp %165 : vector<32x24xf32>
    %cst_76 = arith.constant dense<0.000000e+00> : vector<32xf32>
    %167 = vector.multi_reduction <add>, %166, %cst_76 [1] : vector<32x24xf32> to vector<32xf32>
    %168 = vector.shape_cast %167 : vector<32xf32> to vector<32x1xf32>
    %169 = tpu.reciprocal %168 {approx = true} : vector<32x1xf32> -> vector<32x1xf32>
    %170 = vector.broadcast %169 : vector<32x1xf32> to vector<32x24xf32>
    %171 = arith.mulf %166, %170 : vector<32x24xf32>
    %172 = arith.truncf %171 : vector<32x24xf32> to vector<32x24xbf16>
    %173 = arith.truncf %142 : vector<24x128xf32> to vector<24x128xbf16>
    %174 = vector.extract_strided_slice %172 {offsets = [0, 0], sizes = [8, 24], strides = [1, 1]} : vector<32x24xbf16> to vector<8x24xbf16>
    %175 = vector.extract_strided_slice %173 {offsets = [0, 0], sizes = [24, 32], strides = [1, 1]} : vector<24x128xbf16> to vector<24x32xbf16>
    %cst_77 = arith.constant dense<0.000000e+00> : vector<8x32xf32>
    %176 = tpu.matmul %174, %175, %cst_77 {dimension_numbers = #tpu.dot_dimension_numbers<[1], [0], [0], [1], [0, 0, 1, 1], [], []>} : vector<8x24xbf16>, vector<24x32xbf16>, vector<8x32xf32> -> vector<8x32xf32>
    %177 = arith.truncf %176 : vector<8x32xf32> to vector<8x32xbf16>
    %178 = vector.extract_strided_slice %130 {offsets = [0, 0], sizes = [32, 128], strides = [1, 1]} : vector<128x128xbf16> to vector<32x128xbf16>
    %cst_78 = arith.constant dense<0.000000e+00> : vector<8x128xf32>
    %179 = tpu.matmul %177, %178, %cst_78 {dimension_numbers = #tpu.dot_dimension_numbers<[1], [0], [0], [1], [0, 0, 1, 1], [], []>} : vector<8x32xbf16>, vector<32x128xbf16>, vector<8x128xf32> -> vector<8x128xf32>
    %180 = vector.broadcast %132 : vector<1x128xf32> to vector<8x128xf32>
    %181 = arith.addf %180, %179 : vector<8x128xf32>
    %182 = vector.extract_strided_slice %172 {offsets = [8, 0], sizes = [8, 24], strides = [1, 1]} : vector<32x24xbf16> to vector<8x24xbf16>
    %183 = vector.extract_strided_slice %173 {offsets = [0, 32], sizes = [24, 32], strides = [1, 1]} : vector<24x128xbf16> to vector<24x32xbf16>
    %cst_79 = arith.constant dense<0.000000e+00> : vector<8x32xf32>
    %184 = tpu.matmul %182, %183, %cst_79 {dimension_numbers = #tpu.dot_dimension_numbers<[1], [0], [0], [1], [0, 0, 1, 1], [], []>} : vector<8x24xbf16>, vector<24x32xbf16>, vector<8x32xf32> -> vector<8x32xf32>
    %185 = arith.truncf %184 : vector<8x32xf32> to vector<8x32xbf16>
    %186 = vector.extract_strided_slice %130 {offsets = [32, 0], sizes = [32, 128], strides = [1, 1]} : vector<128x128xbf16> to vector<32x128xbf16>
    %cst_80 = arith.constant dense<0.000000e+00> : vector<8x128xf32>
    %187 = tpu.matmul %185, %186, %cst_80 {dimension_numbers = #tpu.dot_dimension_numbers<[1], [0], [0], [1], [0, 0, 1, 1], [], []>} : vector<8x32xbf16>, vector<32x128xbf16>, vector<8x128xf32> -> vector<8x128xf32>
    %188 = arith.addf %181, %187 : vector<8x128xf32>
    %189 = vector.extract_strided_slice %172 {offsets = [16, 0], sizes = [8, 24], strides = [1, 1]} : vector<32x24xbf16> to vector<8x24xbf16>
    %190 = vector.extract_strided_slice %173 {offsets = [0, 64], sizes = [24, 32], strides = [1, 1]} : vector<24x128xbf16> to vector<24x32xbf16>
    %cst_81 = arith.constant dense<0.000000e+00> : vector<8x32xf32>
    %191 = tpu.matmul %189, %190, %cst_81 {dimension_numbers = #tpu.dot_dimension_numbers<[1], [0], [0], [1], [0, 0, 1, 1], [], []>} : vector<8x24xbf16>, vector<24x32xbf16>, vector<8x32xf32> -> vector<8x32xf32>
    %192 = arith.truncf %191 : vector<8x32xf32> to vector<8x32xbf16>
    %193 = vector.extract_strided_slice %130 {offsets = [64, 0], sizes = [32, 128], strides = [1, 1]} : vector<128x128xbf16> to vector<32x128xbf16>
    %cst_82 = arith.constant dense<0.000000e+00> : vector<8x128xf32>
    %194 = tpu.matmul %192, %193, %cst_82 {dimension_numbers = #tpu.dot_dimension_numbers<[1], [0], [0], [1], [0, 0, 1, 1], [], []>} : vector<8x32xbf16>, vector<32x128xbf16>, vector<8x128xf32> -> vector<8x128xf32>
    %195 = arith.addf %188, %194 : vector<8x128xf32>
    %196 = vector.extract_strided_slice %172 {offsets = [24, 0], sizes = [8, 24], strides = [1, 1]} : vector<32x24xbf16> to vector<8x24xbf16>
    %197 = vector.extract_strided_slice %173 {offsets = [0, 96], sizes = [24, 32], strides = [1, 1]} : vector<24x128xbf16> to vector<24x32xbf16>
    %cst_83 = arith.constant dense<0.000000e+00> : vector<8x32xf32>
    %198 = tpu.matmul %196, %197, %cst_83 {dimension_numbers = #tpu.dot_dimension_numbers<[1], [0], [0], [1], [0, 0, 1, 1], [], []>} : vector<8x24xbf16>, vector<24x32xbf16>, vector<8x32xf32> -> vector<8x32xf32>
    %199 = arith.truncf %198 : vector<8x32xf32> to vector<8x32xbf16>
    %200 = vector.extract_strided_slice %130 {offsets = [96, 0], sizes = [32, 128], strides = [1, 1]} : vector<128x128xbf16> to vector<32x128xbf16>
    %cst_84 = arith.constant dense<0.000000e+00> : vector<8x128xf32>
    %201 = tpu.matmul %199, %200, %cst_84 {dimension_numbers = #tpu.dot_dimension_numbers<[1], [0], [0], [1], [0, 0, 1, 1], [], []>} : vector<8x32xbf16>, vector<32x128xbf16>, vector<8x128xf32> -> vector<8x128xf32>
    %202 = arith.addf %195, %201 : vector<8x128xf32>
    %203 = arith.addf %120, %202 : vector<8x128xf32>
    %c0_85 = arith.constant 0 : index
    %c0_86 = arith.constant 0 : index
    %c0_87 = arith.constant 0 : index
    %204 = vector.load %arg13[%c0_85, %c0_86, %c0_87] : memref<1x1x128xf32, #tpu.memory_space<vmem>>, vector<1x1x128xf32>
    %205 = vector.shape_cast %204 : vector<1x1x128xf32> to vector<1x128xf32>
    %c0_88 = arith.constant 0 : index
    %c0_89 = arith.constant 0 : index
    %c0_90 = arith.constant 0 : index
    %206 = vector.load %arg14[%c0_88, %c0_89, %c0_90] : memref<1x1x128xf32, #tpu.memory_space<vmem>>, vector<1x1x128xf32>
    %207 = vector.shape_cast %206 : vector<1x1x128xf32> to vector<1x128xf32>
    %cst_91 = arith.constant dense<0.000000e+00> : vector<8xf32>
    %208 = vector.multi_reduction <add>, %203, %cst_91 [1] : vector<8x128xf32> to vector<8xf32>
    %209 = vector.shape_cast %208 : vector<8xf32> to vector<8x1xf32>
    %cst_92 = arith.constant 1.280000e+02 : f32
    %210 = vector.broadcast %cst_92 : f32 to vector<8x1xf32>
    %211 = arith.divf %209, %210 : vector<8x1xf32>
    %212 = vector.broadcast %211 : vector<8x1xf32> to vector<8x128xf32>
    %213 = arith.subf %203, %212 : vector<8x128xf32>
    %214 = arith.mulf %213, %213 : vector<8x128xf32>
    %cst_93 = arith.constant dense<0.000000e+00> : vector<8xf32>
    %215 = vector.multi_reduction <add>, %214, %cst_93 [1] : vector<8x128xf32> to vector<8xf32>
    %216 = vector.shape_cast %215 : vector<8xf32> to vector<8x1xf32>
    %cst_94 = arith.constant 1.280000e+02 : f32
    %217 = vector.broadcast %cst_94 : f32 to vector<8x1xf32>
    %218 = arith.divf %216, %217 : vector<8x1xf32>
    %219 = vector.broadcast %211 : vector<8x1xf32> to vector<8x128xf32>
    %220 = arith.subf %203, %219 : vector<8x128xf32>
    %cst_95 = arith.constant 9.99999996E-13 : f32
    %221 = vector.broadcast %cst_95 : f32 to vector<8x1xf32>
    %222 = arith.addf %218, %221 : vector<8x1xf32>
    %223 = math.rsqrt %222 : vector<8x1xf32>
    %224 = vector.broadcast %223 : vector<8x1xf32> to vector<8x128xf32>
    %225 = arith.mulf %220, %224 : vector<8x128xf32>
    %226 = vector.broadcast %205 : vector<1x128xf32> to vector<8x128xf32>
    %227 = arith.mulf %225, %226 : vector<8x128xf32>
    %228 = vector.broadcast %207 : vector<1x128xf32> to vector<8x128xf32>
    %229 = arith.addf %227, %228 : vector<8x128xf32>
    %c0_96 = arith.constant 0 : index
    %c0_97 = arith.constant 0 : index
    %c0_98 = arith.constant 0 : index
    %230 = vector.load %arg23[%c0_96, %c0_97, %c0_98] : memref<1x128x256xbf16, #tpu.memory_space<vmem>>, vector<1x128x256xbf16>
    %231 = vector.shape_cast %230 : vector<1x128x256xbf16> to vector<128x256xbf16>
    %c0_99 = arith.constant 0 : index
    %c0_100 = arith.constant 0 : index
    %c0_101 = arith.constant 0 : index
    %232 = vector.load %arg24[%c0_99, %c0_100, %c0_101] : memref<1x1x256xf32, #tpu.memory_space<vmem>>, vector<1x1x256xf32>
    %233 = vector.shape_cast %232 : vector<1x1x256xf32> to vector<1x256xf32>
    %c0_102 = arith.constant 0 : index
    %c0_103 = arith.constant 0 : index
    %c0_104 = arith.constant 0 : index
    %234 = vector.load %arg25[%c0_102, %c0_103, %c0_104] : memref<1x256x128xbf16, #tpu.memory_space<vmem>>, vector<1x256x128xbf16>
    %235 = vector.shape_cast %234 : vector<1x256x128xbf16> to vector<256x128xbf16>
    %c0_105 = arith.constant 0 : index
    %c0_106 = arith.constant 0 : index
    %c0_107 = arith.constant 0 : index
    %236 = vector.load %arg26[%c0_105, %c0_106, %c0_107] : memref<1x1x128xf32, #tpu.memory_space<vmem>>, vector<1x1x128xf32>
    %237 = vector.shape_cast %236 : vector<1x1x128xf32> to vector<1x128xf32>
    %238 = arith.truncf %229 : vector<8x128xf32> to vector<8x128xbf16>
    %cst_108 = arith.constant dense<0.000000e+00> : vector<8x256xf32>
    %239 = tpu.matmul %238, %231, %cst_108 {dimension_numbers = #tpu.dot_dimension_numbers<[1], [0], [0], [1], [0, 0, 1, 1], [], []>} : vector<8x128xbf16>, vector<128x256xbf16>, vector<8x256xf32> -> vector<8x256xf32>
    %240 = vector.broadcast %233 : vector<1x256xf32> to vector<8x256xf32>
    %241 = arith.addf %239, %240 : vector<8x256xf32>
    %cst_109 = arith.constant 5.000000e-01 : f32
    %242 = vector.broadcast %cst_109 : f32 to vector<8x256xf32>
    %243 = arith.mulf %242, %241 : vector<8x256xf32>
    %cst_110 = arith.constant 4.471500e-02 : f32
    %244 = vector.broadcast %cst_110 : f32 to vector<8x256xf32>
    %245 = arith.mulf %244, %241 : vector<8x256xf32>
    %246 = arith.mulf %245, %241 : vector<8x256xf32>
    %247 = arith.mulf %246, %241 : vector<8x256xf32>
    %248 = arith.addf %241, %247 : vector<8x256xf32>
    %cst_111 = arith.constant 0.797884583 : f32
    %249 = vector.broadcast %cst_111 : f32 to vector<8x256xf32>
    %250 = arith.mulf %249, %248 : vector<8x256xf32>
    %251 = math.tanh %250 : vector<8x256xf32>
    %cst_112 = arith.constant 1.000000e+00 : f32
    %252 = vector.broadcast %cst_112 : f32 to vector<8x256xf32>
    %253 = arith.addf %252, %251 : vector<8x256xf32>
    %254 = arith.mulf %243, %253 : vector<8x256xf32>
    %255 = arith.truncf %254 : vector<8x256xf32> to vector<8x256xbf16>
    %cst_113 = arith.constant dense<0.000000e+00> : vector<8x128xf32>
    %256 = tpu.matmul %255, %235, %cst_113 {dimension_numbers = #tpu.dot_dimension_numbers<[1], [0], [0], [1], [0, 0, 1, 1], [], []>} : vector<8x256xbf16>, vector<256x128xbf16>, vector<8x128xf32> -> vector<8x128xf32>
    %257 = vector.broadcast %237 : vector<1x128xf32> to vector<8x128xf32>
    %258 = arith.addf %256, %257 : vector<8x128xf32>
    %259 = arith.addf %229, %258 : vector<8x128xf32>
    %c0_114 = arith.constant 0 : index
    %c0_115 = arith.constant 0 : index
    %c0_116 = arith.constant 0 : index
    %260 = vector.load %arg21[%c0_114, %c0_115, %c0_116] : memref<1x1x128xf32, #tpu.memory_space<vmem>>, vector<1x1x128xf32>
    %261 = vector.shape_cast %260 : vector<1x1x128xf32> to vector<1x128xf32>
    %c0_117 = arith.constant 0 : index
    %c0_118 = arith.constant 0 : index
    %c0_119 = arith.constant 0 : index
    %262 = vector.load %arg22[%c0_117, %c0_118, %c0_119] : memref<1x1x128xf32, #tpu.memory_space<vmem>>, vector<1x1x128xf32>
    %263 = vector.shape_cast %262 : vector<1x1x128xf32> to vector<1x128xf32>
    %cst_120 = arith.constant dense<0.000000e+00> : vector<8xf32>
    %264 = vector.multi_reduction <add>, %259, %cst_120 [1] : vector<8x128xf32> to vector<8xf32>
    %265 = vector.shape_cast %264 : vector<8xf32> to vector<8x1xf32>
    %cst_121 = arith.constant 1.280000e+02 : f32
    %266 = vector.broadcast %cst_121 : f32 to vector<8x1xf32>
    %267 = arith.divf %265, %266 : vector<8x1xf32>
    %268 = vector.broadcast %267 : vector<8x1xf32> to vector<8x128xf32>
    %269 = arith.subf %259, %268 : vector<8x128xf32>
    %270 = arith.mulf %269, %269 : vector<8x128xf32>
    %cst_122 = arith.constant dense<0.000000e+00> : vector<8xf32>
    %271 = vector.multi_reduction <add>, %270, %cst_122 [1] : vector<8x128xf32> to vector<8xf32>
    %272 = vector.shape_cast %271 : vector<8xf32> to vector<8x1xf32>
    %cst_123 = arith.constant 1.280000e+02 : f32
    %273 = vector.broadcast %cst_123 : f32 to vector<8x1xf32>
    %274 = arith.divf %272, %273 : vector<8x1xf32>
    %275 = vector.broadcast %267 : vector<8x1xf32> to vector<8x128xf32>
    %276 = arith.subf %259, %275 : vector<8x128xf32>
    %cst_124 = arith.constant 9.99999996E-13 : f32
    %277 = vector.broadcast %cst_124 : f32 to vector<8x1xf32>
    %278 = arith.addf %274, %277 : vector<8x1xf32>
    %279 = math.rsqrt %278 : vector<8x1xf32>
    %280 = vector.broadcast %279 : vector<8x1xf32> to vector<8x128xf32>
    %281 = arith.mulf %276, %280 : vector<8x128xf32>
    %282 = vector.broadcast %261 : vector<1x128xf32> to vector<8x128xf32>
    %283 = arith.mulf %281, %282 : vector<8x128xf32>
    %284 = vector.broadcast %263 : vector<1x128xf32> to vector<8x128xf32>
    %285 = arith.addf %283, %284 : vector<8x128xf32>
    %c0_125 = arith.constant 0 : index
    %c0_126 = arith.constant 0 : index
    %286 = vector.load %arg28[%c0_125, %c0_126] : memref<8x128xf32, #tpu.memory_space<vmem>>, vector<8x128xf32>
    tpu.vector_store %arg28[%c0_125, %c0_126], %285 {strides = array<i32>} : memref<8x128xf32, #tpu.memory_space<vmem>>, vector<8x128xf32>,
    %c1_i32 = arith.constant 1 : i32
    %287 = arith.cmpi eq, %arg1, %c1_i32 : i32
    %288 = arith.extui %287 : i1 to i32
    %c0_i32_127 = arith.constant 0 : i32
    %289 = arith.cmpi ne, %288, %c0_i32_127 : i32
    scf.if %289 {
      %290 = arith.truncf %285 : vector<8x128xf32> to vector<8x128xbf16>
      %c0_128 = arith.constant 0 : index
      %c0_129 = arith.constant 0 : index
      %c0_130 = arith.constant 0 : index
      %291 = vector.load %arg27[%c0_128, %c0_129, %c0_130] : memref<1x8x128xbf16, #tpu.memory_space<vmem>>, vector<1x8x128xbf16>
      %292 = vector.shape_cast %291 : vector<1x8x128xbf16> to vector<8x128xbf16>
      %293 = vector.shape_cast %290 : vector<8x128xbf16> to vector<1x8x128xbf16>
      tpu.vector_store %arg27[%c0_128, %c0_129, %c0_130], %293 {strides = array<i32>} : memref<1x8x128xbf16, #tpu.memory_space<vmem>>, vector<1x8x128xbf16>,
    } else {
    }
    return
  }
  func.func @transform_0(%arg0: i32, %arg1: i32) -> (i32, i32, i32) {
    %c0_i32 = arith.constant 0 : i32
    %c0_i32_0 = arith.constant 0 : i32
    %c0_i32_1 = arith.constant 0 : i32
    return %arg0, %c0_i32, %c0_i32_0 : i32, i32, i32
  }
  func.func @transform_1(%arg0: i32, %arg1: i32) -> (i32, i32, i32) {
    %c0_i32 = arith.constant 0 : i32
    %c0_i32_0 = arith.constant 0 : i32
    %c0_i32_1 = arith.constant 0 : i32
    return %arg0, %c0_i32, %c0_i32_0 : i32, i32, i32
  }
  func.func @transform_2(%arg0: i32, %arg1: i32) -> (i32, i32, i32) {
    %c0_i32 = arith.constant 0 : i32
    %c0_i32_0 = arith.constant 0 : i32
    %c0_i32_1 = arith.constant 0 : i32
    return %arg0, %c0_i32, %c0_i32_0 : i32, i32, i32
  }
  func.func @transform_3(%arg0: i32, %arg1: i32) -> (i32, i32) {
    %c0_i32 = arith.constant 0 : i32
    %c0_i32_0 = arith.constant 0 : i32
    %c0_i32_1 = arith.constant 0 : i32
    return %c0_i32, %c0_i32_0 : i32, i32
  }
  func.func @transform_4(%arg0: i32, %arg1: i32) -> (i32, i32) {
    %c0_i32 = arith.constant 0 : i32
    %c0_i32_0 = arith.constant 0 : i32
    %c0_i32_1 = arith.constant 0 : i32
    return %c0_i32, %c0_i32_0 : i32, i32
  }
  func.func @transform_5(%arg0: i32, %arg1: i32) -> (i32, i32, i32) {
    %c0_i32 = arith.constant 0 : i32
    %c0_i32_0 = arith.constant 0 : i32
    %c0_i32_1 = arith.constant 0 : i32
    return %arg1, %c0_i32, %c0_i32_0 : i32, i32, i32
  }
  func.func @transform_6(%arg0: i32, %arg1: i32) -> (i32, i32, i32) {
    %c0_i32 = arith.constant 0 : i32
    %c0_i32_0 = arith.constant 0 : i32
    %c0_i32_1 = arith.constant 0 : i32
    return %arg1, %c0_i32, %c0_i32_0 : i32, i32, i32
  }
  func.func @transform_7(%arg0: i32, %arg1: i32) -> (i32, i32, i32) {
    %c0_i32 = arith.constant 0 : i32
    %c0_i32_0 = arith.constant 0 : i32
    %c0_i32_1 = arith.constant 0 : i32
    return %arg1, %c0_i32, %c0_i32_0 : i32, i32, i32
  }
  func.func @transform_8(%arg0: i32, %arg1: i32) -> (i32, i32, i32) {
    %c0_i32 = arith.constant 0 : i32
    %c0_i32_0 = arith.constant 0 : i32
    %c0_i32_1 = arith.constant 0 : i32
    return %arg1, %c0_i32, %c0_i32_0 : i32, i32, i32
  }
  func.func @transform_9(%arg0: i32, %arg1: i32) -> (i32, i32, i32) {
    %c0_i32 = arith.constant 0 : i32
    %c0_i32_0 = arith.constant 0 : i32
    %c0_i32_1 = arith.constant 0 : i32
    return %arg1, %c0_i32, %c0_i32_0 : i32, i32, i32
  }
  func.func @transform_10(%arg0: i32, %arg1: i32) -> (i32, i32, i32) {
    %c0_i32 = arith.constant 0 : i32
    %c0_i32_0 = arith.constant 0 : i32
    %c0_i32_1 = arith.constant 0 : i32
    return %arg1, %c0_i32, %c0_i32_0 : i32, i32, i32
  }
  func.func @transform_11(%arg0: i32, %arg1: i32) -> (i32, i32, i32) {
    %c0_i32 = arith.constant 0 : i32
    %c0_i32_0 = arith.constant 0 : i32
    %c0_i32_1 = arith.constant 0 : i32
    return %arg1, %c0_i32, %c0_i32_0 : i32, i32, i32
  }
  func.func @transform_12(%arg0: i32, %arg1: i32) -> (i32, i32, i32) {
    %c0_i32 = arith.constant 0 : i32
    %c0_i32_0 = arith.constant 0 : i32
    %c0_i32_1 = arith.constant 0 : i32
    return %arg1, %c0_i32, %c0_i32_0 : i32, i32, i32
  }
  func.func @transform_13(%arg0: i32, %arg1: i32) -> (i32, i32, i32) {
    %c0_i32 = arith.constant 0 : i32
    %c0_i32_0 = arith.constant 0 : i32
    %c0_i32_1 = arith.constant 0 : i32
    return %arg1, %c0_i32, %c0_i32_0 : i32, i32, i32
  }
  func.func @transform_14(%arg0: i32, %arg1: i32) -> (i32, i32, i32) {
    %c0_i32 = arith.constant 0 : i32
    %c0_i32_0 = arith.constant 0 : i32
    %c0_i32_1 = arith.constant 0 : i32
    return %arg1, %c0_i32, %c0_i32_0 : i32, i32, i32
  }
  func.func @transform_15(%arg0: i32, %arg1: i32) -> (i32, i32, i32) {
    %c0_i32 = arith.constant 0 : i32
    %c0_i32_0 = arith.constant 0 : i32
    %c0_i32_1 = arith.constant 0 : i32
    return %arg1, %c0_i32, %c0_i32_0 : i32, i32, i32
  }
  func.func @transform_16(%arg0: i32, %arg1: i32) -> (i32, i32, i32) {
    %c0_i32 = arith.constant 0 : i32
    %c0_i32_0 = arith.constant 0 : i32
    %c0_i32_1 = arith.constant 0 : i32
    return %arg1, %c0_i32, %c0_i32_0 : i32, i32, i32
  }
  func.func @transform_17(%arg0: i32, %arg1: i32) -> (i32, i32, i32) {
    %c0_i32 = arith.constant 0 : i32
    %c0_i32_0 = arith.constant 0 : i32
    %c0_i32_1 = arith.constant 0 : i32
    return %arg1, %c0_i32, %c0_i32_0 : i32, i32, i32
  }
  func.func @transform_18(%arg0: i32, %arg1: i32) -> (i32, i32, i32) {
    %c0_i32 = arith.constant 0 : i32
    %c0_i32_0 = arith.constant 0 : i32
    %c0_i32_1 = arith.constant 0 : i32
    return %arg1, %c0_i32, %c0_i32_0 : i32, i32, i32
  }
  func.func @transform_19(%arg0: i32, %arg1: i32) -> (i32, i32, i32) {
    %c0_i32 = arith.constant 0 : i32
    %c0_i32_0 = arith.constant 0 : i32
    %c0_i32_1 = arith.constant 0 : i32
    return %arg1, %c0_i32, %c0_i32_0 : i32, i32, i32
  }
  func.func @transform_20(%arg0: i32, %arg1: i32) -> (i32, i32, i32) {
    %c0_i32 = arith.constant 0 : i32
    %c0_i32_0 = arith.constant 0 : i32
    %c0_i32_1 = arith.constant 0 : i32
    return %arg1, %c0_i32, %c0_i32_0 : i32, i32, i32
  }
  func.func @transform_21(%arg0: i32, %arg1: i32) -> (i32, i32, i32) {
    %c0_i32 = arith.constant 0 : i32
    %c0_i32_0 = arith.constant 0 : i32
    %c0_i32_1 = arith.constant 0 : i32
    return %arg1, %c0_i32, %c0_i32_0 : i32, i32, i32
  }
  func.func @transform_22(%arg0: i32, %arg1: i32) -> (i32, i32, i32) {
    %c0_i32 = arith.constant 0 : i32
    %c0_i32_0 = arith.constant 0 : i32
    %c0_i32_1 = arith.constant 0 : i32
    return %arg1, %c0_i32, %c0_i32_0 : i32, i32, i32
  }
  func.func @transform_23(%arg0: i32, %arg1: i32) -> (i32, i32, i32) {
    %c0_i32 = arith.constant 0 : i32
    %c0_i32_0 = arith.constant 0 : i32
    %c0_i32_1 = arith.constant 0 : i32
    return %arg1, %c0_i32, %c0_i32_0 : i32, i32, i32
  }
  func.func @transform_24(%arg0: i32, %arg1: i32) -> (i32, i32, i32) {
    %c0_i32 = arith.constant 0 : i32
    %c0_i32_0 = arith.constant 0 : i32
    %c0_i32_1 = arith.constant 0 : i32
    return %arg1, %c0_i32, %c0_i32_0 : i32, i32, i32
  }
  func.func @transform_25(%arg0: i32, %arg1: i32) -> (i32, i32, i32) {
    %c0_i32 = arith.constant 0 : i32
    %c0_i32_0 = arith.constant 0 : i32
    %c0_i32_1 = arith.constant 0 : i32
    return %arg0, %c0_i32, %c0_i32_0 : i32, i32, i32
  }
}

</mosaic_0001>

<bundles_post_ra>
// kernel: _lambda_.5
= control target key start
LH: loop header
LB: loop body
LE: loop exit
PB: predicated region body
PF: predicated region fallthrough
CT: control target
= control target key end

     0   :  { %s3639_s0 = inlined_call_operand.vmem [shape: bf16[2,8,128], index: 0, kind: input, shape index: {}]   ;;  %s3640_s1 = inlined_call_operand.vmem [shape: f32[1,8,128], index: 1, kind: input, shape index: {}]   ;;  %s3641_s2 = inlined_call_operand.vmem [shape: f32[2,1,128], index: 2, kind: input, shape index: {}, may-alias: {2,8}]   ;;  %s3642_s3 = inlined_call_operand.vmem [shape: f32[2,1,128], index: 3, kind: input, shape index: {}, may-alias: {3,7,9,13}]   ;;  %s3643_s4 = inlined_call_operand.vmem [shape: bf16[2,128,384], index: 4, kind: input, shape index: {}]   ;;  %s3644_s5 = inlined_call_operand.vmem [shape: f32[2,1,384], index: 5, kind: input, shape index: {}]   ;;  %s3645_s6 = inlined_call_operand.vmem [shape: bf16[2,128,128], index: 6, kind: input, shape index: {}]   ;;  %s3646_s7 = inlined_call_operand.vmem [shape: f32[2,1,128], index: 7, kind: input, shape index: {}, may-alias: {3,7,9,13}]   ;;  %s3647_s8 = inlined_call_operand.vmem [shape: f32[2,1,128], index: 8, kind: input, shape index: {}, may-alias: {2,8}]   ;;  %s3648_s9 = inlined_call_operand.vmem [shape: f32[2,1,128], index: 9, kind: input, shape index: {}, may-alias: {3,7,9,13}]   ;;  %s3649_s10 = inlined_call_operand.vmem [shape: bf16[2,128,256], index: 10, kind: input, shape index: {}]   ;;  %s3650_s11 = inlined_call_operand.vmem [shape: f32[2,1,256], index: 11, kind: input, shape index: {}]   ;;  %s3651_s12 = inlined_call_operand.vmem [shape: bf16[2,256,128], index: 12, kind: input, shape index: {}]   ;;  %s3652_s13 = inlined_call_operand.vmem [shape: f32[2,1,128], index: 13, kind: input, shape index: {}, may-alias: {3,7,9,13}]   ;;  %s3653_s14 = inlined_call_operand.vmem [shape: f32[1,128], index: 14, kind: input, shape index: {}]   ;;  %s3654_s15 = inlined_call_operand.vmem [shape: f32[1,128], index: 15, kind: input, shape index: {}]   ;;  %s3655_s16 = inlined_call_operand.vmem [shape: bf16[128,128], index: 16, kind: input, shape index: {}]   ;;  %s3656_s17 = inlined_call_operand.hbm [shape: f32[2,8,128], index: 17, kind: output, shape index: {}]  }
   0x1   :  { %3673 = sst [smem:[#allocation19_spill]] %s3639_s0 }
   0x2   :  { %3674 = sst [smem:[#allocation20_spill]] %s3640_s1 }
   0x3   :  { %3675 = sst [smem:[#allocation21_spill]] %s3642_s3 }
   0x4   :  { %3676 = sst [smem:[#allocation22_spill]] %s3643_s4 }
   0x5   :  { %3677 = sst [smem:[#allocation23_spill]] %s3644_s5 }
   0x6   :  { %3678 = sst [smem:[#allocation24_spill]] %s3645_s6 }
   0x7   :  { %3679 = sst [smem:[#allocation25_spill]] %s3653_s14 }
   0x8   :  { %3680 = sst [smem:[#allocation26_spill]] %s3654_s15 }
   0x9   :  { %3681 = sst [smem:[#allocation27_spill]] %s3655_s16 }
   0xa   :  { %3682 = sst [smem:[#allocation28_spill]] %s3656_s17 }
   0xb   :  { %22 = vsyncpa [#allocation4], 0 }
   0xc   :  { %24 = vsyncpa [#allocation4 + $0x1], 0  ;;  %s3184_s24 = smov 0   ;;  %s3186_s25 = smov 0  }
   0xd   :  { %s3188_s26 = smov 0   ;;  %s3190_s27 = smov 0  }
   0xe   :  { %s3192_s28 = smov 0   ;;  %s3194_s29 = smov 0  }
   0xf   :  { %s3196_s0 = smov 0   ;;  %s3198_s30 = smov 0  }
  0x10 LB: > { %3683 = sst [smem:[#allocation6_spill]] %s3055_s24  ;;  %s2490_s18 = sadd.s32 4294967295, %s3083_s30   ;;  %s3083_s30 = sphi %s3198_s30, %s30_s30   ;;  %s3079_s0 = sphi %s3196_s0, %s3729_s0   ;;  %s3075_s29 = sphi %s3194_s29, %s3728_s29   ;;  %s3071_s28 = sphi %s3192_s28, %s3727_s28   ;;  %s3067_s27 = sphi %s3190_s27, %s3726_s27   ;;  %s3063_s26 = sphi %s3188_s26, %s3725_s26   ;;  %s3059_s25 = sphi %s3186_s25, %s3724_s25   ;;  %s3055_s24 = sphi %s3184_s24, %s3723_s24  }
  0x11   : > { %3684 = sst [smem:[#allocation7_spill]] %s3059_s25  ;;  %s2491_s19 = sadd.s32 4294967294, %s3083_s30  }
  0x12   : > { %3685 = sst [smem:[#allocation8_spill]] %s3063_s26  ;;  %s39_s1 = sadd.s32 1, %s3075_s29 }
  0x13   : > { %3686 = sst [smem:[#allocation9_spill]] %s3067_s27  ;;  %p40_p0 = scmp.ge.s32.totalorder %s39_s1, 2 }
  0x14   : > { %3687 = sst [smem:[#allocation10_spill]] %s3071_s28  ;;  %s42_s20 = sadd.s32 1, %s3079_s0 }
  0x15   : > { %3688 = sst [smem:[#allocation11_spill]] %s3075_s29  ;;  %p481_p1 = scmp.ne.s32.totalorder %s3063_s26, %s3059_s25 }
  0x16   : > { %3689 = sst [smem:[#allocation12_spill]] %s3079_s0  ;;  %p482_p2 = scmp.eq.s32.totalorder %s2490_s18, 3 }
  0x17   : > { %3690 = sst [smem:[#allocation13_spill]] %s3083_s30  ;;  %s3731_s1 = smov (%p40_p0, %s39_s1), 0 }
  0x18   : > { %3691 = sst [smem:[#allocation14_spill]] %s3731_s1  ;;  %s3733_s20 = smov (!%p40_p0, %s42_s20), %s3079_s0 }
  0x19   : > { %p3233_p3 = por %p482_p2, %p481_p1  ;;  %p487_p4 = scmp.ne.s32.totalorder %s3059_s25, %s3055_s24 }
  0x1a   : > { %p44_p5 = scmp.ge.s32.totalorder %s3733_s20, 2  ;;  %p488_p6 = scmp.eq.s32.totalorder %s2491_s19, 3 }
  0x1b   : > { %s3692_s21 = scalar_select %p3233_p3, 1, 0 }
  0x1c   : > { %p2494_p7 = scmp.ge.s32.totalorder %s3083_s30, 1  ;;  %p607_p8 = scmp.lt.s32.totalorder %s3083_s30, 5 }
  0x1d   : > { %3693 = sst [smem:[#allocation15_spill]] %s3692_s21  ;;  %s3735_s20 = smov (%p44_p5, %s3733_s20), 0 }
  0x1e   : > { %3694 = sst [smem:[#allocation16_spill]] %s3735_s20  ;;  %p3243_p9 = por %p488_p6, %p487_p4 }
  0x1f   : > { %p608_p10 = pnand %p2494_p7, %p607_p8  ;;  %s468_s23 = ssub.s32 %s3079_s0, %s3735_s20 }
  0x20   : > { %s3695_s22 = scalar_select %p3243_p9, 1, 0 }
  0x21   : > { %s471_s18 = sadd.s32 1, %s3063_s26  ;;  %p469_p11 = scmp.eq.s32.totalorder %s468_s23, 0 }
  0x22   : > { %3696 = sst [smem:[#allocation17_spill]] %s3695_s22  ;;  %611 = sbr.rel (%p608_p10) target bundleno = 3070 (0xbfe), region = 88 }
  0x23   : > { %s3251_s1 = scalar_select %p469_p11, %s3063_s26, %s471_s18  }
  0x24   : > { %s3662_s19 = sand.u32 (!%p608_p10), 1, %s3059_s25   ;;  %p704_p12 = scmp.lt.s32.totalorder (!%p608_p10), %s3071_s28, 1 }
  0x25   : > { %3697 = sst [smem:[#allocation18_spill]] %s3251_s1  ;;  %s3257_s29 = sshll.u32 (!%p608_p10), %s3662_s19, 3 }
  0x26   : > { %p708_p13 = scmp.lt.s32.totalorder (!%p608_p10), %s3067_s27, 1  ;;  %s3698_s0 = sld [smem:[#allocation19_spill]] (!%p608_p10) }
  0x27   : > { %s3700_s4 = sld [smem:[#allocation22_spill]] (!%p608_p10)  ;;  %s3701_s6 = sld [smem:[#allocation24_spill]] (!%p608_p10) }
  0x28   : > { %s3702_s5 = sld [smem:[#allocation23_spill]] (!%p608_p10)  ;;  %s3703_s16 = sld [smem:[#allocation9_spill]] (!%p608_p10) }
  0x29   : > { %s705_s22 = scalar_select %p704_p12, %s3071_s28, 1 }
  0x2a   : > { %s3262_s24 = scalar_select %p708_p13, %s3067_s27, 1 }
  0x2b   : > { %s2496_s23 = sshll.u32 %s705_s22, 2 }
  0x2c   : > { %s707_s19 = scalar_lea.vmem %s3698_s0, %s2496_s23  ;;  %s2794_s28 = smul.u32 192, %s3262_s24 }
  0x2d   : > { %s2795_s15 = smul.u32 3, %s3262_s24  ;;  %s2603_s14 = sshll.u32 %s3262_s24, 6 }
  0x2e   : > { %s3281_s22 = scalar_lea.vmem %s3700_s4, %s2794_s28  ;;  %s3286_s23 = scalar_lea.vmem %s3701_s6, %s2603_s14 }
  0x2f   : > { %s3291_s17 = scalar_lea.vmem %s3702_s5, %s2795_s15  ;;  %s2604_s20 = sshll.u32 %s3262_s24, 7 }
  0x30   : > { %s2502_s14 = sshll.u32 %s3262_s24, 1  ;;  %s3310_s26 = scalar_lea.vmem %s3649_s10, %s2604_s20 }
  0x31   : > { %s3315_s21 = scalar_lea.vmem %s3650_s11, %s2502_s14  ;;  %s3320_s3 = scalar_lea.vmem %s3651_s12, %s2604_s20 }
  0x32   : > { %s753_s28 = scalar_lea.vmem %s3652_s13, %s3262_s24  ;;  %s703_s4 = scalar_lea.vmem [#allocation3], %s3257_s29 }
  0x33   : > { %p2505_p0 = scmp.ne.s32.totalorder %s3703_s16, 0 }
  0x34   : > { %v759_v0 = vld [vmem:[%s707_s19] sm:$0xf] (!%p2505_p0)  ;;  %s3704_s5 = sld [smem:[#allocation20_spill]] (!%p2505_p0) }
  0x35   : > { %758 = sbr.rel (%p2505_p0) target bundleno = 62 (0x3e), region = 92  ;;  %v760_v2 = vunpack.c.l.bf16 (!%p2505_p0), %v759_v0 }
  0x3a   : > { %v761_v1 = vld [vmem:[%s3704_s5] sm:$0xff] (!%p2505_p0) }
  0x3b   : > { %v762_v3 = vadd.f32 (!%p2505_p0), %v761_v1, %v760_v2 }
  0x3d   : > { %763 = vst [vmem:[#allocation2] sm:$0xff] %v762_v3 }
  0x3e PF: > { %v2875_v5 = vld [vmem:[%s3281_s22 + $0x4] ss:$12 sps:$4 sm:$0xff]   ;;  %v2877_v6 = vld [vmem:[%s3281_s22] ss:$12 sps:$4 sm:$0xff]   ;;  %v3085_v7 = vmov 0.0   ;;  %v3086_v29 = vmov 0   ;;  %s3705_s19 = scalar_lea.vmem %s3641_s2, %s3262_s24  ;;  %v845_v45 = vlaneseq  ;;  %s3709_s0 = scalar_lea.vmem %s3647_s8, %s3262_s24 }
  0x3f   : > { %2674 = vmatprep.subr.bf16.mxu1 %v3085_v7  ;;  %v2878_v8 = vld [vmem:[%s3281_s22 + $0x8] ss:$12 sps:$4 sm:$0xff]   ;;  %v2881_v10 = vld [vmem:[%s3281_s22 + $0x18] ss:$12 sps:$4 sm:$0xff]   ;;  %988 = vmatprep.subr.bf16.mxu0 %v2875_v5  ;;  %v2882_v11 = vld [vmem:[%s3281_s22 + $0x20] ss:$12 sps:$4 sm:$0xff]   ;;  %s3710_s25 = scalar_lea.vmem %s3648_s9, %s3262_s24 }
  0x40   : > { %v2879_v9 = vld [vmem:[%s3281_s22 + $0x1c] ss:$12 sps:$4 sm:$0xff]   ;;  %v2883_v12 = vld [vmem:[%s3281_s22 + $0x34] ss:$12 sps:$4 sm:$0xff]   ;;  %989 = vmatpush1.bf16.msra.mxu0 %v2877_v6  ;;  %2675 = vmatpush3.bf16.msra.mxu1 %v2878_v8  ;;  %v2886_v18 = vld [vmem:[%s3281_s22 + $0x38] ss:$12 sps:$4 sm:$0xff]  }
  0x41   : > { %990 = vmatprep.subr.bf16.mxu0 %v2879_v9  ;;  %2676 = vmatprep.subr.bf16.mxu1 %v3085_v7  ;;  %v2885_v17 = vld [vmem:[%s3281_s22 + $0x30] ss:$12 sps:$4 sm:$0xff]   ;;  %v2887_v19 = vld [vmem:[%s3281_s22 + $0x4c] ss:$12 sps:$4 sm:$0xff]   ;;  %v2889_v20 = vld [vmem:[%s3281_s22 + $0x48] ss:$12 sps:$4 sm:$0xff]  }
  0x42   : > { %v2890_v21 = vld [vmem:[%s3281_s22 + $0x50] ss:$12 sps:$4 sm:$0xff]   ;;  %v2893_v23 = vld [vmem:[%s3281_s22 + $0x60] ss:$12 sps:$4 sm:$0xff]   ;;  %v2894_v24 = vld [vmem:[%s3281_s22 + $0x68] ss:$12 sps:$4 sm:$0xff]   ;;  %1020 = vmatprep.mubr.bf16.mxu0 %v3086_v29 }
  0x43   : > { %v2891_v22 = vld [vmem:[%s3281_s22 + $0x64] ss:$12 sps:$4 sm:$0xff]   ;;  %v2895_v25 = vld [vmem:[%s3281_s22 + $0x7c] ss:$12 sps:$4 sm:$0xff]   ;;  %v2898_v27 = vld [vmem:[%s3281_s22 + $0x80] ss:$12 sps:$4 sm:$0xff]  }
  0x44   : > { %v3331_v4 = vld [vmem:[#allocation2] sm:$0xff]  ;;  %991 = vmatpush1.bf16.msra.mxu0 %v2881_v10  ;;  %2677 = vmatpush3.bf16.msra.mxu1 %v2882_v11  ;;  %vm3087_vm0 = vmmov 0   ;;  %v2901_v30 = vld [vmem:[%s3281_s22 + $0x90] ss:$12 sps:$4 sm:$0xff]   ;;  %v2903_v32 = vld [vmem:[%s3281_s22 + $0xac] ss:$12 sps:$4 sm:$0xff]  }
  0x45   : > { %767 = vadd.xlane.f32.xlu0 %v3331_v4  ;;  %992 = vmatprep.subr.bf16.mxu0 %v2883_v12  ;;  %v2897_v26 = vld [vmem:[%s3281_s22 + $0x78] ss:$12 sps:$4 sm:$0xff]   ;;  %v2899_v28 = vld [vmem:[%s3281_s22 + $0x94] ss:$12 sps:$4 sm:$0xff]   ;;  %v2906_v34 = vld [vmem:[%s3281_s22 + $0xb0] ss:$12 sps:$4 sm:$0xff]  }
  0x46   : > { %2678 = vmatprep.subr.bf16.mxu1 %v3085_v7  ;;  %2690 = vmatprep.mubr.msk.bf16.mxu1 %vm3087_vm0, %v3085_v7  ;;  %v2902_v31 = vld [vmem:[%s3281_s22 + $0x98] ss:$12 sps:$4 sm:$0xff]   ;;  %v2905_v33 = vld [vmem:[%s3281_s22 + $0xa8] ss:$12 sps:$4 sm:$0xff]   ;;  %v2506_v39 = vld [vmem:[%s3705_s19] ss:$0 sm:$0xff] }
  0x47   : > { %s3706_s20 = sld [smem:[#allocation21_spill]]  ;;  %v3387_v46 = vshrl.u32 %v845_v45, 7  ;;  %v825_v48 = vld [vmem:[%s3291_s17] sm:$0x7]  ;;  %vm1072_vm1 = vcmask 261120   ;;  %s3088_s17 = smov 64  }
  0x48   : > { %993 = vmatpush1.bf16.msra.mxu0 %v2885_v17  ;;  %2679 = vmatpush3.bf16.msra.mxu1 %v2886_v18  ;;  %s3089_s15 = smov 96   ;;  %s3090_s1 = smov 32   ;;  %vm1341_vm2 = vcmask 1043456   ;;  %v1277_v18 = vand.u32 127, %v845_v45  ;;  %vm1290_vm4 = vcmask 64512  }
  0x49   : > { %2680 = vmatprep.subr.bf16.mxu1 %v3085_v7  ;;  %994 = vmatprep.subr.bf16.mxu0 %v2887_v19  ;;  %v847_v47 = vsub.s32 0, %v3387_v46  ;;  %v851_v49 = vsub.s32 1, %v3387_v46  ;;  %v855_v2 = vsub.s32 2, %v3387_v46  ;;  %v1278_v19 = vand.u32 7, %v3387_v46  ;;  %s3711_s19 = sld [smem:[#allocation9_spill]] }
  0x4b   : > { %v848_v50 = vrot.slane %v825_v48, %v847_v47  ;;  %v852_v51 = vrot.slane %v825_v48, %v851_v49  ;;  %v856_v6 = vrot.slane %v825_v48, %v855_v2  ;;  %vm1282_vm3 = vcmp.le.s32.totalorder %v1277_v18, %v1278_v19 }
  0x4c   : > { %995 = vmatpush1.bf16.msra.mxu0 %v2889_v20  ;;  %2681 = vmatpush3.bf16.msra.mxu1 %v2890_v21 }
  0x4d   : > { %2682 = vmatprep.subr.bf16.mxu1 %v3085_v7  ;;  %996 = vmatprep.subr.bf16.mxu0 %v2891_v22  ;;  %s3707_s14 = scalar_lea.vmem %s3706_s20, %s3262_s24 }
  0x4e   : > { %v2507_v41 = vld [vmem:[%s3707_s14] ss:$0 sm:$0xff] }
  0x4f   : > { %p2588_p1 = scmp.ne.s32.totalorder %s3711_s19, 1 }
  0x50   : > { %997 = vmatpush1.bf16.msra.mxu0 %v2893_v23  ;;  %2683 = vmatpush3.bf16.msra.mxu1 %v2894_v24  ;;  %s3712_s20 = sld [smem:[#allocation27_spill]] (!%p2588_p1)  ;;  %vm3092_vm8 = vmmov (!%p2588_p1), 0   ;;  %s3714_s16 = sld [smem:[#allocation26_spill]] (!%p2588_p1) }
  0x51   : > { %998 = vmatprep.subr.bf16.mxu0 %v2895_v25  ;;  %2684 = vmatprep.subr.bf16.mxu1 %v3085_v7 }
  0x54   : > { %999 = vmatpush1.bf16.msra.mxu0 %v2897_v26  ;;  %2685 = vmatpush3.bf16.msra.mxu1 %v2898_v27  ;;  %v1273_v26 = vadd.s32 8, %v3387_v46 }
  0x55   : > { %1000 = vmatprep.subr.bf16.mxu0 %v2899_v28  ;;  %2686 = vmatprep.subr.bf16.mxu1 %v3085_v7  ;;  %v1274_v28 = vadd.s32 16, %v3387_v46 }
  0x56   : > { %v1279_v27 = vand.u32 7, %v1273_v26 }
  0x58   : > { %1001 = vmatpush1.bf16.msra.mxu0 %v2901_v30  ;;  %2687 = vmatpush3.bf16.msra.mxu1 %v2902_v31  ;;  %vm1283_vm5 = vcmp.le.s32.totalorder %v1277_v18, %v1279_v27  ;;  %v1280_v30 = vand.u32 7, %v1274_v28  ;;  %v1275_v31 = vadd.s32 24, %v3387_v46 }
  0x59   : > { %1002 = vmatprep.subr.bf16.mxu0 %v2903_v32  ;;  %2688 = vmatprep.subr.bf16.mxu1 %v3085_v7 }
  0x5a   : > { %vm1284_vm6 = vcmp.le.s32.totalorder %v1277_v18, %v1280_v30 }
  0x5c   : > { %1003 = vmatpush1.bf16.msra.mxu0 %v2905_v33  ;;  %2689 = vmatpush3.bf16.msra.mxu1 %v2906_v34 }
  0x5d   : > { %2694 = vmatprep.subr.bf16.mxu0 %v3085_v7  ;;  %2700 = vmatprep.subr.bf16.mxu1 %v3085_v7 }
  0xd2   : > { %v768_v13 = vpop.xlane.xlu0 %767 }
  0xd3   : > { %v770_v14 = vmul.f32 0.0078125, %v768_v13 }
  0xd5   : > { %v771_v15 = vsub.f32 %v3331_v4, %v770_v14 }
  0xd7   : > { %v772_v16 = vmul.f32 %v771_v15, %v771_v15 }
  0xd9   : > { %773 = vadd.xlane.f32.xlu0 %v772_v16 }
 0x166   : > { %v774_v35 = vpop.xlane.xlu0 %773 }
 0x167   : > { %v775_v36 = vmul.f32 0.0078125, %v774_v35 }
 0x169   : > { %v776_v37 = vadd.f32 1e-05, %v775_v36 }
 0x16b   : > { %2955 = vrsqrt.f32 %v776_v37  ;;  %v1281_v37 = vand.u32 7, %v1275_v31 }
 0x16d   : > { %vm1285_vm7 = vcmp.le.s32.totalorder %v1277_v18, %v1281_v37 }
 0x175   : > { %v2956_v38 = vpop.eup %2955 }
 0x176   : > { %v778_v40 = vmul.f32 %v2956_v38, %v771_v15 }
 0x178   : > { %v785_v42 = vmul.f32 %v2506_v39, %v778_v40 }
 0x17a   : > { %v792_v43 = vadd.f32 %v2507_v41, %v785_v42 }
 0x17c   : > { %v843_v44 = vpack.c.bf16 %v792_v43, %v792_v43 }
 0x17e   : > { %1021 = vmatmul.mubr.bf16.vlgmr.msra.gmra.mrb[0].mxu0 %v843_v44  ;;  %2691 = vmatmul.mubr.bf16.vlgmr.msra.gmra.mrb[0].mxu1 %v843_v44 }
 0x17f   : > { %2696 = vmatprep.mubr.msk.bf16.mxu0 %vm3087_vm0, %v3085_v7  ;;  %2702 = vmatprep.mubr.msk.bf16.mxu1 %vm3087_vm0, %v3085_v7 }
 0x251   : > { %v1022_v52 = vpop.f32.mrb[0].mxu0  ;;  %v1063_v53 = vpop.f32.mrb[0].mxu1 }
 0x252   : > { %v1023_v54 = vadd.f32 %v1022_v52, %v848_v50  ;;  %v1024_v55 = vpop.f32.mrb[1].mxu0  ;;  %v2692_v56 = vpop.f32.mrb[1].mxu1  ;;  %v1064_v11 = vadd.f32 %v1063_v53, %v856_v6 }
 0x253   : > { %v1025_v57 = vadd.f32 %v1024_v55, %v852_v51  ;;  %v1026_v58 = vpop.f32.mrb[2].mxu0  ;;  %v1066_v59 = vpop.f32.mrb[2].mxu1 }
 0x254   : > { %v1027_v60 = vpop.f32.mrb[3].mxu0  ;;  %v2693_v61 = vpop.f32.mrb[3].mxu1  ;;  %v1069_v62 = vmul.f32 0.17677669, %v1023_v54  ;;  %v3412_v13 = vpack.c.bf16 %v1064_v11, %v1064_v11 }
 0x255   : > { %v1071_v63 = vpack.c.bf16 %v1025_v57, %v1025_v57 }
 0x256   : > { %v1070_v1 = vpack.c.bf16 %v1069_v62, %v1069_v62  ;;  %v1343_v16 = vsel %vm1341_vm2, %v3412_v13, 0 }
 0x257   : > { %1173 = vrot.lane.b32.xlu0 %v1071_v63, %s3088_s17  ;;  %1123 = vrot.lane.b32.xlu1 %v1071_v63, %s3089_s15  ;;  %v1077_v0 = vsel %vm1072_vm1, %v1071_v63, 0 }
 0x258   : > { %2695 = vmatpush3.bf16.xpose.msra.mxu0 %v1077_v0 }
 0x259   : > { %2706 = vmatprep.subr.bf16.mxu0 %v3085_v7 }
 0x25b   : > { %1120 = vrot.lane.b32.xlu1 %v1070_v1, %s3089_s15 }
 0x25f   : > { %1223 = vrot.lane.b32.xlu1 %v1071_v63, %s3090_s1  ;;  %2697 = vmatmul.mubr.msk.bf16.vlgmr.msra.gmra.mrb[4].mxu0 %vm1072_vm1, %v1070_v1 }
 0x260   : > { %2708 = vmatprep.mubr.msk.bf16.mxu0 %vm3087_vm0, %v3085_v7 }
 0x263   : > { %1171 = vrot.lane.b32.xlu1 %v1070_v1, %s3088_s17 }
 0x267   : > { %1221 = vrot.lane.b32.xlu1 %v1070_v1, %s3090_s1 }
 0x2c9   : > { %v1174_v3 = vpop.permute.xlu0 %1173  ;;  %v1124_v5 = vpop.permute.xlu1 %1123 }
 0x2ca   : > { %v1179_v8 = vsel %vm1072_vm1, %v1174_v3, 0  ;;  %v1129_v9 = vsel %vm1072_vm1, %v1124_v5, 0 }
 0x2cb   : > { %2701 = vmatpush3.bf16.xpose.msra.mxu1 %v1129_v9  ;;  %2707 = vmatpush3.bf16.xpose.msra.mxu0 %v1179_v8 }
 0x2cc   : > { %2712 = vmatprep.subr.bf16.mxu1 %v3085_v7  ;;  %2718 = vmatprep.subr.bf16.mxu0 %v3085_v7 }
 0x2cd   : > { %v1121_v10 = vpop.permute.xlu1 %1120 }
 0x2d1   : > { %v1224_v12 = vpop.permute.xlu1 %1223 }
 0x2d2   : > { %v1229_v14 = vsel %vm1072_vm1, %v1224_v12, 0  ;;  %2703 = vmatmul.mubr.msk.bf16.vlgmr.msra.gmra.mrb[4].mxu1 %vm1072_vm1, %v1121_v10  ;;  %v2907_v12 = vld [vmem:[%s3286_s23] sm:$0xff]  }
 0x2d3   : > { %2713 = vmatpush3.bf16.xpose.msra.mxu1 %v1229_v14  ;;  %2714 = vmatprep.mubr.msk.bf16.mxu1 %vm3087_vm0, %v3085_v7 }
 0x2d4   : > { %2724 = vmatprep.subr.bf16.mxu1 %v3085_v7 }
 0x2d5   : > { %v1172_v15 = vpop.permute.xlu1 %1171 }
 0x2d6   : > { %2709 = vmatmul.mubr.msk.bf16.vlgmr.msra.gmra.mrb[8].mxu0 %vm1072_vm1, %v1172_v15 }
 0x2d7   : > { %2719 = vmatpush3.bf16.msra.mxu0 %v1343_v16  ;;  %2720 = vmatprep.mubr.msk.bf16.mxu0 %vm3087_vm0, %v3085_v7 }
 0x2d8   : > { %2732 = vmatprep.subr.bf16.mxu0 %v3085_v7 }
 0x2d9   : > { %v1222_v17 = vpop.permute.xlu1 %1221 }
 0x2da   : > { %2715 = vmatmul.mubr.msk.bf16.vlgmr.msra.gmra.mrb[8].mxu1 %vm1072_vm1, %v1222_v17 }
 0x2db   : > { %2728 = vmatprep.mubr.msk.bf16.mxu1 %vm3087_vm0, %v3085_v7  ;;  %2725 = vmatpush3.bf16.msra.mxu1 %v2907_v12 }
 0x2dc   : > { %2726 = vmatprep.subr.bf16.mxu1 %v3085_v7 }
 0x332   : > { %v1113_v20 = vpop.f32.mrb[4].mxu0 }
 0x333   : > { %v1286_v21 = vsel %vm1282_vm3, %v1113_v20, -1e+09  ;;  %v2698_v22 = vpop.f32.mrb[5].mxu0 }
 0x334   : > { %v1116_v23 = vpop.f32.mrb[6].mxu0  ;;  %v1291_v24 = vsel %vm1290_vm4, %v1286_v21, -inf }
 0x335   : > { %1292 = vmax.xlane.f32.xlu1 %v1291_v24  ;;  %v2699_v25 = vpop.f32.mrb[7].mxu0 }
 0x3a5   : > { %v1165_v32 = vpop.f32.mrb[4].mxu1 }
 0x3a6   : > { %v1287_v33 = vsel %vm1283_vm5, %v1165_v32, -1e+09  ;;  %v2704_v34 = vpop.f32.mrb[5].mxu1 }
 0x3a7   : > { %v1168_v35 = vpop.f32.mrb[6].mxu1  ;;  %v1294_v36 = vsel %vm1290_vm4, %v1287_v33, -inf }
 0x3a8   : > { %1295 = vmax.xlane.f32.xlu0 %v1294_v36  ;;  %v2705_v38 = vpop.f32.mrb[7].mxu1  ;;  %v2908_v36 = vld [vmem:[%s3286_s23 + $0x8] sm:$0xff]  }
 0x3a9   : > { %v1215_v39 = vpop.f32.mrb[8].mxu0  ;;  %2727 = vmatpush3.bf16.msra.mxu1 %v2908_v36  ;;  %v2909_v38 = vld [vmem:[%s3286_s23 + $0x10] sm:$0xff]   ;;  %v2929_v36 = vld [vmem:[%s3310_s26 + $0x44] ss:$8 sps:$4 sm:$0xff]  }
 0x3aa   : > { %v1288_v40 = vsel %vm1284_vm6, %v1215_v39, -1e+09  ;;  %v2710_v41 = vpop.f32.mrb[9].mxu0  ;;  %2738 = vmatprep.subr.bf16.mxu1 %v3085_v7 }
 0x3ab   : > { %v1218_v42 = vpop.f32.mrb[10].mxu0  ;;  %v1297_v43 = vsel %vm1290_vm4, %v1288_v40, -inf }
 0x3ac   : > { %1298 = vmax.xlane.f32.xlu1 %v1297_v43  ;;  %v2711_v44 = vpop.f32.mrb[11].mxu0  ;;  %v2910_v43 = vld [vmem:[%s3286_s23 + $0x18] sm:$0xff]  }
 0x3ad   : > { %v1265_v45 = vpop.f32.mrb[8].mxu1  ;;  %v2911_v44 = vld [vmem:[%s3286_s23 + $0x20] sm:$0xff]  }
 0x3ae   : > { %v1289_v48 = vsel %vm1285_vm7, %v1265_v45, -1e+09  ;;  %v2716_v50 = vpop.f32.mrb[9].mxu1 }
 0x3af   : > { %v1268_v51 = vpop.f32.mrb[10].mxu1  ;;  %v1300_v52 = vsel %vm1290_vm4, %v1289_v48, -inf }
 0x3b0   : > { %v2717_v53 = vpop.f32.mrb[11].mxu1  ;;  %1301 = vmax.xlane.f32.xlu1 %v1300_v52  ;;  %v2912_v52 = vld [vmem:[%s3286_s23 + $0x28] sm:$0xff]  }
 0x3c2   : > { %v1293_v54 = vpop.xlane.xlu1 %1292 }
 0x3c3   : > { %v1303_v55 = vsub.f32 %v1286_v21, %v1293_v54  ;;  %v2913_v54 = vld [vmem:[%s3286_s23 + $0x30] sm:$0xff]  }
 0x3c5   : > { %v1307_v56 = vmul.f32 1.442695, %v1303_v55 }
 0x3c7   : > { %2957 = vpow2.f32 %v1307_v56 }
 0x3d1   : > { %v2958_v57 = vpop.eup %2957 }
 0x3d2   : > { %v1315_v58 = vsel %vm1290_vm4, %v2958_v57, 0.0 }
 0x3d3   : > { %1316 = vadd.xlane.f32.xlu0 %v1315_v58 }
 0x435   : > { %v1296_v59 = vpop.xlane.xlu0 %1295 }
 0x436   : > { %v1304_v60 = vsub.f32 %v1287_v33, %v1296_v59  ;;  %v2914_v59 = vld [vmem:[%s3286_s23 + $0x38] sm:$0xff]   ;;  %s3708_s23 = scalar_lea.vmem %s3646_s7, %s3262_s24 }
 0x438   : > { %v1309_v61 = vmul.f32 1.442695, %v1304_v60 }
 0x439   : > { %v1299_v62 = vpop.xlane.xlu1 %1298 }
 0x43a   : > { %2959 = vpow2.f32 %v1309_v61  ;;  %v1305_v63 = vsub.f32 %v1288_v40, %v1299_v62 }
 0x43c   : > { %v1311_v0 = vmul.f32 1.442695, %v1305_v63 }
 0x43d   : > { %v1302_v6 = vpop.xlane.xlu1 %1301 }
 0x43e   : > { %2961 = vpow2.f32 %v1311_v0  ;;  %v1306_v8 = vsub.f32 %v1289_v48, %v1302_v6  ;;  %v2540_v6 = vld [vmem:[%s3708_s23] ss:$0 sm:$0xff] }
 0x440   : > { %v1313_v9 = vmul.f32 1.442695, %v1306_v8 }
 0x442   : > { %2963 = vpow2.f32 %v1313_v9 }
 0x444   : > { %v2960_v1 = vpop.eup %2959 }
 0x445   : > { %v1318_v2 = vsel %vm1290_vm4, %v2960_v1, 0.0 }
 0x446   : > { %1319 = vadd.xlane.f32.xlu1 %v1318_v2 }
 0x448   : > { %v2962_v3 = vpop.eup %2961 }
 0x449   : > { %v1321_v5 = vsel %vm1290_vm4, %v2962_v3, 0.0 }
 0x44a   : > { %1322 = vadd.xlane.f32.xlu0 %v1321_v5 }
 0x44c   : > { %v2964_v10 = vpop.eup %2963 }
 0x44d   : > { %v1324_v11 = vsel %vm1290_vm4, %v2964_v10, 0.0 }
 0x457   : > { %1556 = vrot.lane.b32.xlu1 %v3412_v13, %s3088_s17 }
 0x460   : > { %1451 = vrot.lane.b32.xlu0 %v3412_v13, %s3089_s15  ;;  %v1317_v14 = vpop.xlane.xlu0 %1316 }
 0x461   : > { %2965 = vrcp.f32 %v1317_v14 }
 0x46b   : > { %v2966_v17 = vpop.eup %2965 }
 0x46c   : > { %v1331_v19 = vmul.f32 %v2966_v17, %v2958_v57 }
 0x47b   : > { %1325 = vadd.xlane.f32.xlu1 %v1324_v11 }
 0x48c   : > { %1663 = vrot.lane.b32.xlu1 %v3412_v13, %s3090_s1 }
 0x4d3   : > { %v1320_v15 = vpop.xlane.xlu1 %1319 }
 0x4d4   : > { %2967 = vrcp.f32 %v1320_v15 }
 0x4d7   : > { %v1323_v16 = vpop.xlane.xlu0 %1322  ;;  %v1557_v13 = vpop.permute.xlu1 %1556 }
 0x4d8   : > { %v1562_v25 = vsel %vm1341_vm2, %v1557_v13, 0  ;;  %2969 = vrcp.f32 %v1323_v16 }
 0x4db   : > { %v1452_v21 = vpop.permute.xlu0 %1451 }
 0x4dc   : > { %v1457_v23 = vsel %vm1341_vm2, %v1452_v21, 0 }
 0x4de   : > { %v2968_v18 = vpop.eup %2967 }
 0x4df   : > { %v1332_v20 = vmul.f32 %v2968_v18, %v2960_v1 }
 0x4e1   : > { %v1335_v22 = vpack.c.bf16 %v1332_v20, %v1331_v19 }
 0x4e2   : > { %v2970_v27 = vpop.eup %2969 }
 0x4e3   : > { %2721 = vmatmul.mubr.msk.bf16.vlgmr.msra.gmra.mrb[12].mxu0 %vm1290_vm4, %v1335_v22  ;;  %v1449_v24 = vrot.slane %v1335_v22, 4  ;;  %v1333_v30 = vmul.f32 %v2970_v27, %v2962_v3  ;;  %v2918_v27 = vld [vmem:[%s3310_s26 + $0x10] ss:$8 sps:$4 sm:$0xff]  }
 0x4e4   : > { %2733 = vmatpush3.bf16.msra.mxu0 %v1457_v23  ;;  %2734 = vmatprep.mubr.msk.bf16.mxu0 %vm3087_vm0, %v3085_v7 }
 0x4e5   : > { %2746 = vmatprep.subr.bf16.mxu0 %v3085_v7 }
 0x4eb   : > { %2735 = vmatmul.mubr.msk.bf16.vlgmr.msra.gmra.mrb[16].mxu0 %vm1290_vm4, %v1449_v24  ;;  %v2915_v24 = vld [vmem:[%s3310_s26] ss:$8 sps:$4 sm:$0xff]  }
 0x4ec   : > { %2747 = vmatpush3.bf16.msra.mxu0 %v1562_v25  ;;  %2748 = vmatprep.mubr.msk.bf16.mxu0 %vm3087_vm0, %v3085_v7  ;;  %v2917_v25 = vld [vmem:[%s3310_s26 + $0x4] ss:$8 sps:$4 sm:$0xff]  }
 0x4ed   : > { %2760 = vmatprep.subr.bf16.mxu0 %v3085_v7 }
 0x508   : > { %v1326_v26 = vpop.xlane.xlu1 %1325 }
 0x509   : > { %2971 = vrcp.f32 %v1326_v26  ;;  %v2920_v26 = vld [vmem:[%s3310_s26 + $0x14] ss:$8 sps:$4 sm:$0xff]  }
 0x50c   : > { %v1664_v32 = vpop.permute.xlu1 %1663 }
 0x50d   : > { %v1669_v34 = vsel %vm1341_vm2, %v1664_v32, 0 }
 0x513   : > { %v2972_v28 = vpop.eup %2971 }
 0x514   : > { %v1334_v31 = vmul.f32 %v2972_v28, %v2964_v10  ;;  %v2923_v28 = vld [vmem:[%s3310_s26 + $0x24] ss:$8 sps:$4 sm:$0xff]  }
 0x516   : > { %v1336_v33 = vpack.c.bf16 %v1334_v31, %v1333_v30  ;;  %v2921_v30 = vld [vmem:[%s3310_s26 + $0x20] ss:$8 sps:$4 sm:$0xff]  }
 0x518   : > { %2749 = vmatmul.mubr.msk.bf16.vlgmr.msra.gmra.mrb[20].mxu0 %vm1290_vm4, %v1336_v33  ;;  %v1662_v35 = vrot.slane %v1336_v33, 4 }
 0x519   : > { %2761 = vmatpush3.bf16.msra.mxu0 %v1669_v34  ;;  %2762 = vmatprep.mubr.msk.bf16.mxu0 %vm3087_vm0, %v3085_v7  ;;  %v2926_v34 = vld [vmem:[%s3310_s26 + $0x34] ss:$8 sps:$4 sm:$0xff]  }
 0x51a   : > { %1938 = vmatprep.subr.bf16.mxu0 %v2917_v25 }
 0x520   : > { %2763 = vmatmul.mubr.msk.bf16.vlgmr.msra.gmra.mrb[24].mxu0 %vm1290_vm4, %v1662_v35  ;;  %v2924_v35 = vld [vmem:[%s3310_s26 + $0x30] ss:$8 sps:$4 sm:$0xff]  }
 0x521   : > { %1970 = vmatprep.mubr.bf16.mxu0 %v3086_v29  ;;  %1939 = vmatpush1.bf16.msra.mxu0 %v2915_v24 }
 0x522   : > { %1940 = vmatprep.subr.bf16.mxu0 %v2920_v26 }
 0x525   : > { %1941 = vmatpush1.bf16.msra.mxu0 %v2918_v27 }
 0x526   : > { %1942 = vmatprep.subr.bf16.mxu0 %v2923_v28 }
 0x529   : > { %1943 = vmatpush1.bf16.msra.mxu0 %v2921_v30 }
 0x52a   : > { %1944 = vmatprep.subr.bf16.mxu0 %v2926_v34 }
 0x52d   : > { %1945 = vmatpush1.bf16.msra.mxu0 %v2924_v35 }
 0x52e   : > { %1946 = vmatprep.subr.bf16.mxu0 %v2929_v36 }
 0x5b6   : > { %v1379_v37 = vpop.f32.mrb[12].mxu0 }
 0x5b7   : > { %v1385_v39 = vpack.c.bf16 %v1379_v37, %v1379_v37  ;;  %v2722_v40 = vpop.f32.mrb[13].mxu0  ;;  %v2927_v37 = vld [vmem:[%s3310_s26 + $0x40] ss:$8 sps:$4 sm:$0xff]  }
 0x5b8   : > { %v1382_v41 = vpop.f32.mrb[14].mxu0  ;;  %1947 = vmatpush1.bf16.msra.mxu0 %v2927_v37  ;;  %v2935_v40 = vld [vmem:[%s3310_s26 + $0x64] ss:$8 sps:$4 sm:$0xff]   ;;  %v2571_v37 = vld [vmem:[%s753_s28] ss:$0 sm:$0xff] }
 0x5b9   : > { %v2723_v42 = vpop.f32.mrb[15].mxu0  ;;  %2729 = vmatmul.mubr.msk.bf16.vlgmr.msra.gmra.mrb[12].mxu1 %vm1072_vm1, %v1385_v39  ;;  %v2930_v39 = vld [vmem:[%s3310_s26 + $0x50] ss:$8 sps:$4 sm:$0xff]   ;;  %v2933_v41 = vld [vmem:[%s3310_s26 + $0x60] ss:$8 sps:$4 sm:$0xff]  }
 0x5ba   : > { %2739 = vmatpush3.bf16.msra.mxu1 %v2909_v38  ;;  %2742 = vmatprep.mubr.msk.bf16.mxu1 %vm3087_vm0, %v3085_v7  ;;  %v2932_v38 = vld [vmem:[%s3310_s26 + $0x54] ss:$8 sps:$4 sm:$0xff]  }
 0x5bb   : > { %2740 = vmatprep.subr.bf16.mxu1 %v3085_v7  ;;  %1948 = vmatprep.subr.bf16.mxu0 %v2932_v38  ;;  %v2938_v42 = vld [vmem:[%s3310_s26 + $0x74] ss:$8 sps:$4 sm:$0xff]  }
 0x5bc   : > { %1949 = vmatpush1.bf16.msra.mxu0 %v2930_v39 }
 0x5bd   : > { %1950 = vmatprep.subr.bf16.mxu0 %v2935_v40 }
 0x5be   : > { %v1493_v29 = vpop.f32.mrb[16].mxu0  ;;  %2741 = vmatpush3.bf16.msra.mxu1 %v2910_v43  ;;  %v2936_v43 = vld [vmem:[%s3310_s26 + $0x70] ss:$8 sps:$4 sm:$0xff]  }
 0x5bf   : > { %v1499_v45 = vpack.c.bf16 %v1493_v29, %v1493_v29  ;;  %v2736_v48 = vpop.f32.mrb[17].mxu0  ;;  %2752 = vmatprep.subr.bf16.mxu1 %v3085_v7 }
 0x5c0   : > { %v1496_v50 = vpop.f32.mrb[18].mxu0  ;;  %1951 = vmatpush1.bf16.msra.mxu0 %v2933_v41 }
 0x5c1   : > { %v2737_v51 = vpop.f32.mrb[19].mxu0  ;;  %2743 = vmatmul.mubr.msk.bf16.vlgmr.msra.gmra.mrb[16].mxu1 %vm1072_vm1, %v1499_v45  ;;  %1952 = vmatprep.subr.bf16.mxu0 %v2938_v42  ;;  %v2553_v50 = vld [vmem:[%s3709_s0] ss:$0 sm:$0xff] }
 0x5c2   : > { %2753 = vmatpush3.bf16.msra.mxu1 %v2911_v44  ;;  %2756 = vmatprep.mubr.msk.bf16.mxu1 %vm3087_vm0, %v3085_v7 }
 0x5c3   : > { %2754 = vmatprep.subr.bf16.mxu1 %v3085_v7 }
 0x5c4   : > { %1953 = vmatpush1.bf16.msra.mxu0 %v2936_v43 }
 0x5c6   : > { %2755 = vmatpush3.bf16.msra.mxu1 %v2912_v52  ;;  %v2554_v52 = vld [vmem:[%s3710_s25] ss:$0 sm:$0xff] }
 0x5c7   : > { %2766 = vmatprep.subr.bf16.mxu1 %v3085_v7 }
 0x5eb   : > { %v1598_v53 = vpop.f32.mrb[20].mxu0 }
 0x5ec   : > { %v1604_v55 = vpack.c.bf16 %v1598_v53, %v1598_v53  ;;  %v2750_v56 = vpop.f32.mrb[21].mxu0 }
 0x5ed   : > { %v1601_v57 = vpop.f32.mrb[22].mxu0  ;;  %v2939_v56 = vld [vmem:[%s3320_s3 + $0x40] sm:$0xff]  }
 0x5ee   : > { %v2751_v58 = vpop.f32.mrb[23].mxu0  ;;  %2757 = vmatmul.mubr.msk.bf16.vlgmr.msra.gmra.mrb[20].mxu1 %vm1072_vm1, %v1604_v55  ;;  %v2940_v57 = vld [vmem:[%s3320_s3] sm:$0xff]  }
 0x5ef   : > { %2767 = vmatpush3.bf16.msra.mxu1 %v2913_v54  ;;  %2770 = vmatprep.mubr.msk.bf16.mxu1 %vm3087_vm0, %v3085_v7  ;;  %v2941_v58 = vld [vmem:[%s3320_s3 + $0x48] sm:$0xff]  }
 0x5f0   : > { %2768 = vmatprep.subr.bf16.mxu1 %v3085_v7 }
 0x5f3   : > { %v1705_v60 = vpop.f32.mrb[24].mxu0  ;;  %2769 = vmatpush3.bf16.msra.mxu1 %v2914_v59  ;;  %v2942_v59 = vld [vmem:[%s3320_s3 + $0x8] sm:$0xff]  }
 0x5f4   : > { %v1711_v61 = vpack.c.bf16 %v1705_v60, %v1705_v60  ;;  %v2764_v62 = vpop.f32.mrb[25].mxu0  ;;  %2643 = vmatprep.subr.bf16.mxu1 %v2939_v56  ;;  %v2943_v60 = vld [vmem:[%s3320_s3 + $0x50] sm:$0xff]  }
 0x5f5   : > { %v1708_v63 = vpop.f32.mrb[26].mxu0  ;;  %v2945_v62 = vld [vmem:[%s3320_s3 + $0x58] sm:$0xff]   ;;  %v2985_v56 = vld [vmem:[%s3712_s20 + $0x30] sm:$0xff] (!%p2588_p1)  }
 0x5f6   : > { %v2765_v0 = vpop.f32.mrb[27].mxu0  ;;  %2771 = vmatmul.mubr.msk.bf16.vlgmr.msra.gmra.mrb[24].mxu1 %vm1072_vm1, %v1711_v61  ;;  %v2944_v61 = vld [vmem:[%s3320_s3 + $0x10] sm:$0xff]   ;;  %v2946_v63 = vld [vmem:[%s3320_s3 + $0x18] sm:$0xff]  }
 0x5f7   : > { %2644 = vmatpush3.bf16.msra.mxu1 %v2940_v57  ;;  %v2947_v0 = vld [vmem:[%s3320_s3 + $0x60] sm:$0xff]   ;;  %v2986_v57 = vld [vmem:[%s3712_s20 + $0x38] sm:$0xff] (!%p2588_p1)  }
 0x5f8   : > { %2645 = vmatprep.subr.bf16.mxu1 %v2941_v58 }
 0x5fb   : > { %2646 = vmatpush3.bf16.msra.mxu1 %v2942_v59 }
 0x5fc   : > { %2647 = vmatprep.subr.bf16.mxu1 %v2943_v60 }
 0x5ff   : > { %2648 = vmatpush3.bf16.msra.mxu1 %v2944_v61 }
 0x600   : > { %2649 = vmatprep.subr.bf16.mxu1 %v2945_v62 }
 0x603   : > { %2650 = vmatpush3.bf16.msra.mxu1 %v2946_v63 }
 0x604   : > { %2651 = vmatprep.subr.bf16.mxu1 %v2947_v0  ;;  %v2590_v0 = vld [vmem:[%s3714_s16] ss:$0 sm:$0xff] (!%p2588_p1) }
 0x68c   : > { %v1435_v1 = vpop.f32.mrb[12].mxu1 }
 0x68d   : > { %v2730_v2 = vpop.f32.mrb[13].mxu1  ;;  %v1447_v8 = vadd.f32 %v2540_v6, %v1435_v1  ;;  %v2948_v1 = vld [vmem:[%s3320_s3 + $0x20] sm:$0xff]   ;;  %v2952_v6 = vld [vmem:[%s3320_s3 + $0x30] sm:$0xff]  }
 0x68e   : > { %v1438_v3 = vpop.f32.mrb[14].mxu1  ;;  %v2949_v2 = vld [vmem:[%s3320_s3 + $0x68] sm:$0xff]   ;;  %2652 = vmatpush3.bf16.msra.mxu1 %v2948_v1 }
 0x68f   : > { %v2731_v5 = vpop.f32.mrb[15].mxu1  ;;  %v2950_v3 = vld [vmem:[%s3320_s3 + $0x28] sm:$0xff]   ;;  %2653 = vmatprep.subr.bf16.mxu1 %v2949_v2 }
 0x690   : > { %v2951_v5 = vld [vmem:[%s3320_s3 + $0x70] sm:$0xff]  }
 0x692   : > { %2654 = vmatpush3.bf16.msra.mxu1 %v2950_v3 }
 0x693   : > { %2655 = vmatprep.subr.bf16.mxu1 %v2951_v5 }
 0x694   : > { %v1549_v9 = vpop.f32.mrb[16].mxu1 }
 0x695   : > { %v1555_v7 = vadd.f32 %v1549_v9, %v1447_v8  ;;  %v2744_v10 = vpop.f32.mrb[17].mxu1  ;;  %v2953_v8 = vld [vmem:[%s3320_s3 + $0x78] sm:$0xff]  }
 0x696   : > { %v1552_v11 = vpop.f32.mrb[18].mxu1  ;;  %2656 = vmatpush3.bf16.msra.mxu1 %v2952_v6  ;;  %v2954_v9 = vld [vmem:[%s3320_s3 + $0x38] sm:$0xff]   ;;  %s3713_s3 = sld [smem:[#allocation25_spill]] (!%p2588_p1) }
 0x697   : > { %v2745_v12 = vpop.f32.mrb[19].mxu1  ;;  %2657 = vmatprep.subr.bf16.mxu1 %v2953_v8 }
 0x69a   : > { %2658 = vmatpush3.bf16.msra.mxu1 %v2954_v9 }
 0x69c   : > { %v2589_v62 = vld [vmem:[%s3713_s3] ss:$0 sm:$0xff] (!%p2588_p1) }
 0x6c1   : > { %v1654_v14 = vpop.f32.mrb[20].mxu1 }
 0x6c2   : > { %v1660_v15 = vadd.f32 %v1654_v14, %v1555_v7  ;;  %v2758_v16 = vpop.f32.mrb[21].mxu1  ;;  %v1812_v7 = vld [vmem:[%s3315_s21] sm:$0x3] }
 0x6c3   : > { %v1657_v17 = vpop.f32.mrb[22].mxu1  ;;  %v1851_v10 = vrot.slane %v1812_v7, %v847_v47  ;;  %v1855_v11 = vrot.slane %v1812_v7, %v851_v49 }
 0x6c4   : > { %v2759_v18 = vpop.f32.mrb[23].mxu1 }
 0x6c9   : > { %v1761_v19 = vpop.f32.mrb[24].mxu1 }
 0x6ca   : > { %v1767_v20 = vadd.f32 %v1761_v19, %v1660_v15  ;;  %v2772_v21 = vpop.f32.mrb[25].mxu1 }
 0x6cb   : > { %v1764_v22 = vpop.f32.mrb[26].mxu1 }
 0x6cc   : > { %v3494_v23 = vadd.f32 %v1767_v20, %v3331_v4  ;;  %v2773_v13 = vpop.f32.mrb[27].mxu1 }
 0x6ce   : > { %1771 = vadd.xlane.f32.xlu0 %v3494_v23 }
 0x75b   : > { %v1772_v4 = vpop.xlane.xlu0 %1771 }
 0x75c   : > { %v1773_v31 = vmul.f32 0.0078125, %v1772_v4 }
 0x75e   : > { %v1774_v32 = vsub.f32 %v3494_v23, %v1773_v31 }
 0x760   : > { %v1775_v33 = vmul.f32 %v1774_v32, %v1774_v32 }
 0x762   : > { %1776 = vadd.xlane.f32.xlu1 %v1775_v33 }
 0x7ef   : > { %v1777_v29 = vpop.xlane.xlu1 %1776 }
 0x7f0   : > { %v1778_v44 = vmul.f32 0.0078125, %v1777_v29  ;;  %v2979_v29 = vld [vmem:[%s3712_s20] sm:$0xff] (!%p2588_p1)  }
 0x7f2   : > { %v1779_v45 = vadd.f32 1e-05, %v1778_v44  ;;  %v3091_v44 = vmov (!%p2588_p1), 0.0  }
 0x7f3   : > { %2774 = vmatprep.subr.bf16.mxu0 (!%p2588_p1), %v3091_v44 }
 0x7f4   : > { %2973 = vrsqrt.f32 %v1779_v45  ;;  %v2980_v45 = vld [vmem:[%s3712_s20 + $0x8] sm:$0xff] (!%p2588_p1)  }
 0x7fe   : > { %v2974_v48 = vpop.eup %2973 }
 0x7ff   : > { %v1781_v51 = vmul.f32 %v2974_v48, %v1774_v32 }
 0x801   : > { %v1788_v53 = vmul.f32 %v2553_v50, %v1781_v51 }
 0x803   : > { %v1795_v54 = vadd.f32 %v2554_v52, %v1788_v53  ;;  %v2981_v52 = vld [vmem:[%s3712_s20 + $0x10] sm:$0xff] (!%p2588_p1)   ;;  %v2982_v53 = vld [vmem:[%s3712_s20 + $0x18] sm:$0xff] (!%p2588_p1)  }
 0x805   : > { %v1846_v55 = vpack.c.bf16 %v1795_v54, %v1795_v54  ;;  %v2983_v54 = vld [vmem:[%s3712_s20 + $0x20] sm:$0xff] (!%p2588_p1)  }
 0x807   : > { %1971 = vmatmul.mubr.bf16.vlgmr.msra.gmra.mrb[28].mxu0 %v1846_v55  ;;  %v2984_v55 = vld [vmem:[%s3712_s20 + $0x28] sm:$0xff] (!%p2588_p1)  }
 0x808   : > { %2775 = vmatpush3.bf16.msra.mxu0 (!%p2588_p1), %v2979_v29  ;;  %2790 = vmatprep.mubr.msk.bf16.mxu0 (!%p2588_p1), %vm3092_vm8, %v3091_v44 }
 0x809   : > { %2776 = vmatprep.subr.bf16.mxu0 (!%p2588_p1), %v3091_v44 }
 0x80c   : > { %2777 = vmatpush3.bf16.msra.mxu0 (!%p2588_p1), %v2980_v45 }
 0x80d   : > { %2778 = vmatprep.subr.bf16.mxu0 (!%p2588_p1), %v3091_v44 }
 0x810   : > { %2779 = vmatpush3.bf16.msra.mxu0 (!%p2588_p1), %v2981_v52 }
 0x811   : > { %2780 = vmatprep.subr.bf16.mxu0 (!%p2588_p1), %v3091_v44 }
 0x814   : > { %2781 = vmatpush3.bf16.msra.mxu0 (!%p2588_p1), %v2982_v53 }
 0x815   : > { %2782 = vmatprep.subr.bf16.mxu0 (!%p2588_p1), %v3091_v44 }
 0x818   : > { %2783 = vmatpush3.bf16.msra.mxu0 (!%p2588_p1), %v2983_v54 }
 0x819   : > { %2784 = vmatprep.subr.bf16.mxu0 (!%p2588_p1), %v3091_v44 }
 0x81c   : > { %2785 = vmatpush3.bf16.msra.mxu0 (!%p2588_p1), %v2984_v55 }
 0x81d   : > { %2786 = vmatprep.subr.bf16.mxu0 (!%p2588_p1), %v3091_v44 }
 0x820   : > { %2787 = vmatpush3.bf16.msra.mxu0 (!%p2588_p1), %v2985_v56 }
 0x821   : > { %2788 = vmatprep.subr.bf16.mxu0 (!%p2588_p1), %v3091_v44 }
 0x824   : > { %2789 = vmatpush3.bf16.msra.mxu0 (!%p2588_p1), %v2986_v57 }
 0x8da   : > { %v1972_v12 = vpop.f32.mrb[28].mxu0 }
 0x8db   : > { %v1973_v14 = vadd.f32 %v1972_v12, %v1851_v10  ;;  %v1974_v15 = vpop.f32.mrb[29].mxu0 }
 0x8dc   : > { %v1975_v16 = vadd.f32 %v1974_v15, %v1855_v11  ;;  %v1976_v17 = vpop.f32.mrb[30].mxu0 }
 0x8dd   : > { %v1981_v18 = vmul.f32 0.044715, %v1973_v14  ;;  %v1977_v19 = vpop.f32.mrb[31].mxu0  ;;  %v1979_v49 = vmul.f32 0.5, %v1973_v14 }
 0x8de   : > { %v1982_v20 = vmul.f32 0.044715, %v1975_v16  ;;  %v1980_v4 = vmul.f32 0.5, %v1975_v16 }
 0x8df   : > { %v1983_v21 = vmul.f32 %v1981_v18, %v1973_v14 }
 0x8e0   : > { %v1984_v22 = vmul.f32 %v1982_v20, %v1975_v16 }
 0x8e1   : > { %v1985_v13 = vmul.f32 %v1983_v21, %v1973_v14 }
 0x8e2   : > { %v1986_v24 = vmul.f32 %v1984_v22, %v1975_v16 }
 0x8e3   : > { %v1987_v25 = vadd.f32 %v1985_v13, %v1973_v14 }
 0x8e4   : > { %v1988_v26 = vadd.f32 %v1986_v24, %v1975_v16 }
 0x8e5   : > { %v1989_v27 = vmul.f32 0.7978846, %v1987_v25 }
 0x8e6   : > { %v1990_v28 = vmul.f32 0.7978846, %v1988_v26 }
 0x8e7   : > { %2975 = vtanh.f32 %v1989_v27 }
 0x8e8   : > { %2977 = vtanh.f32 %v1990_v28 }
 0x8f1   : > { %v2976_v46 = vpop.eup %2975 }
 0x8f2   : > { %v2978_v47 = vpop.eup %2977  ;;  %v1993_v30 = vadd.f32 1.0, %v2976_v46 }
 0x8f3   : > { %v1994_v31 = vadd.f32 1.0, %v2978_v47 }
 0x8f4   : > { %v1995_v32 = vmul.f32 %v1993_v30, %v1979_v49 }
 0x8f5   : > { %v1996_v33 = vmul.f32 %v1994_v31, %v1980_v4 }
 0x8f6   : > { %v1997_v35 = vpack.c.bf16 %v1995_v32, %v1995_v32 }
 0x8f7   : > { %v1998_v34 = vpack.c.bf16 %v1996_v33, %v1996_v33 }
 0x8f9   : > { %2133 = vmatprep.mubr.bf16.mxu1 %v1998_v34 }
 0x8fa   : > { %2134 = vmatmul.mubr.bf16.vlgmr.msra.gmra.mrb[28].mxu1 %v1997_v35 }
 0x9cd   : > { %v2659_v36 = vpop.f32.mrb[28].mxu1 }
 0x9ce   : > { %v2660_v38 = vpop.f32.mrb[29].mxu1 }
 0x9cf   : > { %v2661_v39 = vadd.f32 %v2660_v38, %v2659_v36  ;;  %v2662_v40 = vpop.f32.mrb[30].mxu1  ;;  %2146 = sbr.rel (%p2588_p1) target bundleno = 3045 (0xbe5), region = 96 }
 0x9d0   : > { %v2663_v41 = vpop.f32.mrb[31].mxu1 }
 0x9d1   : > { %v2136_v42 = vadd.f32 %v2661_v39, %v2571_v37 }
 0x9d3   : > { %v2141_v43 = vadd.f32 %v2136_v42, %v3494_v23 }
 0x9d5   : > { %2142 = vst [vmem:[#allocation2] sm:$0xff] %v2141_v43  ;;  %2149 = vadd.xlane.f32.xlu0 (!%p2588_p1), %v2141_v43 }
 0xa62   : > { %v2150_v23 = vpop.xlane.xlu0 %2149 }
 0xa63   : > { %v2151_v48 = vmul.f32 0.0078125, %v2150_v23 }
 0xa65   : > { %v2152_v50 = vsub.f32 %v2141_v43, %v2151_v48 }
 0xa67   : > { %v2153_v51 = vmul.f32 %v2152_v50, %v2152_v50 }
 0xa69   : > { %2154 = vadd.xlane.f32.xlu0 %v2153_v51 }
 0xaf6   : > { %v2155_v58 = vpop.xlane.xlu0 %2154 }
 0xaf7   : > { %v2156_v59 = vmul.f32 0.0078125, %v2155_v58 }
 0xaf9   : > { %v2157_v60 = vadd.f32 1e-05, %v2156_v59 }
 0xafb   : > { %2987 = vrsqrt.f32 %v2157_v60 }
 0xb05   : > { %v2988_v61 = vpop.eup %2987 }
 0xb06   : > { %v2159_v63 = vmul.f32 %v2988_v61, %v2152_v50 }
 0xb08   : > { %v2166_v1 = vmul.f32 %v2589_v62, %v2159_v63 }
 0xb0a   : > { %v2173_v2 = vadd.f32 %v2590_v0, %v2166_v1 }
 0xb0c   : > { %v2174_v3 = vpack.c.bf16 %v2173_v2, %v2173_v2 }
 0xb0e   : > { %2791 = vmatmul.mubr.bf16.vlgmr.msra.gmra.mrb[0].mxu0 %v2174_v3 }
 0xbe1   : > { %v2273_v5 = vpop.f32.mrb[0].mxu0 }
 0xbe2   : > { %2279 = vst [vmem:[%s703_s4] sm:$0xff] %v2273_v5  ;;  %v2792_v6 = vpop.f32.mrb[1].mxu0 }
 0xbe3   : > { %v2276_v8 = vpop.f32.mrb[2].mxu0 }
 0xbe4   : > { %v2793_v9 = vpop.f32.mrb[3].mxu0 }
 0xbe5 PF: > { %s3715_s24 = sld [smem:[#allocation10_spill]]  ;;  %s3716_s28 = sld [smem:[#allocation7_spill]] }
 0xbe6   : > { %s3718_s18 = sld [smem:[#allocation28_spill]]  ;;  %s2294_s23 = sshll.u32 %s703_s4, 4  ;;  %s2295_s23 = int_to_ptr.vmem [resolvable:$true] %s2294_s23 }
 0xbe7   : > { %s2989_s0 = scalar_lea.vmem %s2295_s23, 128  ;;  %s3093_s5 = smov [#allocation3]  }
 0xbe8   : > { %p2990_p2 = scmp.ne.s32.totalorder %s2295_s23, %s2989_s0  ;;  %s2993_s26 = sshll.u32 %s3093_s5, 4  ;;  %s2994_s26 = int_to_ptr.vmem [resolvable:$false] %s2993_s26 }
 0xbe9   : > { %s2995_s25 = scalar_lea.vmem %s2994_s26, 256  ;;  %p2996_p6 = scmp.lt.s32.totalorder %s2295_s23, %s2994_s26 }
 0xbea   : > { %p2991_p4 = pnand %p2990_p2, %p3233_p3  ;;  %p2997_p7 = scmp.lt.s32.totalorder %s2995_s25, %s2989_s0 }
 0xbeb   : > { %s2600_s17 = sshll.u32 %s3715_s24, 7  ;;  %s3719_s27 = sand.u32 1, %s3716_s28  }
 0xbec   : > { %s3588_s30 = scalar_lea.hbm %s3718_s18, %s2600_s17  ;;  %s2281_s6 = scalar_lea.sflag [#allocation4], %s3719_s27 }
 0xbed   : > { %p2992_p5 = pneg %p2991_p4  ;;  %p2998_p8 = por %p2997_p7, %p2996_p6 }
 0xbef   : > { %p2999_p10 = pnand %p2998_p8, %p2992_p5 }
 0xbf1   : > { %3002 = shalt.err (!%p2999_p10)
}
 0xbf2   : > { %s3003_s4 = scalar_lea.hbm %s3588_s30, 128  ;;  %s3007_s3 = scalar_lea.hbm %s3718_s18, 256 }
 0xbf3   : > { %p3004_p11 = scmp.ne.s32.totalorder %s3588_s30, %s3003_s4  ;;  %p3008_p0 = scmp.lt.u32.totalorder %s3588_s30, %s3718_s18 }
 0xbf4   : > { %p3009_p1 = scmp.lt.u32.totalorder %s3007_s3, %s3003_s4  ;;  %p3011_p4 = scmp.lt.u32.totalorder %s3003_s4, %s3588_s30 }
 0xbf5   : > { %p3005_p12 = pnand %p3004_p11, %p3233_p3 }
 0xbf6   : > { %p3010_p2 = por %p3009_p1, %p3008_p0 }
 0xbf7   : > { %p3006_p13 = pneg %p3005_p12 }
 0xbf8   : > { %p3012_p5 = por %p3011_p4, %p3010_p2 }
 0xbfa   : > { %p3013_p6 = pnand %p3012_p5, %p3006_p13 }
 0xbfc   : > { %3016 = shalt.err (!%p3013_p6)
}
 0xbfd   : > { %2796 = dma.vmem_to_hbm [thread:$0]  (%p3233_p3), %s2295_s23, 128, %s3588_s30, %s2281_s6  }
 0xbfe PF: > { %s3720_s16 = sld [smem:[#allocation13_spill]]  ;;  %s3721_s24 = sld [smem:[#allocation6_spill]] }
 0xc04   : > { %p2802_p7 = scmp.ge.s32.totalorder %s3720_s16, 2  ;;  %s2306_s17 = sand.u32 1, %s3721_s24  }
 0xc05   : > { %s2307_s15 = scalar_lea.sflag [#allocation4], %s2306_s17 }
 0xc06   : > { %p2799_p8 = pnand %p2802_p7, %p3243_p9 }
 0xc08   : > { %3050 = dma.done.wait (!%p2799_p8), %s2307_s15, 128  }
 0xc09   : > { %3052 = vsyncadd (!%p2799_p8), %s2307_s15, 4294967168  ;;  %s30_s30 = sadd.s32 1, %s3720_s16   ;;  %s3723_s24 = sld [smem:[#allocation7_spill]] }
 0xc0a   : > { %p27_p10 = scmp.ge.s32.totalorder %s30_s30, 6   ;;  %s3724_s25 = sld [smem:[#allocation8_spill]] }
 0xc0b   : > { %s3725_s26 = sld [smem:[#allocation18_spill]]  ;;  %s3726_s27 = sld [smem:[#allocation11_spill]] }
 0xc0c   : > { %s3727_s28 = sld [smem:[#allocation12_spill]]  ;;  %s3728_s29 = sld [smem:[#allocation14_spill]] }
 0xc0d   : > { %s3729_s0 = sld [smem:[#allocation16_spill]]  ;;  %29 = sbr.rel (!%p27_p10) target bundleno = 16 (0x10), region = 167 }
 0xc14   :  { %2312 = vsyncpa [#allocation4], 1 }
 0xc15   :  { %2314 = vsyncpa [#allocation4 + $0x1], 1 }

// kernel: _lambda_.4
= control target key start
LH: loop header
LB: loop body
LE: loop exit
PB: predicated region body
PF: predicated region fallthrough
CT: control target
= control target key end

     0   :  { %s4773_s29 = smov 0   ;;  %s4779_s30 = smov 0   ;;  %s5355_s0 = inlined_call_operand.vmem [shape: f32[2,8,128], index: 0, kind: input, shape index: {}]   ;;  %s5356_s1 = inlined_call_operand.vmem [shape: f32[2,1,8], index: 1, kind: input, shape index: {}]   ;;  %s5357_s2 = inlined_call_operand.vmem [shape: bf16[2,24,128], index: 2, kind: input, shape index: {}]   ;;  %s5358_s3 = inlined_call_operand.vmem [shape: f32[1,128], index: 3, kind: input, shape index: {}]   ;;  %s5359_s4 = inlined_call_operand.vmem [shape: f32[1,128], index: 4, kind: input, shape index: {}]   ;;  %s5360_s5 = inlined_call_operand.vmem [shape: f32[2,1,128], index: 5, kind: input, shape index: {}, may-alias: {5,11,19}]   ;;  %s5361_s6 = inlined_call_operand.vmem [shape: f32[2,1,128], index: 6, kind: input, shape index: {}, may-alias: {6,10,12,14,18,20,24}]   ;;  %s5362_s7 = inlined_call_operand.vmem [shape: bf16[2,128,384], index: 7, kind: input, shape index: {}]   ;;  %s5363_s8 = inlined_call_operand.vmem [shape: f32[2,1,384], index: 8, kind: input, shape index: {}]   ;;  %s5364_s9 = inlined_call_operand.vmem [shape: bf16[2,128,128], index: 9, kind: input, shape index: {}]   ;;  %s5365_s10 = inlined_call_operand.vmem [shape: f32[2,1,128], index: 10, kind: input, shape index: {}, may-alias: {6,10,12,14,18,20,24}]   ;;  %s5366_s11 = inlined_call_operand.vmem [shape: f32[2,1,128], index: 11, kind: input, shape index: {}, may-alias: {5,11,19}]   ;;  %s5367_s12 = inlined_call_operand.vmem [shape: f32[2,1,128], index: 12, kind: input, shape index: {}, may-alias: {6,10,12,14,18,20,24}]   ;;  %s5368_s13 = inlined_call_operand.vmem [shape: bf16[2,128,128], index: 13, kind: input, shape index: {}]   ;;  %s5369_s14 = inlined_call_operand.vmem [shape: f32[2,1,128], index: 14, kind: input, shape index: {}, may-alias: {6,10,12,14,18,20,24}]   ;;  %s5370_s15 = inlined_call_operand.vmem [shape: bf16[2,128,256], index: 15, kind: input, shape index: {}]   ;;  %s5371_s16 = inlined_call_operand.vmem [shape: f32[2,1,256], index: 16, kind: input, shape index: {}, may-alias: {16,22}]   ;;  %s5372_s17 = inlined_call_operand.vmem [shape: bf16[2,128,128], index: 17, kind: input, shape index: {}]   ;;  %s5373_s18 = inlined_call_operand.vmem [shape: f32[2,1,128], index: 18, kind: input, shape index: {}, may-alias: {6,10,12,14,18,20,24}]   ;;  %s5374_s19 = inlined_call_operand.vmem [shape: f32[2,1,128], index: 19, kind: input, shape index: {}, may-alias: {5,11,19}]   ;;  %s5375_s20 = inlined_call_operand.vmem [shape: f32[2,1,128], index: 20, kind: input, shape index: {}, may-alias: {6,10,12,14,18,20,24}]   ;;  %s5376_s21 = inlined_call_operand.vmem [shape: bf16[2,128,256], index: 21, kind: input, shape index: {}]   ;;  %s5377_s22 = inlined_call_operand.vmem [shape: f32[2,1,256], index: 22, kind: input, shape index: {}, may-alias: {16,22}]   ;;  %s5378_s23 = inlined_call_operand.vmem [shape: bf16[2,256,128], index: 23, kind: input, shape index: {}]   ;;  %s5379_s24 = inlined_call_operand.vmem [shape: f32[2,1,128], index: 24, kind: input, shape index: {}, may-alias: {6,10,12,14,18,20,24}]   ;;  %s5380_s25 = inlined_call_operand.vmem [shape: bf16[2,8,128], index: 25, kind: output, shape index: {}]  }
   0x1   :  { %5386 = sst [smem:[#allocation12_spill]] %s5355_s0 }
   0x2   :  { %5387 = sst [smem:[#allocation13_spill]] %s5356_s1 }
   0x3   :  { %5388 = sst [smem:[#allocation14_spill]] %s5357_s2  ;;  %s4775_s2 = smov 0  }
   0x4   :  { %5389 = sst [smem:[#allocation15_spill]] %s5358_s3 }
   0x5   :  { %5390 = sst [smem:[#allocation16_spill]] %s5359_s4 }
   0x6   :  { %5391 = sst [smem:[#allocation17_spill]] %s5360_s5 }
   0x7   :  { %5392 = sst [smem:[#allocation18_spill]] %s5361_s6  ;;  %s4777_s6 = smov 0  }
   0x8   :  { %5393 = sst [smem:[#allocation19_spill]] %s5362_s7  ;;  %s4781_s7 = smov 0  }
   0x9   :  { %5394 = sst [smem:[#allocation20_spill]] %s5363_s8 }
   0xa   :  { %5395 = sst [smem:[#allocation21_spill]] %s5364_s9 }
   0xb   :  { %5396 = sst [smem:[#allocation22_spill]] %s5366_s11 }
   0xc   :  { %5397 = sst [smem:[#allocation23_spill]] %s5367_s12 }
   0xd   :  { %5398 = sst [smem:[#allocation24_spill]] %s5368_s13 }
   0xe   :  { %5399 = sst [smem:[#allocation25_spill]] %s5369_s14 }
   0xf   :  { %5400 = sst [smem:[#allocation26_spill]] %s5370_s15 }
  0x10   :  { %5401 = sst [smem:[#allocation27_spill]] %s5371_s16 }
  0x11   :  { %5402 = sst [smem:[#allocation28_spill]] %s5372_s17 }
  0x12   :  { %5403 = sst [smem:[#allocation29_spill]] %s5373_s18 }
  0x13   :  { %5404 = sst [smem:[#allocation30_spill]] %s5374_s19 }
  0x14   :  { %5405 = sst [smem:[#allocation31_spill]] %s5375_s20 }
  0x15   :  { %5406 = sst [smem:[#allocation32_spill]] %s5376_s21 }
  0x16   :  { %5407 = sst [smem:[#allocation33_spill]] %s5377_s22 }
  0x17   :  { %5408 = sst [smem:[#allocation34_spill]] %s5378_s23 }
  0x18   :  { %5409 = sst [smem:[#allocation35_spill]] %s5379_s24 }
  0x19   :  { %5410 = sst [smem:[#allocation36_spill]] %s5380_s25 }
  0x1a LB: > { %5411 = sst [smem:[#allocation3_spill]] %s4618_s29  ;;  %s44_s3 = sadd.s32 1, %s4626_s6  ;;  %s4634_s7 = sphi %s4781_s7, %s35_s7   ;;  %s4630_s30 = sphi %s4779_s30, %s5471_s30   ;;  %s4626_s6 = sphi %s4777_s6, %s5470_s6   ;;  %s4622_s2 = sphi %s4775_s2, %s5469_s2   ;;  %s4618_s29 = sphi %s4773_s29, %s5468_s29  }
  0x1b   : > { %5412 = sst [smem:[#allocation4_spill]] %s4626_s6  ;;  %s47_s26 = sadd.s32 1, %s4630_s30 }
  0x1c   : > { %5413 = sst [smem:[#allocation5_spill]] %s4630_s30  ;;  %p45_p0 = scmp.ge.s32.totalorder %s44_s3, 2 }
  0x1d   : > { %5414 = sst [smem:[#allocation6_spill]] %s4634_s7  ;;  %p3896_p1 = scmp.ge.s32.totalorder %s4634_s7, 1 }
  0x1e   : > { %p893_p2 = scmp.lt.s32.totalorder %s4634_s7, 5  ;;  %s5473_s3 = smov (%p45_p0, %s44_s3), 0 }
  0x1f   : > { %5415 = sst [smem:[#allocation7_spill]] %s5473_s3  ;;  %s5475_s26 = smov (!%p45_p0, %s47_s26), %s4630_s30 }
  0x20   : > { %p894_p3 = pnand %p3896_p1, %p893_p2  ;;  %p49_p4 = scmp.ge.s32.totalorder %s5475_s26, 2 }
  0x22   : > { %s5477_s26 = smov (%p49_p4, %s5475_s26), 0  ;;  %897 = sbr.rel (%p894_p3) target bundleno = 4498 (0x1192), region = 120 }
  0x23   : > { %5416 = sst [smem:[#allocation8_spill]] %s5477_s26 }
  0x29   : > { %p1044_p5 = scmp.lt.s32.totalorder %s4622_s2, 1  ;;  %p1056_p6 = scmp.lt.s32.totalorder %s4618_s29, 1  ;;  %v1141_v0 = vlaneseq  ;;  %v4636_v3 = vmov -1e+09  }
  0x2a   : > { %s5417_s28 = sld [smem:[#allocation13_spill]]  ;;  %s5418_s26 = sld [smem:[#allocation12_spill]] }
  0x2b   : > { %s5479_s2 = smov (!%p1044_p5, %s4622_s2), 1  ;;  %v1142_v1 = vand.u32 127, %v1141_v0  ;;  %s5422_s0 = sld [smem:[#allocation14_spill]] }
  0x2c   : > { %s4810_s1 = scalar_select %p1056_p6, %s4618_s29, 1 }
  0x2d   : > { %s3897_s8 = sshll.u32 %s5479_s2, 3  ;;  %vm1143_vm0 = vcmp.lt.s32.totalorder %v1142_v1, 17  ;;  %s4380_s30 = smul.u32 12, %s5479_s2 }
  0x2e   : > { %v4823_v4 = vsel %vm1143_vm0, 0.0, %v4636_v3  ;;  %s4382_s24 = smul.u32 3, %s4810_s1  ;;  %s4054_s23 = sshll.u32 %s4810_s1, 6 }
  0x2f   : > { %s5424_s7 = sld [smem:[#allocation19_spill]]  ;;  %s5425_s5 = sld [smem:[#allocation21_spill]] }
  0x30   : > { %s1050_s9 = scalar_lea.vmem %s5417_s28, %s5479_s2  ;;  %s4820_s3 = scalar_lea.vmem %s5418_s26, %s3897_s8 }
  0x31   : > { %5419 = sst [smem:[#allocation9_spill]] %s4820_s3  ;;  %v1138_v2 = vld [vmem:[%s1050_s9] sm:$0x1]  ;;  %s4836_s9 = scalar_lea.vmem %s5422_s0, %s4380_s30 }
  0x32   : > { %v3915_v5 = vadd.f32 -1.0, %v1138_v2  ;;  %5423 = sst [smem:[#allocation10_spill]] %s4836_s9  ;;  %s4381_s3 = smul.u32 192, %s4810_s1 }
  0x33   : > { %s5426_s8 = sld [smem:[#allocation20_spill]]  ;;  %s5429_s13 = sld [smem:[#allocation24_spill]] }
  0x34   : > { %v4841_v6 = vmul.f32 1e+09, %v3915_v5  ;;  %s4056_s9 = sshll.u32 %s4810_s1, 7  ;;  %s3906_s26 = sshll.u32 %s4810_s1, 1 }
  0x35   : > { %s4846_s4 = scalar_lea.vmem %s5424_s7, %s4381_s3  ;;  %s4851_s27 = scalar_lea.vmem %s5425_s5, %s4054_s23 }
  0x36   : > { %s5431_s15 = sld [smem:[#allocation26_spill]]  ;;  %s5432_s16 = sld [smem:[#allocation27_spill]] }
  0x37   : > { %s5434_s17 = sld [smem:[#allocation28_spill]]  ;;  %s5436_s12 = sld [smem:[#allocation30_spill]] }
  0x38   : > { %s5439_s7 = sld [smem:[#allocation33_spill]]  ;;  %s5440_s30 = sld [smem:[#allocation34_spill]] }
  0x39   : > { %s4856_s0 = scalar_lea.vmem %s5426_s8, %s4382_s24  ;;  %s4873_s28 = scalar_lea.vmem %s5429_s13, %s4054_s23 }
  0x3a   : > { %s5441_s22 = sld [smem:[#allocation35_spill]]  ;;  %s3914_s11 = sshll.u32 %s5479_s2, 2 }
  0x3b   : > { %s5442_s3 = sld [smem:[#allocation36_spill]]  ;;  %s5443_s29 = sld [smem:[#allocation3_spill]] }
  0x3c   : > { %s4884_s20 = scalar_lea.vmem %s5431_s15, %s4056_s9  ;;  %s4889_s6 = scalar_lea.vmem %s5432_s16, %s3906_s26 }
  0x3d   : > { %5433 = sst [smem:[#allocation11_spill]] %s4889_s6  ;;  %s4894_s25 = scalar_lea.vmem %s5434_s17, %s4054_s23 }
  0x3e   : > { %s1112_s8 = scalar_lea.vmem %s5436_s12, %s4810_s1  ;;  %s5438_s16 = sld [smem:[#allocation32_spill]] }
  0x3f   : > { %s4916_s17 = scalar_lea.vmem %s5439_s7, %s3906_s26  ;;  %s4921_s18 = scalar_lea.vmem %s5440_s30, %s4056_s9 }
  0x40   : > { %s1132_s15 = scalar_lea.vmem %s5441_s22, %s4810_s1 }
  0x41   : > { %p3916_p7 = scmp.ne.s32.totalorder %s5443_s29, 0 }
  0x42   : > { %s5444_s26 = sld [smem:[#allocation9_spill]] (!%p3916_p7)  ;;  %s5446_s23 = sld [smem:[#allocation16_spill]] (!%p3916_p7) }
  0x43   : > { %1148 = sbr.rel (%p3916_p7) target bundleno = 385 (0x181), region = 124 }
  0x44   : > { %s4911_s6 = scalar_lea.vmem %s5438_s16, %s4056_s9  ;;  %s4931_s16 = scalar_lea.vmem %s5442_s3, %s3914_s11 }
  0x45   : > { %s5445_s9 = sld [smem:[#allocation15_spill]] (!%p3916_p7) }
  0x48   : > { %v1149_v7 = vld [vmem:[%s5444_s26] sm:$0xff] (!%p3916_p7) }
  0x49   : > { %1152 = vadd.xlane.f32.xlu0 (!%p3916_p7), %v1149_v7  ;;  %v3918_v18 = vld [vmem:[%s5446_s23] ss:$0 sm:$0xff] (!%p3916_p7) }
  0x4b   : > { %v3917_v16 = vld [vmem:[%s5445_s9] ss:$0 sm:$0xff] }
  0xd6   : > { %v1153_v8 = vpop.xlane.xlu0 %1152 }
  0xd7   : > { %v1155_v9 = vmul.f32 0.0078125, %v1153_v8 }
  0xd9   : > { %v1156_v10 = vsub.f32 %v1149_v7, %v1155_v9 }
  0xdb   : > { %v1157_v11 = vmul.f32 %v1156_v10, %v1156_v10 }
  0xdd   : > { %1158 = vadd.xlane.f32.xlu0 %v1157_v11 }
 0x16a   : > { %v1159_v12 = vpop.xlane.xlu0 %1158 }
 0x16b   : > { %v1160_v13 = vmul.f32 0.0078125, %v1159_v12 }
 0x16d   : > { %v1161_v14 = vadd.f32 1e-12, %v1160_v13 }
 0x16f   : > { %4430 = vrsqrt.f32 %v1161_v14 }
 0x179   : > { %v4431_v15 = vpop.eup %4430 }
 0x17a   : > { %v1163_v17 = vmul.f32 %v4431_v15, %v1156_v10 }
 0x17c   : > { %v1170_v19 = vmul.f32 %v3917_v16, %v1163_v17 }
 0x17e   : > { %v1177_v20 = vadd.f32 %v3918_v18, %v1170_v19 }
 0x180   : > { %1178 = vst [vmem:[#allocation2] sm:$0xff] %v1177_v20 }
 0x181 PF: > { %v4432_v21 = vld [vmem:[%s4846_s4 + $0x4] ss:$12 sps:$4 sm:$0xff]   ;;  %v4434_v22 = vld [vmem:[%s4846_s4] ss:$12 sps:$4 sm:$0xff]   ;;  %v4637_v23 = vmov 0   ;;  %v4638_v40 = vmov 0.0   ;;  %s5447_s24 = scalar_lea.vmem %s5365_s10, %s4810_s1 }
 0x182   : > { %1410 = vmatprep.mubr.bf16.mxu0 %v4637_v23  ;;  %1378 = vmatprep.subr.bf16.mxu0 %v4432_v21  ;;  %v4435_v24 = vld [vmem:[%s4846_s4 + $0x1c] ss:$12 sps:$4 sm:$0xff]   ;;  %v4437_v25 = vld [vmem:[%s4846_s4 + $0x18] ss:$12 sps:$4 sm:$0xff]   ;;  %v4438_v26 = vld [vmem:[%s4846_s4 + $0x34] ss:$12 sps:$4 sm:$0xff]  }
 0x183   : > { %1379 = vmatpush1.bf16.msra.mxu0 %v4434_v22  ;;  %v4440_v27 = vld [vmem:[%s4846_s4 + $0x30] ss:$12 sps:$4 sm:$0xff]   ;;  %v4441_v28 = vld [vmem:[%s4846_s4 + $0x4c] ss:$12 sps:$4 sm:$0xff]   ;;  %v4443_v29 = vld [vmem:[%s4846_s4 + $0x48] ss:$12 sps:$4 sm:$0xff]   ;;  %4164 = vmatprep.subr.bf16.mxu1 %v4638_v40 }
 0x184   : > { %1380 = vmatprep.subr.bf16.mxu0 %v4435_v24  ;;  %v4444_v30 = vld [vmem:[%s4846_s4 + $0x64] ss:$12 sps:$4 sm:$0xff]   ;;  %v4446_v31 = vld [vmem:[%s4846_s4 + $0x60] ss:$12 sps:$4 sm:$0xff]   ;;  %v4447_v32 = vld [vmem:[%s4846_s4 + $0x7c] ss:$12 sps:$4 sm:$0xff]  }
 0x185   : > { %v4449_v33 = vld [vmem:[%s4846_s4 + $0x78] ss:$12 sps:$4 sm:$0xff]   ;;  %v4450_v34 = vld [vmem:[%s4846_s4 + $0x94] ss:$12 sps:$4 sm:$0xff]   ;;  %v4452_v35 = vld [vmem:[%s4846_s4 + $0x90] ss:$12 sps:$4 sm:$0xff]  }
 0x186   : > { %v4453_v36 = vld [vmem:[%s4846_s4 + $0xac] ss:$12 sps:$4 sm:$0xff]   ;;  %v4455_v37 = vld [vmem:[%s4846_s4 + $0xa8] ss:$12 sps:$4 sm:$0xff]   ;;  %vm4639_vm1 = vmmov 0   ;;  %v1236_v49 = vshrl.u32 %v1141_v0, 7 }
 0x187   : > { %1381 = vmatpush1.bf16.msra.mxu0 %v4437_v25  ;;  %v4958_v38 = vld [vmem:[#allocation2] sm:$0xff]  ;;  %4180 = vmatprep.mubr.msk.bf16.mxu1 %vm4639_vm1, %v4638_v40  ;;  %v4456_v41 = vld [vmem:[%s4846_s4 + $0x8] ss:$12 sps:$4 sm:$0xff]   ;;  %v4459_v44 = vld [vmem:[%s4846_s4 + $0x50] ss:$12 sps:$4 sm:$0xff]   ;;  %vm1462_vm2 = vcmask 261120  }
 0x188   : > { %1382 = vmatprep.subr.bf16.mxu0 %v4438_v26  ;;  %v1233_v39 = vpack.c.bf16 %v4958_v38, %v4958_v38  ;;  %4165 = vmatpush3.bf16.msra.mxu1 %v4456_v41  ;;  %v4457_v42 = vld [vmem:[%s4846_s4 + $0x20] ss:$12 sps:$4 sm:$0xff]   ;;  %v4458_v43 = vld [vmem:[%s4846_s4 + $0x38] ss:$12 sps:$4 sm:$0xff]   ;;  %v4460_v45 = vld [vmem:[%s4846_s4 + $0x68] ss:$12 sps:$4 sm:$0xff]  }
 0x189   : > { %4166 = vmatprep.subr.bf16.mxu1 %v4638_v40  ;;  %v4461_v46 = vld [vmem:[%s4846_s4 + $0x80] ss:$12 sps:$4 sm:$0xff]   ;;  %v4462_v47 = vld [vmem:[%s4846_s4 + $0x98] ss:$12 sps:$4 sm:$0xff]   ;;  %v4463_v48 = vld [vmem:[%s4846_s4 + $0xb0] ss:$12 sps:$4 sm:$0xff]  }
 0x18a   : > { %v4987_v50 = vsub.s32 0, %v1236_v49  ;;  %v1215_v51 = vld [vmem:[%s4856_s0] sm:$0x7]  ;;  %v4990_v52 = vsub.s32 1, %v1236_v49  ;;  %s4640_s4 = smov 64   ;;  %s4641_s7 = smov 96  }
 0x18b   : > { %1383 = vmatpush1.bf16.msra.mxu0 %v4440_v27  ;;  %s4642_s0 = smov 32   ;;  %v1245_v8 = vsub.s32 2, %v1236_v49  ;;  %vm1722_vm3 = vcmask 1043456   ;;  %vm1671_vm4 = vcmask 64512   ;;  %s5448_s12 = sld [smem:[#allocation10_spill]]  ;;  %vm2701_vm5 = vcmask 195584  }
 0x18c   : > { %1384 = vmatprep.subr.bf16.mxu0 %v4441_v28  ;;  %4167 = vmatpush3.bf16.msra.mxu1 %v4457_v42  ;;  %v1238_v53 = vrot.slane %v1215_v51, %v4987_v50  ;;  %v1242_v54 = vrot.slane %v1215_v51, %v4990_v52  ;;  %v1665_v21 = vrot.slane %v4841_v6, %v4987_v50  ;;  %s5450_s11 = sld [smem:[#allocation17_spill]]  ;;  %s5464_s29 = sld [smem:[#allocation31_spill]] }
 0x18d   : > { %4168 = vmatprep.subr.bf16.mxu1 %v4638_v40  ;;  %v1246_v11 = vrot.slane %v1215_v51, %v1245_v8  ;;  %v4464_v8 = vld [vmem:[%s4851_s27] sm:$0xff]   ;;  %s5454_s9 = sld [smem:[#allocation25_spill]] }
 0x18f   : > { %1385 = vmatpush1.bf16.msra.mxu0 %v4443_v29 }
 0x190   : > { %1386 = vmatprep.subr.bf16.mxu0 %v4444_v30  ;;  %4169 = vmatpush3.bf16.msra.mxu1 %v4458_v43 }
 0x191   : > { %4170 = vmatprep.subr.bf16.mxu1 %v4638_v40 }
 0x192   : > { %s5451_s19 = scalar_lea.vmem %s5450_s11, %s4810_s1 }
 0x193   : > { %1387 = vmatpush1.bf16.msra.mxu0 %v4446_v31  ;;  %s5455_s30 = scalar_lea.vmem %s5454_s9, %s4810_s1 }
 0x194   : > { %1388 = vmatprep.subr.bf16.mxu0 %v4447_v32  ;;  %4171 = vmatpush3.bf16.msra.mxu1 %v4459_v44 }
 0x195   : > { %4172 = vmatprep.subr.bf16.mxu1 %v4638_v40 }
 0x197   : > { %1389 = vmatpush1.bf16.msra.mxu0 %v4449_v33 }
 0x198   : > { %1390 = vmatprep.subr.bf16.mxu0 %v4450_v34  ;;  %4173 = vmatpush3.bf16.msra.mxu1 %v4460_v45 }
 0x199   : > { %4174 = vmatprep.subr.bf16.mxu1 %v4638_v40 }
 0x19b   : > { %1391 = vmatpush1.bf16.msra.mxu0 %v4452_v35 }
 0x19c   : > { %1392 = vmatprep.subr.bf16.mxu0 %v4453_v36  ;;  %4175 = vmatpush3.bf16.msra.mxu1 %v4461_v46 }
 0x19d   : > { %4176 = vmatprep.subr.bf16.mxu1 %v4638_v40 }
 0x19f   : > { %1393 = vmatpush1.bf16.msra.mxu0 %v4455_v37 }
 0x1a0   : > { %4184 = vmatprep.subr.bf16.mxu0 %v4638_v40  ;;  %4177 = vmatpush3.bf16.msra.mxu1 %v4462_v47 }
 0x1a1   : > { %4178 = vmatprep.subr.bf16.mxu1 %v4638_v40 }
 0x1a2   : > { %1411 = vmatmul.mubr.bf16.vlgmr.msra.gmra.mrb[0].mxu0 %v1233_v39 }
 0x1a3   : > { %4186 = vmatprep.mubr.msk.bf16.mxu0 %vm4639_vm1, %v4638_v40 }
 0x1a4   : > { %4179 = vmatpush3.bf16.msra.mxu1 %v4463_v48 }
 0x1a5   : > { %4190 = vmatprep.subr.bf16.mxu1 %v4638_v40 }
 0x1a7   : > { %4181 = vmatmul.mubr.bf16.vlgmr.msra.gmra.mrb[0].mxu1 %v1233_v39 }
 0x1a8   : > { %4192 = vmatprep.mubr.msk.bf16.mxu1 %vm4639_vm1, %v4638_v40 }
 0x275   : > { %v1412_v55 = vpop.f32.mrb[0].mxu0 }
 0x276   : > { %v1413_v56 = vadd.f32 %v1412_v55, %v1238_v53  ;;  %v1414_v57 = vpop.f32.mrb[1].mxu0 }
 0x277   : > { %v1415_v58 = vadd.f32 %v1414_v57, %v1242_v54  ;;  %v1416_v59 = vpop.f32.mrb[2].mxu0 }
 0x278   : > { %v1417_v60 = vpop.f32.mrb[3].mxu0  ;;  %v1459_v61 = vmul.f32 0.17677669, %v1413_v56 }
 0x279   : > { %v1461_v62 = vpack.c.bf16 %v1415_v58, %v1415_v58 }
 0x27a   : > { %v1460_v0 = vpack.c.bf16 %v1459_v61, %v1459_v61  ;;  %v1453_v13 = vpop.f32.mrb[0].mxu1 }
 0x27b   : > { %1563 = vrot.lane.b32.xlu1 %v1461_v62, %s4640_s4  ;;  %1513 = vrot.lane.b32.xlu0 %v1461_v62, %s4641_s7  ;;  %v1467_v63 = vsel %vm1462_vm2, %v1461_v62, 0  ;;  %v1454_v14 = vadd.f32 %v1453_v13, %v1246_v11  ;;  %v4182_v15 = vpop.f32.mrb[1].mxu1 }
 0x27c   : > { %4185 = vmatpush3.bf16.xpose.msra.mxu0 %v1467_v63  ;;  %v1456_v16 = vpop.f32.mrb[2].mxu1 }
 0x27d   : > { %4196 = vmatprep.subr.bf16.mxu0 %v4638_v40  ;;  %v5017_v17 = vpack.c.bf16 %v1454_v14, %v1454_v14  ;;  %v4183_v18 = vpop.f32.mrb[3].mxu1 }
 0x27f   : > { %1613 = vrot.lane.b32.xlu1 %v1461_v62, %s4642_s0  ;;  %1510 = vrot.lane.b32.xlu0 %v1460_v0, %s4641_s7  ;;  %v1724_v20 = vsel %vm1722_vm3, %v5017_v17, 0 }
 0x283   : > { %1611 = vrot.lane.b32.xlu1 %v1460_v0, %s4642_s0  ;;  %1561 = vrot.lane.b32.xlu0 %v1460_v0, %s4640_s4 }
 0x284   : > { %4187 = vmatmul.mubr.msk.bf16.vlgmr.msra.gmra.mrb[4].mxu0 %vm1462_vm2, %v1460_v0 }
 0x285   : > { %4198 = vmatprep.mubr.msk.bf16.mxu0 %vm4639_vm1, %v4638_v40 }
 0x2ed   : > { %v1564_v1 = vpop.permute.xlu1 %1563  ;;  %v1514_v2 = vpop.permute.xlu0 %1513 }
 0x2ee   : > { %v1569_v3 = vsel %vm1462_vm2, %v1564_v1, 0  ;;  %v1519_v5 = vsel %vm1462_vm2, %v1514_v2, 0 }
 0x2ef   : > { %4191 = vmatpush3.bf16.xpose.msra.mxu1 %v1519_v5  ;;  %4197 = vmatpush3.bf16.xpose.msra.mxu0 %v1569_v3 }
 0x2f0   : > { %4202 = vmatprep.subr.bf16.mxu1 %v4638_v40  ;;  %4208 = vmatprep.subr.bf16.mxu0 %v4638_v40 }
 0x2f1   : > { %v1511_v7 = vpop.permute.xlu0 %1510  ;;  %v1614_v9 = vpop.permute.xlu1 %1613 }
 0x2f2   : > { %v1619_v12 = vsel %vm1462_vm2, %v1614_v9, 0 }
 0x2f5   : > { %v1562_v10 = vpop.permute.xlu0 %1561  ;;  %v1612_v19 = vpop.permute.xlu1 %1611 }
 0x2f6   : > { %4193 = vmatmul.mubr.msk.bf16.vlgmr.msra.gmra.mrb[4].mxu1 %vm1462_vm2, %v1511_v7  ;;  %4199 = vmatmul.mubr.msk.bf16.vlgmr.msra.gmra.mrb[8].mxu0 %vm1462_vm2, %v1562_v10 }
 0x2f7   : > { %4203 = vmatpush3.bf16.xpose.msra.mxu1 %v1619_v12  ;;  %4204 = vmatprep.mubr.msk.bf16.mxu1 %vm4639_vm1, %v4638_v40 }
 0x2f8   : > { %4210 = vmatprep.mubr.msk.bf16.mxu0 %vm4639_vm1, %v4638_v40  ;;  %4214 = vmatprep.subr.bf16.mxu1 %v4638_v40 }
 0x2f9   : > { %4209 = vmatpush3.bf16.msra.mxu0 %v1724_v20 }
 0x2fa   : > { %4222 = vmatprep.subr.bf16.mxu0 %v4638_v40 }
 0x2fe   : > { %4205 = vmatmul.mubr.msk.bf16.vlgmr.msra.gmra.mrb[8].mxu1 %vm1462_vm2, %v1612_v19 }
 0x2ff   : > { %4218 = vmatprep.mubr.msk.bf16.mxu1 %vm4639_vm1, %v4638_v40  ;;  %4215 = vmatpush3.bf16.msra.mxu1 %v4464_v8 }
 0x300   : > { %4216 = vmatprep.subr.bf16.mxu1 %v4638_v40 }
 0x357   : > { %v1503_v22 = vpop.f32.mrb[4].mxu0 }
 0x358   : > { %v1667_v24 = vadd.f32 %v1665_v21, %v1503_v22  ;;  %v4188_v25 = vpop.f32.mrb[5].mxu0 }
 0x359   : > { %v1506_v26 = vpop.f32.mrb[6].mxu0 }
 0x35a   : > { %v4189_v27 = vpop.f32.mrb[7].mxu0  ;;  %v1672_v28 = vsel %vm1671_vm4, %v1667_v24, -inf }
 0x35b   : > { %1673 = vmax.xlane.f32.xlu0 %v1672_v28 }
 0x3c9   : > { %v1555_v29 = vpop.f32.mrb[4].mxu1  ;;  %v1605_v30 = vpop.f32.mrb[8].mxu0 }
 0x3ca   : > { %v1668_v31 = vadd.f32 %v1665_v21, %v1555_v29  ;;  %v1669_v32 = vadd.f32 %v1665_v21, %v1605_v30  ;;  %v4194_v33 = vpop.f32.mrb[5].mxu1  ;;  %v4200_v34 = vpop.f32.mrb[9].mxu0 }
 0x3cb   : > { %v1558_v35 = vpop.f32.mrb[6].mxu1  ;;  %v1608_v36 = vpop.f32.mrb[10].mxu0  ;;  %v4466_v34 = vld [vmem:[%s4851_s27 + $0x10] sm:$0xff]  }
 0x3cc   : > { %v4195_v37 = vpop.f32.mrb[7].mxu1  ;;  %v4201_v39 = vpop.f32.mrb[11].mxu0  ;;  %v1675_v6 = vsel %vm1671_vm4, %v1668_v31, -inf  ;;  %v1678_v41 = vsel %vm1671_vm4, %v1669_v32, -inf }
 0x3cd   : > { %1676 = vmax.xlane.f32.xlu1 %v1675_v6  ;;  %1679 = vmax.xlane.f32.xlu0 %v1678_v41  ;;  %v4467_v6 = vld [vmem:[%s4851_s27 + $0x18] sm:$0xff]  }
 0x3d1   : > { %v1655_v42 = vpop.f32.mrb[8].mxu1 }
 0x3d2   : > { %v1670_v43 = vadd.f32 %v1665_v21, %v1655_v42  ;;  %v4206_v44 = vpop.f32.mrb[9].mxu1  ;;  %v4468_v42 = vld [vmem:[%s4851_s27 + $0x20] sm:$0xff]  }
 0x3d3   : > { %v1658_v45 = vpop.f32.mrb[10].mxu1 }
 0x3d4   : > { %v4207_v46 = vpop.f32.mrb[11].mxu1  ;;  %v1681_v47 = vsel %vm1671_vm4, %v1670_v43, -inf }
 0x3d5   : > { %1682 = vmax.xlane.f32.xlu0 %v1681_v47  ;;  %v4469_v47 = vld [vmem:[%s4851_s27 + $0x28] sm:$0xff]  }
 0x3e8   : > { %v1674_v48 = vpop.xlane.xlu0 %1673 }
 0x3e9   : > { %v1684_v49 = vsub.f32 %v1667_v24, %v1674_v48 }
 0x3eb   : > { %v1688_v51 = vmul.f32 1.442695, %v1684_v49  ;;  %v4470_v49 = vld [vmem:[%s4851_s27 + $0x30] sm:$0xff]  }
 0x3ed   : > { %4554 = vpow2.f32 %v1688_v51 }
 0x3f7   : > { %v4555_v53 = vpop.eup %4554 }
 0x3f8   : > { %v1696_v54 = vsel %vm1671_vm4, %v4555_v53, 0.0 }
 0x3f9   : > { %1697 = vadd.xlane.f32.xlu1 %v1696_v54 }
 0x40a   : > { %1832 = vrot.lane.b32.xlu1 %v5017_v17, %s4641_s7 }
 0x45a   : > { %v1677_v55 = vpop.xlane.xlu1 %1676  ;;  %v1680_v56 = vpop.xlane.xlu0 %1679 }
 0x45b   : > { %v1685_v57 = vsub.f32 %v1668_v31, %v1677_v55  ;;  %v1686_v58 = vsub.f32 %v1669_v32, %v1680_v56  ;;  %v4465_v32 = vld [vmem:[%s4851_s27 + $0x8] sm:$0xff]   ;;  %v4471_v56 = vld [vmem:[%s4851_s27 + $0x38] sm:$0xff]   ;;  %s5458_s27 = sld [smem:[#allocation22_spill]] }
 0x45c   : > { %4217 = vmatpush3.bf16.msra.mxu1 %v4465_v32  ;;  %v4486_v32 = vld [vmem:[%s4884_s20 + $0x44] ss:$8 sps:$4 sm:$0xff]  }
 0x45d   : > { %v1690_v59 = vmul.f32 1.442695, %v1685_v57  ;;  %v1692_v60 = vmul.f32 1.442695, %v1686_v58  ;;  %4228 = vmatprep.subr.bf16.mxu1 %v4638_v40 }
 0x45f   : > { %4556 = vpow2.f32 %v1690_v59 }
 0x460   : > { %4558 = vpow2.f32 %v1692_v60 }
 0x461   : > { %s5459_s21 = scalar_lea.vmem %s5458_s27, %s4810_s1 }
 0x462   : > { %v1683_v61 = vpop.xlane.xlu0 %1682 }
 0x463   : > { %v1687_v62 = vsub.f32 %v1670_v43, %v1683_v61 }
 0x465   : > { %v1694_v63 = vmul.f32 1.442695, %v1687_v62 }
 0x467   : > { %4560 = vpow2.f32 %v1694_v63 }
 0x469   : > { %v4557_v0 = vpop.eup %4556 }
 0x46a   : > { %v4559_v1 = vpop.eup %4558  ;;  %v1699_v2 = vsel %vm1671_vm4, %v4557_v0, 0.0 }
 0x46b   : > { %1700 = vadd.xlane.f32.xlu0 %v1699_v2  ;;  %v1702_v3 = vsel %vm1671_vm4, %v4559_v1, 0.0  ;;  %v3951_v2 = vld [vmem:[%s5447_s24] ss:$0 sm:$0xff] }
 0x46c   : > { %1703 = vadd.xlane.f32.xlu1 %v1702_v3 }
 0x471   : > { %v4561_v5 = vpop.eup %4560 }
 0x472   : > { %v1705_v7 = vsel %vm1671_vm4, %v4561_v5, 0.0 }
 0x473   : > { %1706 = vadd.xlane.f32.xlu0 %v1705_v7 }
 0x47d   : > { %2044 = vrot.lane.b32.xlu1 %v5017_v17, %s4642_s0 }
 0x486   : > { %v1698_v9 = vpop.xlane.xlu1 %1697 }
 0x487   : > { %4562 = vrcp.f32 %v1698_v9 }
 0x489   : > { %1937 = vrot.lane.b32.xlu0 %v5017_v17, %s4640_s4 }
 0x48a   : > { %v1833_v11 = vpop.permute.xlu1 %1832 }
 0x48b   : > { %v1838_v17 = vsel %vm1722_vm3, %v1833_v11, 0 }
 0x491   : > { %v4563_v12 = vpop.eup %4562 }
 0x492   : > { %v1712_v15 = vmul.f32 %v4563_v12, %v4555_v53 }
 0x4f8   : > { %v1701_v10 = vpop.xlane.xlu0 %1700 }
 0x4f9   : > { %4564 = vrcp.f32 %v1701_v10  ;;  %v1704_v16 = vpop.xlane.xlu1 %1703 }
 0x4fd   : > { %v2045_v28 = vpop.permute.xlu1 %2044 }
 0x4fe   : > { %v2050_v30 = vsel %vm1722_vm3, %v2045_v28, 0  ;;  %v4490_v28 = vld [vmem:[%s4873_s28] sm:$0xff]  }
 0x500   : > { %v1707_v13 = vpop.xlane.xlu0 %1706 }
 0x501   : > { %4566 = vrcp.f32 %v1707_v13 }
 0x502   : > { %4568 = vrcp.f32 %v1704_v16 }
 0x503   : > { %v4565_v14 = vpop.eup %4564 }
 0x504   : > { %v1713_v18 = vmul.f32 %v4565_v14, %v4557_v0  ;;  %v1938_v20 = vpop.permute.xlu0 %1937 }
 0x505   : > { %v1943_v24 = vsel %vm1722_vm3, %v1938_v20, 0 }
 0x506   : > { %v1716_v19 = vpack.c.bf16 %v1713_v18, %v1712_v15 }
 0x508   : > { %4211 = vmatmul.mubr.msk.bf16.vlgmr.msra.gmra.mrb[12].mxu0 %vm1671_vm4, %v1716_v19  ;;  %v1830_v21 = vrot.slane %v1716_v19, 4 }
 0x509   : > { %4223 = vmatpush3.bf16.msra.mxu0 %v1838_v17  ;;  %4224 = vmatprep.mubr.msk.bf16.mxu0 %vm4639_vm1, %v4638_v40 }
 0x50a   : > { %4236 = vmatprep.subr.bf16.mxu0 %v4638_v40 }
 0x50b   : > { %v4567_v22 = vpop.eup %4566 }
 0x50c   : > { %v4569_v25 = vpop.eup %4568  ;;  %v1715_v26 = vmul.f32 %v4567_v22, %v4561_v5  ;;  %v4472_v22 = vld [vmem:[%s4884_s20] ss:$8 sps:$4 sm:$0xff]  }
 0x50d   : > { %v1714_v27 = vmul.f32 %v4569_v25, %v4559_v1  ;;  %v4477_v25 = vld [vmem:[%s4884_s20 + $0x14] ss:$8 sps:$4 sm:$0xff]  }
 0x50f   : > { %v1717_v29 = vpack.c.bf16 %v1715_v26, %v1714_v27  ;;  %v4475_v26 = vld [vmem:[%s4884_s20 + $0x10] ss:$8 sps:$4 sm:$0xff]   ;;  %v4480_v27 = vld [vmem:[%s4884_s20 + $0x24] ss:$8 sps:$4 sm:$0xff]  }
 0x510   : > { %4225 = vmatmul.mubr.msk.bf16.vlgmr.msra.gmra.mrb[16].mxu0 %vm1671_vm4, %v1830_v21 }
 0x511   : > { %4237 = vmatpush3.bf16.msra.mxu0 %v1943_v24  ;;  %4238 = vmatprep.mubr.msk.bf16.mxu0 %vm4639_vm1, %v4638_v40  ;;  %v2043_v31 = vrot.slane %v1717_v29, 4  ;;  %v4474_v24 = vld [vmem:[%s4884_s20 + $0x4] ss:$8 sps:$4 sm:$0xff]  }
 0x512   : > { %4250 = vmatprep.subr.bf16.mxu0 %v4638_v40 }
 0x518   : > { %4239 = vmatmul.mubr.msk.bf16.vlgmr.msra.gmra.mrb[20].mxu0 %vm1671_vm4, %v1717_v29  ;;  %v4494_v29 = vld [vmem:[%s4873_s28 + $0x8] sm:$0xff]  }
 0x519   : > { %4251 = vmatpush3.bf16.msra.mxu0 %v2050_v30  ;;  %4252 = vmatprep.mubr.msk.bf16.mxu0 %vm4639_vm1, %v4638_v40  ;;  %v4483_v30 = vld [vmem:[%s4884_s20 + $0x34] ss:$8 sps:$4 sm:$0xff]  }
 0x51a   : > { %4264 = vmatprep.subr.bf16.mxu0 %v4638_v40 }
 0x520   : > { %4253 = vmatmul.mubr.msk.bf16.vlgmr.msra.gmra.mrb[24].mxu0 %vm1671_vm4, %v2043_v31  ;;  %v4481_v31 = vld [vmem:[%s4884_s20 + $0x30] ss:$8 sps:$4 sm:$0xff]  }
 0x521   : > { %4280 = vmatprep.mubr.msk.bf16.mxu0 %vm4639_vm1, %v4638_v40  ;;  %4265 = vmatpush3.bf16.msra.mxu0 %v4490_v28 }
 0x522   : > { %4266 = vmatprep.subr.bf16.mxu0 %v4638_v40 }
 0x525   : > { %4267 = vmatpush3.bf16.msra.mxu0 %v4494_v29 }
 0x526   : > { %4268 = vmatprep.subr.bf16.mxu0 %v4638_v40 }
 0x5db   : > { %v1760_v33 = vpop.f32.mrb[12].mxu0 }
 0x5dc   : > { %v1766_v35 = vpack.c.bf16 %v1760_v33, %v1760_v33  ;;  %v4212_v36 = vpop.f32.mrb[13].mxu0  ;;  %v4484_v33 = vld [vmem:[%s4884_s20 + $0x40] ss:$8 sps:$4 sm:$0xff]  }
 0x5dd   : > { %v1763_v37 = vpop.f32.mrb[14].mxu0  ;;  %v4493_v36 = vld [vmem:[%s4884_s20 + $0x64] ss:$8 sps:$4 sm:$0xff]  }
 0x5de   : > { %v4213_v39 = vpop.f32.mrb[15].mxu0  ;;  %4219 = vmatmul.mubr.msk.bf16.vlgmr.msra.gmra.mrb[12].mxu1 %vm1462_vm2, %v1766_v35  ;;  %v4487_v35 = vld [vmem:[%s4884_s20 + $0x50] ss:$8 sps:$4 sm:$0xff]   ;;  %v4491_v37 = vld [vmem:[%s4884_s20 + $0x60] ss:$8 sps:$4 sm:$0xff]  }
 0x5df   : > { %4229 = vmatpush3.bf16.msra.mxu1 %v4466_v34  ;;  %4232 = vmatprep.mubr.msk.bf16.mxu1 %vm4639_vm1, %v4638_v40  ;;  %v4489_v34 = vld [vmem:[%s4884_s20 + $0x54] ss:$8 sps:$4 sm:$0xff]  }
 0x5e0   : > { %4230 = vmatprep.subr.bf16.mxu1 %v4638_v40  ;;  %v4497_v39 = vld [vmem:[%s4884_s20 + $0x74] ss:$8 sps:$4 sm:$0xff]  }
 0x5e3   : > { %v1874_v41 = vpop.f32.mrb[16].mxu0  ;;  %4231 = vmatpush3.bf16.msra.mxu1 %v4467_v6  ;;  %v4495_v6 = vld [vmem:[%s4884_s20 + $0x70] ss:$8 sps:$4 sm:$0xff]  }
 0x5e4   : > { %v1880_v43 = vpack.c.bf16 %v1874_v41, %v1874_v41  ;;  %v4226_v44 = vpop.f32.mrb[17].mxu0  ;;  %4242 = vmatprep.subr.bf16.mxu1 %v4638_v40 }
 0x5e5   : > { %v1877_v45 = vpop.f32.mrb[18].mxu0 }
 0x5e6   : > { %v4227_v46 = vpop.f32.mrb[19].mxu0  ;;  %4233 = vmatmul.mubr.msk.bf16.vlgmr.msra.gmra.mrb[16].mxu1 %vm1462_vm2, %v1880_v43  ;;  %v4498_v45 = vld [vmem:[%s4873_s28 + $0x10] sm:$0xff]  }
 0x5e7   : > { %4243 = vmatpush3.bf16.msra.mxu1 %v4468_v42  ;;  %4246 = vmatprep.mubr.msk.bf16.mxu1 %vm4639_vm1, %v4638_v40  ;;  %v4499_v46 = vld [vmem:[%s5448_s12] sm:$0xff]  }
 0x5e8   : > { %4244 = vmatprep.subr.bf16.mxu1 %v4638_v40  ;;  %4269 = vmatpush3.bf16.msra.mxu0 %v4498_v45 }
 0x5e9   : > { %4270 = vmatprep.subr.bf16.mxu0 %v4638_v40 }
 0x5eb   : > { %v1979_v48 = vpop.f32.mrb[20].mxu0  ;;  %4245 = vmatpush3.bf16.msra.mxu1 %v4469_v47  ;;  %v4500_v47 = vld [vmem:[%s4873_s28 + $0x18] sm:$0xff]  }
 0x5ec   : > { %v1985_v51 = vpack.c.bf16 %v1979_v48, %v1979_v48  ;;  %v4240_v53 = vpop.f32.mrb[21].mxu0  ;;  %4256 = vmatprep.subr.bf16.mxu1 %v4638_v40  ;;  %4271 = vmatpush3.bf16.msra.mxu0 %v4500_v47  ;;  %v4501_v48 = vld [vmem:[%s4873_s28 + $0x20] sm:$0xff]  }
 0x5ed   : > { %v1982_v54 = vpop.f32.mrb[22].mxu0  ;;  %4272 = vmatprep.subr.bf16.mxu0 %v4638_v40  ;;  %v4504_v53 = vld [vmem:[%s4873_s28 + $0x30] sm:$0xff]  }
 0x5ee   : > { %v4241_v55 = vpop.f32.mrb[23].mxu0  ;;  %4247 = vmatmul.mubr.msk.bf16.vlgmr.msra.gmra.mrb[20].mxu1 %vm1462_vm2, %v1985_v51  ;;  %v4503_v51 = vld [vmem:[%s5448_s12 + $0x8] ss:$0 sps:$4 sm:$0xff]   ;;  %v4505_v54 = vld [vmem:[%s4873_s28 + $0x38] sm:$0xff]   ;;  %s5460_s12 = sld [smem:[#allocation23_spill]] }
 0x5ef   : > { %4257 = vmatpush3.bf16.msra.mxu1 %v4470_v49  ;;  %4260 = vmatprep.mubr.msk.bf16.mxu1 %vm4639_vm1, %v4638_v40  ;;  %v4502_v49 = vld [vmem:[%s4873_s28 + $0x28] sm:$0xff]   ;;  %s5452_s28 = sld [smem:[#allocation18_spill]] }
 0x5f0   : > { %4258 = vmatprep.subr.bf16.mxu1 %v4638_v40  ;;  %4273 = vmatpush3.bf16.msra.mxu0 %v4501_v48 }
 0x5f1   : > { %4274 = vmatprep.subr.bf16.mxu0 %v4638_v40 }
 0x5f3   : > { %v2086_v57 = vpop.f32.mrb[24].mxu0  ;;  %4259 = vmatpush3.bf16.msra.mxu1 %v4471_v56 }
 0x5f4   : > { %v2092_v58 = vpack.c.bf16 %v2086_v57, %v2086_v57  ;;  %v4254_v59 = vpop.f32.mrb[25].mxu0  ;;  %2425 = vmatprep.subr.bf16.mxu1 %v4474_v24  ;;  %4275 = vmatpush3.bf16.msra.mxu0 %v4502_v49 }
 0x5f5   : > { %v2089_v60 = vpop.f32.mrb[26].mxu0  ;;  %4276 = vmatprep.subr.bf16.mxu0 %v4638_v40  ;;  %v3964_v59 = vld [vmem:[%s5451_s19] ss:$0 sm:$0xff]  ;;  %s5453_s26 = scalar_lea.vmem %s5452_s28, %s4810_s1  ;;  %s5465_s28 = scalar_lea.vmem %s5464_s29, %s4810_s1 }
 0x5f6   : > { %v4255_v61 = vpop.f32.mrb[27].mxu0  ;;  %4261 = vmatmul.mubr.msk.bf16.vlgmr.msra.gmra.mrb[24].mxu1 %vm1462_vm2, %v2092_v58 }
 0x5f7   : > { %2457 = vmatprep.mubr.bf16.mxu1 %v4637_v23  ;;  %2426 = vmatpush1.bf16.msra.mxu1 %v4472_v22  ;;  %v3965_v61 = vld [vmem:[%s5453_s26] ss:$0 sm:$0xff]  ;;  %s5466_s26 = sld [smem:[#allocation3_spill]] }
 0x5f8   : > { %2427 = vmatprep.subr.bf16.mxu1 %v4477_v25  ;;  %4277 = vmatpush3.bf16.msra.mxu0 %v4504_v53 }
 0x5f9   : > { %4278 = vmatprep.subr.bf16.mxu0 %v4638_v40 }
 0x5fb   : > { %2428 = vmatpush1.bf16.msra.mxu1 %v4475_v26 }
 0x5fc   : > { %2429 = vmatprep.subr.bf16.mxu1 %v4480_v27  ;;  %4279 = vmatpush3.bf16.msra.mxu0 %v4505_v54 }
 0x5fd   : > { %4284 = vmatprep.subr.bf16.mxu0 %v4638_v40  ;;  %p4051_p8 = scmp.ne.s32.totalorder %s5466_s26, 1 }
 0x6b1   : > { %v1816_v62 = vpop.f32.mrb[12].mxu1 }
 0x6b2   : > { %v4220_v63 = vpop.f32.mrb[13].mxu1  ;;  %v1828_v3 = vadd.f32 %v3951_v2, %v1816_v62 }
 0x6b3   : > { %v1819_v0 = vpop.f32.mrb[14].mxu1 }
 0x6b4   : > { %v4221_v1 = vpop.f32.mrb[15].mxu1 }
 0x6b9   : > { %v1930_v5 = vpop.f32.mrb[16].mxu1 }
 0x6ba   : > { %v1936_v7 = vadd.f32 %v1930_v5, %v1828_v3  ;;  %v4234_v8 = vpop.f32.mrb[17].mxu1 }
 0x6bb   : > { %v1933_v9 = vpop.f32.mrb[18].mxu1 }
 0x6bc   : > { %v4235_v10 = vpop.f32.mrb[19].mxu1 }
 0x6c1   : > { %v2035_v11 = vpop.f32.mrb[20].mxu1 }
 0x6c2   : > { %v2041_v12 = vadd.f32 %v2035_v11, %v1936_v7  ;;  %v4248_v13 = vpop.f32.mrb[21].mxu1 }
 0x6c3   : > { %v2038_v14 = vpop.f32.mrb[22].mxu1 }
 0x6c4   : > { %v4249_v15 = vpop.f32.mrb[23].mxu1 }
 0x6c9   : > { %v2142_v16 = vpop.f32.mrb[24].mxu1 }
 0x6ca   : > { %v2148_v18 = vadd.f32 %v2142_v16, %v2041_v12  ;;  %v4262_v19 = vpop.f32.mrb[25].mxu1 }
 0x6cb   : > { %v2145_v17 = vpop.f32.mrb[26].mxu1 }
 0x6cc   : > { %v4263_v20 = vpop.f32.mrb[27].mxu1  ;;  %v2149_v21 = vadd.f32 %v2148_v18, %v4958_v38  ;;  %v4478_v38 = vld [vmem:[%s4884_s20 + $0x20] ss:$8 sps:$4 sm:$0xff]   ;;  %s5449_s20 = sld [smem:[#allocation11_spill]] }
 0x6cd   : > { %2430 = vmatpush1.bf16.msra.mxu1 %v4478_v38  ;;  %v3966_v38 = vld [vmem:[%s5455_s30] ss:$0 sm:$0xff] }
 0x6ce   : > { %2152 = vadd.xlane.f32.xlu1 %v2149_v21  ;;  %2431 = vmatprep.subr.bf16.mxu1 %v4483_v30 }
 0x6d1   : > { %2432 = vmatpush1.bf16.msra.mxu1 %v4481_v31 }
 0x6d2   : > { %2433 = vmatprep.subr.bf16.mxu1 %v4486_v32  ;;  %v2211_v1 = vld [vmem:[%s5449_s20] sm:$0x3]  ;;  %s5461_s20 = scalar_lea.vmem %s5460_s12, %s4810_s1 }
 0x6d3   : > { %v2328_v2 = vrot.slane %v2211_v1, %v4987_v50  ;;  %v2332_v3 = vrot.slane %v2211_v1, %v4990_v52 }
 0x6d5   : > { %2434 = vmatpush1.bf16.msra.mxu1 %v4484_v33 }
 0x6d6   : > { %2435 = vmatprep.subr.bf16.mxu1 %v4489_v34 }
 0x6d9   : > { %2436 = vmatpush1.bf16.msra.mxu1 %v4487_v35 }
 0x6da   : > { %2437 = vmatprep.subr.bf16.mxu1 %v4493_v36 }
 0x6dd   : > { %2438 = vmatpush1.bf16.msra.mxu1 %v4491_v37 }
 0x6de   : > { %2439 = vmatprep.subr.bf16.mxu1 %v4497_v39 }
 0x6e1   : > { %2440 = vmatpush1.bf16.msra.mxu1 %v4495_v6 }
 0x6e2   : > { %4292 = vmatprep.subr.bf16.mxu1 %v4638_v40 }
 0x6e4   : > { %2458 = vmatmul.mubr.bf16.vlgmr.msra.gmra.mrb[28].mxu1 %v4499_v46 }
 0x6e5   : > { %2467 = vmatprep.mubr.bf16.mxu1 %v4637_v23 }
 0x6ec   : > { %2468 = vmatmul.mubr.bf16.gmra.mrb[32].mxu1 %v4503_v51 }
 0x6ed   : > { %4296 = vmatprep.mubr.msk.bf16.mxu1 %vm4639_vm1, %v4638_v40 }
 0x75b   : > { %v2153_v41 = vpop.xlane.xlu1 %2152 }
 0x75c   : > { %v2155_v42 = vmul.f32 0.0078125, %v2153_v41 }
 0x75e   : > { %v2156_v43 = vsub.f32 %v2149_v21, %v2155_v42 }
 0x760   : > { %v2157_v44 = vmul.f32 %v2156_v43, %v2156_v43 }
 0x762   : > { %2158 = vadd.xlane.f32.xlu0 %v2157_v44 }
 0x7b7   : > { %v2459_v5 = vpop.f32.mrb[28].mxu1 }
 0x7b8   : > { %v2460_v7 = vadd.f32 %v2459_v5, %v2328_v2  ;;  %v2461_v8 = vpop.f32.mrb[29].mxu1 }
 0x7b9   : > { %v2462_v9 = vadd.f32 %v2461_v8, %v2332_v3  ;;  %v2463_v10 = vpop.f32.mrb[30].mxu1 }
 0x7ba   : > { %v2464_v11 = vadd.f32 %v2463_v10, %v2328_v2  ;;  %v2465_v12 = vpop.f32.mrb[31].mxu1 }
 0x7bb   : > { %v2466_v13 = vadd.f32 %v2465_v12, %v2332_v3 }
 0x7bc   : > { %v2478_v14 = vpack.c.bf16 %v2464_v11, %v2460_v7 }
 0x7bd   : > { %v5148_v15 = vpack.c.bf16 %v2466_v13, %v2462_v9 }
 0x7be   : > { %2534 = vrot.lane.b32.xlu0 %v2478_v14, %s4641_s7  ;;  %v2484_v16 = vsel %vm1462_vm2, %v2478_v14, 0 }
 0x7bf   : > { %v2469_v18 = vpop.f32.mrb[32].mxu1 }
 0x7c0   : > { %v2470_v19 = vadd.f32 %v2469_v18, %v2328_v2  ;;  %v2471_v17 = vpop.f32.mrb[33].mxu1 }
 0x7c1   : > { %v2472_v20 = vadd.f32 %v2471_v17, %v2332_v3  ;;  %v2473_v21 = vpop.f32.mrb[34].mxu1 }
 0x7c2   : > { %2589 = vrot.lane.b32.xlu0 %v2478_v14, %s4640_s4  ;;  %v2479_v22 = vpack.c.bf16 %v2470_v19, %v2470_v19  ;;  %v2474_v24 = vpop.f32.mrb[35].mxu1 }
 0x7c3   : > { %v5179_v44 = vpack.c.bf16 %v2472_v20, %v2472_v20 }
 0x7c4   : > { %2536 = vrot.lane.b32.xlu1 %v2479_v22, %s4641_s7  ;;  %v2487_v25 = vsel %vm1462_vm2, %v2479_v22, 0 }
 0x7c5   : > { %v2754_v47 = vsel %vm1722_vm3, %v5179_v44, 0 }
 0x7c6   : > { %2591 = vrot.lane.b32.xlu0 %v2479_v22, %s4640_s4 }
 0x7ef   : > { %v2159_v55 = vpop.xlane.xlu0 %2158 }
 0x7f0   : > { %v2160_v56 = vmul.f32 0.0078125, %v2159_v55 }
 0x7f2   : > { %v2161_v57 = vadd.f32 1e-12, %v2160_v56 }
 0x7f4   : > { %4570 = vrsqrt.f32 %v2161_v57 }
 0x7fe   : > { %v4571_v58 = vpop.eup %4570 }
 0x7ff   : > { %v2163_v60 = vmul.f32 %v4571_v58, %v2156_v43 }
 0x801   : > { %v2170_v62 = vmul.f32 %v3964_v59, %v2163_v60 }
 0x803   : > { %v5139_v63 = vadd.f32 %v3965_v61, %v2170_v62 }
 0x805   : > { %v2229_v0 = vpack.c.bf16 %v5139_v63, %v5139_v63 }
 0x807   : > { %4281 = vmatmul.mubr.bf16.vlgmr.msra.gmra.mrb[28].mxu0 %v2229_v0 }
 0x808   : > { %4288 = vmatprep.mubr.msk.bf16.mxu0 %vm4639_vm1, %v4638_v40  ;;  %4285 = vmatpush3.bf16.xpose.msra.mxu0 %v2484_v16 }
 0x809   : > { %4286 = vmatprep.subr.bf16.mxu0 %v4638_v40 }
 0x810   : > { %4287 = vmatpush3.bf16.xpose.msra.mxu0 %v2487_v25 }
 0x811   : > { %4300 = vmatprep.subr.bf16.mxu0 %v4638_v40 }
 0x830   : > { %v2535_v26 = vpop.permute.xlu0 %2534 }
 0x831   : > { %v2542_v27 = vsel %vm1462_vm2, %v2535_v26, 0 }
 0x832   : > { %4293 = vmatpush3.bf16.xpose.msra.mxu1 %v2542_v27 }
 0x833   : > { %4294 = vmatprep.subr.bf16.mxu1 %v4638_v40 }
 0x834   : > { %v2590_v36 = vpop.permute.xlu0 %2589 }
 0x835   : > { %v2597_v39 = vsel %vm1462_vm2, %v2590_v36, 0  ;;  %v4506_v36 = vld [vmem:[%s4894_s25] sm:$0xff]  }
 0x836   : > { %v2537_v28 = vpop.permute.xlu1 %2536 }
 0x837   : > { %v2545_v29 = vsel %vm1462_vm2, %v2537_v28, 0 }
 0x838   : > { %v2592_v6 = vpop.permute.xlu0 %2591 }
 0x839   : > { %v2600_v41 = vsel %vm1462_vm2, %v2592_v6, 0 }
 0x83a   : > { %4295 = vmatpush3.bf16.xpose.msra.mxu1 %v2545_v29 }
 0x83b   : > { %4308 = vmatprep.subr.bf16.mxu1 %v4638_v40 }
 0x8da   : > { %v2318_v30 = vpop.f32.mrb[28].mxu0 }
 0x8db   : > { %v2319_v31 = vadd.f32 %v3966_v38, %v2318_v30  ;;  %v4282_v32 = vpop.f32.mrb[29].mxu0 }
 0x8dc   : > { %v2321_v33 = vpop.f32.mrb[30].mxu0 }
 0x8dd   : > { %v2476_v34 = vmul.f32 0.17677669, %v2319_v31  ;;  %v4283_v35 = vpop.f32.mrb[31].mxu0 }
 0x8df   : > { %v2477_v37 = vpack.c.bf16 %v2476_v34, %v2476_v34 }
 0x8e1   : > { %2587 = vrot.lane.b32.xlu0 %v2477_v37, %s4640_s4  ;;  %2530 = vrot.lane.b32.xlu1 %v2477_v37, %s4641_s7 }
 0x8e2   : > { %4289 = vmatmul.mubr.msk.bf16.vlgmr.msra.gmra.mrb[32].mxu0 %vm1462_vm2, %v2477_v37 }
 0x8e3   : > { %4301 = vmatpush3.bf16.xpose.msra.mxu0 %v2597_v39  ;;  %4304 = vmatprep.mubr.msk.bf16.mxu0 %vm4639_vm1, %v4638_v40 }
 0x8e4   : > { %4302 = vmatprep.subr.bf16.mxu0 %v4638_v40 }
 0x8e5   : > { %2644 = vrot.lane.b32.xlu1 %v2478_v14, %s4642_s0 }
 0x8e9   : > { %2646 = vrot.lane.b32.xlu1 %v2479_v22, %s4642_s0 }
 0x8eb   : > { %4303 = vmatpush3.bf16.xpose.msra.mxu0 %v2600_v41 }
 0x8ec   : > { %4316 = vmatprep.subr.bf16.mxu0 %v4638_v40 }
 0x8ed   : > { %2642 = vrot.lane.b32.xlu1 %v2477_v37, %s4642_s0 }
 0x953   : > { %v2588_v42 = vpop.permute.xlu0 %2587  ;;  %v2531_v43 = vpop.permute.xlu1 %2530 }
 0x954   : > { %4297 = vmatmul.mubr.msk.bf16.vlgmr.msra.gmra.mrb[36].mxu1 %vm1462_vm2, %v2531_v43  ;;  %4305 = vmatmul.mubr.msk.bf16.vlgmr.msra.gmra.mrb[36].mxu0 %vm1462_vm2, %v2588_v42 }
 0x955   : > { %4317 = vmatpush3.bf16.msra.mxu0 %v5148_v15  ;;  %4312 = vmatprep.mubr.msk.bf16.mxu1 %vm4639_vm1, %v4638_v40 }
 0x956   : > { %4318 = vmatprep.subr.bf16.mxu0 %v4638_v40  ;;  %4320 = vmatprep.mubr.msk.bf16.mxu0 %vm4639_vm1, %v4638_v40 }
 0x957   : > { %v2645_v45 = vpop.permute.xlu1 %2644 }
 0x958   : > { %v2652_v46 = vsel %vm1462_vm2, %v2645_v45, 0 }
 0x959   : > { %4319 = vmatpush3.bf16.msra.mxu0 %v2754_v47  ;;  %4309 = vmatpush3.bf16.xpose.msra.mxu1 %v2652_v46 }
 0x95a   : > { %4310 = vmatprep.subr.bf16.mxu1 %v4638_v40  ;;  %4332 = vmatprep.subr.bf16.mxu0 %v4638_v40 }
 0x95b   : > { %v2647_v48 = vpop.permute.xlu1 %2646 }
 0x95c   : > { %v2655_v49 = vsel %vm1462_vm2, %v2647_v48, 0 }
 0x95f   : > { %v2643_v51 = vpop.permute.xlu1 %2642 }
 0x961   : > { %4311 = vmatpush3.bf16.xpose.msra.mxu1 %v2655_v49 }
 0x962   : > { %4324 = vmatprep.subr.bf16.mxu1 %v4638_v40 }
 0x968   : > { %4313 = vmatmul.mubr.msk.bf16.vlgmr.msra.gmra.mrb[40].mxu1 %vm1462_vm2, %v2643_v51 }
 0x969   : > { %4328 = vmatprep.mubr.msk.bf16.mxu1 %vm4639_vm1, %v4638_v40  ;;  %4325 = vmatpush3.bf16.msra.mxu1 %v4506_v36 }
 0x96a   : > { %4326 = vmatprep.subr.bf16.mxu1 %v4638_v40 }
 0x9b5   : > { %v2523_v53 = vpop.f32.mrb[32].mxu0 }
 0x9b6   : > { %v2697_v54 = vadd.f32 %v2523_v53, %v4823_v4  ;;  %v4290_v55 = vpop.f32.mrb[33].mxu0 }
 0x9b7   : > { %v2526_v56 = vpop.f32.mrb[34].mxu0 }
 0x9b8   : > { %v4291_v57 = vpop.f32.mrb[35].mxu0  ;;  %v2702_v58 = vsel %vm2701_vm5, %v2697_v54, -inf }
 0x9b9   : > { %2703 = vmax.xlane.f32.xlu0 %v2702_v58 }
 0xa27   : > { %v2581_v59 = vpop.f32.mrb[36].mxu1  ;;  %v2636_v60 = vpop.f32.mrb[36].mxu0 }
 0xa28   : > { %v2698_v61 = vadd.f32 %v2581_v59, %v4823_v4  ;;  %v2699_v62 = vadd.f32 %v2636_v60, %v4823_v4  ;;  %v4298_v0 = vpop.f32.mrb[37].mxu1  ;;  %v4306_v1 = vpop.f32.mrb[37].mxu0 }
 0xa29   : > { %v2584_v2 = vpop.f32.mrb[38].mxu1  ;;  %v2639_v3 = vpop.f32.mrb[38].mxu0  ;;  %v4507_v1 = vld [vmem:[%s4894_s25 + $0x8] sm:$0xff]  }
 0xa2a   : > { %v4299_v5 = vpop.f32.mrb[39].mxu1  ;;  %v4307_v7 = vpop.f32.mrb[39].mxu0  ;;  %v2705_v8 = vsel %vm2701_vm5, %v2698_v61, -inf  ;;  %v2708_v9 = vsel %vm2701_vm5, %v2699_v62, -inf  ;;  %4327 = vmatpush3.bf16.msra.mxu1 %v4507_v1  ;;  %v4508_v3 = vld [vmem:[%s4894_s25 + $0x10] sm:$0xff]  }
 0xa2b   : > { %2706 = vmax.xlane.f32.xlu1 %v2705_v8  ;;  %2709 = vmax.xlane.f32.xlu0 %v2708_v9  ;;  %v4526_v1 = vld [vmem:[%s4911_s6 + $0x40] ss:$8 sps:$4 sm:$0xff]  }
 0xa2c   : > { %4340 = vmatprep.subr.bf16.mxu1 %v4638_v40 }
 0xa3b   : > { %v2691_v10 = vpop.f32.mrb[40].mxu1 }
 0xa3c   : > { %v2700_v11 = vadd.f32 %v2691_v10, %v4823_v4  ;;  %2863 = vrot.lane.b32.xlu1 %v5148_v15, %s4641_s7  ;;  %v4314_v12 = vpop.f32.mrb[41].mxu1  ;;  %v4509_v10 = vld [vmem:[%s4894_s25 + $0x18] sm:$0xff]  }
 0xa3d   : > { %v2694_v13 = vpop.f32.mrb[42].mxu1 }
 0xa3e   : > { %v4315_v14 = vpop.f32.mrb[43].mxu1  ;;  %v2711_v16 = vsel %vm2701_vm5, %v2700_v11, -inf }
 0xa3f   : > { %2712 = vmax.xlane.f32.xlu0 %v2711_v16 }
 0xa46   : > { %v2704_v18 = vpop.xlane.xlu0 %2703 }
 0xa47   : > { %v2714_v19 = vsub.f32 %v2697_v54, %v2704_v18  ;;  %v4511_v18 = vld [vmem:[%s4894_s25 + $0x28] sm:$0xff]  }
 0xa49   : > { %v2718_v17 = vmul.f32 1.442695, %v2714_v19 }
 0xa4b   : > { %4572 = vpow2.f32 %v2718_v17  ;;  %v4512_v17 = vld [vmem:[%s4894_s25 + $0x30] sm:$0xff]  }
 0xa55   : > { %v4573_v20 = vpop.eup %4572 }
 0xa56   : > { %v2726_v21 = vsel %vm2701_vm5, %v4573_v20, 0.0 }
 0xa60   : > { %2727 = vadd.xlane.f32.xlu1 %v2726_v21 }
 0xa71   : > { %2971 = vrot.lane.b32.xlu1 %v5148_v15, %s4640_s4 }
 0xa75   : > { %2973 = vrot.lane.b32.xlu1 %v5179_v44, %s4640_s4 }
 0xab8   : > { %v2707_v4 = vpop.xlane.xlu1 %2706  ;;  %v2710_v22 = vpop.xlane.xlu0 %2709 }
 0xab9   : > { %v2715_v24 = vsub.f32 %v2698_v61, %v2707_v4  ;;  %v2716_v25 = vsub.f32 %v2699_v62, %v2710_v22 }
 0xabb   : > { %v2720_v26 = vmul.f32 1.442695, %v2715_v24  ;;  %v2722_v27 = vmul.f32 1.442695, %v2716_v25  ;;  %v4513_v24 = vld [vmem:[%s4894_s25 + $0x38] sm:$0xff]  }
 0xabc   : > { %v2864_v37 = vpop.permute.xlu1 %2863 }
 0xabd   : > { %4574 = vpow2.f32 %v2720_v26 }
 0xabe   : > { %4576 = vpow2.f32 %v2722_v27 }
 0xac7   : > { %v4575_v28 = vpop.eup %4574 }
 0xac8   : > { %v4577_v29 = vpop.eup %4576  ;;  %v2729_v38 = vsel %vm2701_vm5, %v4575_v28, 0.0 }
 0xac9   : > { %2730 = vadd.xlane.f32.xlu0 %v2729_v38  ;;  %v2732_v30 = vsel %vm2701_vm5, %v4577_v29, 0.0 }
 0xaca   : > { %2733 = vadd.xlane.f32.xlu1 %v2732_v30 }
 0xacc   : > { %v2713_v31 = vpop.xlane.xlu0 %2712 }
 0xacd   : > { %v2717_v32 = vsub.f32 %v2700_v11, %v2713_v31  ;;  %v4510_v11 = vld [vmem:[%s4894_s25 + $0x20] sm:$0xff]   ;;  %s5456_s25 = sld [smem:[#allocation29_spill]] }
 0xacf   : > { %v2724_v33 = vmul.f32 1.442695, %v2717_v32 }
 0xad1   : > { %4578 = vpow2.f32 %v2724_v33 }
 0xad3   : > { %s5457_s4 = scalar_lea.vmem %s5456_s25, %s4810_s1 }
 0xad4   : > { %v4001_v33 = vld [vmem:[%s5457_s4] ss:$0 sm:$0xff] }
 0xadb   : > { %3083 = vrot.lane.b32.xlu1 %v5179_v44, %s4642_s0  ;;  %v4579_v34 = vpop.eup %4578 }
 0xadc   : > { %v2735_v35 = vsel %vm2701_vm5, %v4579_v34, 0.0 }
 0xadf   : > { %2865 = vrot.lane.b32.xlu0 %v5179_v44, %s4641_s7 }
 0xaed   : > { %v2728_v39 = vpop.xlane.xlu1 %2727 }
 0xaee   : > { %4580 = vrcp.f32 %v2728_v39 }
 0xaf8   : > { %v4581_v41 = vpop.eup %4580 }
 0xaf9   : > { %v2742_v43 = vmul.f32 %v4581_v41, %v4573_v20 }
 0xafe   : > { %2736 = vadd.xlane.f32.xlu0 %v2735_v35 }
 0xb14   : > { %3081 = vrot.lane.b32.xlu0 %v5148_v15, %s4642_s0  ;;  %v2972_v15 = vpop.permute.xlu1 %2971 }
 0xb18   : > { %v2974_v49 = vpop.permute.xlu1 %2973 }
 0xb19   : > { %v2980_v51 = vsel %vm1722_vm3, %v2974_v49, 0 }
 0xb56   : > { %v2731_v6 = vpop.xlane.xlu0 %2730 }
 0xb57   : > { %4582 = vrcp.f32 %v2731_v6  ;;  %v2734_v53 = vpop.xlane.xlu1 %2733 }
 0xb58   : > { %4584 = vrcp.f32 %v2734_v53  ;;  %v4516_v53 = vld [vmem:[%s4911_s6 + $0x4] ss:$8 sps:$4 sm:$0xff]  }
 0xb5a   : > { %v2866_v46 = vpop.permute.xlu0 %2865 }
 0xb5b   : > { %v2872_v47 = vsel %vm1722_vm3, %v2866_v46, 0  ;;  %v3084_v61 = vpop.permute.xlu1 %3083 }
 0xb5c   : > { %v3090_v62 = vsel %vm1722_vm3, %v3084_v61, 0  ;;  %v4525_v61 = vld [vmem:[%s4911_s6 + $0x34] ss:$8 sps:$4 sm:$0xff]  }
 0xb61   : > { %v4583_v42 = vpop.eup %4582 }
 0xb62   : > { %v2743_v44 = vmul.f32 %v4583_v42, %v4575_v28  ;;  %v4585_v55 = vpop.eup %4584 }
 0xb63   : > { %v2744_v57 = vmul.f32 %v4585_v55, %v4577_v29  ;;  %v4517_v55 = vld [vmem:[%s4911_s6 + $0x10] ss:$8 sps:$4 sm:$0xff]  }
 0xb64   : > { %v2746_v45 = vpack.c.bf16 %v2743_v44, %v2742_v43 }
 0xb66   : > { %4321 = vmatmul.mubr.msk.bf16.vlgmr.msra.gmra.mrb[40].mxu0 %vm2701_vm5, %v2746_v45  ;;  %v2860_v48 = vrot.slane %v2746_v45, 4 }
 0xb67   : > { %4333 = vmatpush3.bf16.msra.mxu0 %v2864_v37  ;;  %4336 = vmatprep.mubr.msk.bf16.mxu0 %vm4639_vm1, %v4638_v40 }
 0xb68   : > { %4334 = vmatprep.subr.bf16.mxu0 %v4638_v40 }
 0xb6b   : > { %4335 = vmatpush3.bf16.msra.mxu0 %v2872_v47 }
 0xb6c   : > { %4348 = vmatprep.subr.bf16.mxu0 %v4638_v40 }
 0xb6e   : > { %4337 = vmatmul.mubr.msk.bf16.vlgmr.msra.gmra.mrb[44].mxu0 %vm2701_vm5, %v2860_v48 }
 0xb6f   : > { %4349 = vmatpush3.bf16.msra.mxu0 %v2972_v15  ;;  %4352 = vmatprep.mubr.msk.bf16.mxu0 %vm4639_vm1, %v4638_v40 }
 0xb70   : > { %4350 = vmatprep.subr.bf16.mxu0 %v4638_v40 }
 0xb73   : > { %4351 = vmatpush3.bf16.msra.mxu0 %v2980_v51  ;;  %v4514_v51 = vld [vmem:[%s4911_s6] ss:$8 sps:$4 sm:$0xff]  }
 0xb74   : > { %4364 = vmatprep.subr.bf16.mxu0 %v4638_v40 }
 0xb8b   : > { %v2737_v54 = vpop.xlane.xlu0 %2736 }
 0xb8c   : > { %4586 = vrcp.f32 %v2737_v54  ;;  %v4519_v54 = vld [vmem:[%s4911_s6 + $0x14] ss:$8 sps:$4 sm:$0xff]  }
 0xb8f   : > { %v3082_v60 = vpop.permute.xlu0 %3081 }
 0xb96   : > { %v4587_v56 = vpop.eup %4586 }
 0xb97   : > { %v2745_v58 = vmul.f32 %v4587_v56, %v4579_v34  ;;  %v4522_v56 = vld [vmem:[%s4911_s6 + $0x24] ss:$8 sps:$4 sm:$0xff]  }
 0xb99   : > { %v2747_v59 = vpack.c.bf16 %v2745_v58, %v2744_v57  ;;  %v4520_v57 = vld [vmem:[%s4911_s6 + $0x20] ss:$8 sps:$4 sm:$0xff]  }
 0xb9b   : > { %4353 = vmatmul.mubr.msk.bf16.vlgmr.msra.gmra.mrb[48].mxu0 %vm2701_vm5, %v2747_v59  ;;  %v3080_v0 = vrot.slane %v2747_v59, 4 }
 0xb9c   : > { %4365 = vmatpush3.bf16.msra.mxu0 %v3082_v60  ;;  %4368 = vmatprep.mubr.msk.bf16.mxu0 %vm4639_vm1, %v4638_v40 }
 0xb9d   : > { %4366 = vmatprep.subr.bf16.mxu0 %v4638_v40 }
 0xba0   : > { %4367 = vmatpush3.bf16.msra.mxu0 %v3090_v62  ;;  %v4523_v62 = vld [vmem:[%s4911_s6 + $0x30] ss:$8 sps:$4 sm:$0xff]  }
 0xba1   : > { %3359 = vmatprep.subr.bf16.mxu0 %v4516_v53 }
 0xba3   : > { %4369 = vmatmul.mubr.msk.bf16.vlgmr.msra.gmra.mrb[52].mxu0 %vm2701_vm5, %v3080_v0  ;;  %v4528_v0 = vld [vmem:[%s4911_s6 + $0x44] ss:$8 sps:$4 sm:$0xff]  }
 0xba4   : > { %3391 = vmatprep.mubr.bf16.mxu0 %v4637_v23  ;;  %3360 = vmatpush1.bf16.msra.mxu0 %v4514_v51 }
 0xba5   : > { %3361 = vmatprep.subr.bf16.mxu0 %v4519_v54 }
 0xba8   : > { %3362 = vmatpush1.bf16.msra.mxu0 %v4517_v55 }
 0xba9   : > { %3363 = vmatprep.subr.bf16.mxu0 %v4522_v56 }
 0xbac   : > { %3364 = vmatpush1.bf16.msra.mxu0 %v4520_v57 }
 0xbad   : > { %3365 = vmatprep.subr.bf16.mxu0 %v4525_v61 }
 0xbb0   : > { %3366 = vmatpush1.bf16.msra.mxu0 %v4523_v62 }
 0xbb1   : > { %3367 = vmatprep.subr.bf16.mxu0 %v4528_v0  ;;  %v4032_v0 = vld [vmem:[%s1132_s15] ss:$0 sm:$0xff] }
 0xbb4   : > { %3368 = vmatpush1.bf16.msra.mxu0 %v4526_v1 }
 0xc39   : > { %v2790_v2 = vpop.f32.mrb[40].mxu0 }
 0xc3a   : > { %v2796_v5 = vpack.c.bf16 %v2790_v2, %v2790_v2  ;;  %v4322_v7 = vpop.f32.mrb[41].mxu0  ;;  %v4531_v2 = vld [vmem:[%s4911_s6 + $0x54] ss:$8 sps:$4 sm:$0xff]  }
 0xc3b   : > { %v2793_v8 = vpop.f32.mrb[42].mxu0  ;;  %3369 = vmatprep.subr.bf16.mxu0 %v4531_v2  ;;  %v4532_v7 = vld [vmem:[%s4911_s6 + $0x60] ss:$8 sps:$4 sm:$0xff]  }
 0xc3c   : > { %v4323_v9 = vpop.f32.mrb[43].mxu0  ;;  %4329 = vmatmul.mubr.msk.bf16.vlgmr.msra.gmra.mrb[44].mxu1 %vm1462_vm2, %v2796_v5  ;;  %v4534_v5 = vld [vmem:[%s4911_s6 + $0x64] ss:$8 sps:$4 sm:$0xff]   ;;  %v4537_v8 = vld [vmem:[%s4911_s6 + $0x74] ss:$8 sps:$4 sm:$0xff]  }
 0xc3d   : > { %4341 = vmatpush3.bf16.msra.mxu1 %v4508_v3  ;;  %4344 = vmatprep.mubr.msk.bf16.mxu1 %vm4639_vm1, %v4638_v40  ;;  %v4529_v3 = vld [vmem:[%s4911_s6 + $0x50] ss:$8 sps:$4 sm:$0xff]  }
 0xc3e   : > { %4342 = vmatprep.subr.bf16.mxu1 %v4638_v40  ;;  %3370 = vmatpush1.bf16.msra.mxu0 %v4529_v3  ;;  %v4535_v9 = vld [vmem:[%s4911_s6 + $0x70] ss:$8 sps:$4 sm:$0xff]  }
 0xc3f   : > { %3371 = vmatprep.subr.bf16.mxu0 %v4534_v5 }
 0xc41   : > { %v2908_v23 = vpop.f32.mrb[44].mxu0  ;;  %4343 = vmatpush3.bf16.msra.mxu1 %v4509_v10 }
 0xc42   : > { %v2914_v12 = vpack.c.bf16 %v2908_v23, %v2908_v23  ;;  %v4338_v13 = vpop.f32.mrb[45].mxu0  ;;  %4356 = vmatprep.subr.bf16.mxu1 %v4638_v40  ;;  %3372 = vmatpush1.bf16.msra.mxu0 %v4532_v7 }
 0xc43   : > { %v2911_v14 = vpop.f32.mrb[46].mxu0  ;;  %3373 = vmatprep.subr.bf16.mxu0 %v4537_v8  ;;  %v4014_v13 = vld [vmem:[%s5459_s21] ss:$0 sm:$0xff] }
 0xc44   : > { %v4339_v16 = vpop.f32.mrb[47].mxu0  ;;  %4345 = vmatmul.mubr.msk.bf16.vlgmr.msra.gmra.mrb[48].mxu1 %vm1462_vm2, %v2914_v12 }
 0xc45   : > { %4357 = vmatpush3.bf16.msra.mxu1 %v4510_v11  ;;  %4360 = vmatprep.mubr.msk.bf16.mxu1 %vm4639_vm1, %v4638_v40  ;;  %v4015_v16 = vld [vmem:[%s5461_s20] ss:$0 sm:$0xff] }
 0xc46   : > { %4358 = vmatprep.subr.bf16.mxu1 %v4638_v40  ;;  %3374 = vmatpush1.bf16.msra.mxu0 %v4535_v9 }
 0xc49   : > { %4359 = vmatpush3.bf16.msra.mxu1 %v4511_v18 }
 0xc4a   : > { %4372 = vmatprep.subr.bf16.mxu1 %v4638_v40 }
 0xc6e   : > { %v3016_v19 = vpop.f32.mrb[48].mxu0 }
 0xc6f   : > { %v3022_v20 = vpack.c.bf16 %v3016_v19, %v3016_v19  ;;  %v4354_v21 = vpop.f32.mrb[49].mxu0 }
 0xc70   : > { %v3019_v4 = vpop.f32.mrb[50].mxu0  ;;  %v4539_v21 = vld [vmem:[%s4921_s18] sm:$0xff]  }
 0xc71   : > { %v4355_v22 = vpop.f32.mrb[51].mxu0  ;;  %4361 = vmatmul.mubr.msk.bf16.vlgmr.msra.gmra.mrb[52].mxu1 %vm1462_vm2, %v3022_v20  ;;  %v4538_v20 = vld [vmem:[%s4921_s18 + $0x40] sm:$0xff]   ;;  %v4540_v4 = vld [vmem:[%s4921_s18 + $0x48] sm:$0xff]  }
 0xc72   : > { %4373 = vmatpush3.bf16.msra.mxu1 %v4512_v17  ;;  %4376 = vmatprep.mubr.msk.bf16.mxu1 %vm4639_vm1, %v4638_v40  ;;  %v4541_v22 = vld [vmem:[%s4921_s18 + $0x8] sm:$0xff]  }
 0xc73   : > { %4374 = vmatprep.subr.bf16.mxu1 %v4638_v40 }
 0xc76   : > { %v3126_v25 = vpop.f32.mrb[52].mxu0  ;;  %4375 = vmatpush3.bf16.msra.mxu1 %v4513_v24  ;;  %v4542_v24 = vld [vmem:[%s4921_s18 + $0x50] sm:$0xff]  }
 0xc77   : > { %v3132_v26 = vpack.c.bf16 %v3126_v25, %v3126_v25  ;;  %v4370_v27 = vpop.f32.mrb[53].mxu0  ;;  %4142 = vmatprep.subr.bf16.mxu1 %v4538_v20  ;;  %v4543_v25 = vld [vmem:[%s4921_s18 + $0x10] sm:$0xff]  }
 0xc78   : > { %v3129_v28 = vpop.f32.mrb[54].mxu0  ;;  %v4545_v27 = vld [vmem:[%s4921_s18 + $0x18] sm:$0xff]  }
 0xc79   : > { %v4371_v29 = vpop.f32.mrb[55].mxu0  ;;  %4377 = vmatmul.mubr.msk.bf16.vlgmr.msra.gmra.mrb[56].mxu1 %vm1462_vm2, %v3132_v26  ;;  %v4544_v26 = vld [vmem:[%s4921_s18 + $0x58] sm:$0xff]   ;;  %v4546_v28 = vld [vmem:[%s4921_s18 + $0x60] sm:$0xff]  }
 0xc7a   : > { %4143 = vmatpush3.bf16.msra.mxu1 %v4539_v21  ;;  %v4547_v29 = vld [vmem:[%s4921_s18 + $0x20] sm:$0xff]  }
 0xc7b   : > { %4144 = vmatprep.subr.bf16.mxu1 %v4540_v4 }
 0xc7e   : > { %4145 = vmatpush3.bf16.msra.mxu1 %v4541_v22 }
 0xc7f   : > { %4146 = vmatprep.subr.bf16.mxu1 %v4542_v24 }
 0xc82   : > { %4147 = vmatpush3.bf16.msra.mxu1 %v4543_v25 }
 0xc83   : > { %4148 = vmatprep.subr.bf16.mxu1 %v4544_v26 }
 0xc86   : > { %4149 = vmatpush3.bf16.msra.mxu1 %v4545_v27 }
 0xc87   : > { %4150 = vmatprep.subr.bf16.mxu1 %v4546_v28 }
 0xc8a   : > { %4151 = vmatpush3.bf16.msra.mxu1 %v4547_v29 }
 0xd0f   : > { %v2846_v38 = vpop.f32.mrb[44].mxu1 }
 0xd10   : > { %v4330_v30 = vpop.f32.mrb[45].mxu1  ;;  %v2858_v34 = vadd.f32 %v4001_v33, %v2846_v38  ;;  %v4548_v38 = vld [vmem:[%s4921_s18 + $0x68] sm:$0xff]   ;;  %v4552_v33 = vld [vmem:[%s4921_s18 + $0x78] sm:$0xff]  }
 0xd11   : > { %v2849_v31 = vpop.f32.mrb[46].mxu1  ;;  %v4549_v30 = vld [vmem:[%s4921_s18 + $0x28] sm:$0xff]   ;;  %4152 = vmatprep.subr.bf16.mxu1 %v4548_v38 }
 0xd12   : > { %v4331_v32 = vpop.f32.mrb[47].mxu1  ;;  %v4550_v31 = vld [vmem:[%s4921_s18 + $0x70] sm:$0xff]   ;;  %4153 = vmatpush3.bf16.msra.mxu1 %v4549_v30 }
 0xd13   : > { %v4551_v32 = vld [vmem:[%s4921_s18 + $0x30] sm:$0xff]   ;;  %4154 = vmatprep.subr.bf16.mxu1 %v4550_v31 }
 0xd16   : > { %4155 = vmatpush3.bf16.msra.mxu1 %v4551_v32 }
 0xd17   : > { %v2964_v35 = vpop.f32.mrb[48].mxu1  ;;  %4156 = vmatprep.subr.bf16.mxu1 %v4552_v33 }
 0xd18   : > { %v2970_v40 = vadd.f32 %v2964_v35, %v2858_v34  ;;  %v4346_v36 = vpop.f32.mrb[49].mxu1  ;;  %v4553_v34 = vld [vmem:[%s4921_s18 + $0x38] sm:$0xff]   ;;  %v3233_v35 = vld [vmem:[%s4916_s17] sm:$0x3] }
 0xd19   : > { %v2967_v37 = vpop.f32.mrb[50].mxu1  ;;  %v3276_v36 = vrot.slane %v3233_v35, %v4990_v52 }
 0xd1a   : > { %v4347_v39 = vpop.f32.mrb[51].mxu1  ;;  %4157 = vmatpush3.bf16.msra.mxu1 %v4553_v34 }
 0xd44   : > { %v3072_v6 = vpop.f32.mrb[52].mxu1 }
 0xd45   : > { %v3078_v41 = vadd.f32 %v3072_v6, %v2970_v40  ;;  %v4362_v42 = vpop.f32.mrb[53].mxu1  ;;  %v3272_v40 = vrot.slane %v3233_v35, %v4987_v50 }
 0xd46   : > { %v3075_v43 = vpop.f32.mrb[54].mxu1 }
 0xd47   : > { %v4363_v44 = vpop.f32.mrb[55].mxu1 }
 0xd4c   : > { %v3182_v45 = vpop.f32.mrb[56].mxu1 }
 0xd4d   : > { %v3188_v46 = vadd.f32 %v3182_v45, %v3078_v41  ;;  %v4378_v15 = vpop.f32.mrb[57].mxu1 }
 0xd4e   : > { %v3185_v47 = vpop.f32.mrb[58].mxu1 }
 0xd4f   : > { %v4379_v48 = vpop.f32.mrb[59].mxu1  ;;  %v3189_v49 = vadd.f32 %v3188_v46, %v5139_v63 }
 0xd51   : > { %3192 = vadd.xlane.f32.xlu0 %v3189_v49 }
 0xdde   : > { %v3193_v63 = vpop.xlane.xlu0 %3192 }
 0xddf   : > { %v3194_v58 = vmul.f32 0.0078125, %v3193_v63 }
 0xde1   : > { %v3195_v59 = vsub.f32 %v3189_v49, %v3194_v58 }
 0xde3   : > { %v3196_v60 = vmul.f32 %v3195_v59, %v3195_v59 }
 0xde5   : > { %3197 = vadd.xlane.f32.xlu1 %v3196_v60 }
 0xe72   : > { %v3198_v10 = vpop.xlane.xlu1 %3197 }
 0xe73   : > { %v3199_v23 = vmul.f32 0.0078125, %v3198_v10 }
 0xe75   : > { %v3200_v11 = vadd.f32 1e-12, %v3199_v23 }
 0xe77   : > { %4588 = vrsqrt.f32 %v3200_v11 }
 0xe81   : > { %v4589_v12 = vpop.eup %4588 }
 0xe82   : > { %v3202_v14 = vmul.f32 %v4589_v12, %v3195_v59 }
 0xe84   : > { %v3209_v18 = vmul.f32 %v4014_v13, %v3202_v14 }
 0xe86   : > { %v5299_v19 = vadd.f32 %v4015_v16, %v3209_v18  ;;  %v4049_v18 = vld [vmem:[%s1112_s8] ss:$0 sm:$0xff] }
 0xe88   : > { %v3267_v17 = vpack.c.bf16 %v5299_v19, %v5299_v19 }
 0xe8a   : > { %3392 = vmatmul.mubr.bf16.vlgmr.msra.gmra.mrb[56].mxu0 %v3267_v17 }
 0xf5d   : > { %v3393_v37 = vpop.f32.mrb[56].mxu0 }
 0xf5e   : > { %v3394_v39 = vadd.f32 %v3393_v37, %v3272_v40  ;;  %v3395_v6 = vpop.f32.mrb[57].mxu0 }
 0xf5f   : > { %v3396_v41 = vadd.f32 %v3395_v6, %v3276_v36  ;;  %v3397_v42 = vpop.f32.mrb[58].mxu0 }
 0xf60   : > { %v3402_v43 = vmul.f32 0.044715, %v3394_v39  ;;  %v3398_v44 = vpop.f32.mrb[59].mxu0  ;;  %v3400_v55 = vmul.f32 0.5, %v3394_v39 }
 0xf61   : > { %v3403_v45 = vmul.f32 0.044715, %v3396_v41  ;;  %v3401_v57 = vmul.f32 0.5, %v3396_v41 }
 0xf62   : > { %v3404_v46 = vmul.f32 %v3402_v43, %v3394_v39 }
 0xf63   : > { %v3405_v15 = vmul.f32 %v3403_v45, %v3396_v41 }
 0xf64   : > { %v3406_v47 = vmul.f32 %v3404_v46, %v3394_v39 }
 0xf65   : > { %v3407_v48 = vmul.f32 %v3405_v15, %v3396_v41 }
 0xf66   : > { %v3408_v49 = vadd.f32 %v3406_v47, %v3394_v39 }
 0xf67   : > { %v3409_v51 = vadd.f32 %v3407_v48, %v3396_v41 }
 0xf68   : > { %v3410_v53 = vmul.f32 0.7978846, %v3408_v49 }
 0xf69   : > { %v3411_v54 = vmul.f32 0.7978846, %v3409_v51 }
 0xf6a   : > { %4590 = vtanh.f32 %v3410_v53 }
 0xf6b   : > { %4592 = vtanh.f32 %v3411_v54 }
 0xf74   : > { %v4591_v50 = vpop.eup %4590 }
 0xf75   : > { %v4593_v52 = vpop.eup %4592  ;;  %v3414_v56 = vadd.f32 1.0, %v4591_v50 }
 0xf76   : > { %v3415_v63 = vadd.f32 1.0, %v4593_v52 }
 0xf77   : > { %v3416_v58 = vmul.f32 %v3414_v56, %v3400_v55 }
 0xf78   : > { %v3417_v59 = vmul.f32 %v3415_v63, %v3401_v57 }
 0xf79   : > { %v3418_v61 = vpack.c.bf16 %v3416_v58, %v3416_v58 }
 0xf7a   : > { %v3419_v60 = vpack.c.bf16 %v3417_v59, %v3417_v59 }
 0xf7c   : > { %3554 = vmatprep.mubr.bf16.mxu1 %v3419_v60 }
 0xf7d   : > { %3555 = vmatmul.mubr.bf16.vlgmr.msra.gmra.mrb[60].mxu1 %v3418_v61 }
0x1050   : > { %v4158_v62 = vpop.f32.mrb[60].mxu1 }
0x1051   : > { %v4159_v1 = vpop.f32.mrb[61].mxu1 }
0x1052   : > { %v4160_v2 = vadd.f32 %v4159_v1, %v4158_v62  ;;  %v4161_v3 = vpop.f32.mrb[62].mxu1 }
0x1053   : > { %v4162_v5 = vpop.f32.mrb[63].mxu1 }
0x1054   : > { %v3557_v7 = vadd.f32 %v4160_v2, %v4032_v0 }
0x1056   : > { %v3562_v8 = vadd.f32 %v3557_v7, %v5299_v19  ;;  %v4050_v19 = vld [vmem:[%s5465_s28] ss:$0 sm:$0xff] }
0x1058   : > { %3565 = vadd.xlane.f32.xlu0 %v3562_v8 }
0x10e5   : > { %v3566_v9 = vpop.xlane.xlu0 %3565 }
0x10e6   : > { %v3567_v10 = vmul.f32 0.0078125, %v3566_v9 }
0x10e8   : > { %v3568_v23 = vsub.f32 %v3562_v8, %v3567_v10 }
0x10ea   : > { %v3569_v11 = vmul.f32 %v3568_v23, %v3568_v23 }
0x10ec   : > { %3570 = vadd.xlane.f32.xlu0 %v3569_v11 }
0x1179   : > { %v3571_v12 = vpop.xlane.xlu0 %3570 }
0x117a   : > { %v3572_v13 = vmul.f32 0.0078125, %v3571_v12 }
0x117c   : > { %v3573_v14 = vadd.f32 1e-12, %v3572_v13 }
0x117e   : > { %4594 = vrsqrt.f32 %v3573_v14 }
0x1188   : > { %v4595_v16 = vpop.eup %4594 }
0x1189   : > { %v3575_v17 = vmul.f32 %v4595_v16, %v3568_v23  ;;  %3594 = sbr.rel (%p4051_p8) target bundleno = 4498 (0x1192), region = 128 }
0x118b   : > { %v3582_v20 = vmul.f32 %v4049_v18, %v3575_v17 }
0x118d   : > { %v3589_v21 = vadd.f32 %v4050_v19, %v3582_v20 }
0x118f   : > { %3590 = vst [vmem:[#allocation2] sm:$0xff] %v3589_v21  ;;  %v3595_v4 = vpack.c.bf16 (!%p4051_p8), %v3589_v21, %v3589_v21 }
0x1191   : > { %3596 = vst [vmem:[%s4931_s16] sm:$0xf] %v3595_v4 }
0x1192 PF: > { %s5467_s2 = sld [smem:[#allocation6_spill]]  ;;  %s5468_s29 = sld [smem:[#allocation4_spill]] }
0x1193   : > { %s5470_s6 = sld [smem:[#allocation7_spill]]  ;;  %s5471_s30 = sld [smem:[#allocation8_spill]] }
0x1198   : > { %s35_s7 = sadd.s32 1, %s5467_s2   ;;  %s5469_s2 = sld [smem:[#allocation5_spill]] }
0x1199   : > { %p32_p9 = scmp.ge.s32.totalorder %s35_s7, 6  }
0x119b   :  { %34 = sbr.rel (!%p32_p9) target bundleno = 26 (0x1a), region = 224 }

// kernel: _lambda_.3
= control target key start
LH: loop header
LB: loop body
LE: loop exit
PB: predicated region body
PF: predicated region fallthrough
CT: control target
= control target key end

     0   :  { %s3732_s24 = smov 0   ;;  %s3734_s25 = smov 0   ;;  %s4278_s0 = inlined_call_operand.vmem [shape: f32[2,24,192], index: 0, kind: input, shape index: {}]   ;;  %s4279_s1 = inlined_call_operand.vmem [shape: bf16[192,128], index: 1, kind: input, shape index: {}]   ;;  %s4280_s2 = inlined_call_operand.vmem [shape: f32[1,24,128], index: 2, kind: input, shape index: {}]   ;;  %s4281_s3 = inlined_call_operand.vmem [shape: f32[2,1,128], index: 3, kind: input, shape index: {}, may-alias: {3,9}]   ;;  %s4282_s4 = inlined_call_operand.vmem [shape: f32[2,1,128], index: 4, kind: input, shape index: {}, may-alias: {4,8,10,14}]   ;;  %s4283_s5 = inlined_call_operand.vmem [shape: bf16[2,128,384], index: 5, kind: input, shape index: {}]   ;;  %s4284_s6 = inlined_call_operand.vmem [shape: f32[2,1,384], index: 6, kind: input, shape index: {}]   ;;  %s4285_s7 = inlined_call_operand.vmem [shape: bf16[2,128,128], index: 7, kind: input, shape index: {}]   ;;  %s4286_s8 = inlined_call_operand.vmem [shape: f32[2,1,128], index: 8, kind: input, shape index: {}, may-alias: {4,8,10,14}]   ;;  %s4287_s9 = inlined_call_operand.vmem [shape: f32[2,1,128], index: 9, kind: input, shape index: {}, may-alias: {3,9}]   ;;  %s4288_s10 = inlined_call_operand.vmem [shape: f32[2,1,128], index: 10, kind: input, shape index: {}, may-alias: {4,8,10,14}]   ;;  %s4289_s11 = inlined_call_operand.vmem [shape: bf16[2,128,256], index: 11, kind: input, shape index: {}]   ;;  %s4290_s12 = inlined_call_operand.vmem [shape: f32[2,1,256], index: 12, kind: input, shape index: {}]   ;;  %s4291_s13 = inlined_call_operand.vmem [shape: bf16[2,256,128], index: 13, kind: input, shape index: {}]   ;;  %s4292_s14 = inlined_call_operand.vmem [shape: f32[2,1,128], index: 14, kind: input, shape index: {}, may-alias: {4,8,10,14}]   ;;  %s4293_s15 = inlined_call_operand.vmem [shape: f32[1,128], index: 15, kind: input, shape index: {}]   ;;  %s4294_s16 = inlined_call_operand.vmem [shape: f32[1,128], index: 16, kind: input, shape index: {}]   ;;  %s4295_s17 = inlined_call_operand.vmem [shape: bf16[2,24,128], index: 17, kind: output, shape index: {}]  }
   0x1   :  { %4302 = sst [smem:[#allocation9_spill]] %s4278_s0  ;;  %s3736_s26 = smov 0  }
   0x2   :  { %4303 = sst [smem:[#allocation10_spill]] %s4279_s1  ;;  %s3738_s27 = smov 0  }
   0x3   :  { %4304 = sst [smem:[#allocation11_spill]] %s4280_s2  ;;  %s3740_s28 = smov 0  }
   0x4   :  { %4305 = sst [smem:[#allocation12_spill]] %s4281_s3 }
   0x5   :  { %4306 = sst [smem:[#allocation13_spill]] %s4282_s4 }
   0x6   :  { %4307 = sst [smem:[#allocation14_spill]] %s4283_s5 }
   0x7   :  { %4308 = sst [smem:[#allocation15_spill]] %s4284_s6 }
   0x8   :  { %4309 = sst [smem:[#allocation16_spill]] %s4285_s7 }
   0x9   :  { %4310 = sst [smem:[#allocation17_spill]] %s4293_s15 }
   0xa   :  { %4311 = sst [smem:[#allocation18_spill]] %s4294_s16 }
   0xb LB: > { %4312 = sst [smem:[#allocation3_spill]] %s3626_s26  ;;  %s36_s29 = sadd.s32 1, %s3626_s26  ;;  %s3634_s28 = sphi %s3740_s28, %s27_s28   ;;  %s3630_s27 = sphi %s3738_s27, %s4340_s27   ;;  %s3626_s26 = sphi %s3736_s26, %s4339_s26   ;;  %s3622_s25 = sphi %s3734_s25, %s4338_s25   ;;  %s3618_s24 = sphi %s3732_s24, %s4337_s24  }
   0xc   : > { %4313 = sst [smem:[#allocation4_spill]] %s3630_s27  ;;  %s39_s0 = sadd.s32 1, %s3630_s27 }
   0xd   : > { %4314 = sst [smem:[#allocation5_spill]] %s3634_s28  ;;  %p37_p0 = scmp.ge.s32.totalorder %s36_s29, 2 }
   0xe   : > { %p2996_p1 = scmp.ge.s32.totalorder %s3634_s28, 1  ;;  %p605_p2 = scmp.lt.s32.totalorder %s3634_s28, 5 }
   0xf   : > { %s4342_s29 = smov (%p37_p0, %s36_s29), 0  ;;  %s4344_s0 = smov (!%p37_p0, %s39_s0), %s3630_s27 }
  0x10   : > { %4315 = sst [smem:[#allocation6_spill]] %s4342_s29  ;;  %p606_p3 = pnand %p2996_p1, %p605_p2 }
  0x11   : > { %p41_p4 = scmp.ge.s32.totalorder %s4344_s0, 2 }
  0x12   : > { %609 = sbr.rel (%p606_p3) target bundleno = 3132 (0xc3c), region = 88 }
  0x13   : > { %s4346_s0 = smov (%p41_p4, %s4344_s0), 0 }
  0x14   : > { %4316 = sst [smem:[#allocation7_spill]] %s4346_s0 }
  0x19   : > { %p703_p5 = scmp.lt.s32.totalorder %s3622_s25, 1  ;;  %p708_p6 = scmp.lt.s32.totalorder %s3618_s24, 1  ;;  %v760_v0 = vlaneseq  ;;  %v3636_v2 = vmov -1e+09  }
  0x1a   : > { %s4319_s27 = sld [smem:[#allocation9_spill]]  ;;  %s4321_s5 = sld [smem:[#allocation14_spill]] }
  0x1b   : > { %s4348_s25 = smov (!%p703_p5, %s3622_s25), 1  ;;  %v761_v1 = vand.u32 127, %v760_v0  ;;  %s4322_s7 = sld [smem:[#allocation16_spill]] }
  0x1c   : > { %s3767_s30 = scalar_select %p708_p6, %s3618_s24, 1 }
  0x1d   : > { %s3373_s18 = smul.u32 48, %s4348_s25  ;;  %vm762_vm0 = vcmp.lt.s32.totalorder %v761_v1, 17  ;;  %s4323_s6 = sld [smem:[#allocation15_spill]] }
  0x1e   : > { %v3777_v3 = vsel %vm762_vm0, 0.0, %v3636_v2  ;;  %s3374_s28 = smul.u32 192, %s3767_s30  ;;  %s3124_s15 = sshll.u32 %s3767_s30, 6 }
  0x1f   : > { %s3375_s16 = smul.u32 3, %s3767_s30  ;;  %s3125_s20 = sshll.u32 %s3767_s30, 7 }
  0x20   : > { %s3782_s26 = scalar_lea.vmem %s4319_s27, %s3373_s18  ;;  %s3790_s1 = scalar_lea.vmem %s4321_s5, %s3374_s28 }
  0x21   : > { %4320 = sst [smem:[#allocation8_spill]] %s3782_s26  ;;  %s3795_s22 = scalar_lea.vmem %s4322_s7, %s3124_s15 }
  0x22   : > { %s3003_s15 = sshll.u32 %s3767_s30, 1  ;;  %s3819_s4 = scalar_lea.vmem %s4289_s11, %s3125_s20 }
  0x23   : > { %s3800_s29 = scalar_lea.vmem %s4323_s6, %s3375_s16  ;;  %s3824_s27 = scalar_lea.vmem %s4290_s12, %s3003_s15 }
  0x24   : > { %s3829_s3 = scalar_lea.vmem %s4291_s13, %s3125_s20  ;;  %s753_s19 = scalar_lea.vmem %s4292_s14, %s3767_s30 }
  0x25   : > { %s3376_s5 = smul.u32 12, %s4348_s25  ;;  %p3007_p7 = scmp.ne.s32.totalorder %s3618_s24, 0 }
  0x26   : > { %s4324_s16 = sld [smem:[#allocation10_spill]] (!%p3007_p7)  ;;  %v3637_v5 = vmov (!%p3007_p7), 0   ;;  %s4325_s18 = sld [smem:[#allocation8_spill]] (!%p3007_p7)  ;;  %vm877_vm1 = vcmask (!%p3007_p7), 523264  }
  0x27   : > { %s3838_s7 = scalar_lea.vmem %s4295_s17, %s3376_s5  ;;  %767 = sbr.rel (%p3007_p7) target bundleno = 309 (0x135), region = 92  ;;  %884 = vmatprep.subr.bf16.mxu0 (!%p3007_p7), %v3637_v5  ;;  %3337 = vmatprep.subr.bf16.mxu1 (!%p3007_p7), %v3637_v5 }
  0x28   : > { %s4326_s5 = sld [smem:[#allocation11_spill]] (!%p3007_p7) }
  0x2c   : > { %v3423_v4 = vld [vmem:[%s4324_s16] sm:$0xff] (!%p3007_p7)   ;;  %v3424_v6 = vld [vmem:[%s4324_s16 + $0x8] sm:$0xff] (!%p3007_p7)   ;;  %v3425_v7 = vld [vmem:[%s4324_s16 + $0x10] sm:$0xff] (!%p3007_p7)  }
  0x2d   : > { %885 = vmatpush1.bf16.msra.mxu0 (!%p3007_p7), %v3423_v4  ;;  %3349 = vmatpush1.bf16.msra.mxu1 (!%p3007_p7), %v3423_v4  ;;  %v3426_v8 = vld [vmem:[%s4324_s16 + $0x18] sm:$0xff] (!%p3007_p7)   ;;  %v769_v9 = vld [vmem:[%s4325_s18 + $0x8] sm:$0xff] (!%p3007_p7)  ;;  %v3427_v14 = vld [vmem:[%s4324_s16 + $0x20] sm:$0xff] (!%p3007_p7)  }
  0x2e   : > { %886 = vmatprep.subr.bf16.mxu0 %v3637_v5  ;;  %3338 = vmatprep.subr.bf16.mxu1 %v3637_v5  ;;  %v771_v10 = vld [vmem:[%s4325_s18 + $0x18] sm:$0xff]  ;;  %v773_v11 = vld [vmem:[%s4325_s18 + $0x28] sm:$0xff]  ;;  %v3429_v16 = vld [vmem:[%s4324_s16 + $0x30] sm:$0xff]  }
  0x2f   : > { %v775_v12 = vpack.c.bf16 %v771_v10, %v769_v9  ;;  %v777_v13 = vpack.c.bf16 %v773_v11, %v773_v11  ;;  %v3428_v15 = vld [vmem:[%s4324_s16 + $0x28] sm:$0xff]   ;;  %v3430_v17 = vld [vmem:[%s4324_s16 + $0x38] sm:$0xff]   ;;  %v3431_v18 = vld [vmem:[%s4324_s16 + $0x40] sm:$0xff]  }
  0x30   : > { %v3432_v19 = vld [vmem:[%s4324_s16 + $0x48] sm:$0xff]   ;;  %v3433_v20 = vld [vmem:[%s4324_s16 + $0x50] sm:$0xff]   ;;  %v3434_v21 = vld [vmem:[%s4324_s16 + $0x58] sm:$0xff]  }
  0x31   : > { %887 = vmatpush1.bf16.msra.mxu0 %v3424_v6  ;;  %3350 = vmatpush1.bf16.msra.mxu1 %v3424_v6  ;;  %v768_v22 = vld [vmem:[%s4325_s18] sm:$0xff]  ;;  %v770_v23 = vld [vmem:[%s4325_s18 + $0x10] sm:$0xff]  ;;  %v803_v31 = vld [vmem:[%s4326_s5 + $0x8] sm:$0xff] }
  0x32   : > { %888 = vmatprep.subr.bf16.mxu0 %v3637_v5  ;;  %3339 = vmatprep.subr.bf16.mxu1 %v3637_v5  ;;  %v772_v24 = vld [vmem:[%s4325_s18 + $0x20] sm:$0xff]  ;;  %v774_v25 = vpack.c.bf16 %v770_v23, %v768_v22  ;;  %v804_v28 = vld [vmem:[%s4326_s5 + $0x10] sm:$0xff] }
  0x33   : > { %3020 = vmatprep.mubr.msk.bf16.mxu0 %vm877_vm1, %v775_v12  ;;  %3021 = vmatprep.mubr.msk.bf16.mxu1 %vm877_vm1, %v777_v13  ;;  %v776_v26 = vpack.c.bf16 %v772_v24, %v772_v24  ;;  %v802_v27 = vld [vmem:[%s4326_s5] sm:$0xff] }
  0x35   : > { %889 = vmatpush1.bf16.msra.mxu0 %v3425_v7  ;;  %3351 = vmatpush1.bf16.msra.mxu1 %v3425_v7 }
  0x36   : > { %890 = vmatprep.subr.bf16.mxu0 %v3637_v5  ;;  %3340 = vmatprep.subr.bf16.mxu1 %v3637_v5 }
  0x39   : > { %891 = vmatpush1.bf16.msra.mxu0 %v3426_v8  ;;  %3352 = vmatpush1.bf16.msra.mxu1 %v3426_v8 }
  0x3a   : > { %892 = vmatprep.subr.bf16.mxu0 %v3637_v5  ;;  %3341 = vmatprep.subr.bf16.mxu1 %v3637_v5 }
  0x3d   : > { %893 = vmatpush1.bf16.msra.mxu0 %v3427_v14  ;;  %3353 = vmatpush1.bf16.msra.mxu1 %v3427_v14 }
  0x3e   : > { %894 = vmatprep.subr.bf16.mxu0 %v3637_v5  ;;  %3342 = vmatprep.subr.bf16.mxu1 %v3637_v5 }
  0x41   : > { %895 = vmatpush1.bf16.msra.mxu0 %v3428_v15  ;;  %3354 = vmatpush1.bf16.msra.mxu1 %v3428_v15 }
  0x42   : > { %896 = vmatprep.subr.bf16.mxu0 %v3637_v5  ;;  %3343 = vmatprep.subr.bf16.mxu1 %v3637_v5 }
  0x45   : > { %897 = vmatpush1.bf16.msra.mxu0 %v3429_v16  ;;  %3355 = vmatpush1.bf16.msra.mxu1 %v3429_v16 }
  0x46   : > { %898 = vmatprep.subr.bf16.mxu0 %v3637_v5  ;;  %3344 = vmatprep.subr.bf16.mxu1 %v3637_v5 }
  0x49   : > { %899 = vmatpush1.bf16.msra.mxu0 %v3430_v17  ;;  %3356 = vmatpush1.bf16.msra.mxu1 %v3430_v17 }
  0x4a   : > { %900 = vmatprep.subr.bf16.mxu0 %v3637_v5  ;;  %3345 = vmatprep.subr.bf16.mxu1 %v3637_v5 }
  0x4d   : > { %901 = vmatpush1.bf16.msra.mxu0 %v3431_v18  ;;  %3357 = vmatpush1.bf16.msra.mxu1 %v3431_v18 }
  0x4e   : > { %902 = vmatprep.subr.bf16.mxu0 %v3637_v5  ;;  %3346 = vmatprep.subr.bf16.mxu1 %v3637_v5 }
  0x51   : > { %903 = vmatpush1.bf16.msra.mxu0 %v3432_v19  ;;  %3358 = vmatpush1.bf16.msra.mxu1 %v3432_v19 }
  0x52   : > { %904 = vmatprep.subr.bf16.mxu0 %v3637_v5  ;;  %3347 = vmatprep.subr.bf16.mxu1 %v3637_v5 }
  0x55   : > { %905 = vmatpush1.bf16.msra.mxu0 %v3433_v20  ;;  %3359 = vmatpush1.bf16.msra.mxu1 %v3433_v20 }
  0x56   : > { %906 = vmatprep.subr.bf16.mxu0 %v3637_v5  ;;  %3348 = vmatprep.subr.bf16.mxu1 %v3637_v5 }
  0x59   : > { %907 = vmatpush1.bf16.msra.mxu0 %v3434_v21  ;;  %3360 = vmatpush1.bf16.msra.mxu1 %v3434_v21 }
  0x5c   : > { %917 = vmatmul.mubr.bf16.vlgmr.msra.gmra.mrb[0].mxu0 %v774_v25  ;;  %925 = vmatmul.mubr.bf16.vlgmr.msra.gmra.mrb[0].mxu1 %v776_v26 }
 0x12f   : > { %v918_v29 = vpop.f32.mrb[0].mxu0  ;;  %v926_v30 = vpop.f32.mrb[0].mxu1 }
 0x130   : > { %v919_v32 = vadd.f32 %v918_v29, %v802_v27  ;;  %v927_v33 = vadd.f32 %v926_v30, %v804_v28  ;;  %v920_v34 = vpop.f32.mrb[1].mxu0  ;;  %v928_v35 = vpop.f32.mrb[1].mxu1 }
 0x131   : > { %v921_v36 = vpop.f32.mrb[2].mxu0  ;;  %v929_v37 = vpop.f32.mrb[2].mxu1 }
 0x132   : > { %932 = vst [vmem:[#allocation2] sm:$0xff] %v919_v32  ;;  %934 = vst [vmem:[#allocation2 + $0x10] sm:$0xff] %v927_v33  ;;  %v922_v38 = vadd.f32 %v921_v36, %v803_v31  ;;  %v923_v39 = vpop.f32.mrb[3].mxu0  ;;  %v930_v40 = vpop.f32.mrb[3].mxu1 }
 0x134   : > { %933 = vst [vmem:[#allocation2 + $0x8] sm:$0xff] %v922_v38 }
 0x135 PF: > { %v3435_v44 = vld [vmem:[%s3790_s1 + $0x4] ss:$12 sps:$4 sm:$0xff]   ;;  %v3437_v45 = vld [vmem:[%s3790_s1] ss:$12 sps:$4 sm:$0xff]   ;;  %v3438_v46 = vld [vmem:[%s3790_s1 + $0x8] ss:$12 sps:$4 sm:$0xff]   ;;  %s4331_s23 = scalar_lea.vmem %s4286_s8, %s3767_s30  ;;  %s4332_s0 = scalar_lea.vmem %s4287_s9, %s3767_s30 }
 0x136   : > { %v3439_v47 = vld [vmem:[%s3790_s1 + $0x1c] ss:$12 sps:$4 sm:$0xff]   ;;  %1188 = vmatprep.subr.bf16.mxu0 %v3435_v44  ;;  %3221 = vmatprep.subr.bf16.mxu1 %v3438_v46  ;;  %v3441_v60 = vld [vmem:[%s3790_s1 + $0x18] ss:$12 sps:$4 sm:$0xff]   ;;  %v3442_v61 = vld [vmem:[%s3790_s1 + $0x20] ss:$12 sps:$4 sm:$0xff]   ;;  %s4333_s15 = scalar_lea.vmem %s4288_s10, %s3767_s30 }
 0x137   : > { %1189 = vmatpush1.bf16.msra.mxu0 %v3437_v45  ;;  %3222 = vmatpush3.bf16.msra.mxu1 %v3438_v46  ;;  %v3443_v62 = vld [vmem:[%s3790_s1 + $0x34] ss:$12 sps:$4 sm:$0xff]   ;;  %v3445_v63 = vld [vmem:[%s3790_s1 + $0x30] ss:$12 sps:$4 sm:$0xff]   ;;  %v3446_v1 = vld [vmem:[%s3790_s1 + $0x38] ss:$12 sps:$4 sm:$0xff]  }
 0x138   : > { %1190 = vmatprep.subr.bf16.mxu0 %v3439_v47  ;;  %3223 = vmatprep.subr.bf16.mxu1 %v3442_v61  ;;  %v3447_v2 = vld [vmem:[%s3790_s1 + $0x4c] ss:$12 sps:$4 sm:$0xff]   ;;  %v3449_v4 = vld [vmem:[%s3790_s1 + $0x48] ss:$12 sps:$4 sm:$0xff]   ;;  %v3450_v5 = vld [vmem:[%s3790_s1 + $0x50] ss:$12 sps:$4 sm:$0xff]  }
 0x139   : > { %v935_v41 = vld [vmem:[#allocation2] sm:$0xff]  ;;  %v937_v42 = vld [vmem:[#allocation2 + $0x10] sm:$0xff]  ;;  %v3455_v9 = vld [vmem:[%s3790_s1 + $0x7c] ss:$12 sps:$4 sm:$0xff]   ;;  %v3638_v14 = vmov 0   ;;  %s4327_s26 = sld [smem:[#allocation12_spill]] }
 0x13a   : > { %940 = vadd.xlane.f32.xlu0 %v935_v41  ;;  %944 = vadd.xlane.f32.xlu1 %v937_v42  ;;  %v3451_v6 = vld [vmem:[%s3790_s1 + $0x64] ss:$12 sps:$4 sm:$0xff]   ;;  %v3453_v7 = vld [vmem:[%s3790_s1 + $0x60] ss:$12 sps:$4 sm:$0xff]   ;;  %v3454_v8 = vld [vmem:[%s3790_s1 + $0x68] ss:$12 sps:$4 sm:$0xff]  }
 0x13b   : > { %v936_v43 = vld [vmem:[#allocation2 + $0x8] sm:$0xff]  ;;  %1191 = vmatpush1.bf16.msra.mxu0 %v3441_v60  ;;  %3224 = vmatpush3.bf16.msra.mxu1 %v3442_v61  ;;  %v3457_v11 = vld [vmem:[%s3790_s1 + $0x78] ss:$12 sps:$4 sm:$0xff]   ;;  %v3459_v12 = vld [vmem:[%s3790_s1 + $0x94] ss:$12 sps:$4 sm:$0xff]   ;;  %s4329_s25 = sld [smem:[#allocation13_spill]] }
 0x13c   : > { %1192 = vmatprep.subr.bf16.mxu0 %v3443_v62  ;;  %3225 = vmatprep.subr.bf16.mxu1 %v3446_v1  ;;  %v3458_v10 = vld [vmem:[%s3790_s1 + $0x80] ss:$12 sps:$4 sm:$0xff]   ;;  %v3462_v13 = vld [vmem:[%s3790_s1 + $0x98] ss:$12 sps:$4 sm:$0xff]   ;;  %v3461_v15 = vld [vmem:[%s3790_s1 + $0x90] ss:$12 sps:$4 sm:$0xff]  }
 0x13d   : > { %1220 = vmatprep.mubr.bf16.mxu0 %v3638_v14  ;;  %v3463_v16 = vld [vmem:[%s3790_s1 + $0xac] ss:$12 sps:$4 sm:$0xff]   ;;  %v3466_v17 = vld [vmem:[%s3790_s1 + $0xb0] ss:$12 sps:$4 sm:$0xff]   ;;  %v3465_v18 = vld [vmem:[%s3790_s1 + $0xa8] ss:$12 sps:$4 sm:$0xff]  }
 0x13e   : > { %942 = vadd.xlane.f32.xlu0 %v936_v43  ;;  %v3968_v44 = vshrl.u32 %v760_v0, 7  ;;  %v1024_v46 = vld [vmem:[%s3800_s29] sm:$0x7]  ;;  %vm1294_vm2 = vcmask 261120   ;;  %s3639_s29 = smov 64   ;;  %s3640_s2 = smov 96  }
 0x13f   : > { %1193 = vmatpush1.bf16.msra.mxu0 %v3445_v63  ;;  %3226 = vmatpush3.bf16.msra.mxu1 %v3446_v1  ;;  %s4328_s28 = scalar_lea.vmem %s4327_s26, %s3767_s30  ;;  %s3641_s20 = smov 32   ;;  %vm1722_vm3 = vcmask 1043456   ;;  %vm1575_vm4 = vcmask 195584  }
 0x140   : > { %1194 = vmatprep.subr.bf16.mxu0 %v3447_v2  ;;  %3227 = vmatprep.subr.bf16.mxu1 %v3450_v5  ;;  %v3022_v30 = vld [vmem:[%s4328_s28] ss:$0 sm:$0xff]  ;;  %v1047_v45 = vsub.s32 0, %v3968_v44  ;;  %v1051_v47 = vsub.s32 1, %v3968_v44  ;;  %p3116_p8 = scmp.ne.s32.totalorder %s3618_s24, 1 }
 0x141   : > { %s4330_s6 = scalar_lea.vmem %s4329_s25, %s3767_s30 }
 0x142   : > { %v3023_v36 = vld [vmem:[%s4330_s6] ss:$0 sm:$0xff]  ;;  %s4335_s6 = sld [smem:[#allocation18_spill]] (!%p3116_p8) }
 0x143   : > { %1195 = vmatpush1.bf16.msra.mxu0 %v3449_v4  ;;  %3228 = vmatpush3.bf16.msra.mxu1 %v3450_v5 }
 0x144   : > { %1196 = vmatprep.subr.bf16.mxu0 %v3451_v6  ;;  %3229 = vmatprep.subr.bf16.mxu1 %v3454_v8 }
 0x147   : > { %1197 = vmatpush1.bf16.msra.mxu0 %v3453_v7  ;;  %3230 = vmatpush3.bf16.msra.mxu1 %v3454_v8 }
 0x148   : > { %1198 = vmatprep.subr.bf16.mxu0 %v3455_v9  ;;  %3231 = vmatprep.subr.bf16.mxu1 %v3458_v10 }
 0x14b   : > { %1199 = vmatpush1.bf16.msra.mxu0 %v3457_v11  ;;  %3232 = vmatpush3.bf16.msra.mxu1 %v3458_v10 }
 0x14c   : > { %1200 = vmatprep.subr.bf16.mxu0 %v3459_v12  ;;  %3233 = vmatprep.subr.bf16.mxu1 %v3462_v13 }
 0x14f   : > { %1201 = vmatpush1.bf16.msra.mxu0 %v3461_v15  ;;  %3234 = vmatpush3.bf16.msra.mxu1 %v3462_v13 }
 0x150   : > { %1202 = vmatprep.subr.bf16.mxu0 %v3463_v16  ;;  %3235 = vmatprep.subr.bf16.mxu1 %v3466_v17 }
 0x153   : > { %1203 = vmatpush1.bf16.msra.mxu0 %v3465_v18  ;;  %3236 = vmatpush3.bf16.msra.mxu1 %v3466_v17 }
 0x1c7   : > { %v941_v48 = vpop.xlane.xlu0 %940  ;;  %v945_v49 = vpop.xlane.xlu1 %944 }
 0x1c8   : > { %v947_v50 = vmul.f32 0.0078125, %v941_v48  ;;  %v949_v51 = vmul.f32 0.0078125, %v945_v49  ;;  %v1048_v48 = vrot.slane %v1024_v46, %v1047_v45  ;;  %v1055_v49 = vsub.s32 2, %v3968_v44 }
 0x1ca   : > { %v3920_v52 = vsub.f32 %v935_v41, %v947_v50  ;;  %v3922_v53 = vsub.f32 %v937_v42, %v949_v51  ;;  %v1052_v51 = vrot.slane %v1024_v46, %v1051_v47 }
 0x1cb   : > { %v943_v54 = vpop.xlane.xlu0 %942 }
 0x1cc   : > { %v948_v55 = vmul.f32 0.0078125, %v943_v54  ;;  %v953_v56 = vmul.f32 %v3920_v52, %v3920_v52  ;;  %v955_v58 = vmul.f32 %v3922_v53, %v3922_v53  ;;  %v3978_v54 = vrot.slane %v1024_v46, %v1055_v49 }
 0x1ce   : > { %v3926_v57 = vsub.f32 %v936_v43, %v948_v55  ;;  %956 = vadd.xlane.f32.xlu1 %v953_v56 }
 0x1d0   : > { %v954_v59 = vmul.f32 %v3926_v57, %v3926_v57 }
 0x1d2   : > { %960 = vadd.xlane.f32.xlu1 %v955_v58  ;;  %958 = vadd.xlane.f32.xlu0 %v954_v59 }
 0x25b   : > { %v957_v19 = vpop.xlane.xlu1 %956 }
 0x25c   : > { %v962_v20 = vmul.f32 0.0078125, %v957_v19 }
 0x25e   : > { %v965_v21 = vadd.f32 1e-12, %v962_v20 }
 0x25f   : > { %v961_v22 = vpop.xlane.xlu1 %960  ;;  %v959_v23 = vpop.xlane.xlu0 %958 }
 0x260   : > { %3515 = vrsqrt.f32 %v965_v21  ;;  %v964_v24 = vmul.f32 0.0078125, %v961_v22  ;;  %v963_v25 = vmul.f32 0.0078125, %v959_v23 }
 0x262   : > { %v967_v26 = vadd.f32 1e-12, %v964_v24  ;;  %v966_v27 = vadd.f32 1e-12, %v963_v25 }
 0x264   : > { %3517 = vrsqrt.f32 %v967_v26 }
 0x265   : > { %3519 = vrsqrt.f32 %v966_v27 }
 0x26a   : > { %v3516_v28 = vpop.eup %3515 }
 0x26b   : > { %v971_v29 = vmul.f32 %v3516_v28, %v3920_v52 }
 0x26d   : > { %v980_v35 = vmul.f32 %v3022_v30, %v971_v29 }
 0x26e   : > { %v3518_v31 = vpop.eup %3517 }
 0x26f   : > { %v3520_v32 = vpop.eup %3519  ;;  %v973_v33 = vmul.f32 %v3518_v31, %v3922_v53  ;;  %v989_v40 = vadd.f32 %v3023_v36, %v980_v35 }
 0x270   : > { %v972_v34 = vmul.f32 %v3520_v32, %v3926_v57 }
 0x271   : > { %v982_v37 = vmul.f32 %v3022_v30, %v973_v33 }
 0x272   : > { %v981_v38 = vmul.f32 %v3022_v30, %v972_v34 }
 0x273   : > { %v991_v39 = vadd.f32 %v3023_v36, %v982_v37 }
 0x274   : > { %v990_v41 = vadd.f32 %v3023_v36, %v981_v38 }
 0x275   : > { %v1043_v42 = vpack.c.bf16 %v991_v39, %v991_v39 }
 0x276   : > { %v1042_v43 = vpack.c.bf16 %v990_v41, %v989_v40 }
 0x278   : > { %1221 = vmatmul.mubr.bf16.vlgmr.msra.gmra.mrb[0].mxu0 %v1042_v43  ;;  %3237 = vmatprep.mubr.bf16.mxu1 %v1042_v43 }
 0x279   : > { %3238 = vmatmul.mubr.bf16.vlgmr.msra.gmra.mrb[0].mxu1 %v1043_v42  ;;  %1230 = vmatprep.mubr.bf16.mxu0 %v3638_v14 }
 0x280   : > { %1231 = vmatmul.mubr.bf16.gmra.mrb[4].mxu0 %v1043_v42 }
 0x34b   : > { %v1222_v50 = vpop.f32.mrb[0].mxu0 }
 0x34c   : > { %v1223_v52 = vadd.f32 %v1222_v50, %v1048_v48  ;;  %v1224_v53 = vpop.f32.mrb[1].mxu0  ;;  %v3980_v0 = vpop.f32.mrb[0].mxu1 }
 0x34d   : > { %v1226_v55 = vpop.f32.mrb[2].mxu0  ;;  %v1273_v56 = vpop.f32.mrb[1].mxu1  ;;  %v1225_v60 = vadd.f32 %v1224_v53, %v1052_v51  ;;  %v1282_v34 = vadd.f32 %v3980_v0, %v3978_v54 }
 0x34e   : > { %v1227_v57 = vadd.f32 %v1226_v55, %v1048_v48  ;;  %v1228_v58 = vpop.f32.mrb[3].mxu0  ;;  %v3240_v59 = vpop.f32.mrb[2].mxu1  ;;  %v1287_v63 = vmul.f32 0.17677669, %v1223_v52  ;;  %v1274_v2 = vadd.f32 %v1273_v56, %v3978_v54 }
 0x34f   : > { %v1229_v61 = vadd.f32 %v1228_v58, %v1052_v51  ;;  %v1276_v62 = vpop.f32.mrb[3].mxu1  ;;  %v4022_v37 = vpack.c.bf16 %v1282_v34, %v1282_v34 }
 0x350   : > { %v1288_v1 = vmul.f32 0.17677669, %v1227_v57  ;;  %v1277_v4 = vadd.f32 %v1276_v62, %v3978_v54 }
 0x351   : > { %v1292_v5 = vpack.c.bf16 %v1229_v61, %v1225_v60  ;;  %v1724_v39 = vsel %vm1722_vm3, %v4022_v37, 0 }
 0x352   : > { %v1290_v6 = vpack.c.bf16 %v1288_v1, %v1287_v63  ;;  %v3984_v7 = vpack.c.bf16 %v1277_v4, %v1274_v2 }
 0x353   : > { %v1232_v8 = vpop.f32.mrb[4].mxu0  ;;  %1431 = vrot.lane.b32.xlu1 %v1292_v5, %s3639_s29  ;;  %1363 = vrot.lane.b32.xlu0 %v1292_v5, %s3640_s2  ;;  %v1302_v9 = vsel %vm1294_vm2, %v1292_v5, 0 }
 0x354   : > { %v1233_v10 = vadd.f32 %v1232_v8, %v1048_v48  ;;  %3361 = vmatprep.subr.msk.bf16.mxu0 %vm1294_vm2, %v1292_v5  ;;  %v1234_v11 = vpop.f32.mrb[5].mxu0  ;;  %3245 = vmatprep.mubr.msk.bf16.mxu0 %vm1294_vm2, %v1290_v6 }
 0x355   : > { %v1235_v12 = vadd.f32 %v1234_v11, %v1052_v51  ;;  %3242 = vmatpush3.bf16.xpose.msra.mxu0 %v1302_v9  ;;  %v1236_v13 = vpop.f32.mrb[6].mxu0 }
 0x356   : > { %v1289_v15 = vmul.f32 0.17677669, %v1233_v10  ;;  %v1237_v16 = vpop.f32.mrb[7].mxu0 }
 0x357   : > { %v1293_v17 = vpack.c.bf16 %v1235_v12, %v1235_v12 }
 0x358   : > { %v1291_v18 = vpack.c.bf16 %v1289_v15, %v1289_v15 }
 0x359   : > { %1365 = vrot.lane.b32.xlu1 %v1293_v17, %s3640_s2  ;;  %3362 = vmatprep.subr.msk.bf16.mxu0 %vm1294_vm2, %v1293_v17  ;;  %v1305_v19 = vsel %vm1294_vm2, %v1293_v17, 0 }
 0x35a   : > { %1359 = vrot.lane.b32.xlu0 %v1291_v18, %s3640_s2 }
 0x35d   : > { %3244 = vmatpush3.bf16.xpose.msra.mxu0 %v1305_v19  ;;  %1357 = vrot.lane.b32.xlu1 %v1290_v6, %s3640_s2 }
 0x35e   : > { %1433 = vrot.lane.b32.xlu0 %v1293_v17, %s3639_s29 }
 0x361   : > { %1499 = vrot.lane.b32.xlu1 %v1292_v5, %s3641_s20 }
 0x362   : > { %1427 = vrot.lane.b32.xlu0 %v1290_v6, %s3639_s29 }
 0x364   : > { %3246 = vmatmul.mubr.msk.bf16.vlgmr.msra.gmra.mrb[8].mxu0 %vm1294_vm2, %v1291_v18 }
 0x365   : > { %1501 = vrot.lane.b32.xlu1 %v1293_v17, %s3641_s20 }
 0x366   : > { %1495 = vrot.lane.b32.xlu0 %v1290_v6, %s3641_s20 }
 0x369   : > { %1429 = vrot.lane.b32.xlu1 %v1291_v18, %s3639_s29 }
 0x36d   : > { %1497 = vrot.lane.b32.xlu1 %v1291_v18, %s3641_s20 }
 0x3c5   : > { %v1432_v20 = vpop.permute.xlu1 %1431  ;;  %v1364_v21 = vpop.permute.xlu0 %1363 }
 0x3c6   : > { %v1442_v22 = vsel %vm1294_vm2, %v1432_v20, 0  ;;  %v1374_v23 = vsel %vm1294_vm2, %v1364_v21, 0  ;;  %3363 = vmatprep.subr.msk.bf16.mxu1 %vm1294_vm2, %v1364_v21  ;;  %3365 = vmatprep.subr.msk.bf16.mxu0 %vm1294_vm2, %v1432_v20 }
 0x3c7   : > { %3250 = vmatpush3.bf16.xpose.msra.mxu1 %v1374_v23  ;;  %3258 = vmatpush3.bf16.xpose.msra.mxu0 %v1442_v22 }
 0x3cb   : > { %v1366_v24 = vpop.permute.xlu1 %1365 }
 0x3cc   : > { %3364 = vmatprep.subr.msk.bf16.mxu1 %vm1294_vm2, %v1366_v24  ;;  %v1360_v25 = vpop.permute.xlu0 %1359  ;;  %v1377_v26 = vsel %vm1294_vm2, %v1366_v24, 0 }
 0x3cf   : > { %3252 = vmatpush3.bf16.xpose.msra.mxu1 %v1377_v26  ;;  %v1358_v27 = vpop.permute.xlu1 %1357 }
 0x3d0   : > { %v1434_v28 = vpop.permute.xlu0 %1433  ;;  %3253 = vmatprep.mubr.msk.bf16.mxu1 %vm1294_vm2, %v1358_v27 }
 0x3d1   : > { %v1445_v29 = vsel %vm1294_vm2, %v1434_v28, 0  ;;  %3366 = vmatprep.subr.msk.bf16.mxu0 %vm1294_vm2, %v1434_v28 }
 0x3d2   : > { %3260 = vmatpush3.bf16.xpose.msra.mxu0 %v1445_v29 }
 0x3d3   : > { %v1500_v30 = vpop.permute.xlu1 %1499  ;;  %3273 = vmatprep.subr.bf16.mxu0 %v3984_v7 }
 0x3d4   : > { %v1428_v31 = vpop.permute.xlu0 %1427  ;;  %3367 = vmatprep.subr.msk.bf16.mxu1 %vm1294_vm2, %v1500_v30  ;;  %v1510_v32 = vsel %vm1294_vm2, %v1500_v30, 0 }
 0x3d5   : > { %3261 = vmatprep.mubr.msk.bf16.mxu0 %vm1294_vm2, %v1428_v31 }
 0x3d6   : > { %3254 = vmatmul.mubr.msk.bf16.vlgmr.msra.gmra.mrb[4].mxu1 %vm1294_vm2, %v1360_v25 }
 0x3d7   : > { %3266 = vmatpush3.bf16.xpose.msra.mxu1 %v1510_v32  ;;  %v1502_v33 = vpop.permute.xlu1 %1501 }
 0x3d8   : > { %v1496_v35 = vpop.permute.xlu0 %1495  ;;  %3368 = vmatprep.subr.msk.bf16.mxu1 %vm1294_vm2, %v1502_v33  ;;  %v1513_v38 = vsel %vm1294_vm2, %v1502_v33, 0 }
 0x3d9   : > { %3269 = vmatprep.mubr.msk.bf16.mxu1 %vm1294_vm2, %v1496_v35 }
 0x3db   : > { %v1430_v36 = vpop.permute.xlu1 %1429 }
 0x3dc   : > { %3262 = vmatmul.mubr.msk.bf16.vlgmr.msra.gmra.mrb[12].mxu0 %vm1294_vm2, %v1430_v36 }
 0x3dd   : > { %3274 = vmatpush3.bf16.msra.mxu0 %v3984_v7 }
 0x3de   : > { %3369 = vmatprep.subr.msk.bf16.mxu0 %vm1722_vm3, %v4022_v37 }
 0x3df   : > { %3268 = vmatpush3.bf16.xpose.msra.mxu1 %v1513_v38  ;;  %v1498_v40 = vpop.permute.xlu1 %1497 }
 0x3e1   : > { %3276 = vmatpush3.bf16.msra.mxu0 %v1724_v39 }
 0x3e6   : > { %3270 = vmatmul.mubr.msk.bf16.vlgmr.msra.gmra.mrb[8].mxu1 %vm1294_vm2, %v1498_v40 }
 0x437   : > { %v3247_v41 = vpop.f32.mrb[8].mxu0 }
 0x438   : > { %v1341_v42 = vpop.f32.mrb[9].mxu0  ;;  %v1565_v49 = vadd.f32 %v3247_v41, %v3777_v3 }
 0x439   : > { %v1563_v43 = vadd.f32 %v1341_v42, %v3777_v3  ;;  %v3248_v46 = vpop.f32.mrb[10].mxu0 }
 0x43a   : > { %v1344_v48 = vpop.f32.mrb[11].mxu0  ;;  %v1582_v53 = vsel %vm1575_vm4, %v1565_v49, -inf }
 0x43b   : > { %v1564_v50 = vadd.f32 %v1344_v48, %v3777_v3  ;;  %v1576_v51 = vsel %vm1575_vm4, %v1563_v43, -inf }
 0x43c   : > { %1577 = vmax.xlane.f32.xlu0 %v1576_v51 }
 0x43d   : > { %v1579_v52 = vsel %vm1575_vm4, %v1564_v50, -inf }
 0x43e   : > { %1580 = vmax.xlane.f32.xlu1 %v1579_v52 }
 0x440   : > { %1583 = vmax.xlane.f32.xlu0 %v1582_v53 }
 0x4a9   : > { %v3255_v54 = vpop.f32.mrb[4].mxu1 }
 0x4aa   : > { %v4039_v0 = vadd.f32 %v3255_v54, %v3777_v3  ;;  %v1413_v55 = vpop.f32.mrb[5].mxu1 }
 0x4ab   : > { %v1566_v56 = vadd.f32 %v1413_v55, %v3777_v3  ;;  %v3256_v57 = vpop.f32.mrb[6].mxu1 }
 0x4ac   : > { %v1416_v58 = vpop.f32.mrb[7].mxu1  ;;  %v1591_v59 = vsel %vm1575_vm4, %v4039_v0, -inf }
 0x4ad   : > { %v4045_v60 = vadd.f32 %v1416_v58, %v3777_v3  ;;  %1592 = vmax.xlane.f32.xlu1 %v1591_v59  ;;  %v1585_v61 = vsel %vm1575_vm4, %v1566_v56, -inf }
 0x4ae   : > { %1586 = vmax.xlane.f32.xlu0 %v1585_v61 }
 0x4af   : > { %v3263_v62 = vpop.f32.mrb[12].mxu0  ;;  %v1588_v4 = vsel %vm1575_vm4, %v4045_v60, -inf }
 0x4b0   : > { %v1481_v63 = vpop.f32.mrb[13].mxu0  ;;  %v1571_v8 = vadd.f32 %v3263_v62, %v3777_v3 }
 0x4b1   : > { %v1569_v1 = vadd.f32 %v1481_v63, %v3777_v3  ;;  %v3264_v2 = vpop.f32.mrb[14].mxu0 }
 0x4b2   : > { %1589 = vmax.xlane.f32.xlu0 %v1588_v4  ;;  %v1484_v5 = vpop.f32.mrb[15].mxu0  ;;  %v1600_v12 = vsel %vm1575_vm4, %v1571_v8, -inf }
 0x4b3   : > { %v4052_v6 = vadd.f32 %v1484_v5, %v3777_v3  ;;  %v1594_v9 = vsel %vm1575_vm4, %v1569_v1, -inf }
 0x4b5   : > { %v1597_v10 = vsel %vm1575_vm4, %v4052_v6, -inf }
 0x4b6   : > { %1595 = vmax.xlane.f32.xlu0 %v1594_v9  ;;  %1598 = vmax.xlane.f32.xlu1 %v1597_v10 }
 0x4b9   : > { %v3271_v11 = vpop.f32.mrb[8].mxu1 }
 0x4ba   : > { %v1549_v13 = vpop.f32.mrb[9].mxu1  ;;  %1601 = vmax.xlane.f32.xlu0 %v1600_v12  ;;  %v4063_v18 = vadd.f32 %v3271_v11, %v3777_v3 }
 0x4bb   : > { %v4060_v15 = vadd.f32 %v1549_v13, %v3777_v3  ;;  %v3272_v16 = vpop.f32.mrb[10].mxu1 }
 0x4bc   : > { %v1552_v17 = vpop.f32.mrb[11].mxu1  ;;  %v1609_v22 = vsel %vm1575_vm4, %v4063_v18, -inf }
 0x4bd   : > { %v4066_v19 = vadd.f32 %v1552_v17, %v3777_v3  ;;  %v1603_v20 = vsel %vm1575_vm4, %v4060_v15, -inf }
 0x4be   : > { %1604 = vmax.xlane.f32.xlu1 %v1603_v20 }
 0x4bf   : > { %v1606_v21 = vsel %vm1575_vm4, %v4066_v19, -inf }
 0x4c0   : > { %1607 = vmax.xlane.f32.xlu0 %v1606_v21 }
 0x4c2   : > { %1610 = vmax.xlane.f32.xlu1 %v1609_v22 }
 0x4c9   : > { %v1578_v23 = vpop.xlane.xlu0 %1577 }
 0x4ca   : > { %v1612_v25 = vsub.f32 %v1563_v43, %v1578_v23 }
 0x4cb   : > { %v1581_v24 = vpop.xlane.xlu1 %1580 }
 0x4cc   : > { %v1613_v26 = vsub.f32 %v1564_v50, %v1581_v24  ;;  %v1624_v29 = vmul.f32 1.442695, %v1612_v25 }
 0x4cd   : > { %v1584_v27 = vpop.xlane.xlu0 %1583 }
 0x4ce   : > { %v1626_v28 = vmul.f32 1.442695, %v1613_v26  ;;  %v1614_v3 = vsub.f32 %v1565_v49, %v1584_v27 }
 0x4d0   : > { %3521 = vpow2.f32 %v1626_v28  ;;  %v1628_v30 = vmul.f32 1.442695, %v1614_v3 }
 0x4d2   : > { %3523 = vpow2.f32 %v1628_v30 }
 0x4d3   : > { %3525 = vpow2.f32 %v1624_v29 }
 0x4da   : > { %v4074_v31 = vpop.eup %3521 }
 0x4db   : > { %v1651_v32 = vsel %vm1575_vm4, %v4074_v31, 0.0 }
 0x4dc   : > { %v4078_v33 = vpop.eup %3523  ;;  %1652 = vadd.xlane.f32.xlu1 %v1651_v32  ;;  %v3467_v32 = vld [vmem:[%s3795_s22] sm:$0xff]  }
 0x4dd   : > { %v1654_v34 = vsel %vm1575_vm4, %v4078_v33, 0.0  ;;  %v3526_v35 = vpop.eup %3525  ;;  %3281 = vmatprep.subr.bf16.mxu1 %v3467_v32 }
 0x4de   : > { %1655 = vadd.xlane.f32.xlu0 %v1654_v34  ;;  %v1648_v36 = vsel %vm1575_vm4, %v3526_v35, 0.0  ;;  %3282 = vmatpush3.bf16.msra.mxu1 %v3467_v32 }
 0x4e2   : > { %1649 = vadd.xlane.f32.xlu0 %v1648_v36 }
 0x53a   : > { %v1593_v38 = vpop.xlane.xlu1 %1592 }
 0x53b   : > { %v1617_v39 = vsub.f32 %v4039_v0, %v1593_v38  ;;  %v1587_v40 = vpop.xlane.xlu0 %1586 }
 0x53c   : > { %v1615_v41 = vsub.f32 %v1566_v56, %v1587_v40 }
 0x53d   : > { %v1634_v42 = vmul.f32 1.442695, %v1617_v39 }
 0x53e   : > { %v1630_v43 = vmul.f32 1.442695, %v1615_v41 }
 0x53f   : > { %3527 = vpow2.f32 %v1634_v42  ;;  %v1590_v46 = vpop.xlane.xlu0 %1589 }
 0x540   : > { %3529 = vpow2.f32 %v1630_v43  ;;  %v1616_v53 = vsub.f32 %v4045_v60, %v1590_v46 }
 0x542   : > { %v1632_v56 = vmul.f32 1.442695, %v1616_v53 }
 0x543   : > { %v1596_v48 = vpop.xlane.xlu0 %1595 }
 0x544   : > { %v1618_v49 = vsub.f32 %v1569_v1, %v1596_v48  ;;  %v1599_v1 = vpop.xlane.xlu1 %1598 }
 0x545   : > { %v1619_v12 = vsub.f32 %v4052_v6, %v1599_v1 }
 0x546   : > { %v1636_v54 = vmul.f32 1.442695, %v1618_v49 }
 0x547   : > { %v1602_v50 = vpop.xlane.xlu0 %1601  ;;  %v1638_v17 = vmul.f32 1.442695, %v1619_v12 }
 0x548   : > { %v1620_v51 = vsub.f32 %v1571_v8, %v1602_v50 }
 0x549   : > { %v4084_v52 = vpop.eup %3527 }
 0x54a   : > { %v1640_v55 = vmul.f32 1.442695, %v1620_v51  ;;  %v1663_v0 = vsel %vm1575_vm4, %v4084_v52, 0.0  ;;  %v4089_v57 = vpop.eup %3529 }
 0x54b   : > { %1664 = vadd.xlane.f32.xlu1 %v1663_v0  ;;  %v1657_v58 = vsel %vm1575_vm4, %v4089_v57, 0.0  ;;  %v1605_v4 = vpop.xlane.xlu1 %1604 }
 0x54c   : > { %3531 = vpow2.f32 %v1640_v55  ;;  %v1621_v24 = vsub.f32 %v4060_v15, %v1605_v4 }
 0x54d   : > { %3533 = vpow2.f32 %v1636_v54  ;;  %v1608_v5 = vpop.xlane.xlu0 %1607 }
 0x54e   : > { %3535 = vpow2.f32 %v1632_v56  ;;  %v1622_v26 = vsub.f32 %v4066_v19, %v1608_v5  ;;  %v1642_v6 = vmul.f32 1.442695, %v1621_v24 }
 0x54f   : > { %1658 = vadd.xlane.f32.xlu1 %v1657_v58  ;;  %v1611_v8 = vpop.xlane.xlu1 %1610 }
 0x550   : > { %v1623_v20 = vsub.f32 %v4063_v18, %v1611_v8  ;;  %v1644_v27 = vmul.f32 1.442695, %v1622_v26 }
 0x552   : > { %v1646_v25 = vmul.f32 1.442695, %v1623_v20 }
 0x556   : > { %v4093_v59 = vpop.eup %3531 }
 0x557   : > { %v1672_v60 = vsel %vm1575_vm4, %v4093_v59, 0.0  ;;  %v4097_v61 = vpop.eup %3533 }
 0x558   : > { %1673 = vadd.xlane.f32.xlu0 %v1672_v60  ;;  %v1666_v62 = vsel %vm1575_vm4, %v4097_v61, 0.0  ;;  %v4101_v63 = vpop.eup %3535 }
 0x559   : > { %v1660_v2 = vsel %vm1575_vm4, %v4101_v63, 0.0 }
 0x55c   : > { %1667 = vadd.xlane.f32.xlu0 %v1666_v62 }
 0x560   : > { %1661 = vadd.xlane.f32.xlu0 %v1660_v2  ;;  %1861 = vrot.lane.b32.xlu1 %v4022_v37, %s3640_s2 }
 0x564   : > { %1992 = vrot.lane.b32.xlu1 %v3984_v7, %s3639_s29 }
 0x568   : > { %1994 = vrot.lane.b32.xlu1 %v4022_v37, %s3639_s29 }
 0x569   : > { %v1653_v9 = vpop.xlane.xlu1 %1652 }
 0x56a   : > { %3537 = vrcp.f32 %v1653_v9 }
 0x56b   : > { %v1656_v10 = vpop.xlane.xlu0 %1655 }
 0x56f   : > { %v1650_v11 = vpop.xlane.xlu0 %1649 }
 0x570   : > { %3539 = vrcp.f32 %v1650_v11 }
 0x571   : > { %3541 = vpow2.f32 %v1638_v17 }
 0x572   : > { %3543 = vpow2.f32 %v1646_v25 }
 0x573   : > { %3545 = vpow2.f32 %v1642_v6  ;;  %v3468_v6 = vld [vmem:[%s3795_s22 + $0x8] sm:$0xff]  }
 0x574   : > { %v3538_v13 = vpop.eup %3537  ;;  %3547 = vpow2.f32 %v1644_v27  ;;  %3283 = vmatprep.subr.bf16.mxu1 %v3468_v6  ;;  %v3469_v27 = vld [vmem:[%s3795_s22 + $0x10] sm:$0xff]  }
 0x575   : > { %v1697_v22 = vmul.f32 %v3538_v13, %v4074_v31  ;;  %3549 = vrcp.f32 %v1656_v10  ;;  %3284 = vmatpush3.bf16.msra.mxu1 %v3468_v6 }
 0x576   : > { %1859 = vrot.lane.b32.xlu0 %v3984_v7, %s3640_s2  ;;  %3297 = vmatprep.subr.bf16.mxu1 %v3469_v27 }
 0x57a   : > { %v3540_v16 = vpop.eup %3539 }
 0x57b   : > { %v1696_v21 = vmul.f32 %v3540_v16, %v3526_v35  ;;  %v4119_v28 = vpop.eup %3541 }
 0x57c   : > { %v1669_v18 = vsel %vm1575_vm4, %v4119_v28, 0.0  ;;  %v4123_v3 = vpop.eup %3543 }
 0x57d   : > { %v1708_v23 = vpack.c.bf16 %v1697_v22, %v1696_v21  ;;  %v1681_v15 = vsel %vm1575_vm4, %v4123_v3, 0.0  ;;  %v4127_v19 = vpop.eup %3545 }
 0x57e   : > { %v4129_v29 = vpop.eup %3547  ;;  %v1675_v30 = vsel %vm1575_vm4, %v4127_v19, 0.0 }
 0x57f   : > { %3277 = vmatprep.mubr.msk.bf16.mxu0 %vm1575_vm4, %v1708_v23  ;;  %v1678_v31 = vsel %vm1575_vm4, %v4129_v29, 0.0  ;;  %v3550_v36 = vpop.eup %3549 }
 0x580   : > { %v1698_v40 = vmul.f32 %v3550_v36, %v4078_v33 }
 0x58c   : > { %1670 = vadd.xlane.f32.xlu1 %v1669_v18 }
 0x590   : > { %1682 = vadd.xlane.f32.xlu1 %v1681_v15 }
 0x594   : > { %1676 = vadd.xlane.f32.xlu1 %v1675_v30  ;;  %v3470_v30 = vld [vmem:[%s3795_s22 + $0x18] sm:$0xff]  }
 0x595   : > { %1679 = vadd.xlane.f32.xlu0 %v1678_v31  ;;  %v3471_v31 = vld [vmem:[%s3795_s22 + $0x20] sm:$0xff]  }
 0x5a5   : > { %2132 = vrot.lane.b32.xlu1 %v4022_v37, %s3641_s20 }
 0x5ab   : > { %2130 = vrot.lane.b32.xlu0 %v3984_v7, %s3641_s20 }
 0x5d8   : > { %v1665_v34 = vpop.xlane.xlu1 %1664 }
 0x5dc   : > { %v1659_v35 = vpop.xlane.xlu1 %1658 }
 0x5dd   : > { %3551 = vrcp.f32 %v1659_v35 }
 0x5de   : > { %3553 = vrcp.f32 %v1665_v34 }
 0x5e0   : > { %v1862_v37 = vpop.permute.xlu1 %1861 }
 0x5e1   : > { %v1871_v49 = vsel %vm1722_vm3, %v1862_v37, 0 }
 0x5e4   : > { %v1993_v50 = vpop.permute.xlu1 %1992 }
 0x5e5   : > { %v1674_v38 = vpop.xlane.xlu0 %1673 }
 0x5e7   : > { %v3552_v39 = vpop.eup %3551 }
 0x5e8   : > { %v1699_v41 = vmul.f32 %v3552_v39, %v4089_v57  ;;  %v3554_v48 = vpop.eup %3553  ;;  %v1995_v56 = vpop.permute.xlu1 %1994 }
 0x5e9   : > { %v1668_v42 = vpop.xlane.xlu0 %1667  ;;  %v1701_v53 = vmul.f32 %v3554_v48, %v4084_v52  ;;  %v2004_v58 = vsel %vm1722_vm3, %v1995_v56, 0 }
 0x5ea   : > { %v1709_v43 = vpack.c.bf16 %v1699_v41, %v1698_v40  ;;  %v3472_v40 = vld [vmem:[%s3795_s22 + $0x28] sm:$0xff]   ;;  %v3473_v41 = vld [vmem:[%s3795_s22 + $0x30] sm:$0xff]  }
 0x5ec   : > { %3278 = vmatmul.mubr.msk.bf16.vlgmr.msra.gmra.mrb[16].mxu0 %vm1575_vm4, %v1709_v43  ;;  %v1854_v55 = vrot.slane %v1709_v43, 4 }
 0x5ed   : > { %v1662_v7 = vpop.xlane.xlu0 %1661 }
 0x5ee   : > { %3555 = vrcp.f32 %v1662_v7 }
 0x5ef   : > { %3557 = vrcp.f32 %v1668_v42 }
 0x5f1   : > { %v1860_v46 = vpop.permute.xlu0 %1859 }
 0x5f2   : > { %3289 = vmatprep.subr.bf16.mxu0 %v1860_v46 }
 0x5f3   : > { %3290 = vmatpush3.bf16.msra.mxu0 %v1860_v46 }
 0x5f4   : > { %3370 = vmatprep.subr.msk.bf16.mxu0 %vm1722_vm3, %v1862_v37 }
 0x5f7   : > { %3292 = vmatpush3.bf16.msra.mxu0 %v1871_v49  ;;  %v3474_v49 = vld [vmem:[%s3795_s22 + $0x38] sm:$0xff]  }
 0x5f8   : > { %v3556_v33 = vpop.eup %3555  ;;  %3305 = vmatprep.subr.bf16.mxu0 %v1993_v50 }
 0x5f9   : > { %v1700_v51 = vmul.f32 %v3556_v33, %v4101_v63  ;;  %v3558_v63 = vpop.eup %3557 }
 0x5fa   : > { %v1702_v4 = vmul.f32 %v3558_v63, %v4097_v61 }
 0x5fb   : > { %v1710_v54 = vpack.c.bf16 %v1701_v53, %v1700_v51 }
 0x5fd   : > { %v1855_v0 = vrot.slane %v1710_v54, 4 }
 0x5ff   : > { %v1856_v57 = vsel %vm1722_vm3, %v1854_v55, %v1855_v0 }
 0x600   : > { %3293 = vmatprep.mubr.msk.bf16.mxu0 %vm1575_vm4, %v1856_v57 }
 0x601   : > { %3294 = vmatmul.mubr.msk.bf16.vlgmr.msra.gmra.mrb[20].mxu0 %vm1575_vm4, %v1855_v0 }
 0x602   : > { %3306 = vmatpush3.bf16.msra.mxu0 %v1993_v50 }
 0x603   : > { %3371 = vmatprep.subr.msk.bf16.mxu0 %vm1722_vm3, %v1995_v56 }
 0x606   : > { %3308 = vmatpush3.bf16.msra.mxu0 %v2004_v58 }
 0x619   : > { %v1671_v60 = vpop.xlane.xlu1 %1670 }
 0x61a   : > { %3559 = vrcp.f32 %v1671_v60  ;;  %v3062_v60 = vld [vmem:[%s4331_s23] ss:$0 sm:$0xff] }
 0x61b   : > { %3561 = vrcp.f32 %v1674_v38 }
 0x61d   : > { %v1683_v52 = vpop.xlane.xlu1 %1682 }
 0x61e   : > { %3563 = vrcp.f32 %v1683_v52 }
 0x621   : > { %v1677_v62 = vpop.xlane.xlu1 %1676 }
 0x622   : > { %3565 = vrcp.f32 %v1677_v62  ;;  %v1680_v1 = vpop.xlane.xlu0 %1679 }
 0x623   : > { %3567 = vrcp.f32 %v1680_v1 }
 0x624   : > { %v3560_v2 = vpop.eup %3559 }
 0x625   : > { %v1703_v5 = vmul.f32 %v3560_v2, %v4119_v28  ;;  %v3562_v10 = vpop.eup %3561  ;;  %v2133_v24 = vpop.permute.xlu1 %2132 }
 0x626   : > { %v2131_v8 = vpop.permute.xlu0 %2130  ;;  %v1704_v16 = vmul.f32 %v3562_v10, %v4093_v59  ;;  %v2142_v26 = vsel %vm1722_vm3, %v2133_v24, 0 }
 0x627   : > { %3321 = vmatprep.subr.bf16.mxu0 %v2131_v8  ;;  %v1711_v9 = vpack.c.bf16 %v1703_v5, %v1702_v4 }
 0x628   : > { %v3564_v11 = vpop.eup %3563 }
 0x629   : > { %3309 = vmatprep.mubr.msk.bf16.mxu0 %vm1575_vm4, %v1711_v9  ;;  %v1707_v61 = vmul.f32 %v3564_v11, %v4123_v3 }
 0x62c   : > { %v3566_v12 = vpop.eup %3565 }
 0x62d   : > { %v3568_v13 = vpop.eup %3567  ;;  %v1705_v17 = vmul.f32 %v3566_v12, %v4127_v19 }
 0x62e   : > { %v1706_v20 = vmul.f32 %v3568_v13, %v4129_v29 }
 0x62f   : > { %v1712_v21 = vpack.c.bf16 %v1705_v17, %v1704_v16 }
 0x630   : > { %v1713_v22 = vpack.c.bf16 %v1707_v61, %v1706_v20 }
 0x631   : > { %3310 = vmatmul.mubr.msk.bf16.vlgmr.msra.gmra.mrb[24].mxu0 %vm1575_vm4, %v1712_v21  ;;  %v2127_v23 = vrot.slane %v1712_v21, 4 }
 0x632   : > { %3322 = vmatpush3.bf16.msra.mxu0 %v2131_v8  ;;  %v2128_v25 = vrot.slane %v1713_v22, 4 }
 0x633   : > { %3372 = vmatprep.subr.msk.bf16.mxu0 %vm1722_vm3, %v2133_v24 }
 0x634   : > { %v2129_v59 = vsel %vm1722_vm3, %v2127_v23, %v2128_v25 }
 0x635   : > { %3325 = vmatprep.mubr.msk.bf16.mxu0 %vm1575_vm4, %v2129_v59 }
 0x636   : > { %3324 = vmatpush3.bf16.msra.mxu0 %v2142_v26  ;;  %v3587_v26 = vld [vmem:[#allocation2] sm:$0xff] }
 0x639   : > { %3326 = vmatmul.mubr.msk.bf16.vlgmr.msra.gmra.mrb[28].mxu0 %vm1575_vm4, %v2128_v25 }
 0x63a   : > { %2494 = vmatprep.mubr.bf16.mxu0 %v3638_v14 }
 0x6bf   : > { %v3279_v28 = vpop.f32.mrb[16].mxu0 }
 0x6c0   : > { %v1760_v18 = vpop.f32.mrb[17].mxu0  ;;  %v1775_v29 = vpack.c.bf16 %v3279_v28, %v3279_v28  ;;  %v3588_v28 = vld [vmem:[#allocation2 + $0x8] sm:$0xff] }
 0x6c1   : > { %v3280_v3 = vpop.f32.mrb[18].mxu0 }
 0x6c2   : > { %v1763_v15 = vpop.f32.mrb[19].mxu0  ;;  %v3589_v3 = vld [vmem:[#allocation2 + $0x10] sm:$0xff] }
 0x6c3   : > { %v1774_v19 = vpack.c.bf16 %v1763_v15, %v1760_v18 }
 0x6c5   : > { %3285 = vmatprep.mubr.msk.bf16.mxu1 %vm1294_vm2, %v1774_v19  ;;  %v3475_v19 = vld [vmem:[%s3819_s4] ss:$8 sps:$4 sm:$0xff]  }
 0x6c6   : > { %3286 = vmatmul.mubr.msk.bf16.vlgmr.msra.gmra.mrb[12].mxu1 %vm1294_vm2, %v1775_v29  ;;  %v3477_v29 = vld [vmem:[%s3819_s4 + $0x4] ss:$8 sps:$4 sm:$0xff]  }
 0x6c7   : > { %3298 = vmatpush3.bf16.msra.mxu1 %v3469_v27  ;;  %2462 = vmatprep.subr.bf16.mxu0 %v3477_v29  ;;  %v3505_v29 = vld [vmem:[%s3829_s3 + $0x58] sm:$0xff]  }
 0x6c8   : > { %3299 = vmatprep.subr.bf16.mxu1 %v3470_v30  ;;  %2463 = vmatpush1.bf16.msra.mxu0 %v3475_v19  ;;  %v3503_v19 = vld [vmem:[%s3829_s3 + $0x50] sm:$0xff]  }
 0x6cb   : > { %3300 = vmatpush3.bf16.msra.mxu1 %v3470_v30  ;;  %v3480_v30 = vld [vmem:[%s3819_s4 + $0x14] ss:$8 sps:$4 sm:$0xff]  }
 0x6cc   : > { %3313 = vmatprep.subr.bf16.mxu1 %v3471_v31  ;;  %2464 = vmatprep.subr.bf16.mxu0 %v3480_v30  ;;  %v3506_v30 = vld [vmem:[%s3829_s3 + $0x18] sm:$0xff]  }
 0x6d4   : > { %v3295_v32 = vpop.f32.mrb[20].mxu0 }
 0x6d5   : > { %v1907_v34 = vpop.f32.mrb[21].mxu0  ;;  %v1922_v39 = vpack.c.bf16 %v3295_v32, %v3295_v32 }
 0x6d6   : > { %v3296_v35 = vpop.f32.mrb[22].mxu0 }
 0x6d7   : > { %v1910_v36 = vpop.f32.mrb[23].mxu0 }
 0x6d8   : > { %v1921_v38 = vpack.c.bf16 %v1910_v36, %v1907_v34 }
 0x6da   : > { %3301 = vmatprep.mubr.msk.bf16.mxu1 %vm1294_vm2, %v1921_v38 }
 0x6db   : > { %3302 = vmatmul.mubr.msk.bf16.vlgmr.msra.gmra.mrb[16].mxu1 %vm1294_vm2, %v1922_v39 }
 0x6dc   : > { %3314 = vmatpush3.bf16.msra.mxu1 %v3471_v31  ;;  %v3478_v31 = vld [vmem:[%s3819_s4 + $0x10] ss:$8 sps:$4 sm:$0xff]  }
 0x6dd   : > { %3315 = vmatprep.subr.bf16.mxu1 %v3472_v40  ;;  %2465 = vmatpush1.bf16.msra.mxu0 %v3478_v31  ;;  %v3507_v31 = vld [vmem:[%s3829_s3 + $0x60] sm:$0xff]  }
 0x6e0   : > { %3316 = vmatpush3.bf16.msra.mxu1 %v3472_v40 }
 0x6e1   : > { %3329 = vmatprep.subr.bf16.mxu1 %v3473_v41 }
 0x704   : > { %v3311_v42 = vpop.f32.mrb[24].mxu0 }
 0x705   : > { %v2040_v43 = vpop.f32.mrb[25].mxu0  ;;  %v2055_v48 = vpack.c.bf16 %v3311_v42, %v3311_v42 }
 0x706   : > { %v3312_v7 = vpop.f32.mrb[26].mxu0 }
 0x707   : > { %v2043_v37 = vpop.f32.mrb[27].mxu0 }
 0x708   : > { %v2054_v46 = vpack.c.bf16 %v2043_v37, %v2040_v43 }
 0x70a   : > { %3317 = vmatprep.mubr.msk.bf16.mxu1 %vm1294_vm2, %v2054_v46  ;;  %v3483_v46 = vld [vmem:[%s3819_s4 + $0x24] ss:$8 sps:$4 sm:$0xff]  }
 0x70b   : > { %3318 = vmatmul.mubr.msk.bf16.vlgmr.msra.gmra.mrb[20].mxu1 %vm1294_vm2, %v2055_v48  ;;  %v3481_v48 = vld [vmem:[%s3819_s4 + $0x20] ss:$8 sps:$4 sm:$0xff]   ;;  %2466 = vmatprep.subr.bf16.mxu0 %v3483_v46 }
 0x70c   : > { %3330 = vmatpush3.bf16.msra.mxu1 %v3473_v41  ;;  %v3327_v50 = vpop.f32.mrb[28].mxu0  ;;  %2467 = vmatpush1.bf16.msra.mxu0 %v3481_v48 }
 0x70d   : > { %v2178_v33 = vpop.f32.mrb[29].mxu0  ;;  %3331 = vmatprep.subr.bf16.mxu1 %v3474_v49  ;;  %v2193_v55 = vpack.c.bf16 %v3327_v50, %v3327_v50  ;;  %v3484_v50 = vld [vmem:[%s3819_s4 + $0x30] ss:$8 sps:$4 sm:$0xff]  }
 0x70e   : > { %v3328_v51 = vpop.f32.mrb[30].mxu0 }
 0x70f   : > { %v2181_v53 = vpop.f32.mrb[31].mxu0  ;;  %v3487_v51 = vld [vmem:[%s3819_s4 + $0x40] ss:$8 sps:$4 sm:$0xff]  }
 0x710   : > { %v2192_v54 = vpack.c.bf16 %v2181_v53, %v2178_v33  ;;  %3332 = vmatpush3.bf16.msra.mxu1 %v3474_v49  ;;  %v3486_v49 = vld [vmem:[%s3819_s4 + $0x34] ss:$8 sps:$4 sm:$0xff]   ;;  %v3489_v33 = vld [vmem:[%s3819_s4 + $0x44] ss:$8 sps:$4 sm:$0xff]  }
 0x711   : > { %2468 = vmatprep.subr.bf16.mxu0 %v3486_v49  ;;  %v3492_v53 = vld [vmem:[%s3819_s4 + $0x54] ss:$8 sps:$4 sm:$0xff]  }
 0x712   : > { %3333 = vmatprep.mubr.msk.bf16.mxu1 %vm1294_vm2, %v2192_v54  ;;  %2469 = vmatpush1.bf16.msra.mxu0 %v3484_v50  ;;  %v3490_v54 = vld [vmem:[%s3819_s4 + $0x50] ss:$8 sps:$4 sm:$0xff]  }
 0x713   : > { %3334 = vmatmul.mubr.msk.bf16.vlgmr.msra.gmra.mrb[24].mxu1 %vm1294_vm2, %v2193_v55  ;;  %2470 = vmatprep.subr.bf16.mxu0 %v3489_v33  ;;  %v3495_v55 = vld [vmem:[%s3819_s4 + $0x64] ss:$8 sps:$4 sm:$0xff]  }
 0x716   : > { %2471 = vmatpush1.bf16.msra.mxu0 %v3487_v51 }
 0x717   : > { %2472 = vmatprep.subr.bf16.mxu0 %v3492_v53 }
 0x71a   : > { %2473 = vmatpush1.bf16.msra.mxu0 %v3490_v54 }
 0x71b   : > { %2474 = vmatprep.subr.bf16.mxu0 %v3495_v55 }
 0x799   : > { %v3287_v0 = vpop.f32.mrb[12].mxu1 }
 0x79a   : > { %v1828_v57 = vpop.f32.mrb[13].mxu1  ;;  %v1850_v52 = vadd.f32 %v3287_v0, %v3062_v60  ;;  %v3493_v0 = vld [vmem:[%s3819_s4 + $0x60] ss:$8 sps:$4 sm:$0xff]  }
 0x79b   : > { %v3288_v56 = vpop.f32.mrb[14].mxu1  ;;  %v1848_v62 = vadd.f32 %v3062_v60, %v1828_v57  ;;  %v3498_v57 = vld [vmem:[%s3819_s4 + $0x74] ss:$8 sps:$4 sm:$0xff]   ;;  %2475 = vmatpush1.bf16.msra.mxu0 %v3493_v0 }
 0x79c   : > { %v1831_v58 = vpop.f32.mrb[15].mxu1  ;;  %v3496_v56 = vld [vmem:[%s3819_s4 + $0x70] ss:$8 sps:$4 sm:$0xff]   ;;  %2476 = vmatprep.subr.bf16.mxu0 %v3498_v57 }
 0x79d   : > { %v1849_v4 = vadd.f32 %v3062_v60, %v1831_v58 }
 0x79f   : > { %2477 = vmatpush1.bf16.msra.mxu0 %v3496_v56 }
 0x7ae   : > { %v3303_v63 = vpop.f32.mrb[16].mxu1 }
 0x7af   : > { %v1991_v1 = vadd.f32 %v3303_v63, %v1850_v52  ;;  %v1975_v2 = vpop.f32.mrb[17].mxu1 }
 0x7b0   : > { %v1989_v5 = vadd.f32 %v1975_v2, %v1848_v62  ;;  %v3304_v8 = vpop.f32.mrb[18].mxu1 }
 0x7b1   : > { %v1978_v9 = vpop.f32.mrb[19].mxu1 }
 0x7b2   : > { %v1990_v10 = vadd.f32 %v1978_v9, %v1849_v4 }
 0x7de   : > { %v3319_v11 = vpop.f32.mrb[20].mxu1 }
 0x7df   : > { %v2124_v12 = vadd.f32 %v3319_v11, %v1991_v1  ;;  %v2108_v13 = vpop.f32.mrb[21].mxu1 }
 0x7e0   : > { %v2122_v16 = vadd.f32 %v2108_v13, %v1989_v5  ;;  %v3320_v17 = vpop.f32.mrb[22].mxu1 }
 0x7e1   : > { %v2111_v20 = vpop.f32.mrb[23].mxu1  ;;  %v3082_v17 = vld [vmem:[%s4333_s15] ss:$0 sm:$0xff] }
 0x7e2   : > { %v2123_v61 = vadd.f32 %v2111_v20, %v1990_v10  ;;  %v3081_v10 = vld [vmem:[%s4332_s0] ss:$0 sm:$0xff] }
 0x7e6   : > { %v3335_v21 = vpop.f32.mrb[24].mxu1 }
 0x7e7   : > { %v2262_v22 = vadd.f32 %v3335_v21, %v2124_v12  ;;  %v2246_v23 = vpop.f32.mrb[25].mxu1 }
 0x7e8   : > { %v2260_v24 = vadd.f32 %v2246_v23, %v2122_v16  ;;  %v3336_v25 = vpop.f32.mrb[26].mxu1 }
 0x7e9   : > { %v2249_v59 = vpop.f32.mrb[27].mxu1  ;;  %v4191_v15 = vadd.f32 %v3589_v3, %v2262_v22  ;;  %v3502_v3 = vld [vmem:[%s3829_s3 + $0x8] sm:$0xff]  }
 0x7ea   : > { %v4186_v6 = vadd.f32 %v3587_v26, %v2260_v24  ;;  %v2261_v27 = vadd.f32 %v2249_v59, %v2123_v61  ;;  %v3499_v26 = vld [vmem:[%s3829_s3 + $0x40] sm:$0xff]  }
 0x7eb   : > { %3193 = vmatprep.subr.bf16.mxu1 %v3499_v26 }
 0x7ec   : > { %v4188_v18 = vadd.f32 %v3588_v28, %v2261_v27  ;;  %2268 = vadd.xlane.f32.xlu0 %v4186_v6  ;;  %v3500_v27 = vld [vmem:[%s3829_s3] sm:$0xff]   ;;  %v3501_v28 = vld [vmem:[%s3829_s3 + $0x48] sm:$0xff]  }
 0x7ed   : > { %3194 = vmatpush3.bf16.msra.mxu1 %v3500_v27 }
 0x7ee   : > { %2270 = vadd.xlane.f32.xlu1 %v4188_v18  ;;  %3195 = vmatprep.subr.bf16.mxu1 %v3501_v28 }
 0x7f0   : > { %2272 = vadd.xlane.f32.xlu0 %v4191_v15 }
 0x7f1   : > { %3196 = vmatpush3.bf16.msra.mxu1 %v3502_v3 }
 0x7f2   : > { %3197 = vmatprep.subr.bf16.mxu1 %v3503_v19 }
 0x879   : > { %v2269_v32 = vpop.xlane.xlu0 %2268 }
 0x87a   : > { %v2274_v34 = vmul.f32 0.0078125, %v2269_v32  ;;  %v3508_v32 = vld [vmem:[%s3829_s3 + $0x20] sm:$0xff]  }
 0x87b   : > { %v2271_v35 = vpop.xlane.xlu1 %2270 }
 0x87c   : > { %v2277_v36 = vsub.f32 %v4186_v6, %v2274_v34  ;;  %v2275_v38 = vmul.f32 0.0078125, %v2271_v35  ;;  %v3509_v34 = vld [vmem:[%s3829_s3 + $0x68] sm:$0xff]  }
 0x87d   : > { %v2273_v39 = vpop.xlane.xlu0 %2272  ;;  %v3510_v35 = vld [vmem:[%s3829_s3 + $0x28] sm:$0xff]  }
 0x87e   : > { %v2278_v40 = vsub.f32 %v4188_v18, %v2275_v38  ;;  %v2276_v41 = vmul.f32 0.0078125, %v2273_v39  ;;  %v2280_v42 = vmul.f32 %v2277_v36, %v2277_v36  ;;  %v3512_v38 = vld [vmem:[%s3829_s3 + $0x30] sm:$0xff]   ;;  %v3513_v39 = vld [vmem:[%s3829_s3 + $0x78] sm:$0xff]  }
 0x880   : > { %v2279_v43 = vsub.f32 %v4191_v15, %v2276_v41  ;;  %2283 = vadd.xlane.f32.xlu0 %v2280_v42  ;;  %v2281_v37 = vmul.f32 %v2278_v40, %v2278_v40  ;;  %v2335_v41 = vld [vmem:[%s3824_s27] sm:$0x3] }
 0x881   : > { %v2375_v42 = vrot.slane %v2335_v41, %v1047_v45 }
 0x882   : > { %v2282_v7 = vmul.f32 %v2279_v43, %v2279_v43 }
 0x884   : > { %2287 = vadd.xlane.f32.xlu1 %v2282_v7  ;;  %2285 = vadd.xlane.f32.xlu0 %v2281_v37 }
 0x90d   : > { %v2284_v58 = vpop.xlane.xlu0 %2283 }
 0x90e   : > { %v2289_v60 = vmul.f32 0.0078125, %v2284_v58 }
 0x910   : > { %v2292_v52 = vadd.f32 1e-12, %v2289_v60 }
 0x911   : > { %v2286_v62 = vpop.xlane.xlu0 %2285  ;;  %v2288_v63 = vpop.xlane.xlu1 %2287 }
 0x912   : > { %3569 = vrsqrt.f32 %v2292_v52  ;;  %v2290_v1 = vmul.f32 0.0078125, %v2286_v62  ;;  %v2291_v2 = vmul.f32 0.0078125, %v2288_v63 }
 0x914   : > { %v2293_v4 = vadd.f32 1e-12, %v2290_v1  ;;  %v2294_v5 = vadd.f32 1e-12, %v2291_v2 }
 0x916   : > { %3571 = vrsqrt.f32 %v2293_v4 }
 0x917   : > { %3573 = vrsqrt.f32 %v2294_v5 }
 0x91c   : > { %v3570_v8 = vpop.eup %3569 }
 0x91d   : > { %v2298_v9 = vmul.f32 %v3570_v8, %v2277_v36  ;;  %v3511_v36 = vld [vmem:[%s3829_s3 + $0x70] sm:$0xff]  }
 0x91f   : > { %v2307_v16 = vmul.f32 %v3081_v10, %v2298_v9 }
 0x920   : > { %v3572_v11 = vpop.eup %3571 }
 0x921   : > { %v3574_v12 = vpop.eup %3573  ;;  %v2299_v13 = vmul.f32 %v3572_v11, %v2278_v40  ;;  %v2316_v21 = vadd.f32 %v3082_v17, %v2307_v16  ;;  %v3514_v40 = vld [vmem:[%s3829_s3 + $0x38] sm:$0xff]  }
 0x922   : > { %v2300_v61 = vmul.f32 %v3574_v12, %v2279_v43  ;;  %v2379_v43 = vrot.slane %v2335_v41, %v1051_v47 }
 0x923   : > { %v2308_v20 = vmul.f32 %v3081_v10, %v2299_v13 }
 0x924   : > { %v2309_v24 = vmul.f32 %v3081_v10, %v2300_v61 }
 0x925   : > { %v2317_v22 = vadd.f32 %v3082_v17, %v2308_v20 }
 0x926   : > { %v2318_v25 = vadd.f32 %v3082_v17, %v2309_v24 }
 0x927   : > { %v2369_v23 = vpack.c.bf16 %v2317_v22, %v2316_v21 }
 0x928   : > { %v2370_v59 = vpack.c.bf16 %v2318_v25, %v2318_v25 }
 0x929   : > { %2495 = vmatmul.mubr.bf16.vlgmr.msra.gmra.mrb[32].mxu0 %v2369_v23 }
 0x92a   : > { %2504 = vmatprep.mubr.bf16.mxu0 %v3638_v14  ;;  %v3504_v14 = vld [vmem:[%s3829_s3 + $0x10] sm:$0xff]  }
 0x92b   : > { %3198 = vmatpush3.bf16.msra.mxu1 %v3504_v14 }
 0x92c   : > { %3199 = vmatprep.subr.bf16.mxu1 %v3505_v29 }
 0x92f   : > { %3200 = vmatpush3.bf16.msra.mxu1 %v3506_v30 }
 0x930   : > { %3201 = vmatprep.subr.bf16.mxu1 %v3507_v31 }
 0x931   : > { %2505 = vmatmul.mubr.bf16.gmra.mrb[36].mxu0 %v2370_v59 }
 0x933   : > { %3202 = vmatpush3.bf16.msra.mxu1 %v3508_v32 }
 0x934   : > { %3203 = vmatprep.subr.bf16.mxu1 %v3509_v34 }
 0x937   : > { %3204 = vmatpush3.bf16.msra.mxu1 %v3510_v35 }
 0x938   : > { %3205 = vmatprep.subr.bf16.mxu1 %v3511_v36 }
 0x93b   : > { %3206 = vmatpush3.bf16.msra.mxu1 %v3512_v38 }
 0x93c   : > { %3207 = vmatprep.subr.bf16.mxu1 %v3513_v39 }
 0x93f   : > { %3208 = vmatpush3.bf16.msra.mxu1 %v3514_v40 }
 0x9fc   : > { %v2496_v7 = vpop.f32.mrb[32].mxu0 }
 0x9fd   : > { %v2497_v37 = vadd.f32 %v2496_v7, %v2375_v42  ;;  %v2498_v46 = vpop.f32.mrb[33].mxu0 }
 0x9fe   : > { %v2499_v48 = vadd.f32 %v2498_v46, %v2379_v43  ;;  %v2500_v49 = vpop.f32.mrb[34].mxu0 }
 0x9ff   : > { %v2519_v50 = vmul.f32 0.044715, %v2497_v37  ;;  %v2501_v33 = vadd.f32 %v2500_v49, %v2375_v42  ;;  %v2502_v51 = vpop.f32.mrb[35].mxu0  ;;  %v2513_v31 = vmul.f32 0.5, %v2497_v37 }
 0xa00   : > { %v2520_v53 = vmul.f32 0.044715, %v2499_v48  ;;  %v2503_v54 = vadd.f32 %v2502_v51, %v2379_v43  ;;  %v2514_v35 = vmul.f32 0.5, %v2499_v48 }
 0xa01   : > { %v2525_v55 = vmul.f32 %v2519_v50, %v2497_v37  ;;  %v2521_v0 = vmul.f32 0.044715, %v2501_v33  ;;  %v2515_v32 = vmul.f32 0.5, %v2501_v33 }
 0xa02   : > { %v2526_v57 = vmul.f32 %v2520_v53, %v2499_v48  ;;  %v2522_v56 = vmul.f32 0.044715, %v2503_v54  ;;  %v2516_v36 = vmul.f32 0.5, %v2503_v54 }
 0xa03   : > { %v2531_v58 = vmul.f32 %v2525_v55, %v2497_v37  ;;  %v2527_v60 = vmul.f32 %v2521_v0, %v2501_v33 }
 0xa04   : > { %v2532_v45 = vmul.f32 %v2526_v57, %v2499_v48  ;;  %v2528_v52 = vmul.f32 %v2522_v56, %v2503_v54  ;;  %v2506_v44 = vpop.f32.mrb[36].mxu0  ;;  %v3099_v57 = vld [vmem:[%s753_s19] ss:$0 sm:$0xff]  ;;  %s4334_s19 = sld [smem:[#allocation17_spill]] (!%p3116_p8) }
 0xa05   : > { %v2537_v47 = vadd.f32 %v2531_v58, %v2497_v37  ;;  %v2533_v62 = vmul.f32 %v2527_v60, %v2501_v33  ;;  %v2507_v63 = vadd.f32 %v2506_v44, %v2375_v42  ;;  %v2508_v1 = vpop.f32.mrb[37].mxu0 }
 0xa06   : > { %v2534_v2 = vmul.f32 %v2528_v52, %v2503_v54  ;;  %v2509_v4 = vadd.f32 %v2508_v1, %v2379_v43  ;;  %v2510_v5 = vpop.f32.mrb[38].mxu0  ;;  %v2538_v8 = vadd.f32 %v2532_v45, %v2499_v48 }
 0xa07   : > { %v2543_v9 = vmul.f32 0.7978846, %v2537_v47  ;;  %v2539_v10 = vadd.f32 %v2533_v62, %v2501_v33  ;;  %v2523_v11 = vmul.f32 0.044715, %v2507_v63  ;;  %v2511_v12 = vpop.f32.mrb[39].mxu0  ;;  %v2517_v37 = vmul.f32 0.5, %v2507_v63 }
 0xa08   : > { %v2524_v13 = vmul.f32 0.044715, %v2509_v4  ;;  %v2540_v16 = vadd.f32 %v2534_v2, %v2503_v54  ;;  %v2544_v17 = vmul.f32 0.7978846, %v2538_v8  ;;  %v2518_v51 = vmul.f32 0.5, %v2509_v4 }
 0xa09   : > { %3575 = vtanh.f32 %v2543_v9  ;;  %v2545_v20 = vmul.f32 0.7978846, %v2539_v10  ;;  %v2529_v61 = vmul.f32 %v2523_v11, %v2507_v63 }
 0xa0a   : > { %v2530_v21 = vmul.f32 %v2524_v13, %v2509_v4  ;;  %v2546_v22 = vmul.f32 0.7978846, %v2540_v16  ;;  %3577 = vtanh.f32 %v2544_v17 }
 0xa0b   : > { %3579 = vtanh.f32 %v2545_v20  ;;  %v2535_v23 = vmul.f32 %v2529_v61, %v2507_v63 }
 0xa0c   : > { %3581 = vtanh.f32 %v2546_v22  ;;  %v2536_v24 = vmul.f32 %v2530_v21, %v2509_v4 }
 0xa0d   : > { %v2541_v25 = vadd.f32 %v2535_v23, %v2507_v63 }
 0xa0e   : > { %v2542_v59 = vadd.f32 %v2536_v24, %v2509_v4 }
 0xa0f   : > { %v2547_v26 = vmul.f32 0.7978846, %v2541_v25 }
 0xa10   : > { %v2548_v27 = vmul.f32 0.7978846, %v2542_v59 }
 0xa11   : > { %3583 = vtanh.f32 %v2547_v26 }
 0xa12   : > { %3585 = vtanh.f32 %v2548_v27 }
 0xa13   : > { %v3576_v28 = vpop.eup %3575 }
 0xa14   : > { %v3578_v3 = vpop.eup %3577  ;;  %v2555_v19 = vadd.f32 1.0, %v3576_v28 }
 0xa15   : > { %v3580_v14 = vpop.eup %3579  ;;  %v2556_v29 = vadd.f32 1.0, %v3578_v3 }
 0xa16   : > { %v3582_v30 = vpop.eup %3581  ;;  %v2557_v34 = vadd.f32 1.0, %v3580_v14  ;;  %v2561_v39 = vmul.f32 %v2555_v19, %v2513_v31 }
 0xa17   : > { %v2558_v38 = vadd.f32 1.0, %v3582_v30  ;;  %v2562_v41 = vmul.f32 %v2556_v29, %v2514_v35  ;;  %v3117_v30 = vld [vmem:[%s4334_s19] ss:$0 sm:$0xff] (!%p3116_p8) }
 0xa18   : > { %v2563_v40 = vmul.f32 %v2557_v34, %v2515_v32 }
 0xa19   : > { %v2564_v42 = vmul.f32 %v2558_v38, %v2516_v36  ;;  %v3118_v38 = vld [vmem:[%s4335_s6] ss:$0 sm:$0xff] (!%p3116_p8) }
 0xa1a   : > { %v2567_v43 = vpack.c.bf16 %v2563_v40, %v2561_v39 }
 0xa1b   : > { %v3584_v7 = vpop.eup %3583  ;;  %v2568_v46 = vpack.c.bf16 %v2564_v42, %v2562_v41 }
 0xa1c   : > { %v3586_v49 = vpop.eup %3585  ;;  %v2559_v50 = vadd.f32 1.0, %v3584_v7 }
 0xa1d   : > { %2705 = vmatprep.mubr.bf16.mxu1 %v2568_v46  ;;  %v2560_v53 = vadd.f32 1.0, %v3586_v49 }
 0xa1e   : > { %2706 = vmatmul.mubr.bf16.vlgmr.msra.gmra.mrb[28].mxu1 %v2567_v43  ;;  %v2565_v55 = vmul.f32 %v2559_v50, %v2517_v37 }
 0xa1f   : > { %v2566_v33 = vmul.f32 %v2560_v53, %v2518_v51 }
 0xa20   : > { %v2569_v54 = vpack.c.bf16 %v2565_v55, %v2565_v55 }
 0xa21   : > { %v2570_v48 = vpack.c.bf16 %v2566_v33, %v2566_v33 }
 0xa23   : > { %2713 = vmatprep.mubr.bf16.mxu1 %v2570_v48 }
 0xa26   : > { %2714 = vmatmul.mubr.bf16.gmra.mrb[32].mxu1 %v2569_v54 }
 0xaf1   : > { %v3209_v0 = vpop.f32.mrb[28].mxu1 }
 0xaf2   : > { %v3210_v56 = vpop.f32.mrb[29].mxu1 }
 0xaf3   : > { %v3211_v58 = vadd.f32 %v3210_v56, %v3209_v0  ;;  %v3212_v60 = vpop.f32.mrb[30].mxu1 }
 0xaf4   : > { %v3213_v45 = vpop.f32.mrb[31].mxu1 }
 0xaf5   : > { %v2708_v52 = vadd.f32 %v3211_v58, %v3099_v57  ;;  %v3214_v44 = vadd.f32 %v3213_v45, %v3212_v60 }
 0xaf7   : > { %v2721_v47 = vadd.f32 %v2708_v52, %v4186_v6  ;;  %v2711_v62 = vadd.f32 %v3214_v44, %v3099_v57 }
 0xaf9   : > { %2724 = vst [vmem:[#allocation2] sm:$0xff] %v2721_v47  ;;  %v2722_v63 = vadd.f32 %v2711_v62, %v4188_v18  ;;  %v3215_v1 = vpop.f32.mrb[32].mxu1  ;;  %2733 = vadd.xlane.f32.xlu0 (!%p3116_p8), %v2721_v47 }
 0xafa   : > { %v3216_v2 = vpop.f32.mrb[33].mxu1 }
 0xafb   : > { %2725 = vst [vmem:[#allocation2 + $0x8] sm:$0xff] %v2722_v63  ;;  %v3217_v4 = vadd.f32 %v3216_v2, %v3215_v1  ;;  %v3218_v5 = vpop.f32.mrb[34].mxu1  ;;  %2730 = sbr.rel (%p3116_p8) target bundleno = 3132 (0xc3c), region = 96 }
 0xafc   : > { %v3219_v8 = vpop.f32.mrb[35].mxu1 }
 0xafd   : > { %v2716_v9 = vadd.f32 %v3217_v4, %v3099_v57  ;;  %2735 = vadd.xlane.f32.xlu0 (!%p3116_p8), %v2722_v63 }
 0xaff   : > { %v2723_v10 = vadd.f32 %v2716_v9, %v4191_v15 }
 0xb01   : > { %2726 = vst [vmem:[#allocation2 + $0x10] sm:$0xff] %v2723_v10  ;;  %2737 = vadd.xlane.f32.xlu1 (!%p3116_p8), %v2723_v10 }
 0xb86   : > { %v2734_v6 = vpop.xlane.xlu0 %2733 }
 0xb87   : > { %v2739_v12 = vmul.f32 0.0078125, %v2734_v6 }
 0xb89   : > { %v2742_v13 = vsub.f32 %v2721_v47, %v2739_v12 }
 0xb8a   : > { %v2736_v17 = vpop.xlane.xlu0 %2735 }
 0xb8b   : > { %v2740_v20 = vmul.f32 0.0078125, %v2736_v17  ;;  %v2745_v61 = vmul.f32 %v2742_v13, %v2742_v13 }
 0xb8d   : > { %v2743_v21 = vsub.f32 %v2722_v63, %v2740_v20  ;;  %2748 = vadd.xlane.f32.xlu1 %v2745_v61 }
 0xb8e   : > { %v2738_v11 = vpop.xlane.xlu1 %2737 }
 0xb8f   : > { %v2741_v18 = vmul.f32 0.0078125, %v2738_v11  ;;  %v2746_v15 = vmul.f32 %v2743_v21, %v2743_v21 }
 0xb91   : > { %v2744_v16 = vsub.f32 %v2723_v10, %v2741_v18  ;;  %2750 = vadd.xlane.f32.xlu0 %v2746_v15 }
 0xb93   : > { %v2747_v22 = vmul.f32 %v2744_v16, %v2744_v16 }
 0xb95   : > { %2752 = vadd.xlane.f32.xlu1 %v2747_v22 }
 0xc1a   : > { %v2749_v23 = vpop.xlane.xlu1 %2748 }
 0xc1b   : > { %v2754_v24 = vmul.f32 0.0078125, %v2749_v23 }
 0xc1d   : > { %v2757_v25 = vadd.f32 1e-12, %v2754_v24 }
 0xc1e   : > { %v2751_v26 = vpop.xlane.xlu0 %2750 }
 0xc1f   : > { %3590 = vrsqrt.f32 %v2757_v25  ;;  %v2755_v28 = vmul.f32 0.0078125, %v2751_v26 }
 0xc21   : > { %v2758_v19 = vadd.f32 1e-12, %v2755_v28 }
 0xc22   : > { %v2753_v59 = vpop.xlane.xlu1 %2752 }
 0xc23   : > { %v2756_v27 = vmul.f32 0.0078125, %v2753_v59 }
 0xc25   : > { %v2759_v3 = vadd.f32 1e-12, %v2756_v27 }
 0xc27   : > { %3592 = vrsqrt.f32 %v2759_v3 }
 0xc28   : > { %3594 = vrsqrt.f32 %v2758_v19 }
 0xc29   : > { %v3591_v14 = vpop.eup %3590 }
 0xc2a   : > { %v2763_v29 = vmul.f32 %v3591_v14, %v2742_v13 }
 0xc2c   : > { %v2772_v35 = vmul.f32 %v3117_v30, %v2763_v29 }
 0xc2e   : > { %v2781_v42 = vadd.f32 %v3118_v38, %v2772_v35 }
 0xc31   : > { %v3593_v31 = vpop.eup %3592 }
 0xc32   : > { %v3595_v32 = vpop.eup %3594  ;;  %v2765_v34 = vmul.f32 %v3593_v31, %v2744_v16 }
 0xc33   : > { %v2764_v36 = vmul.f32 %v3595_v32, %v2743_v21 }
 0xc34   : > { %v2774_v39 = vmul.f32 %v3117_v30, %v2765_v34 }
 0xc35   : > { %v2773_v40 = vmul.f32 %v3117_v30, %v2764_v36 }
 0xc36   : > { %v2783_v41 = vadd.f32 %v3118_v38, %v2774_v39 }
 0xc37   : > { %v2782_v43 = vadd.f32 %v3118_v38, %v2773_v40 }
 0xc38   : > { %v3129_v7 = vpack.c.bf16 %v2783_v41, %v2783_v41 }
 0xc39   : > { %v3133_v46 = vpack.c.bf16 %v2782_v43, %v2781_v42 }
 0xc3a   : > { %2799 = vst [vmem:[%s3838_s7 + $0x8] sm:$0xf] %v3129_v7 }
 0xc3b   : > { %3134 = vst [vmem:[%s3838_s7] sm:$0xff] %v3133_v46  }
 0xc3c PF: > { %s4336_s29 = sld [smem:[#allocation5_spill]]  ;;  %s4337_s24 = sld [smem:[#allocation3_spill]] }
 0xc3d   : > { %s4338_s25 = sld [smem:[#allocation4_spill]]  ;;  %s4339_s26 = sld [smem:[#allocation6_spill]] }
 0xc3e   : > { %s4340_s27 = sld [smem:[#allocation7_spill]] }
 0xc42   : > { %s27_s28 = sadd.s32 1, %s4336_s29  }
 0xc43   : > { %p24_p9 = scmp.ge.s32.totalorder %s27_s28, 6  }
 0xc45   :  { %26 = sbr.rel (!%p24_p9) target bundleno = 11 (0xb), region = 162 }

</bundles_post_ra>
